<compile_context>
chip_gen: v5e
topology: v5e:2x2
jax: 0.10.0
libtpu: 0.0.40
codegen_flags: <defaults>
</compile_context>

<pallas_src>
import functools
import math

import jax
import jax.numpy as jnp
import numpy as np
from jax import lax
from jax.experimental import pallas as pl
from jax.experimental.pallas import tpu as pltpu

# --------------------------- configuration (small) ---------------------------
INPUT_DIM = 16
HIDDEN = 32
OUTPUT_DIM = 6
MAX_SEQ_LEN = 16
NUM_HEADS = 4
NUM_LAYERS = 2
FFN_DIM = 2048          # nn.TransformerDecoderLayer default dim_feedforward
D0, D1 = 4, 8           # x shape: (D0, D1, INPUT_DIM); D1 <= MAX_SEQ_LEN
LN_EPS = 1e-5
HEAD_DIM = HIDDEN // NUM_HEADS
LANES = 128             # padded output lane width (unmasked stores)
NEG_INF = -1e9          # additive mask value (finite so exp() stays well-defined)
VECS_PER_LAYER = 9      # [sa_ob, ca_ob, g1, be1, g2, be2, g3, be3, ffn_b2]


# ------------------------------ shared math ----------------------------------
def _layer_norm(x, g, b, eps=LN_EPS):
    mu = jnp.mean(x, axis=-1, keepdims=True)
    var = jnp.mean(jnp.square(x - mu), axis=-1, keepdims=True)
    return (x - mu) * lax.rsqrt(var + eps) * g + b


# --------------------- pure-JAX reference (PyTorch layout) -------------------
def _ref_proj(x, w, b):
    """x: (N, T, Din); w: (Dout, Din) [PyTorch layout]; b: (1, Dout)."""
    n, t, din = x.shape
    y = lax.dot_general(x.reshape(n * t, din), w,
                        dimension_numbers=(((1,), (1,)), ((), ())),
                        preferred_element_type=jnp.float32)
    return (y + b).reshape(n, t, w.shape[0])


def _ref_mha(q_in, kv_in, w_in, b_in, w_out, b_out, num_heads):
    """nn.MultiheadAttention (no mask, eval).  q_in/kv_in: (N, T, H)."""
    _, _, h = q_in.shape
    hd = h // num_heads
    q = _ref_proj(q_in, w_in[:h], b_in[:, :h])
    k = _ref_proj(kv_in, w_in[h:2 * h], b_in[:, h:2 * h])
    v = _ref_proj(kv_in, w_in[2 * h:], b_in[:, 2 * h:])
    scale = 1.0 / math.sqrt(hd)
    heads = []
    for i in range(num_heads):
        sl = slice(i * hd, (i + 1) * hd)
        s = jnp.einsum("ntd,nsd->nts", q[..., sl], k[..., sl],
                       preferred_element_type=jnp.float32) * scale
        s = s - jnp.max(s, axis=-1, keepdims=True)
        p = jnp.exp(s)
        p = p / jnp.sum(p, axis=-1, keepdims=True)
        heads.append(jnp.einsum("nts,nsd->ntd", p, v[..., sl],
                                preferred_element_type=jnp.float32))
    o = jnp.concatenate(heads, axis=-1)
    return _ref_proj(o, w_out, b_out)


def _ref_decoder_layer(x, p, num_heads):
    """nn.TransformerDecoderLayer (norm_first=False, relu, eval), tgt=memory=x."""
    sa = _ref_mha(x, x, p["sa_wi"], p["sa_bi"], p["sa_wo"], p["sa_bo"], num_heads)
    x1 = _layer_norm(x + sa, p["g1"], p["be1"])
    ca = _ref_mha(x1, x, p["ca_wi"], p["ca_bi"], p["ca_wo"], p["ca_bo"], num_heads)
    x2 = _layer_norm(x1 + ca, p["g2"], p["be2"])
    ff = _ref_proj(jnp.maximum(_ref_proj(x2, p["w1"], p["b1"]), 0.0), p["w2"], p["b2"])
    return _layer_norm(x2 + ff, p["g3"], p["be3"])


def reference_forward(x, params, pos_enc, num_heads=NUM_HEADS):
    emb_w, emb_b, out_w, out_b, layers = params
    d0, d1, _ = x.shape
    xt = jnp.transpose(x, (1, 0, 2))
    h = _ref_proj(xt, emb_w, emb_b) + pos_enc[:d1][:, None, :]
    for p in layers:
        h = _ref_decoder_layer(h, p, num_heads)
    out = _ref_proj(h, out_w, out_b)
    return jnp.transpose(out, (1, 0, 2))


# ------------------------- in-kernel building blocks --------------------------
def _kernel_mha(q_in, kv_in, q_w, q_b, kv_w, kv_b, ow, ob, mask, num_heads):
    """Flat 2-D multi-head attention on (M, H) activations.

    q_w: (H, H) with 1/sqrt(hd) pre-folded, kv_w: (H, 2H) [K | V columns],
    ow: (H, H) (in,out layout).  mask: (M, M) additive block-diagonal mask.
    """
    m, hidden = q_in.shape
    hd = hidden // num_heads
    q_all = jnp.dot(q_in, q_w, preferred_element_type=jnp.float32) + q_b
    kv_all = jnp.dot(kv_in, kv_w, preferred_element_type=jnp.float32) + kv_b
    heads = []
    for h in range(num_heads):
        q_h = q_all[:, h * hd:(h + 1) * hd]                       # (M, hd)
        k_h = kv_all[:, h * hd:(h + 1) * hd]                      # (M, hd)
        v_h = kv_all[:, hidden + h * hd:hidden + (h + 1) * hd]    # (M, hd)
        # scores = q_h @ k_h^T, then masked softmax (mask before max-sub).
        s = lax.dot_general(q_h, k_h,
                            dimension_numbers=(((1,), (1,)), ((), ())),
                            preferred_element_type=jnp.float32)
        s = s + mask
        s = s - jnp.max(s, axis=-1, keepdims=True)
        p = jnp.exp(s)
        p = p * pl.reciprocal(jnp.sum(p, axis=-1, keepdims=True), approx=True)
        heads.append(jnp.dot(p, v_h, preferred_element_type=jnp.float32))
    o = jnp.concatenate(heads, axis=-1)                           # (M, H)
    return jnp.dot(o, ow, preferred_element_type=jnp.float32) + ob


def _kernel_ffn(x2d, w1, b1, w2, b2):
    """Un-chunked FFN.  w1: (H, FFN) bf16, w2: (FFN, H) bf16; elementwise in f32."""
    h = jnp.dot(x2d.astype(jnp.bfloat16), w1,
                preferred_element_type=jnp.float32) + b1
    h = jnp.maximum(h, 0.0)
    return jnp.dot(h.astype(jnp.bfloat16), w2,
                   preferred_element_type=jnp.float32) + b2


def _fused_forward_kernel(x_ref, emb_w_ref, pos_bias_ref, mask_ref,
                          q_w_ref, q_b_ref, kv_w_ref, kv_b_ref, ow_ref,
                          vec_ref, b1_ref, w1_ref, w2_ref,
                          out_w_ref, out_b_ref, o_ref,
                          *, num_heads, num_layers):
    """Single fused kernel: embed + pos-enc + all decoder layers + output proj."""
    mask = mask_ref[...]                                          # (M, M)

    # Embedding: (M, IN) @ (IN, H); emb bias + positional encoding pre-folded
    # into a flat (M, H) table -> one 2-D add, no reshape.
    h = jnp.dot(x_ref[...], emb_w_ref[...], preferred_element_type=jnp.float32)
    h = h + pos_bias_ref[...]

    for l in range(num_layers):
        base = l * VECS_PER_LAYER
        vec = lambda j, b=base: vec_ref[b + j:b + j + 1, :]       # (1, H)
        i_sa, i_ca = 2 * l, 2 * l + 1

        sa = _kernel_mha(h, h,
                         q_w_ref[i_sa], q_b_ref[i_sa:i_sa + 1, :],
                         kv_w_ref[i_sa], kv_b_ref[i_sa:i_sa + 1, :],
                         ow_ref[i_sa], vec(0), mask, num_heads)
        x1 = _layer_norm(h + sa, vec(2), vec(3))

        ca = _kernel_mha(x1, h,
                         q_w_ref[i_ca], q_b_ref[i_ca:i_ca + 1, :],
                         kv_w_ref[i_ca], kv_b_ref[i_ca:i_ca + 1, :],
                         ow_ref[i_ca], vec(1), mask, num_heads)
        x2 = _layer_norm(x1 + ca, vec(4), vec(5))

        ff = _kernel_ffn(x2, w1_ref[l], b1_ref[l:l + 1, :], w2_ref[l], vec(8))
        h = _layer_norm(x2 + ff, vec(6), vec(7))

    # Output projection against a 128-lane padded weight -> unmasked full store.
    out = jnp.dot(h, out_w_ref[...], preferred_element_type=jnp.float32)
    o_ref[...] = out + out_b_ref[...]


# ------------------------------- model wrapper --------------------------------
def create_positional_encoding(max_seq_len, d_model):
    # Exact replica of the (non-standard) PyTorch formula in the module.
    pe = np.zeros((max_seq_len, d_model), dtype=np.float32)
    for pos in range(max_seq_len):
        for i in range(0, d_model, 2):
            pe[pos, i] = np.sin(pos / 10000 ** (2 * i / d_model))
            pe[pos, i + 1] = np.cos(pos / 10000 ** (2 * (i + 1) / d_model))
    return jnp.asarray(pe)


def init_params(key):
    """PyTorch-layout parameters (weights as (out, in))."""
    def dense(k, out_d, in_d, scale=0.05):
        kw, kb = jax.random.split(k)
        return (scale * jax.random.normal(kw, (out_d, in_d), jnp.float32),
                scale * jax.random.normal(kb, (1, out_d), jnp.float32))

    keys = jax.random.split(key, 2 + NUM_LAYERS)
    emb_w, emb_b = dense(keys[0], HIDDEN, INPUT_DIM)
    out_w, out_b = dense(keys[1], OUTPUT_DIM, HIDDEN)
    layers = []
    ones = jnp.ones((1, HIDDEN), jnp.float32)
    zeros = jnp.zeros((1, HIDDEN), jnp.float32)
    for l in range(NUM_LAYERS):
        ks = jax.random.split(keys[2 + l], 6)
        sa_wi, sa_bi = dense(ks[0], 3 * HIDDEN, HIDDEN)
        sa_wo, sa_bo = dense(ks[1], HIDDEN, HIDDEN)
        ca_wi, ca_bi = dense(ks[2], 3 * HIDDEN, HIDDEN)
        ca_wo, ca_bo = dense(ks[3], HIDDEN, HIDDEN)
        w1, b1 = dense(ks[4], FFN_DIM, HIDDEN)
        w2, b2 = dense(ks[5], HIDDEN, FFN_DIM)
        layers.append(dict(
            sa_wi=sa_wi, sa_bi=sa_bi, sa_wo=sa_wo, sa_bo=sa_bo,
            ca_wi=ca_wi, ca_bi=ca_bi, ca_wo=ca_wo, ca_bo=ca_bo,
            w1=w1, b1=b1, w2=w2, b2=b2,
            g1=ones, be1=zeros, g2=ones, be2=zeros, g3=ones, be3=zeros,
        ))
    return emb_w, emb_b, out_w, out_b, layers


def prepare_kernel_params(params, pos_enc, n=D1, t=D0, num_heads=NUM_HEADS):
    """One-time host-side packing of all parameters into a few lane-dense slabs.

    Also folds: 1/sqrt(head_dim) into the Q weights/bias, embedding bias +
    positional encoding into one flat (N*T, H) table, and builds the additive
    block-diagonal attention mask for the flattened (N*T) axis.
    """
    emb_w, emb_b, out_w, out_b, layers = params
    hidden = emb_w.shape[0]
    hd = hidden // num_heads
    scale = 1.0 / math.sqrt(hd)
    assert n <= MAX_SEQ_LEN

    # Embedding weight in (in, out) layout; fused (emb bias + pos-enc) table.
    emb_w_t = emb_w.T                                           # (IN, H)
    pe = np.asarray(pos_enc)[:n]                                # (n, H)
    pos_bias = jnp.asarray(np.repeat(pe, t, axis=0)) + emb_b    # (n*t, H)

    # Block-diagonal additive mask over the flattened batch*time axis.
    bidx = np.arange(n * t) // t
    mask = jnp.asarray(
        np.where(bidx[:, None] == bidx[None, :], 0.0, NEG_INF).astype(np.float32))

    q_w, q_b, kv_w, kv_b, ows, vecs, b1s, w1s, w2s = ([] for _ in range(9))
    for p in layers:
        for pre in ("sa", "ca"):
            w_in, b_in = p[f"{pre}_wi"], p[f"{pre}_bi"]         # (3H, H), (1, 3H)
            q_w.append(w_in[:hidden].T * scale)                 # (H, H), scale folded
            q_b.append(b_in[:, :hidden] * scale)                # (1, H)
            kv_w.append(w_in[hidden:].T)                        # (H, 2H)  [K | V]
            kv_b.append(b_in[:, hidden:])                       # (1, 2H)
            ows.append(p[f"{pre}_wo"].T)                        # (H, H) (in, out)
        vecs.extend([p["sa_bo"], p["ca_bo"], p["g1"], p["be1"], p["g2"],
                     p["be2"], p["g3"], p["be3"], p["b2"]])
        b1s.append(p["b1"])                                     # (1, FFN)
        w1s.append(p["w1"].T.astype(jnp.bfloat16))              # (H, FFN) bf16
        w2s.append(p["w2"].T.astype(jnp.bfloat16))              # (FFN, H) bf16

    out_w_pad = jnp.zeros((hidden, LANES), jnp.float32).at[:, :OUTPUT_DIM].set(out_w.T)
    out_b_pad = jnp.zeros((1, LANES), jnp.float32).at[:, :OUTPUT_DIM].set(out_b)

    return dict(
        emb_w=emb_w_t, pos_bias=pos_bias, mask=mask,
        q_w=jnp.stack(q_w), q_b=jnp.concatenate(q_b, axis=0),
        kv_w=jnp.stack(kv_w), kv_b=jnp.concatenate(kv_b, axis=0),
        attn_ow=jnp.stack(ows), vecs=jnp.concatenate(vecs, axis=0),
        ffn_b1=jnp.concatenate(b1s, axis=0),
        ffn_w1=jnp.stack(w1s), ffn_w2=jnp.stack(w2s),
        out_w=out_w_pad, out_b=out_b_pad)


def transformer_decoder_qnetwork(x, kp, num_heads=NUM_HEADS, num_layers=NUM_LAYERS):
    """Fused Pallas forward.  x: (d0, d1, input_dim) -> (d0, d1, output_dim)."""
    d0, d1, in_dim = x.shape
    m = d0 * d1
    assert kp["pos_bias"].shape[0] == m, "params were prepared for a different (d0, d1)"
    # Flatten to (M = N*T, in) with row = n*T + t (N = d1, T = d0).
    x2d = jnp.transpose(x, (1, 0, 2)).reshape(m, in_dim)

    args = (x2d, kp["emb_w"], kp["pos_bias"], kp["mask"],
            kp["q_w"], kp["q_b"], kp["kv_w"], kp["kv_b"], kp["attn_ow"],
            kp["vecs"], kp["ffn_b1"], kp["ffn_w1"], kp["ffn_w2"],
            kp["out_w"], kp["out_b"])
    kernel = functools.partial(_fused_forward_kernel,
                               num_heads=num_heads, num_layers=num_layers)
    # Tiny workload (<1 MiB weights): single program, whole operands in VMEM,
    # no grid / tiling / multi-buffering needed on any TPU generation.
    out2d = pl.pallas_call(
        kernel,
        out_shape=jax.ShapeDtypeStruct((m, LANES), jnp.float32),
        in_specs=[pl.BlockSpec(memory_space=pltpu.MemorySpace.VMEM)] * len(args),
        out_specs=pl.BlockSpec(memory_space=pltpu.MemorySpace.VMEM),
    )(*args)

    out = out2d[:, :OUTPUT_DIM].reshape(d1, d0, OUTPUT_DIM)
    return jnp.transpose(out, (1, 0, 2))        # back to (d0, d1, output_dim)


if __name__ == "__main__":
    key = jax.random.PRNGKey(0)
    kx, kparam = jax.random.split(key)
    x = jax.random.normal(kx, (D0, D1, INPUT_DIM), jnp.float32)
    params = init_params(kparam)
    pos_enc = create_positional_encoding(MAX_SEQ_LEN, HIDDEN)
    kernel_params = prepare_kernel_params(params, pos_enc, n=D1, t=D0)

    out = transformer_decoder_qnetwork(x, kernel_params)
    out = jax.block_until_ready(out)
    assert out.shape == (D0, D1, OUTPUT_DIM), out.shape

    ref = jax.block_until_ready(reference_forward(x, params, pos_enc))
    np.testing.assert_allclose(np.asarray(out), np.asarray(ref), rtol=5e-2, atol=5e-2)

    print("KERNEL_OK")
</pallas_src>

<mosaic_0001>
module attributes {stable_mosaic.version = 11 : i64} {
  func.func @_fused_forward_kernel(%arg0: memref<32x16xf32, #tpu.memory_space<vmem>>, %arg1: memref<16x32xf32, #tpu.memory_space<vmem>>, %arg2: memref<32x32xf32, #tpu.memory_space<vmem>>, %arg3: memref<32x32xf32, #tpu.memory_space<vmem>>, %arg4: memref<4x32x32xf32, #tpu.memory_space<vmem>>, %arg5: memref<4x32xf32, #tpu.memory_space<vmem>>, %arg6: memref<4x32x64xf32, #tpu.memory_space<vmem>>, %arg7: memref<4x64xf32, #tpu.memory_space<vmem>>, %arg8: memref<4x32x32xf32, #tpu.memory_space<vmem>>, %arg9: memref<18x32xf32, #tpu.memory_space<vmem>>, %arg10: memref<2x2048xf32, #tpu.memory_space<vmem>>, %arg11: memref<2x32x2048xbf16, #tpu.memory_space<vmem>>, %arg12: memref<2x2048x32xbf16, #tpu.memory_space<vmem>>, %arg13: memref<32x128xf32, #tpu.memory_space<vmem>>, %arg14: memref<1x128xf32, #tpu.memory_space<vmem>>, %arg15: memref<32x128xf32, #tpu.memory_space<vmem>>) attributes {dimension_semantics = [], scalar_prefetch = 0 : i64, scratch_operands = 0 : i64, tpu.core_type = #tpu.core_type<tc>} {
    %c0 = arith.constant 0 : index
    %c0_0 = arith.constant 0 : index
    %0 = vector.load %arg3[%c0, %c0_0] : memref<32x32xf32, #tpu.memory_space<vmem>>, vector<32x32xf32>
    %c0_1 = arith.constant 0 : index
    %c0_2 = arith.constant 0 : index
    %1 = vector.load %arg0[%c0_1, %c0_2] : memref<32x16xf32, #tpu.memory_space<vmem>>, vector<32x16xf32>
    %c0_3 = arith.constant 0 : index
    %c0_4 = arith.constant 0 : index
    %2 = vector.load %arg1[%c0_3, %c0_4] : memref<16x32xf32, #tpu.memory_space<vmem>>, vector<16x32xf32>
    %cst = arith.constant dense<0.000000e+00> : vector<32x32xf32>
    %3 = tpu.matmul %1, %2, %cst {dimension_numbers = #tpu.dot_dimension_numbers<[1], [0], [0], [1], [0, 0, 1, 1], [], []>} : vector<32x16xf32>, vector<16x32xf32>, vector<32x32xf32> -> vector<32x32xf32>
    %c0_5 = arith.constant 0 : index
    %c0_6 = arith.constant 0 : index
    %4 = vector.load %arg2[%c0_5, %c0_6] : memref<32x32xf32, #tpu.memory_space<vmem>>, vector<32x32xf32>
    %5 = arith.addf %3, %4 : vector<32x32xf32>
    %c0_7 = arith.constant 0 : index
    %c0_8 = arith.constant 0 : index
    %c0_9 = arith.constant 0 : index
    %6 = vector.load %arg4[%c0_7, %c0_8, %c0_9] : memref<4x32x32xf32, #tpu.memory_space<vmem>>, vector<1x32x32xf32>
    %7 = vector.shape_cast %6 : vector<1x32x32xf32> to vector<32x32xf32>
    %c0_10 = arith.constant 0 : index
    %c0_11 = arith.constant 0 : index
    %8 = vector.load %arg5[%c0_10, %c0_11] : memref<4x32xf32, #tpu.memory_space<vmem>>, vector<1x32xf32>
    %c0_12 = arith.constant 0 : index
    %c0_13 = arith.constant 0 : index
    %c0_14 = arith.constant 0 : index
    %9 = vector.load %arg6[%c0_12, %c0_13, %c0_14] : memref<4x32x64xf32, #tpu.memory_space<vmem>>, vector<1x32x64xf32>
    %10 = vector.shape_cast %9 : vector<1x32x64xf32> to vector<32x64xf32>
    %c0_15 = arith.constant 0 : index
    %c0_16 = arith.constant 0 : index
    %11 = vector.load %arg7[%c0_15, %c0_16] : memref<4x64xf32, #tpu.memory_space<vmem>>, vector<1x64xf32>
    %c0_17 = arith.constant 0 : index
    %c0_18 = arith.constant 0 : index
    %c0_19 = arith.constant 0 : index
    %12 = vector.load %arg8[%c0_17, %c0_18, %c0_19] : memref<4x32x32xf32, #tpu.memory_space<vmem>>, vector<1x32x32xf32>
    %13 = vector.shape_cast %12 : vector<1x32x32xf32> to vector<32x32xf32>
    %c0_20 = arith.constant 0 : index
    %c0_21 = arith.constant 0 : index
    %14 = vector.load %arg9[%c0_20, %c0_21] : memref<18x32xf32, #tpu.memory_space<vmem>>, vector<1x32xf32>
    %cst_22 = arith.constant dense<0.000000e+00> : vector<32x32xf32>
    %15 = tpu.matmul %5, %7, %cst_22 {dimension_numbers = #tpu.dot_dimension_numbers<[1], [0], [0], [1], [0, 0, 1, 1], [], []>} : vector<32x32xf32>, vector<32x32xf32>, vector<32x32xf32> -> vector<32x32xf32>
    %16 = vector.broadcast %8 : vector<1x32xf32> to vector<32x32xf32>
    %17 = arith.addf %15, %16 : vector<32x32xf32>
    %cst_23 = arith.constant dense<0.000000e+00> : vector<32x64xf32>
    %18 = tpu.matmul %5, %10, %cst_23 {dimension_numbers = #tpu.dot_dimension_numbers<[1], [0], [0], [1], [0, 0, 1, 1], [], []>} : vector<32x32xf32>, vector<32x64xf32>, vector<32x64xf32> -> vector<32x64xf32>
    %19 = vector.broadcast %11 : vector<1x64xf32> to vector<32x64xf32>
    %20 = arith.addf %18, %19 : vector<32x64xf32>
    %21 = vector.extract_strided_slice %17 {offsets = [0, 0], sizes = [32, 8], strides = [1, 1]} : vector<32x32xf32> to vector<32x8xf32>
    %22 = vector.extract_strided_slice %20 {offsets = [0, 0], sizes = [32, 8], strides = [1, 1]} : vector<32x64xf32> to vector<32x8xf32>
    %23 = vector.extract_strided_slice %20 {offsets = [0, 32], sizes = [32, 8], strides = [1, 1]} : vector<32x64xf32> to vector<32x8xf32>
    %cst_24 = arith.constant dense<0.000000e+00> : vector<32x32xf32>
    %24 = tpu.matmul %21, %22, %cst_24 {dimension_numbers = #tpu.dot_dimension_numbers<[1], [1], [0], [0], [0, 0, 1, 0], [], []>} : vector<32x8xf32>, vector<32x8xf32>, vector<32x32xf32> -> vector<32x32xf32>
    %25 = arith.addf %24, %0 : vector<32x32xf32>
    %cst_25 = arith.constant dense<0xFF800000> : vector<32xf32>
    %26 = vector.multi_reduction <maximumf>, %25, %cst_25 [1] : vector<32x32xf32> to vector<32xf32>
    %27 = vector.shape_cast %26 : vector<32xf32> to vector<32x1xf32>
    %28 = vector.broadcast %27 : vector<32x1xf32> to vector<32x32xf32>
    %29 = arith.subf %25, %28 : vector<32x32xf32>
    %30 = math.exp %29 : vector<32x32xf32>
    %cst_26 = arith.constant dense<0.000000e+00> : vector<32xf32>
    %31 = vector.multi_reduction <add>, %30, %cst_26 [1] : vector<32x32xf32> to vector<32xf32>
    %32 = vector.shape_cast %31 : vector<32xf32> to vector<32x1xf32>
    %33 = tpu.reciprocal %32 {approx = true} : vector<32x1xf32> -> vector<32x1xf32>
    %34 = vector.broadcast %33 : vector<32x1xf32> to vector<32x32xf32>
    %35 = arith.mulf %30, %34 : vector<32x32xf32>
    %cst_27 = arith.constant dense<0.000000e+00> : vector<32x8xf32>
    %36 = tpu.matmul %35, %23, %cst_27 {dimension_numbers = #tpu.dot_dimension_numbers<[1], [0], [0], [1], [0, 0, 1, 1], [], []>} : vector<32x32xf32>, vector<32x8xf32>, vector<32x8xf32> -> vector<32x8xf32>
    %37 = vector.extract_strided_slice %17 {offsets = [0, 8], sizes = [32, 8], strides = [1, 1]} : vector<32x32xf32> to vector<32x8xf32>
    %38 = vector.extract_strided_slice %20 {offsets = [0, 8], sizes = [32, 8], strides = [1, 1]} : vector<32x64xf32> to vector<32x8xf32>
    %39 = vector.extract_strided_slice %20 {offsets = [0, 40], sizes = [32, 8], strides = [1, 1]} : vector<32x64xf32> to vector<32x8xf32>
    %cst_28 = arith.constant dense<0.000000e+00> : vector<32x32xf32>
    %40 = tpu.matmul %37, %38, %cst_28 {dimension_numbers = #tpu.dot_dimension_numbers<[1], [1], [0], [0], [0, 0, 1, 0], [], []>} : vector<32x8xf32>, vector<32x8xf32>, vector<32x32xf32> -> vector<32x32xf32>
    %41 = arith.addf %40, %0 : vector<32x32xf32>
    %cst_29 = arith.constant dense<0xFF800000> : vector<32xf32>
    %42 = vector.multi_reduction <maximumf>, %41, %cst_29 [1] : vector<32x32xf32> to vector<32xf32>
    %43 = vector.shape_cast %42 : vector<32xf32> to vector<32x1xf32>
    %44 = vector.broadcast %43 : vector<32x1xf32> to vector<32x32xf32>
    %45 = arith.subf %41, %44 : vector<32x32xf32>
    %46 = math.exp %45 : vector<32x32xf32>
    %cst_30 = arith.constant dense<0.000000e+00> : vector<32xf32>
    %47 = vector.multi_reduction <add>, %46, %cst_30 [1] : vector<32x32xf32> to vector<32xf32>
    %48 = vector.shape_cast %47 : vector<32xf32> to vector<32x1xf32>
    %49 = tpu.reciprocal %48 {approx = true} : vector<32x1xf32> -> vector<32x1xf32>
    %50 = vector.broadcast %49 : vector<32x1xf32> to vector<32x32xf32>
    %51 = arith.mulf %46, %50 : vector<32x32xf32>
    %cst_31 = arith.constant dense<0.000000e+00> : vector<32x8xf32>
    %52 = tpu.matmul %51, %39, %cst_31 {dimension_numbers = #tpu.dot_dimension_numbers<[1], [0], [0], [1], [0, 0, 1, 1], [], []>} : vector<32x32xf32>, vector<32x8xf32>, vector<32x8xf32> -> vector<32x8xf32>
    %53 = vector.extract_strided_slice %17 {offsets = [0, 16], sizes = [32, 8], strides = [1, 1]} : vector<32x32xf32> to vector<32x8xf32>
    %54 = vector.extract_strided_slice %20 {offsets = [0, 16], sizes = [32, 8], strides = [1, 1]} : vector<32x64xf32> to vector<32x8xf32>
    %55 = vector.extract_strided_slice %20 {offsets = [0, 48], sizes = [32, 8], strides = [1, 1]} : vector<32x64xf32> to vector<32x8xf32>
    %cst_32 = arith.constant dense<0.000000e+00> : vector<32x32xf32>
    %56 = tpu.matmul %53, %54, %cst_32 {dimension_numbers = #tpu.dot_dimension_numbers<[1], [1], [0], [0], [0, 0, 1, 0], [], []>} : vector<32x8xf32>, vector<32x8xf32>, vector<32x32xf32> -> vector<32x32xf32>
    %57 = arith.addf %56, %0 : vector<32x32xf32>
    %cst_33 = arith.constant dense<0xFF800000> : vector<32xf32>
    %58 = vector.multi_reduction <maximumf>, %57, %cst_33 [1] : vector<32x32xf32> to vector<32xf32>
    %59 = vector.shape_cast %58 : vector<32xf32> to vector<32x1xf32>
    %60 = vector.broadcast %59 : vector<32x1xf32> to vector<32x32xf32>
    %61 = arith.subf %57, %60 : vector<32x32xf32>
    %62 = math.exp %61 : vector<32x32xf32>
    %cst_34 = arith.constant dense<0.000000e+00> : vector<32xf32>
    %63 = vector.multi_reduction <add>, %62, %cst_34 [1] : vector<32x32xf32> to vector<32xf32>
    %64 = vector.shape_cast %63 : vector<32xf32> to vector<32x1xf32>
    %65 = tpu.reciprocal %64 {approx = true} : vector<32x1xf32> -> vector<32x1xf32>
    %66 = vector.broadcast %65 : vector<32x1xf32> to vector<32x32xf32>
    %67 = arith.mulf %62, %66 : vector<32x32xf32>
    %cst_35 = arith.constant dense<0.000000e+00> : vector<32x8xf32>
    %68 = tpu.matmul %67, %55, %cst_35 {dimension_numbers = #tpu.dot_dimension_numbers<[1], [0], [0], [1], [0, 0, 1, 1], [], []>} : vector<32x32xf32>, vector<32x8xf32>, vector<32x8xf32> -> vector<32x8xf32>
    %69 = vector.extract_strided_slice %17 {offsets = [0, 24], sizes = [32, 8], strides = [1, 1]} : vector<32x32xf32> to vector<32x8xf32>
    %70 = vector.extract_strided_slice %20 {offsets = [0, 24], sizes = [32, 8], strides = [1, 1]} : vector<32x64xf32> to vector<32x8xf32>
    %71 = vector.extract_strided_slice %20 {offsets = [0, 56], sizes = [32, 8], strides = [1, 1]} : vector<32x64xf32> to vector<32x8xf32>
    %cst_36 = arith.constant dense<0.000000e+00> : vector<32x32xf32>
    %72 = tpu.matmul %69, %70, %cst_36 {dimension_numbers = #tpu.dot_dimension_numbers<[1], [1], [0], [0], [0, 0, 1, 0], [], []>} : vector<32x8xf32>, vector<32x8xf32>, vector<32x32xf32> -> vector<32x32xf32>
    %73 = arith.addf %72, %0 : vector<32x32xf32>
    %cst_37 = arith.constant dense<0xFF800000> : vector<32xf32>
    %74 = vector.multi_reduction <maximumf>, %73, %cst_37 [1] : vector<32x32xf32> to vector<32xf32>
    %75 = vector.shape_cast %74 : vector<32xf32> to vector<32x1xf32>
    %76 = vector.broadcast %75 : vector<32x1xf32> to vector<32x32xf32>
    %77 = arith.subf %73, %76 : vector<32x32xf32>
    %78 = math.exp %77 : vector<32x32xf32>
    %cst_38 = arith.constant dense<0.000000e+00> : vector<32xf32>
    %79 = vector.multi_reduction <add>, %78, %cst_38 [1] : vector<32x32xf32> to vector<32xf32>
    %80 = vector.shape_cast %79 : vector<32xf32> to vector<32x1xf32>
    %81 = tpu.reciprocal %80 {approx = true} : vector<32x1xf32> -> vector<32x1xf32>
    %82 = vector.broadcast %81 : vector<32x1xf32> to vector<32x32xf32>
    %83 = arith.mulf %78, %82 : vector<32x32xf32>
    %cst_39 = arith.constant dense<0.000000e+00> : vector<32x8xf32>
    %84 = tpu.matmul %83, %71, %cst_39 {dimension_numbers = #tpu.dot_dimension_numbers<[1], [0], [0], [1], [0, 0, 1, 1], [], []>} : vector<32x32xf32>, vector<32x8xf32>, vector<32x8xf32> -> vector<32x8xf32>
    %85 = tpu.concatenate %36, %52, %68, %84 in 1 : vector<32x8xf32>, vector<32x8xf32>, vector<32x8xf32>, vector<32x8xf32> -> vector<32x32xf32>
    %cst_40 = arith.constant dense<0.000000e+00> : vector<32x32xf32>
    %86 = tpu.matmul %85, %13, %cst_40 {dimension_numbers = #tpu.dot_dimension_numbers<[1], [0], [0], [1], [0, 0, 1, 1], [], []>} : vector<32x32xf32>, vector<32x32xf32>, vector<32x32xf32> -> vector<32x32xf32>
    %87 = vector.broadcast %14 : vector<1x32xf32> to vector<32x32xf32>
    %88 = arith.addf %86, %87 : vector<32x32xf32>
    %89 = arith.addf %5, %88 : vector<32x32xf32>
    %c2 = arith.constant 2 : index
    %c0_41 = arith.constant 0 : index
    %90 = vector.load %arg9[%c2, %c0_41] : memref<18x32xf32, #tpu.memory_space<vmem>>, vector<1x32xf32>
    %c3 = arith.constant 3 : index
    %c0_42 = arith.constant 0 : index
    %91 = vector.load %arg9[%c3, %c0_42] : memref<18x32xf32, #tpu.memory_space<vmem>>, vector<1x32xf32>
    %cst_43 = arith.constant dense<0.000000e+00> : vector<32xf32>
    %92 = vector.multi_reduction <add>, %89, %cst_43 [1] : vector<32x32xf32> to vector<32xf32>
    %93 = vector.shape_cast %92 : vector<32xf32> to vector<32x1xf32>
    %cst_44 = arith.constant 3.200000e+01 : f32
    %94 = vector.broadcast %cst_44 : f32 to vector<32x1xf32>
    %95 = arith.divf %93, %94 : vector<32x1xf32>
    %96 = vector.broadcast %95 : vector<32x1xf32> to vector<32x32xf32>
    %97 = arith.subf %89, %96 : vector<32x32xf32>
    %98 = arith.mulf %97, %97 : vector<32x32xf32>
    %cst_45 = arith.constant dense<0.000000e+00> : vector<32xf32>
    %99 = vector.multi_reduction <add>, %98, %cst_45 [1] : vector<32x32xf32> to vector<32xf32>
    %100 = vector.shape_cast %99 : vector<32xf32> to vector<32x1xf32>
    %cst_46 = arith.constant 3.200000e+01 : f32
    %101 = vector.broadcast %cst_46 : f32 to vector<32x1xf32>
    %102 = arith.divf %100, %101 : vector<32x1xf32>
    %103 = vector.broadcast %95 : vector<32x1xf32> to vector<32x32xf32>
    %104 = arith.subf %89, %103 : vector<32x32xf32>
    %cst_47 = arith.constant 9.99999974E-6 : f32
    %105 = vector.broadcast %cst_47 : f32 to vector<32x1xf32>
    %106 = arith.addf %102, %105 : vector<32x1xf32>
    %107 = math.rsqrt %106 : vector<32x1xf32>
    %108 = vector.broadcast %107 : vector<32x1xf32> to vector<32x32xf32>
    %109 = arith.mulf %104, %108 : vector<32x32xf32>
    %110 = vector.broadcast %90 : vector<1x32xf32> to vector<32x32xf32>
    %111 = arith.mulf %109, %110 : vector<32x32xf32>
    %112 = vector.broadcast %91 : vector<1x32xf32> to vector<32x32xf32>
    %113 = arith.addf %111, %112 : vector<32x32xf32>
    %c1 = arith.constant 1 : index
    %c0_48 = arith.constant 0 : index
    %c0_49 = arith.constant 0 : index
    %114 = vector.load %arg4[%c1, %c0_48, %c0_49] : memref<4x32x32xf32, #tpu.memory_space<vmem>>, vector<1x32x32xf32>
    %115 = vector.shape_cast %114 : vector<1x32x32xf32> to vector<32x32xf32>
    %c1_50 = arith.constant 1 : index
    %c0_51 = arith.constant 0 : index
    %116 = vector.load %arg5[%c1_50, %c0_51] : memref<4x32xf32, #tpu.memory_space<vmem>>, vector<1x32xf32>
    %c1_52 = arith.constant 1 : index
    %c0_53 = arith.constant 0 : index
    %c0_54 = arith.constant 0 : index
    %117 = vector.load %arg6[%c1_52, %c0_53, %c0_54] : memref<4x32x64xf32, #tpu.memory_space<vmem>>, vector<1x32x64xf32>
    %118 = vector.shape_cast %117 : vector<1x32x64xf32> to vector<32x64xf32>
    %c1_55 = arith.constant 1 : index
    %c0_56 = arith.constant 0 : index
    %119 = vector.load %arg7[%c1_55, %c0_56] : memref<4x64xf32, #tpu.memory_space<vmem>>, vector<1x64xf32>
    %c1_57 = arith.constant 1 : index
    %c0_58 = arith.constant 0 : index
    %c0_59 = arith.constant 0 : index
    %120 = vector.load %arg8[%c1_57, %c0_58, %c0_59] : memref<4x32x32xf32, #tpu.memory_space<vmem>>, vector<1x32x32xf32>
    %121 = vector.shape_cast %120 : vector<1x32x32xf32> to vector<32x32xf32>
    %c1_60 = arith.constant 1 : index
    %c0_61 = arith.constant 0 : index
    %122 = vector.load %arg9[%c1_60, %c0_61] : memref<18x32xf32, #tpu.memory_space<vmem>>, vector<1x32xf32>
    %cst_62 = arith.constant dense<0.000000e+00> : vector<32x32xf32>
    %123 = tpu.matmul %113, %115, %cst_62 {dimension_numbers = #tpu.dot_dimension_numbers<[1], [0], [0], [1], [0, 0, 1, 1], [], []>} : vector<32x32xf32>, vector<32x32xf32>, vector<32x32xf32> -> vector<32x32xf32>
    %124 = vector.broadcast %116 : vector<1x32xf32> to vector<32x32xf32>
    %125 = arith.addf %123, %124 : vector<32x32xf32>
    %cst_63 = arith.constant dense<0.000000e+00> : vector<32x64xf32>
    %126 = tpu.matmul %5, %118, %cst_63 {dimension_numbers = #tpu.dot_dimension_numbers<[1], [0], [0], [1], [0, 0, 1, 1], [], []>} : vector<32x32xf32>, vector<32x64xf32>, vector<32x64xf32> -> vector<32x64xf32>
    %127 = vector.broadcast %119 : vector<1x64xf32> to vector<32x64xf32>
    %128 = arith.addf %126, %127 : vector<32x64xf32>
    %129 = vector.extract_strided_slice %125 {offsets = [0, 0], sizes = [32, 8], strides = [1, 1]} : vector<32x32xf32> to vector<32x8xf32>
    %130 = vector.extract_strided_slice %128 {offsets = [0, 0], sizes = [32, 8], strides = [1, 1]} : vector<32x64xf32> to vector<32x8xf32>
    %131 = vector.extract_strided_slice %128 {offsets = [0, 32], sizes = [32, 8], strides = [1, 1]} : vector<32x64xf32> to vector<32x8xf32>
    %cst_64 = arith.constant dense<0.000000e+00> : vector<32x32xf32>
    %132 = tpu.matmul %129, %130, %cst_64 {dimension_numbers = #tpu.dot_dimension_numbers<[1], [1], [0], [0], [0, 0, 1, 0], [], []>} : vector<32x8xf32>, vector<32x8xf32>, vector<32x32xf32> -> vector<32x32xf32>
    %133 = arith.addf %132, %0 : vector<32x32xf32>
    %cst_65 = arith.constant dense<0xFF800000> : vector<32xf32>
    %134 = vector.multi_reduction <maximumf>, %133, %cst_65 [1] : vector<32x32xf32> to vector<32xf32>
    %135 = vector.shape_cast %134 : vector<32xf32> to vector<32x1xf32>
    %136 = vector.broadcast %135 : vector<32x1xf32> to vector<32x32xf32>
    %137 = arith.subf %133, %136 : vector<32x32xf32>
    %138 = math.exp %137 : vector<32x32xf32>
    %cst_66 = arith.constant dense<0.000000e+00> : vector<32xf32>
    %139 = vector.multi_reduction <add>, %138, %cst_66 [1] : vector<32x32xf32> to vector<32xf32>
    %140 = vector.shape_cast %139 : vector<32xf32> to vector<32x1xf32>
    %141 = tpu.reciprocal %140 {approx = true} : vector<32x1xf32> -> vector<32x1xf32>
    %142 = vector.broadcast %141 : vector<32x1xf32> to vector<32x32xf32>
    %143 = arith.mulf %138, %142 : vector<32x32xf32>
    %cst_67 = arith.constant dense<0.000000e+00> : vector<32x8xf32>
    %144 = tpu.matmul %143, %131, %cst_67 {dimension_numbers = #tpu.dot_dimension_numbers<[1], [0], [0], [1], [0, 0, 1, 1], [], []>} : vector<32x32xf32>, vector<32x8xf32>, vector<32x8xf32> -> vector<32x8xf32>
    %145 = vector.extract_strided_slice %125 {offsets = [0, 8], sizes = [32, 8], strides = [1, 1]} : vector<32x32xf32> to vector<32x8xf32>
    %146 = vector.extract_strided_slice %128 {offsets = [0, 8], sizes = [32, 8], strides = [1, 1]} : vector<32x64xf32> to vector<32x8xf32>
    %147 = vector.extract_strided_slice %128 {offsets = [0, 40], sizes = [32, 8], strides = [1, 1]} : vector<32x64xf32> to vector<32x8xf32>
    %cst_68 = arith.constant dense<0.000000e+00> : vector<32x32xf32>
    %148 = tpu.matmul %145, %146, %cst_68 {dimension_numbers = #tpu.dot_dimension_numbers<[1], [1], [0], [0], [0, 0, 1, 0], [], []>} : vector<32x8xf32>, vector<32x8xf32>, vector<32x32xf32> -> vector<32x32xf32>
    %149 = arith.addf %148, %0 : vector<32x32xf32>
    %cst_69 = arith.constant dense<0xFF800000> : vector<32xf32>
    %150 = vector.multi_reduction <maximumf>, %149, %cst_69 [1] : vector<32x32xf32> to vector<32xf32>
    %151 = vector.shape_cast %150 : vector<32xf32> to vector<32x1xf32>
    %152 = vector.broadcast %151 : vector<32x1xf32> to vector<32x32xf32>
    %153 = arith.subf %149, %152 : vector<32x32xf32>
    %154 = math.exp %153 : vector<32x32xf32>
    %cst_70 = arith.constant dense<0.000000e+00> : vector<32xf32>
    %155 = vector.multi_reduction <add>, %154, %cst_70 [1] : vector<32x32xf32> to vector<32xf32>
    %156 = vector.shape_cast %155 : vector<32xf32> to vector<32x1xf32>
    %157 = tpu.reciprocal %156 {approx = true} : vector<32x1xf32> -> vector<32x1xf32>
    %158 = vector.broadcast %157 : vector<32x1xf32> to vector<32x32xf32>
    %159 = arith.mulf %154, %158 : vector<32x32xf32>
    %cst_71 = arith.constant dense<0.000000e+00> : vector<32x8xf32>
    %160 = tpu.matmul %159, %147, %cst_71 {dimension_numbers = #tpu.dot_dimension_numbers<[1], [0], [0], [1], [0, 0, 1, 1], [], []>} : vector<32x32xf32>, vector<32x8xf32>, vector<32x8xf32> -> vector<32x8xf32>
    %161 = vector.extract_strided_slice %125 {offsets = [0, 16], sizes = [32, 8], strides = [1, 1]} : vector<32x32xf32> to vector<32x8xf32>
    %162 = vector.extract_strided_slice %128 {offsets = [0, 16], sizes = [32, 8], strides = [1, 1]} : vector<32x64xf32> to vector<32x8xf32>
    %163 = vector.extract_strided_slice %128 {offsets = [0, 48], sizes = [32, 8], strides = [1, 1]} : vector<32x64xf32> to vector<32x8xf32>
    %cst_72 = arith.constant dense<0.000000e+00> : vector<32x32xf32>
    %164 = tpu.matmul %161, %162, %cst_72 {dimension_numbers = #tpu.dot_dimension_numbers<[1], [1], [0], [0], [0, 0, 1, 0], [], []>} : vector<32x8xf32>, vector<32x8xf32>, vector<32x32xf32> -> vector<32x32xf32>
    %165 = arith.addf %164, %0 : vector<32x32xf32>
    %cst_73 = arith.constant dense<0xFF800000> : vector<32xf32>
    %166 = vector.multi_reduction <maximumf>, %165, %cst_73 [1] : vector<32x32xf32> to vector<32xf32>
    %167 = vector.shape_cast %166 : vector<32xf32> to vector<32x1xf32>
    %168 = vector.broadcast %167 : vector<32x1xf32> to vector<32x32xf32>
    %169 = arith.subf %165, %168 : vector<32x32xf32>
    %170 = math.exp %169 : vector<32x32xf32>
    %cst_74 = arith.constant dense<0.000000e+00> : vector<32xf32>
    %171 = vector.multi_reduction <add>, %170, %cst_74 [1] : vector<32x32xf32> to vector<32xf32>
    %172 = vector.shape_cast %171 : vector<32xf32> to vector<32x1xf32>
    %173 = tpu.reciprocal %172 {approx = true} : vector<32x1xf32> -> vector<32x1xf32>
    %174 = vector.broadcast %173 : vector<32x1xf32> to vector<32x32xf32>
    %175 = arith.mulf %170, %174 : vector<32x32xf32>
    %cst_75 = arith.constant dense<0.000000e+00> : vector<32x8xf32>
    %176 = tpu.matmul %175, %163, %cst_75 {dimension_numbers = #tpu.dot_dimension_numbers<[1], [0], [0], [1], [0, 0, 1, 1], [], []>} : vector<32x32xf32>, vector<32x8xf32>, vector<32x8xf32> -> vector<32x8xf32>
    %177 = vector.extract_strided_slice %125 {offsets = [0, 24], sizes = [32, 8], strides = [1, 1]} : vector<32x32xf32> to vector<32x8xf32>
    %178 = vector.extract_strided_slice %128 {offsets = [0, 24], sizes = [32, 8], strides = [1, 1]} : vector<32x64xf32> to vector<32x8xf32>
    %179 = vector.extract_strided_slice %128 {offsets = [0, 56], sizes = [32, 8], strides = [1, 1]} : vector<32x64xf32> to vector<32x8xf32>
    %cst_76 = arith.constant dense<0.000000e+00> : vector<32x32xf32>
    %180 = tpu.matmul %177, %178, %cst_76 {dimension_numbers = #tpu.dot_dimension_numbers<[1], [1], [0], [0], [0, 0, 1, 0], [], []>} : vector<32x8xf32>, vector<32x8xf32>, vector<32x32xf32> -> vector<32x32xf32>
    %181 = arith.addf %180, %0 : vector<32x32xf32>
    %cst_77 = arith.constant dense<0xFF800000> : vector<32xf32>
    %182 = vector.multi_reduction <maximumf>, %181, %cst_77 [1] : vector<32x32xf32> to vector<32xf32>
    %183 = vector.shape_cast %182 : vector<32xf32> to vector<32x1xf32>
    %184 = vector.broadcast %183 : vector<32x1xf32> to vector<32x32xf32>
    %185 = arith.subf %181, %184 : vector<32x32xf32>
    %186 = math.exp %185 : vector<32x32xf32>
    %cst_78 = arith.constant dense<0.000000e+00> : vector<32xf32>
    %187 = vector.multi_reduction <add>, %186, %cst_78 [1] : vector<32x32xf32> to vector<32xf32>
    %188 = vector.shape_cast %187 : vector<32xf32> to vector<32x1xf32>
    %189 = tpu.reciprocal %188 {approx = true} : vector<32x1xf32> -> vector<32x1xf32>
    %190 = vector.broadcast %189 : vector<32x1xf32> to vector<32x32xf32>
    %191 = arith.mulf %186, %190 : vector<32x32xf32>
    %cst_79 = arith.constant dense<0.000000e+00> : vector<32x8xf32>
    %192 = tpu.matmul %191, %179, %cst_79 {dimension_numbers = #tpu.dot_dimension_numbers<[1], [0], [0], [1], [0, 0, 1, 1], [], []>} : vector<32x32xf32>, vector<32x8xf32>, vector<32x8xf32> -> vector<32x8xf32>
    %193 = tpu.concatenate %144, %160, %176, %192 in 1 : vector<32x8xf32>, vector<32x8xf32>, vector<32x8xf32>, vector<32x8xf32> -> vector<32x32xf32>
    %cst_80 = arith.constant dense<0.000000e+00> : vector<32x32xf32>
    %194 = tpu.matmul %193, %121, %cst_80 {dimension_numbers = #tpu.dot_dimension_numbers<[1], [0], [0], [1], [0, 0, 1, 1], [], []>} : vector<32x32xf32>, vector<32x32xf32>, vector<32x32xf32> -> vector<32x32xf32>
    %195 = vector.broadcast %122 : vector<1x32xf32> to vector<32x32xf32>
    %196 = arith.addf %194, %195 : vector<32x32xf32>
    %197 = arith.addf %113, %196 : vector<32x32xf32>
    %c4 = arith.constant 4 : index
    %c0_81 = arith.constant 0 : index
    %198 = vector.load %arg9[%c4, %c0_81] : memref<18x32xf32, #tpu.memory_space<vmem>>, vector<1x32xf32>
    %c5 = arith.constant 5 : index
    %c0_82 = arith.constant 0 : index
    %199 = vector.load %arg9[%c5, %c0_82] : memref<18x32xf32, #tpu.memory_space<vmem>>, vector<1x32xf32>
    %cst_83 = arith.constant dense<0.000000e+00> : vector<32xf32>
    %200 = vector.multi_reduction <add>, %197, %cst_83 [1] : vector<32x32xf32> to vector<32xf32>
    %201 = vector.shape_cast %200 : vector<32xf32> to vector<32x1xf32>
    %cst_84 = arith.constant 3.200000e+01 : f32
    %202 = vector.broadcast %cst_84 : f32 to vector<32x1xf32>
    %203 = arith.divf %201, %202 : vector<32x1xf32>
    %204 = vector.broadcast %203 : vector<32x1xf32> to vector<32x32xf32>
    %205 = arith.subf %197, %204 : vector<32x32xf32>
    %206 = arith.mulf %205, %205 : vector<32x32xf32>
    %cst_85 = arith.constant dense<0.000000e+00> : vector<32xf32>
    %207 = vector.multi_reduction <add>, %206, %cst_85 [1] : vector<32x32xf32> to vector<32xf32>
    %208 = vector.shape_cast %207 : vector<32xf32> to vector<32x1xf32>
    %cst_86 = arith.constant 3.200000e+01 : f32
    %209 = vector.broadcast %cst_86 : f32 to vector<32x1xf32>
    %210 = arith.divf %208, %209 : vector<32x1xf32>
    %211 = vector.broadcast %203 : vector<32x1xf32> to vector<32x32xf32>
    %212 = arith.subf %197, %211 : vector<32x32xf32>
    %cst_87 = arith.constant 9.99999974E-6 : f32
    %213 = vector.broadcast %cst_87 : f32 to vector<32x1xf32>
    %214 = arith.addf %210, %213 : vector<32x1xf32>
    %215 = math.rsqrt %214 : vector<32x1xf32>
    %216 = vector.broadcast %215 : vector<32x1xf32> to vector<32x32xf32>
    %217 = arith.mulf %212, %216 : vector<32x32xf32>
    %218 = vector.broadcast %198 : vector<1x32xf32> to vector<32x32xf32>
    %219 = arith.mulf %217, %218 : vector<32x32xf32>
    %220 = vector.broadcast %199 : vector<1x32xf32> to vector<32x32xf32>
    %221 = arith.addf %219, %220 : vector<32x32xf32>
    %c0_88 = arith.constant 0 : index
    %c0_89 = arith.constant 0 : index
    %c0_90 = arith.constant 0 : index
    %222 = vector.load %arg11[%c0_88, %c0_89, %c0_90] : memref<2x32x2048xbf16, #tpu.memory_space<vmem>>, vector<1x32x2048xbf16>
    %223 = vector.shape_cast %222 : vector<1x32x2048xbf16> to vector<32x2048xbf16>
    %c0_91 = arith.constant 0 : index
    %c0_92 = arith.constant 0 : index
    %224 = vector.load %arg10[%c0_91, %c0_92] : memref<2x2048xf32, #tpu.memory_space<vmem>>, vector<1x2048xf32>
    %c0_93 = arith.constant 0 : index
    %c0_94 = arith.constant 0 : index
    %c0_95 = arith.constant 0 : index
    %225 = vector.load %arg12[%c0_93, %c0_94, %c0_95] : memref<2x2048x32xbf16, #tpu.memory_space<vmem>>, vector<1x2048x32xbf16>
    %226 = vector.shape_cast %225 : vector<1x2048x32xbf16> to vector<2048x32xbf16>
    %c8 = arith.constant 8 : index
    %c0_96 = arith.constant 0 : index
    %227 = vector.load %arg9[%c8, %c0_96] : memref<18x32xf32, #tpu.memory_space<vmem>>, vector<1x32xf32>
    %228 = arith.truncf %221 : vector<32x32xf32> to vector<32x32xbf16>
    %cst_97 = arith.constant dense<0.000000e+00> : vector<32x2048xf32>
    %229 = tpu.matmul %228, %223, %cst_97 {dimension_numbers = #tpu.dot_dimension_numbers<[1], [0], [0], [1], [0, 0, 1, 1], [], []>} : vector<32x32xbf16>, vector<32x2048xbf16>, vector<32x2048xf32> -> vector<32x2048xf32>
    %230 = vector.broadcast %224 : vector<1x2048xf32> to vector<32x2048xf32>
    %231 = arith.addf %229, %230 : vector<32x2048xf32>
    %cst_98 = arith.constant 0.000000e+00 : f32
    %232 = vector.broadcast %cst_98 : f32 to vector<32x2048xf32>
    %233 = arith.maximumf %231, %232 : vector<32x2048xf32>
    %234 = arith.truncf %233 : vector<32x2048xf32> to vector<32x2048xbf16>
    %cst_99 = arith.constant dense<0.000000e+00> : vector<32x32xf32>
    %235 = tpu.matmul %234, %226, %cst_99 {dimension_numbers = #tpu.dot_dimension_numbers<[1], [0], [0], [1], [0, 0, 1, 1], [], []>} : vector<32x2048xbf16>, vector<2048x32xbf16>, vector<32x32xf32> -> vector<32x32xf32>
    %236 = vector.broadcast %227 : vector<1x32xf32> to vector<32x32xf32>
    %237 = arith.addf %235, %236 : vector<32x32xf32>
    %238 = arith.addf %221, %237 : vector<32x32xf32>
    %c6 = arith.constant 6 : index
    %c0_100 = arith.constant 0 : index
    %239 = vector.load %arg9[%c6, %c0_100] : memref<18x32xf32, #tpu.memory_space<vmem>>, vector<1x32xf32>
    %c7 = arith.constant 7 : index
    %c0_101 = arith.constant 0 : index
    %240 = vector.load %arg9[%c7, %c0_101] : memref<18x32xf32, #tpu.memory_space<vmem>>, vector<1x32xf32>
    %cst_102 = arith.constant dense<0.000000e+00> : vector<32xf32>
    %241 = vector.multi_reduction <add>, %238, %cst_102 [1] : vector<32x32xf32> to vector<32xf32>
    %242 = vector.shape_cast %241 : vector<32xf32> to vector<32x1xf32>
    %cst_103 = arith.constant 3.200000e+01 : f32
    %243 = vector.broadcast %cst_103 : f32 to vector<32x1xf32>
    %244 = arith.divf %242, %243 : vector<32x1xf32>
    %245 = vector.broadcast %244 : vector<32x1xf32> to vector<32x32xf32>
    %246 = arith.subf %238, %245 : vector<32x32xf32>
    %247 = arith.mulf %246, %246 : vector<32x32xf32>
    %cst_104 = arith.constant dense<0.000000e+00> : vector<32xf32>
    %248 = vector.multi_reduction <add>, %247, %cst_104 [1] : vector<32x32xf32> to vector<32xf32>
    %249 = vector.shape_cast %248 : vector<32xf32> to vector<32x1xf32>
    %cst_105 = arith.constant 3.200000e+01 : f32
    %250 = vector.broadcast %cst_105 : f32 to vector<32x1xf32>
    %251 = arith.divf %249, %250 : vector<32x1xf32>
    %252 = vector.broadcast %244 : vector<32x1xf32> to vector<32x32xf32>
    %253 = arith.subf %238, %252 : vector<32x32xf32>
    %cst_106 = arith.constant 9.99999974E-6 : f32
    %254 = vector.broadcast %cst_106 : f32 to vector<32x1xf32>
    %255 = arith.addf %251, %254 : vector<32x1xf32>
    %256 = math.rsqrt %255 : vector<32x1xf32>
    %257 = vector.broadcast %256 : vector<32x1xf32> to vector<32x32xf32>
    %258 = arith.mulf %253, %257 : vector<32x32xf32>
    %259 = vector.broadcast %239 : vector<1x32xf32> to vector<32x32xf32>
    %260 = arith.mulf %258, %259 : vector<32x32xf32>
    %261 = vector.broadcast %240 : vector<1x32xf32> to vector<32x32xf32>
    %262 = arith.addf %260, %261 : vector<32x32xf32>
    %c2_107 = arith.constant 2 : index
    %c0_108 = arith.constant 0 : index
    %c0_109 = arith.constant 0 : index
    %263 = vector.load %arg4[%c2_107, %c0_108, %c0_109] : memref<4x32x32xf32, #tpu.memory_space<vmem>>, vector<1x32x32xf32>
    %264 = vector.shape_cast %263 : vector<1x32x32xf32> to vector<32x32xf32>
    %c2_110 = arith.constant 2 : index
    %c0_111 = arith.constant 0 : index
    %265 = vector.load %arg5[%c2_110, %c0_111] : memref<4x32xf32, #tpu.memory_space<vmem>>, vector<1x32xf32>
    %c2_112 = arith.constant 2 : index
    %c0_113 = arith.constant 0 : index
    %c0_114 = arith.constant 0 : index
    %266 = vector.load %arg6[%c2_112, %c0_113, %c0_114] : memref<4x32x64xf32, #tpu.memory_space<vmem>>, vector<1x32x64xf32>
    %267 = vector.shape_cast %266 : vector<1x32x64xf32> to vector<32x64xf32>
    %c2_115 = arith.constant 2 : index
    %c0_116 = arith.constant 0 : index
    %268 = vector.load %arg7[%c2_115, %c0_116] : memref<4x64xf32, #tpu.memory_space<vmem>>, vector<1x64xf32>
    %c2_117 = arith.constant 2 : index
    %c0_118 = arith.constant 0 : index
    %c0_119 = arith.constant 0 : index
    %269 = vector.load %arg8[%c2_117, %c0_118, %c0_119] : memref<4x32x32xf32, #tpu.memory_space<vmem>>, vector<1x32x32xf32>
    %270 = vector.shape_cast %269 : vector<1x32x32xf32> to vector<32x32xf32>
    %c9 = arith.constant 9 : index
    %c0_120 = arith.constant 0 : index
    %271 = vector.load %arg9[%c9, %c0_120] : memref<18x32xf32, #tpu.memory_space<vmem>>, vector<1x32xf32>
    %cst_121 = arith.constant dense<0.000000e+00> : vector<32x32xf32>
    %272 = tpu.matmul %262, %264, %cst_121 {dimension_numbers = #tpu.dot_dimension_numbers<[1], [0], [0], [1], [0, 0, 1, 1], [], []>} : vector<32x32xf32>, vector<32x32xf32>, vector<32x32xf32> -> vector<32x32xf32>
    %273 = vector.broadcast %265 : vector<1x32xf32> to vector<32x32xf32>
    %274 = arith.addf %272, %273 : vector<32x32xf32>
    %cst_122 = arith.constant dense<0.000000e+00> : vector<32x64xf32>
    %275 = tpu.matmul %262, %267, %cst_122 {dimension_numbers = #tpu.dot_dimension_numbers<[1], [0], [0], [1], [0, 0, 1, 1], [], []>} : vector<32x32xf32>, vector<32x64xf32>, vector<32x64xf32> -> vector<32x64xf32>
    %276 = vector.broadcast %268 : vector<1x64xf32> to vector<32x64xf32>
    %277 = arith.addf %275, %276 : vector<32x64xf32>
    %278 = vector.extract_strided_slice %274 {offsets = [0, 0], sizes = [32, 8], strides = [1, 1]} : vector<32x32xf32> to vector<32x8xf32>
    %279 = vector.extract_strided_slice %277 {offsets = [0, 0], sizes = [32, 8], strides = [1, 1]} : vector<32x64xf32> to vector<32x8xf32>
    %280 = vector.extract_strided_slice %277 {offsets = [0, 32], sizes = [32, 8], strides = [1, 1]} : vector<32x64xf32> to vector<32x8xf32>
    %cst_123 = arith.constant dense<0.000000e+00> : vector<32x32xf32>
    %281 = tpu.matmul %278, %279, %cst_123 {dimension_numbers = #tpu.dot_dimension_numbers<[1], [1], [0], [0], [0, 0, 1, 0], [], []>} : vector<32x8xf32>, vector<32x8xf32>, vector<32x32xf32> -> vector<32x32xf32>
    %282 = arith.addf %281, %0 : vector<32x32xf32>
    %cst_124 = arith.constant dense<0xFF800000> : vector<32xf32>
    %283 = vector.multi_reduction <maximumf>, %282, %cst_124 [1] : vector<32x32xf32> to vector<32xf32>
    %284 = vector.shape_cast %283 : vector<32xf32> to vector<32x1xf32>
    %285 = vector.broadcast %284 : vector<32x1xf32> to vector<32x32xf32>
    %286 = arith.subf %282, %285 : vector<32x32xf32>
    %287 = math.exp %286 : vector<32x32xf32>
    %cst_125 = arith.constant dense<0.000000e+00> : vector<32xf32>
    %288 = vector.multi_reduction <add>, %287, %cst_125 [1] : vector<32x32xf32> to vector<32xf32>
    %289 = vector.shape_cast %288 : vector<32xf32> to vector<32x1xf32>
    %290 = tpu.reciprocal %289 {approx = true} : vector<32x1xf32> -> vector<32x1xf32>
    %291 = vector.broadcast %290 : vector<32x1xf32> to vector<32x32xf32>
    %292 = arith.mulf %287, %291 : vector<32x32xf32>
    %cst_126 = arith.constant dense<0.000000e+00> : vector<32x8xf32>
    %293 = tpu.matmul %292, %280, %cst_126 {dimension_numbers = #tpu.dot_dimension_numbers<[1], [0], [0], [1], [0, 0, 1, 1], [], []>} : vector<32x32xf32>, vector<32x8xf32>, vector<32x8xf32> -> vector<32x8xf32>
    %294 = vector.extract_strided_slice %274 {offsets = [0, 8], sizes = [32, 8], strides = [1, 1]} : vector<32x32xf32> to vector<32x8xf32>
    %295 = vector.extract_strided_slice %277 {offsets = [0, 8], sizes = [32, 8], strides = [1, 1]} : vector<32x64xf32> to vector<32x8xf32>
    %296 = vector.extract_strided_slice %277 {offsets = [0, 40], sizes = [32, 8], strides = [1, 1]} : vector<32x64xf32> to vector<32x8xf32>
    %cst_127 = arith.constant dense<0.000000e+00> : vector<32x32xf32>
    %297 = tpu.matmul %294, %295, %cst_127 {dimension_numbers = #tpu.dot_dimension_numbers<[1], [1], [0], [0], [0, 0, 1, 0], [], []>} : vector<32x8xf32>, vector<32x8xf32>, vector<32x32xf32> -> vector<32x32xf32>
    %298 = arith.addf %297, %0 : vector<32x32xf32>
    %cst_128 = arith.constant dense<0xFF800000> : vector<32xf32>
    %299 = vector.multi_reduction <maximumf>, %298, %cst_128 [1] : vector<32x32xf32> to vector<32xf32>
    %300 = vector.shape_cast %299 : vector<32xf32> to vector<32x1xf32>
    %301 = vector.broadcast %300 : vector<32x1xf32> to vector<32x32xf32>
    %302 = arith.subf %298, %301 : vector<32x32xf32>
    %303 = math.exp %302 : vector<32x32xf32>
    %cst_129 = arith.constant dense<0.000000e+00> : vector<32xf32>
    %304 = vector.multi_reduction <add>, %303, %cst_129 [1] : vector<32x32xf32> to vector<32xf32>
    %305 = vector.shape_cast %304 : vector<32xf32> to vector<32x1xf32>
    %306 = tpu.reciprocal %305 {approx = true} : vector<32x1xf32> -> vector<32x1xf32>
    %307 = vector.broadcast %306 : vector<32x1xf32> to vector<32x32xf32>
    %308 = arith.mulf %303, %307 : vector<32x32xf32>
    %cst_130 = arith.constant dense<0.000000e+00> : vector<32x8xf32>
    %309 = tpu.matmul %308, %296, %cst_130 {dimension_numbers = #tpu.dot_dimension_numbers<[1], [0], [0], [1], [0, 0, 1, 1], [], []>} : vector<32x32xf32>, vector<32x8xf32>, vector<32x8xf32> -> vector<32x8xf32>
    %310 = vector.extract_strided_slice %274 {offsets = [0, 16], sizes = [32, 8], strides = [1, 1]} : vector<32x32xf32> to vector<32x8xf32>
    %311 = vector.extract_strided_slice %277 {offsets = [0, 16], sizes = [32, 8], strides = [1, 1]} : vector<32x64xf32> to vector<32x8xf32>
    %312 = vector.extract_strided_slice %277 {offsets = [0, 48], sizes = [32, 8], strides = [1, 1]} : vector<32x64xf32> to vector<32x8xf32>
    %cst_131 = arith.constant dense<0.000000e+00> : vector<32x32xf32>
    %313 = tpu.matmul %310, %311, %cst_131 {dimension_numbers = #tpu.dot_dimension_numbers<[1], [1], [0], [0], [0, 0, 1, 0], [], []>} : vector<32x8xf32>, vector<32x8xf32>, vector<32x32xf32> -> vector<32x32xf32>
    %314 = arith.addf %313, %0 : vector<32x32xf32>
    %cst_132 = arith.constant dense<0xFF800000> : vector<32xf32>
    %315 = vector.multi_reduction <maximumf>, %314, %cst_132 [1] : vector<32x32xf32> to vector<32xf32>
    %316 = vector.shape_cast %315 : vector<32xf32> to vector<32x1xf32>
    %317 = vector.broadcast %316 : vector<32x1xf32> to vector<32x32xf32>
    %318 = arith.subf %314, %317 : vector<32x32xf32>
    %319 = math.exp %318 : vector<32x32xf32>
    %cst_133 = arith.constant dense<0.000000e+00> : vector<32xf32>
    %320 = vector.multi_reduction <add>, %319, %cst_133 [1] : vector<32x32xf32> to vector<32xf32>
    %321 = vector.shape_cast %320 : vector<32xf32> to vector<32x1xf32>
    %322 = tpu.reciprocal %321 {approx = true} : vector<32x1xf32> -> vector<32x1xf32>
    %323 = vector.broadcast %322 : vector<32x1xf32> to vector<32x32xf32>
    %324 = arith.mulf %319, %323 : vector<32x32xf32>
    %cst_134 = arith.constant dense<0.000000e+00> : vector<32x8xf32>
    %325 = tpu.matmul %324, %312, %cst_134 {dimension_numbers = #tpu.dot_dimension_numbers<[1], [0], [0], [1], [0, 0, 1, 1], [], []>} : vector<32x32xf32>, vector<32x8xf32>, vector<32x8xf32> -> vector<32x8xf32>
    %326 = vector.extract_strided_slice %274 {offsets = [0, 24], sizes = [32, 8], strides = [1, 1]} : vector<32x32xf32> to vector<32x8xf32>
    %327 = vector.extract_strided_slice %277 {offsets = [0, 24], sizes = [32, 8], strides = [1, 1]} : vector<32x64xf32> to vector<32x8xf32>
    %328 = vector.extract_strided_slice %277 {offsets = [0, 56], sizes = [32, 8], strides = [1, 1]} : vector<32x64xf32> to vector<32x8xf32>
    %cst_135 = arith.constant dense<0.000000e+00> : vector<32x32xf32>
    %329 = tpu.matmul %326, %327, %cst_135 {dimension_numbers = #tpu.dot_dimension_numbers<[1], [1], [0], [0], [0, 0, 1, 0], [], []>} : vector<32x8xf32>, vector<32x8xf32>, vector<32x32xf32> -> vector<32x32xf32>
    %330 = arith.addf %329, %0 : vector<32x32xf32>
    %cst_136 = arith.constant dense<0xFF800000> : vector<32xf32>
    %331 = vector.multi_reduction <maximumf>, %330, %cst_136 [1] : vector<32x32xf32> to vector<32xf32>
    %332 = vector.shape_cast %331 : vector<32xf32> to vector<32x1xf32>
    %333 = vector.broadcast %332 : vector<32x1xf32> to vector<32x32xf32>
    %334 = arith.subf %330, %333 : vector<32x32xf32>
    %335 = math.exp %334 : vector<32x32xf32>
    %cst_137 = arith.constant dense<0.000000e+00> : vector<32xf32>
    %336 = vector.multi_reduction <add>, %335, %cst_137 [1] : vector<32x32xf32> to vector<32xf32>
    %337 = vector.shape_cast %336 : vector<32xf32> to vector<32x1xf32>
    %338 = tpu.reciprocal %337 {approx = true} : vector<32x1xf32> -> vector<32x1xf32>
    %339 = vector.broadcast %338 : vector<32x1xf32> to vector<32x32xf32>
    %340 = arith.mulf %335, %339 : vector<32x32xf32>
    %cst_138 = arith.constant dense<0.000000e+00> : vector<32x8xf32>
    %341 = tpu.matmul %340, %328, %cst_138 {dimension_numbers = #tpu.dot_dimension_numbers<[1], [0], [0], [1], [0, 0, 1, 1], [], []>} : vector<32x32xf32>, vector<32x8xf32>, vector<32x8xf32> -> vector<32x8xf32>
    %342 = tpu.concatenate %293, %309, %325, %341 in 1 : vector<32x8xf32>, vector<32x8xf32>, vector<32x8xf32>, vector<32x8xf32> -> vector<32x32xf32>
    %cst_139 = arith.constant dense<0.000000e+00> : vector<32x32xf32>
    %343 = tpu.matmul %342, %270, %cst_139 {dimension_numbers = #tpu.dot_dimension_numbers<[1], [0], [0], [1], [0, 0, 1, 1], [], []>} : vector<32x32xf32>, vector<32x32xf32>, vector<32x32xf32> -> vector<32x32xf32>
    %344 = vector.broadcast %271 : vector<1x32xf32> to vector<32x32xf32>
    %345 = arith.addf %343, %344 : vector<32x32xf32>
    %346 = arith.addf %262, %345 : vector<32x32xf32>
    %c11 = arith.constant 11 : index
    %c0_140 = arith.constant 0 : index
    %347 = vector.load %arg9[%c11, %c0_140] : memref<18x32xf32, #tpu.memory_space<vmem>>, vector<1x32xf32>
    %c12 = arith.constant 12 : index
    %c0_141 = arith.constant 0 : index
    %348 = vector.load %arg9[%c12, %c0_141] : memref<18x32xf32, #tpu.memory_space<vmem>>, vector<1x32xf32>
    %cst_142 = arith.constant dense<0.000000e+00> : vector<32xf32>
    %349 = vector.multi_reduction <add>, %346, %cst_142 [1] : vector<32x32xf32> to vector<32xf32>
    %350 = vector.shape_cast %349 : vector<32xf32> to vector<32x1xf32>
    %cst_143 = arith.constant 3.200000e+01 : f32
    %351 = vector.broadcast %cst_143 : f32 to vector<32x1xf32>
    %352 = arith.divf %350, %351 : vector<32x1xf32>
    %353 = vector.broadcast %352 : vector<32x1xf32> to vector<32x32xf32>
    %354 = arith.subf %346, %353 : vector<32x32xf32>
    %355 = arith.mulf %354, %354 : vector<32x32xf32>
    %cst_144 = arith.constant dense<0.000000e+00> : vector<32xf32>
    %356 = vector.multi_reduction <add>, %355, %cst_144 [1] : vector<32x32xf32> to vector<32xf32>
    %357 = vector.shape_cast %356 : vector<32xf32> to vector<32x1xf32>
    %cst_145 = arith.constant 3.200000e+01 : f32
    %358 = vector.broadcast %cst_145 : f32 to vector<32x1xf32>
    %359 = arith.divf %357, %358 : vector<32x1xf32>
    %360 = vector.broadcast %352 : vector<32x1xf32> to vector<32x32xf32>
    %361 = arith.subf %346, %360 : vector<32x32xf32>
    %cst_146 = arith.constant 9.99999974E-6 : f32
    %362 = vector.broadcast %cst_146 : f32 to vector<32x1xf32>
    %363 = arith.addf %359, %362 : vector<32x1xf32>
    %364 = math.rsqrt %363 : vector<32x1xf32>
    %365 = vector.broadcast %364 : vector<32x1xf32> to vector<32x32xf32>
    %366 = arith.mulf %361, %365 : vector<32x32xf32>
    %367 = vector.broadcast %347 : vector<1x32xf32> to vector<32x32xf32>
    %368 = arith.mulf %366, %367 : vector<32x32xf32>
    %369 = vector.broadcast %348 : vector<1x32xf32> to vector<32x32xf32>
    %370 = arith.addf %368, %369 : vector<32x32xf32>
    %c3_147 = arith.constant 3 : index
    %c0_148 = arith.constant 0 : index
    %c0_149 = arith.constant 0 : index
    %371 = vector.load %arg4[%c3_147, %c0_148, %c0_149] : memref<4x32x32xf32, #tpu.memory_space<vmem>>, vector<1x32x32xf32>
    %372 = vector.shape_cast %371 : vector<1x32x32xf32> to vector<32x32xf32>
    %c3_150 = arith.constant 3 : index
    %c0_151 = arith.constant 0 : index
    %373 = vector.load %arg5[%c3_150, %c0_151] : memref<4x32xf32, #tpu.memory_space<vmem>>, vector<1x32xf32>
    %c3_152 = arith.constant 3 : index
    %c0_153 = arith.constant 0 : index
    %c0_154 = arith.constant 0 : index
    %374 = vector.load %arg6[%c3_152, %c0_153, %c0_154] : memref<4x32x64xf32, #tpu.memory_space<vmem>>, vector<1x32x64xf32>
    %375 = vector.shape_cast %374 : vector<1x32x64xf32> to vector<32x64xf32>
    %c3_155 = arith.constant 3 : index
    %c0_156 = arith.constant 0 : index
    %376 = vector.load %arg7[%c3_155, %c0_156] : memref<4x64xf32, #tpu.memory_space<vmem>>, vector<1x64xf32>
    %c3_157 = arith.constant 3 : index
    %c0_158 = arith.constant 0 : index
    %c0_159 = arith.constant 0 : index
    %377 = vector.load %arg8[%c3_157, %c0_158, %c0_159] : memref<4x32x32xf32, #tpu.memory_space<vmem>>, vector<1x32x32xf32>
    %378 = vector.shape_cast %377 : vector<1x32x32xf32> to vector<32x32xf32>
    %c10 = arith.constant 10 : index
    %c0_160 = arith.constant 0 : index
    %379 = vector.load %arg9[%c10, %c0_160] : memref<18x32xf32, #tpu.memory_space<vmem>>, vector<1x32xf32>
    %cst_161 = arith.constant dense<0.000000e+00> : vector<32x32xf32>
    %380 = tpu.matmul %370, %372, %cst_161 {dimension_numbers = #tpu.dot_dimension_numbers<[1], [0], [0], [1], [0, 0, 1, 1], [], []>} : vector<32x32xf32>, vector<32x32xf32>, vector<32x32xf32> -> vector<32x32xf32>
    %381 = vector.broadcast %373 : vector<1x32xf32> to vector<32x32xf32>
    %382 = arith.addf %380, %381 : vector<32x32xf32>
    %cst_162 = arith.constant dense<0.000000e+00> : vector<32x64xf32>
    %383 = tpu.matmul %262, %375, %cst_162 {dimension_numbers = #tpu.dot_dimension_numbers<[1], [0], [0], [1], [0, 0, 1, 1], [], []>} : vector<32x32xf32>, vector<32x64xf32>, vector<32x64xf32> -> vector<32x64xf32>
    %384 = vector.broadcast %376 : vector<1x64xf32> to vector<32x64xf32>
    %385 = arith.addf %383, %384 : vector<32x64xf32>
    %386 = vector.extract_strided_slice %382 {offsets = [0, 0], sizes = [32, 8], strides = [1, 1]} : vector<32x32xf32> to vector<32x8xf32>
    %387 = vector.extract_strided_slice %385 {offsets = [0, 0], sizes = [32, 8], strides = [1, 1]} : vector<32x64xf32> to vector<32x8xf32>
    %388 = vector.extract_strided_slice %385 {offsets = [0, 32], sizes = [32, 8], strides = [1, 1]} : vector<32x64xf32> to vector<32x8xf32>
    %cst_163 = arith.constant dense<0.000000e+00> : vector<32x32xf32>
    %389 = tpu.matmul %386, %387, %cst_163 {dimension_numbers = #tpu.dot_dimension_numbers<[1], [1], [0], [0], [0, 0, 1, 0], [], []>} : vector<32x8xf32>, vector<32x8xf32>, vector<32x32xf32> -> vector<32x32xf32>
    %390 = arith.addf %389, %0 : vector<32x32xf32>
    %cst_164 = arith.constant dense<0xFF800000> : vector<32xf32>
    %391 = vector.multi_reduction <maximumf>, %390, %cst_164 [1] : vector<32x32xf32> to vector<32xf32>
    %392 = vector.shape_cast %391 : vector<32xf32> to vector<32x1xf32>
    %393 = vector.broadcast %392 : vector<32x1xf32> to vector<32x32xf32>
    %394 = arith.subf %390, %393 : vector<32x32xf32>
    %395 = math.exp %394 : vector<32x32xf32>
    %cst_165 = arith.constant dense<0.000000e+00> : vector<32xf32>
    %396 = vector.multi_reduction <add>, %395, %cst_165 [1] : vector<32x32xf32> to vector<32xf32>
    %397 = vector.shape_cast %396 : vector<32xf32> to vector<32x1xf32>
    %398 = tpu.reciprocal %397 {approx = true} : vector<32x1xf32> -> vector<32x1xf32>
    %399 = vector.broadcast %398 : vector<32x1xf32> to vector<32x32xf32>
    %400 = arith.mulf %395, %399 : vector<32x32xf32>
    %cst_166 = arith.constant dense<0.000000e+00> : vector<32x8xf32>
    %401 = tpu.matmul %400, %388, %cst_166 {dimension_numbers = #tpu.dot_dimension_numbers<[1], [0], [0], [1], [0, 0, 1, 1], [], []>} : vector<32x32xf32>, vector<32x8xf32>, vector<32x8xf32> -> vector<32x8xf32>
    %402 = vector.extract_strided_slice %382 {offsets = [0, 8], sizes = [32, 8], strides = [1, 1]} : vector<32x32xf32> to vector<32x8xf32>
    %403 = vector.extract_strided_slice %385 {offsets = [0, 8], sizes = [32, 8], strides = [1, 1]} : vector<32x64xf32> to vector<32x8xf32>
    %404 = vector.extract_strided_slice %385 {offsets = [0, 40], sizes = [32, 8], strides = [1, 1]} : vector<32x64xf32> to vector<32x8xf32>
    %cst_167 = arith.constant dense<0.000000e+00> : vector<32x32xf32>
    %405 = tpu.matmul %402, %403, %cst_167 {dimension_numbers = #tpu.dot_dimension_numbers<[1], [1], [0], [0], [0, 0, 1, 0], [], []>} : vector<32x8xf32>, vector<32x8xf32>, vector<32x32xf32> -> vector<32x32xf32>
    %406 = arith.addf %405, %0 : vector<32x32xf32>
    %cst_168 = arith.constant dense<0xFF800000> : vector<32xf32>
    %407 = vector.multi_reduction <maximumf>, %406, %cst_168 [1] : vector<32x32xf32> to vector<32xf32>
    %408 = vector.shape_cast %407 : vector<32xf32> to vector<32x1xf32>
    %409 = vector.broadcast %408 : vector<32x1xf32> to vector<32x32xf32>
    %410 = arith.subf %406, %409 : vector<32x32xf32>
    %411 = math.exp %410 : vector<32x32xf32>
    %cst_169 = arith.constant dense<0.000000e+00> : vector<32xf32>
    %412 = vector.multi_reduction <add>, %411, %cst_169 [1] : vector<32x32xf32> to vector<32xf32>
    %413 = vector.shape_cast %412 : vector<32xf32> to vector<32x1xf32>
    %414 = tpu.reciprocal %413 {approx = true} : vector<32x1xf32> -> vector<32x1xf32>
    %415 = vector.broadcast %414 : vector<32x1xf32> to vector<32x32xf32>
    %416 = arith.mulf %411, %415 : vector<32x32xf32>
    %cst_170 = arith.constant dense<0.000000e+00> : vector<32x8xf32>
    %417 = tpu.matmul %416, %404, %cst_170 {dimension_numbers = #tpu.dot_dimension_numbers<[1], [0], [0], [1], [0, 0, 1, 1], [], []>} : vector<32x32xf32>, vector<32x8xf32>, vector<32x8xf32> -> vector<32x8xf32>
    %418 = vector.extract_strided_slice %382 {offsets = [0, 16], sizes = [32, 8], strides = [1, 1]} : vector<32x32xf32> to vector<32x8xf32>
    %419 = vector.extract_strided_slice %385 {offsets = [0, 16], sizes = [32, 8], strides = [1, 1]} : vector<32x64xf32> to vector<32x8xf32>
    %420 = vector.extract_strided_slice %385 {offsets = [0, 48], sizes = [32, 8], strides = [1, 1]} : vector<32x64xf32> to vector<32x8xf32>
    %cst_171 = arith.constant dense<0.000000e+00> : vector<32x32xf32>
    %421 = tpu.matmul %418, %419, %cst_171 {dimension_numbers = #tpu.dot_dimension_numbers<[1], [1], [0], [0], [0, 0, 1, 0], [], []>} : vector<32x8xf32>, vector<32x8xf32>, vector<32x32xf32> -> vector<32x32xf32>
    %422 = arith.addf %421, %0 : vector<32x32xf32>
    %cst_172 = arith.constant dense<0xFF800000> : vector<32xf32>
    %423 = vector.multi_reduction <maximumf>, %422, %cst_172 [1] : vector<32x32xf32> to vector<32xf32>
    %424 = vector.shape_cast %423 : vector<32xf32> to vector<32x1xf32>
    %425 = vector.broadcast %424 : vector<32x1xf32> to vector<32x32xf32>
    %426 = arith.subf %422, %425 : vector<32x32xf32>
    %427 = math.exp %426 : vector<32x32xf32>
    %cst_173 = arith.constant dense<0.000000e+00> : vector<32xf32>
    %428 = vector.multi_reduction <add>, %427, %cst_173 [1] : vector<32x32xf32> to vector<32xf32>
    %429 = vector.shape_cast %428 : vector<32xf32> to vector<32x1xf32>
    %430 = tpu.reciprocal %429 {approx = true} : vector<32x1xf32> -> vector<32x1xf32>
    %431 = vector.broadcast %430 : vector<32x1xf32> to vector<32x32xf32>
    %432 = arith.mulf %427, %431 : vector<32x32xf32>
    %cst_174 = arith.constant dense<0.000000e+00> : vector<32x8xf32>
    %433 = tpu.matmul %432, %420, %cst_174 {dimension_numbers = #tpu.dot_dimension_numbers<[1], [0], [0], [1], [0, 0, 1, 1], [], []>} : vector<32x32xf32>, vector<32x8xf32>, vector<32x8xf32> -> vector<32x8xf32>
    %434 = vector.extract_strided_slice %382 {offsets = [0, 24], sizes = [32, 8], strides = [1, 1]} : vector<32x32xf32> to vector<32x8xf32>
    %435 = vector.extract_strided_slice %385 {offsets = [0, 24], sizes = [32, 8], strides = [1, 1]} : vector<32x64xf32> to vector<32x8xf32>
    %436 = vector.extract_strided_slice %385 {offsets = [0, 56], sizes = [32, 8], strides = [1, 1]} : vector<32x64xf32> to vector<32x8xf32>
    %cst_175 = arith.constant dense<0.000000e+00> : vector<32x32xf32>
    %437 = tpu.matmul %434, %435, %cst_175 {dimension_numbers = #tpu.dot_dimension_numbers<[1], [1], [0], [0], [0, 0, 1, 0], [], []>} : vector<32x8xf32>, vector<32x8xf32>, vector<32x32xf32> -> vector<32x32xf32>
    %438 = arith.addf %437, %0 : vector<32x32xf32>
    %cst_176 = arith.constant dense<0xFF800000> : vector<32xf32>
    %439 = vector.multi_reduction <maximumf>, %438, %cst_176 [1] : vector<32x32xf32> to vector<32xf32>
    %440 = vector.shape_cast %439 : vector<32xf32> to vector<32x1xf32>
    %441 = vector.broadcast %440 : vector<32x1xf32> to vector<32x32xf32>
    %442 = arith.subf %438, %441 : vector<32x32xf32>
    %443 = math.exp %442 : vector<32x32xf32>
    %cst_177 = arith.constant dense<0.000000e+00> : vector<32xf32>
    %444 = vector.multi_reduction <add>, %443, %cst_177 [1] : vector<32x32xf32> to vector<32xf32>
    %445 = vector.shape_cast %444 : vector<32xf32> to vector<32x1xf32>
    %446 = tpu.reciprocal %445 {approx = true} : vector<32x1xf32> -> vector<32x1xf32>
    %447 = vector.broadcast %446 : vector<32x1xf32> to vector<32x32xf32>
    %448 = arith.mulf %443, %447 : vector<32x32xf32>
    %cst_178 = arith.constant dense<0.000000e+00> : vector<32x8xf32>
    %449 = tpu.matmul %448, %436, %cst_178 {dimension_numbers = #tpu.dot_dimension_numbers<[1], [0], [0], [1], [0, 0, 1, 1], [], []>} : vector<32x32xf32>, vector<32x8xf32>, vector<32x8xf32> -> vector<32x8xf32>
    %450 = tpu.concatenate %401, %417, %433, %449 in 1 : vector<32x8xf32>, vector<32x8xf32>, vector<32x8xf32>, vector<32x8xf32> -> vector<32x32xf32>
    %cst_179 = arith.constant dense<0.000000e+00> : vector<32x32xf32>
    %451 = tpu.matmul %450, %378, %cst_179 {dimension_numbers = #tpu.dot_dimension_numbers<[1], [0], [0], [1], [0, 0, 1, 1], [], []>} : vector<32x32xf32>, vector<32x32xf32>, vector<32x32xf32> -> vector<32x32xf32>
    %452 = vector.broadcast %379 : vector<1x32xf32> to vector<32x32xf32>
    %453 = arith.addf %451, %452 : vector<32x32xf32>
    %454 = arith.addf %370, %453 : vector<32x32xf32>
    %c13 = arith.constant 13 : index
    %c0_180 = arith.constant 0 : index
    %455 = vector.load %arg9[%c13, %c0_180] : memref<18x32xf32, #tpu.memory_space<vmem>>, vector<1x32xf32>
    %c14 = arith.constant 14 : index
    %c0_181 = arith.constant 0 : index
    %456 = vector.load %arg9[%c14, %c0_181] : memref<18x32xf32, #tpu.memory_space<vmem>>, vector<1x32xf32>
    %cst_182 = arith.constant dense<0.000000e+00> : vector<32xf32>
    %457 = vector.multi_reduction <add>, %454, %cst_182 [1] : vector<32x32xf32> to vector<32xf32>
    %458 = vector.shape_cast %457 : vector<32xf32> to vector<32x1xf32>
    %cst_183 = arith.constant 3.200000e+01 : f32
    %459 = vector.broadcast %cst_183 : f32 to vector<32x1xf32>
    %460 = arith.divf %458, %459 : vector<32x1xf32>
    %461 = vector.broadcast %460 : vector<32x1xf32> to vector<32x32xf32>
    %462 = arith.subf %454, %461 : vector<32x32xf32>
    %463 = arith.mulf %462, %462 : vector<32x32xf32>
    %cst_184 = arith.constant dense<0.000000e+00> : vector<32xf32>
    %464 = vector.multi_reduction <add>, %463, %cst_184 [1] : vector<32x32xf32> to vector<32xf32>
    %465 = vector.shape_cast %464 : vector<32xf32> to vector<32x1xf32>
    %cst_185 = arith.constant 3.200000e+01 : f32
    %466 = vector.broadcast %cst_185 : f32 to vector<32x1xf32>
    %467 = arith.divf %465, %466 : vector<32x1xf32>
    %468 = vector.broadcast %460 : vector<32x1xf32> to vector<32x32xf32>
    %469 = arith.subf %454, %468 : vector<32x32xf32>
    %cst_186 = arith.constant 9.99999974E-6 : f32
    %470 = vector.broadcast %cst_186 : f32 to vector<32x1xf32>
    %471 = arith.addf %467, %470 : vector<32x1xf32>
    %472 = math.rsqrt %471 : vector<32x1xf32>
    %473 = vector.broadcast %472 : vector<32x1xf32> to vector<32x32xf32>
    %474 = arith.mulf %469, %473 : vector<32x32xf32>
    %475 = vector.broadcast %455 : vector<1x32xf32> to vector<32x32xf32>
    %476 = arith.mulf %474, %475 : vector<32x32xf32>
    %477 = vector.broadcast %456 : vector<1x32xf32> to vector<32x32xf32>
    %478 = arith.addf %476, %477 : vector<32x32xf32>
    %c1_187 = arith.constant 1 : index
    %c0_188 = arith.constant 0 : index
    %c0_189 = arith.constant 0 : index
    %479 = vector.load %arg11[%c1_187, %c0_188, %c0_189] : memref<2x32x2048xbf16, #tpu.memory_space<vmem>>, vector<1x32x2048xbf16>
    %480 = vector.shape_cast %479 : vector<1x32x2048xbf16> to vector<32x2048xbf16>
    %c1_190 = arith.constant 1 : index
    %c0_191 = arith.constant 0 : index
    %481 = vector.load %arg10[%c1_190, %c0_191] : memref<2x2048xf32, #tpu.memory_space<vmem>>, vector<1x2048xf32>
    %c1_192 = arith.constant 1 : index
    %c0_193 = arith.constant 0 : index
    %c0_194 = arith.constant 0 : index
    %482 = vector.load %arg12[%c1_192, %c0_193, %c0_194] : memref<2x2048x32xbf16, #tpu.memory_space<vmem>>, vector<1x2048x32xbf16>
    %483 = vector.shape_cast %482 : vector<1x2048x32xbf16> to vector<2048x32xbf16>
    %c17 = arith.constant 17 : index
    %c0_195 = arith.constant 0 : index
    %484 = vector.load %arg9[%c17, %c0_195] : memref<18x32xf32, #tpu.memory_space<vmem>>, vector<1x32xf32>
    %485 = arith.truncf %478 : vector<32x32xf32> to vector<32x32xbf16>
    %cst_196 = arith.constant dense<0.000000e+00> : vector<32x2048xf32>
    %486 = tpu.matmul %485, %480, %cst_196 {dimension_numbers = #tpu.dot_dimension_numbers<[1], [0], [0], [1], [0, 0, 1, 1], [], []>} : vector<32x32xbf16>, vector<32x2048xbf16>, vector<32x2048xf32> -> vector<32x2048xf32>
    %487 = vector.broadcast %481 : vector<1x2048xf32> to vector<32x2048xf32>
    %488 = arith.addf %486, %487 : vector<32x2048xf32>
    %cst_197 = arith.constant 0.000000e+00 : f32
    %489 = vector.broadcast %cst_197 : f32 to vector<32x2048xf32>
    %490 = arith.maximumf %488, %489 : vector<32x2048xf32>
    %491 = arith.truncf %490 : vector<32x2048xf32> to vector<32x2048xbf16>
    %cst_198 = arith.constant dense<0.000000e+00> : vector<32x32xf32>
    %492 = tpu.matmul %491, %483, %cst_198 {dimension_numbers = #tpu.dot_dimension_numbers<[1], [0], [0], [1], [0, 0, 1, 1], [], []>} : vector<32x2048xbf16>, vector<2048x32xbf16>, vector<32x32xf32> -> vector<32x32xf32>
    %493 = vector.broadcast %484 : vector<1x32xf32> to vector<32x32xf32>
    %494 = arith.addf %492, %493 : vector<32x32xf32>
    %495 = arith.addf %478, %494 : vector<32x32xf32>
    %c15 = arith.constant 15 : index
    %c0_199 = arith.constant 0 : index
    %496 = vector.load %arg9[%c15, %c0_199] : memref<18x32xf32, #tpu.memory_space<vmem>>, vector<1x32xf32>
    %c16 = arith.constant 16 : index
    %c0_200 = arith.constant 0 : index
    %497 = vector.load %arg9[%c16, %c0_200] : memref<18x32xf32, #tpu.memory_space<vmem>>, vector<1x32xf32>
    %cst_201 = arith.constant dense<0.000000e+00> : vector<32xf32>
    %498 = vector.multi_reduction <add>, %495, %cst_201 [1] : vector<32x32xf32> to vector<32xf32>
    %499 = vector.shape_cast %498 : vector<32xf32> to vector<32x1xf32>
    %cst_202 = arith.constant 3.200000e+01 : f32
    %500 = vector.broadcast %cst_202 : f32 to vector<32x1xf32>
    %501 = arith.divf %499, %500 : vector<32x1xf32>
    %502 = vector.broadcast %501 : vector<32x1xf32> to vector<32x32xf32>
    %503 = arith.subf %495, %502 : vector<32x32xf32>
    %504 = arith.mulf %503, %503 : vector<32x32xf32>
    %cst_203 = arith.constant dense<0.000000e+00> : vector<32xf32>
    %505 = vector.multi_reduction <add>, %504, %cst_203 [1] : vector<32x32xf32> to vector<32xf32>
    %506 = vector.shape_cast %505 : vector<32xf32> to vector<32x1xf32>
    %cst_204 = arith.constant 3.200000e+01 : f32
    %507 = vector.broadcast %cst_204 : f32 to vector<32x1xf32>
    %508 = arith.divf %506, %507 : vector<32x1xf32>
    %509 = vector.broadcast %501 : vector<32x1xf32> to vector<32x32xf32>
    %510 = arith.subf %495, %509 : vector<32x32xf32>
    %cst_205 = arith.constant 9.99999974E-6 : f32
    %511 = vector.broadcast %cst_205 : f32 to vector<32x1xf32>
    %512 = arith.addf %508, %511 : vector<32x1xf32>
    %513 = math.rsqrt %512 : vector<32x1xf32>
    %514 = vector.broadcast %513 : vector<32x1xf32> to vector<32x32xf32>
    %515 = arith.mulf %510, %514 : vector<32x32xf32>
    %516 = vector.broadcast %496 : vector<1x32xf32> to vector<32x32xf32>
    %517 = arith.mulf %515, %516 : vector<32x32xf32>
    %518 = vector.broadcast %497 : vector<1x32xf32> to vector<32x32xf32>
    %519 = arith.addf %517, %518 : vector<32x32xf32>
    %c0_206 = arith.constant 0 : index
    %c0_207 = arith.constant 0 : index
    %520 = vector.load %arg13[%c0_206, %c0_207] : memref<32x128xf32, #tpu.memory_space<vmem>>, vector<32x128xf32>
    %cst_208 = arith.constant dense<0.000000e+00> : vector<32x128xf32>
    %521 = tpu.matmul %519, %520, %cst_208 {dimension_numbers = #tpu.dot_dimension_numbers<[1], [0], [0], [1], [0, 0, 1, 1], [], []>} : vector<32x32xf32>, vector<32x128xf32>, vector<32x128xf32> -> vector<32x128xf32>
    %c0_209 = arith.constant 0 : index
    %c0_210 = arith.constant 0 : index
    %522 = vector.load %arg14[%c0_209, %c0_210] : memref<1x128xf32, #tpu.memory_space<vmem>>, vector<1x128xf32>
    %523 = vector.broadcast %522 : vector<1x128xf32> to vector<32x128xf32>
    %524 = arith.addf %521, %523 : vector<32x128xf32>
    %c0_211 = arith.constant 0 : index
    %c0_212 = arith.constant 0 : index
    %525 = vector.load %arg15[%c0_211, %c0_212] : memref<32x128xf32, #tpu.memory_space<vmem>>, vector<32x128xf32>
    tpu.vector_store %arg15[%c0_211, %c0_212], %524 {strides = array<i32>} : memref<32x128xf32, #tpu.memory_space<vmem>>, vector<32x128xf32>,
    return
  }
}

</mosaic_0001>

<bundles_post_ra>
// kernel: tpu_custom_call.1
= control target key start
LH: loop header
LB: loop body
LE: loop exit
PB: predicated region body
PF: predicated region fallthrough
CT: control target
= control target key end

     0   :  { %vm66_vm0 = vcmask 130048   ;;  %s14362_s0 = inlined_call_operand.vmem [shape: f32[32,16], index: 0, kind: input, shape index: {}]   ;;  %s14363_s1 = inlined_call_operand.vmem [shape: f32[16,32], index: 1, kind: input, shape index: {}]   ;;  %s14364_s2 = inlined_call_operand.vmem [shape: f32[32,32], index: 2, kind: input, shape index: {}]   ;;  %s14365_s3 = inlined_call_operand.vmem [shape: f32[32,32], index: 3, kind: input, shape index: {}]   ;;  %s14366_s4 = inlined_call_operand.vmem [shape: f32[4,32,32], index: 4, kind: input, shape index: {}]   ;;  %s14367_s5 = inlined_call_operand.vmem [shape: f32[4,32], index: 5, kind: input, shape index: {}]   ;;  %s14368_s6 = inlined_call_operand.vmem [shape: f32[4,32,64], index: 6, kind: input, shape index: {}]   ;;  %s14369_s7 = inlined_call_operand.vmem [shape: f32[4,64], index: 7, kind: input, shape index: {}]   ;;  %s14370_s8 = inlined_call_operand.vmem [shape: f32[4,32,32], index: 8, kind: input, shape index: {}]   ;;  %s14371_s9 = inlined_call_operand.vmem [shape: f32[18,32], index: 9, kind: input, shape index: {}]   ;;  %s14372_s10 = inlined_call_operand.vmem [shape: f32[2,2048], index: 10, kind: input, shape index: {}]   ;;  %s14373_s11 = inlined_call_operand.vmem [shape: bf16[2,32,2048], index: 11, kind: input, shape index: {}]   ;;  %s14374_s12 = inlined_call_operand.vmem [shape: bf16[2,2048,32], index: 12, kind: input, shape index: {}]   ;;  %s14375_s13 = inlined_call_operand.vmem [shape: f32[32,128], index: 13, kind: input, shape index: {}]   ;;  %s14376_s14 = inlined_call_operand.vmem [shape: f32[1,128], index: 14, kind: input, shape index: {}]   ;;  %s14377_s15 = inlined_call_operand.hbm [shape: f32[32,128], index: 15, kind: output, shape index: {}]  }
   0x1   :  { %v61_v0 = vld [vmem:[%s14363_s1 + $0x8] sm:$0xff]  ;;  %v60_v1 = vld [vmem:[%s14363_s1] sm:$0xff]  ;;  %v58_v2 = vld [vmem:[%s14362_s0 + $0x10] sm:$0xff] }
   0x2   :  { %10250 = vmatpush.msra.mxu3 %v61_v0  ;;  %93 = vmatpush.msra.mxu0 %v61_v0  ;;  %v56_v3 = vld [vmem:[%s14362_s0] sm:$0xff]  ;;  %v111_v4 = vld [vmem:[%s14366_s4 + $0x18] sm:$0xff]  ;;  %v110_v5 = vld [vmem:[%s14366_s4 + $0x10] sm:$0xff] }
   0x3   :  { %149 = vmatpush.msra.mxu1 %v111_v4  ;;  %10252 = vmatpush.msra.mxu2 %v111_v4  ;;  %v59_v6 = vld [vmem:[%s14362_s0 + $0x18] sm:$0xff]  ;;  %v57_v7 = vld [vmem:[%s14362_s0 + $0x8] sm:$0xff] }
   0x4   :  { %10251 = vmatpush.msra.mxu3 %v60_v1  ;;  %94 = vmatpush.msra.mxu0 %v60_v1 }
   0x5   :  { %8013 = vmatmul.msk.f32.vlgmr.msra.gmra.mxu3 %vm66_vm0, %v58_v2  ;;  %8011 = vmatmul.msk.f32.vlgmr.msra.gmra.mxu0 %vm66_vm0, %v56_v3 }
   0x6   :  { %150 = vmatpush.msra.mxu1 %v110_v5  ;;  %10253 = vmatpush.msra.mxu2 %v110_v5 }
   0xd   :  { %8014 = vmatmul.msk.f32.gmra.mxu3 %vm66_vm0, %v59_v6  ;;  %8012 = vmatmul.msk.f32.gmra.mxu0 %vm66_vm0, %v57_v7 }
   0xe   :  { %20 = vsyncpa [#allocation3], 0  ;;  %v109_v8 = vld [vmem:[%s14366_s4 + $0x8] sm:$0xff]  ;;  %v108_v9 = vld [vmem:[%s14366_s4] sm:$0xff]  ;;  %vm124_vm1 = vcmask 261120   ;;  %s10800_s0 = smov 120  }
   0xf   :  { %151 = vmatpush.msra.mxu1 %v109_v8  ;;  %10254 = vmatpush.msra.mxu2 %v109_v8  ;;  %v116_v10 = vld [vmem:[%s14368_s6 + $0x18] sm:$0xff]  ;;  %v115_v11 = vld [vmem:[%s14368_s6 + $0x10] sm:$0xff]  ;;  %v114_v12 = vld [vmem:[%s14368_s6 + $0x8] sm:$0xff]  ;;  %vm196_vm2 = vcmask 64512   ;;  %s10801_s24 = smov 104   ;;  %s10802_s25 = smov 112  }
  0x10   :  { %v113_v13 = vld [vmem:[%s14368_s6] sm:$0xff]  ;;  %v64_v17 = vld [vmem:[%s14364_s2 + $0x10] sm:$0xff]  ;;  %v63_v19 = vld [vmem:[%s14364_s2 + $0x8] sm:$0xff]  ;;  %s10803_s26 = smov 88   ;;  %s10804_s27 = smov 96   ;;  %vm877_vm3 = vcmask 195584  }
  0x11   :  { %152 = vmatpush.msra.mxu1 %v108_v9  ;;  %10255 = vmatpush.msra.mxu2 %v108_v9  ;;  %v62_v14 = vld [vmem:[%s14364_s2] sm:$0xff]  ;;  %v65_v23 = vld [vmem:[%s14364_s2 + $0x18] sm:$0xff]  ;;  %v11056_v9 = vld [vmem:[%s14365_s3 + $0x8] sm:$0xff]  ;;  %s10805_s30 = smov 72   ;;  %s10806_s16 = smov 80  }
  0x12   :  { %v10429_v26 = vld [vmem:[%s14367_s5] ss:$0 sm:$0xff]  ;;  %s14380_s19 = smov 8   ;;  %s14382_s20 = smov 16  }
  0x13   :  { %179 = vmatpush.msrb.mxu2 %v116_v10  ;;  %v10430_v35 = vld [vmem:[%s14369_s7] ss:$0 sm:$0xff]  ;;  %s14378_s21 = smov 24   ;;  %s10811_s17 = smov [#allocation2]  }
  0x14   :  { %v11043_v3 = vld [vmem:[%s14365_s3] sm:$0xff]  ;;  %s7999_s22 = sshll.u32 %s14377_s15, 4  ;;  %s8000_s22 = int_to_ptr.hbm [resolvable:$true] %s7999_s22 }
  0x15   :  { %180 = vmatpush.msrb.mxu2 %v115_v11 }
  0x17   :  { %181 = vmatpush.msrb.mxu2 %v114_v12 }
  0x19   :  { %182 = vmatpush.msrb.mxu2 %v113_v13 }
  0x82   :  { %v96_v15 = vpop.f32.mrf.mxu0 }
  0x83   :  { %v10942_v16 = vadd.f32 %v96_v15, %v62_v14  ;;  %v8082_v15 = vld [vmem:[%s14368_s6 + $0x38] sm:$0xff] }
  0x85   :  { %8015 = vmatmul.msk.f32.vlgmr.msra.gmra.mxu1 %vm124_vm1, %v10942_v16 }
  0x88   :  { %v102_v18 = vpop.f32.mrf.mxu3 }
  0x89   :  { %v10952_v20 = vadd.f32 %v102_v18, %v64_v17  ;;  %v8081_v17 = vld [vmem:[%s14368_s6 + $0x30] sm:$0xff] }
  0x8a   :  { %v99_v21 = vpop.f32.mrf.mxu0  ;;  %v11075_v18 = vld [vmem:[%s14365_s3 + $0x10] sm:$0xff] }
  0x8b   :  { %8017 = vmatmul.msk.f32.vlgmr.msra.gmra.mxu2 %vm124_vm1, %v10952_v20  ;;  %v10956_v22 = vadd.f32 %v99_v21, %v63_v19  ;;  %v8080_v19 = vld [vmem:[%s14368_s6 + $0x28] sm:$0xff] }
  0x8d   :  { %8016 = vmatmul.msk.f32.gmra.mxu1 %vm124_vm1, %v10956_v22 }
  0x90   :  { %v105_v24 = vpop.f32.mrf.mxu3 }
  0x91   :  { %v10963_v25 = vadd.f32 %v105_v24, %v65_v23  ;;  %v8079_v24 = vld [vmem:[%s14368_s6 + $0x20] sm:$0xff] }
  0x93   :  { %8018 = vmatmul.msk.f32.gmra.mxu2 %vm124_vm1, %v10963_v25 }
  0x9b   :  { %8019 = vmatmul.msk.f32.vlgmr.msrb.gmra.mxu2 %vm124_vm1, %v10942_v16 }
  0xa3   :  { %8020 = vmatmul.msk.f32.gmra.mxu2 %vm124_vm1, %v10956_v22 }
  0xab   :  { %8021 = vmatmul.msk.f32.gmra.mxu2 %vm124_vm1, %v10952_v20 }
  0xb3   :  { %8022 = vmatmul.msk.f32.gmra.mxu2 %vm124_vm1, %v10963_v25 }
 0x102   :  { %v154_v27 = vpop.f32.mrf.mxu1 }
 0x103   :  { %v155_v28 = vadd.f32 %v10429_v26, %v154_v27 }
 0x105   :  { %347 = vrot.lane.b32.xlu2 %v155_v28, %s10800_s0 }
 0x10a   :  { %v157_v29 = vpop.f32.mrf.mxu1 }
 0x10b   :  { %v158_v30 = vadd.f32 %v10429_v26, %v157_v29  ;;  %v11093_v29 = vld [vmem:[%s14365_s3 + $0x18] sm:$0xff] }
 0x10d   :  { %349 = vrot.lane.b32.xlu2 %v158_v30, %s10800_s0 }
 0x10e   :  { %v160_v31 = vpop.f32.mrf.mxu2 }
 0x10f   :  { %v161_v45 = vadd.f32 %v10429_v26, %v160_v31 }
 0x116   :  { %v163_v32 = vpop.f32.mrf.mxu2 }
 0x117   :  { %v164_v33 = vadd.f32 %v10429_v26, %v163_v32 }
 0x119   :  { %353 = vrot.lane.b32.xlu2 %v164_v33, %s10800_s0 }
 0x11e   :  { %v184_v34 = vpop.f32.mrf.mxu2 }
 0x11f   :  { %v185_v37 = vadd.f32 %v10430_v35, %v184_v34 }
 0x126   :  { %v187_v36 = vpop.f32.mrf.mxu2 }
 0x127   :  { %v188_v38 = vadd.f32 %v10430_v35, %v187_v36 }
 0x129   :  { %357 = vrot.lane.b32.xlu1 %v188_v38, %s10800_s0  ;;  %v10985_v39 = vpack.i.bf16 %v185_v37, %v188_v38 }
 0x12e   :  { %v190_v40 = vpop.f32.mrf.mxu2 }
 0x12f   :  { %v191_v42 = vadd.f32 %v10430_v35, %v190_v40 }
 0x131   :  { %355 = vrot.lane.b32.xlu1 %v185_v37, %s10800_s0 }
 0x136   :  { %v193_v41 = vpop.f32.mrf.mxu2 }
 0x137   :  { %v194_v43 = vadd.f32 %v10430_v35, %v193_v41 }
 0x139   :  { %361 = vrot.lane.b32.xlu0 %v194_v43, %s10800_s0  ;;  %8023 = vmatpush.xpose.msk.msrb.mxu3 %vm196_vm2, %v194_v43  ;;  %v10990_v44 = vpack.i.bf16 %v191_v42, %v194_v43 }
 0x13a   :  { %675 = vrot.lane.b32.xlu1 %v191_v42, %s10801_s24  ;;  %677 = vrot.lane.b32.xlu2 %v194_v43, %s10801_s24 }
 0x13d   :  { %8024 = vmatpush.xpose.msk.msrb.mxu3 %vm196_vm2, %v191_v42 }
 0x141   :  { %359 = vrot.lane.b32.xlu0 %v191_v42, %s10800_s0  ;;  %8025 = vmatpush.xpose.msk.msrb.mxu3 %vm196_vm2, %v188_v38 }
 0x142   :  { %519 = vrot.lane.b32.xlu1 %v194_v43, %s10802_s25  ;;  %513 = vrot.lane.b32.xlu2 %v185_v37, %s10802_s25 }
 0x145   :  { %8026 = vmatpush.xpose.msk.msrb.mxu3 %vm196_vm2, %v185_v37 }
 0x148   :  { %8027 = vmatmul.msk.f32.vlgmr.msrb.gmra.mxu3 %vm196_vm2, %v155_v28 }
 0x149   :  { %351 = vrot.lane.b32.xlu0 %v161_v45, %s10800_s0 }
 0x14a   :  { %673 = vrot.lane.b32.xlu1 %v188_v38, %s10801_s24  ;;  %663 = vrot.lane.b32.xlu2 %v155_v28, %s10801_s24 }
 0x150   :  { %8028 = vmatmul.msk.f32.gmra.mxu3 %vm196_vm2, %v158_v30 }
 0x151   :  { %517 = vrot.lane.b32.xlu0 %v191_v42, %s10802_s25 }
 0x152   :  { %505 = vrot.lane.b32.xlu1 %v155_v28, %s10802_s25  ;;  %509 = vrot.lane.b32.xlu2 %v161_v45, %s10802_s25 }
 0x158   :  { %8029 = vmatmul.msk.f32.gmra.mxu3 %vm196_vm2, %v161_v45 }
 0x159   :  { %515 = vrot.lane.b32.xlu0 %v188_v38, %s10802_s25 }
 0x15a   :  { %665 = vrot.lane.b32.xlu1 %v158_v30, %s10801_s24  ;;  %669 = vrot.lane.b32.xlu2 %v164_v33, %s10801_s24 }
 0x15f   :  { %v348_v46 = vpop.permute.xlu2 %347 }
 0x160   :  { %8030 = vmatmul.msk.f32.gmra.mxu3 %vm196_vm2, %v164_v33 }
 0x161   :  { %671 = vrot.lane.b32.xlu0 %v185_v37, %s10801_s24 }
 0x162   :  { %511 = vrot.lane.b32.xlu1 %v164_v33, %s10802_s25  ;;  %10280 = vrot.lane.b32.xlu2 %v10990_v44, %s10803_s26 }
 0x167   :  { %v350_v47 = vpop.permute.xlu2 %349 }
 0x169   :  { %507 = vrot.lane.b32.xlu0 %v158_v30, %s10802_s25 }
 0x16a   :  { %10275 = vrot.lane.b32.xlu1 %v10985_v39, %s10804_s27 }
 0x171   :  { %667 = vrot.lane.b32.xlu0 %v161_v45, %s10801_s24 }
 0x172   :  { %10285 = vrot.lane.b32.xlu1 %v10990_v44, %s10804_s27 }
 0x173   :  { %v354_v48 = vpop.permute.xlu2 %353 }
 0x179   :  { %10270 = vrot.lane.b32.xlu0 %v10985_v39, %s10803_s26 }
 0x194   :  { %v678_v49 = vpop.permute.xlu2 %677 }
 0x19b   :  { %v358_v50 = vpop.permute.xlu1 %357 }
 0x19c   :  { %v514_v51 = vpop.permute.xlu2 %513 }
 0x1a3   :  { %v356_v52 = vpop.permute.xlu1 %355 }
 0x1a4   :  { %v664_v53 = vpop.permute.xlu2 %663 }
 0x1ab   :  { %v362_v54 = vpop.permute.xlu0 %361 }
 0x1ac   :  { %v676_v55 = vpop.permute.xlu1 %675  ;;  %v11025_v56 = vpop.permute.xlu2 %509  ;;  %8035 = vmatpush.xpose.msk.msrb.mxu1 %vm196_vm2, %v362_v54 }
 0x1b3   :  { %v360_v57 = vpop.permute.xlu0 %359 }
 0x1b4   :  { %v520_v58 = vpop.permute.xlu1 %519  ;;  %v11028_v59 = vpop.permute.xlu2 %669  ;;  %8036 = vmatpush.xpose.msk.msrb.mxu1 %vm196_vm2, %v360_v57 }
 0x1b5   :  { %8047 = vmatpush.xpose.msk.msra.mxu3 %vm196_vm2, %v520_v58 }
 0x1b8   :  { %8037 = vmatpush.xpose.msk.msrb.mxu1 %vm196_vm2, %v358_v50 }
 0x1bb   :  { %v352_v60 = vpop.permute.xlu0 %351 }
 0x1bc   :  { %v674_v61 = vpop.permute.xlu1 %673  ;;  %v10281_v62 = vpop.permute.xlu2 %10280  ;;  %8038 = vmatpush.xpose.msk.msrb.mxu1 %vm196_vm2, %v356_v52 }
 0x1bd   :  { %v10282_v63 = vunpack.i.l.bf16 %v10281_v62  ;;  %v10283_v0 = vunpack.i.h.bf16 %v10281_v62 }
 0x1bf   :  { %488 = vmatpush.msra.mxu2 %v10282_v63  ;;  %8039 = vmatmul.msk.f32.vlgmr.msrb.gmra.mxu1 %vm196_vm2, %v348_v46 }
 0x1c0   :  { %8059 = vmatpush.xpose.msk.msra.mxu1 %vm196_vm2, %v678_v49 }
 0x1c1   :  { %489 = vmatpush.msra.mxu2 %v10283_v0 }
 0x1c3   :  { %v518_v1 = vpop.permute.xlu0 %517 }
 0x1c4   :  { %8060 = vmatpush.xpose.msk.msra.mxu1 %vm196_vm2, %v676_v55  ;;  %v506_v2 = vpop.permute.xlu1 %505  ;;  %8048 = vmatpush.xpose.msk.msra.mxu3 %vm196_vm2, %v518_v1 }
 0x1c7   :  { %8040 = vmatmul.msk.f32.gmra.mxu1 %vm196_vm2, %v350_v47 }
 0x1c8   :  { %8061 = vmatpush.xpose.msk.msra.mxu1 %vm196_vm2, %v674_v61 }
 0x1cb   :  { %v516_v4 = vpop.permute.xlu0 %515  ;;  %v238_v5 = vpop.f32.mrf.mxu3 }
 0x1cc   :  { %v666_v6 = vpop.permute.xlu1 %665  ;;  %v11046_v7 = vadd.f32 %v238_v5, %v11043_v3  ;;  %8049 = vmatpush.xpose.msk.msra.mxu3 %vm196_vm2, %v516_v4 }
 0x1ce   :  { %v250_v8 = vsel %vm124_vm1, %v11046_v7, -inf }
 0x1cf   :  { %8041 = vmatmul.msk.f32.gmra.mxu1 %vm196_vm2, %v352_v60  ;;  %251 = vmax.xlane.f32.xlu1 %v250_v8 }
 0x1d0   :  { %8050 = vmatpush.xpose.msk.msra.mxu3 %vm196_vm2, %v514_v51 }
 0x1d3   :  { %v672_v10 = vpop.permute.xlu0 %671  ;;  %v241_v11 = vpop.f32.mrf.mxu3  ;;  %8051 = vmatmul.msk.f32.vlgmr.msra.gmra.mxu3 %vm196_vm2, %v506_v2 }
 0x1d4   :  { %v512_v12 = vpop.permute.xlu1 %511  ;;  %v11060_v13 = vadd.f32 %v241_v11, %v11056_v9  ;;  %8062 = vmatpush.xpose.msk.msra.mxu1 %vm196_vm2, %v672_v10 }
 0x1d6   :  { %v253_v14 = vsel %vm124_vm1, %v11060_v13, -inf }
 0x1d7   :  { %8042 = vmatmul.msk.f32.gmra.mxu1 %vm196_vm2, %v354_v48  ;;  %254 = vmax.xlane.f32.xlu2 %v253_v14 }
 0x1d8   :  { %1108 = vmatpush.msrb.mxu1 %v8082_v15 }
 0x1da   :  { %1109 = vmatpush.msrb.mxu1 %v8081_v17 }
 0x1db   :  { %v508_v21 = vpop.permute.xlu0 %507  ;;  %v244_v23 = vpop.f32.mrf.mxu3 }
 0x1dc   :  { %v10276_v26 = vpop.permute.xlu1 %10275  ;;  %v11084_v27 = vadd.f32 %v244_v23, %v11075_v18  ;;  %8052 = vmatmul.msk.f32.gmra.mxu3 %vm196_vm2, %v508_v21  ;;  %1110 = vmatpush.msrb.mxu1 %v8080_v19 }
 0x1dd   :  { %v10277_v37 = vunpack.i.l.bf16 %v10276_v26  ;;  %v10278_v40 = vunpack.i.h.bf16 %v10276_v26 }
 0x1de   :  { %v256_v28 = vsel %vm124_vm1, %v11084_v27, -inf  ;;  %1111 = vmatpush.msrb.mxu1 %v8079_v24 }
 0x1df   :  { %8063 = vmatmul.msk.f32.vlgmr.msra.gmra.mxu1 %vm196_vm2, %v664_v53  ;;  %257 = vmax.xlane.f32.xlu1 %v256_v28 }
 0x1e3   :  { %v668_v30 = vpop.permute.xlu0 %667  ;;  %v247_v31 = vpop.f32.mrf.mxu3 }
 0x1e4   :  { %v10286_v32 = vpop.permute.xlu1 %10285  ;;  %v11096_v33 = vadd.f32 %v247_v31, %v11093_v29  ;;  %8053 = vmatmul.msk.f32.gmra.mxu3 %vm196_vm2, %v11025_v56 }
 0x1e5   :  { %v10287_v34 = vunpack.i.l.bf16 %v10286_v32  ;;  %v10288_v36 = vunpack.i.h.bf16 %v10286_v32 }
 0x1e6   :  { %v259_v35 = vsel %vm124_vm1, %v11096_v33, -inf }
 0x1e7   :  { %330 = vmatpush.msrb.mxu0 %v10287_v34  ;;  %8064 = vmatmul.msk.f32.gmra.mxu1 %vm196_vm2, %v666_v6 }
 0x1e8   :  { %260 = vmax.xlane.f32.xlu0 %v259_v35 }
 0x1e9   :  { %331 = vmatpush.msrb.mxu0 %v10288_v36 }
 0x1eb   :  { %332 = vmatpush.msrb.mxu0 %v10277_v37  ;;  %v10271_v38 = vpop.permute.xlu0 %10270 }
 0x1ec   :  { %v10272_v41 = vunpack.i.l.bf16 %v10271_v38  ;;  %8054 = vmatmul.msk.f32.gmra.mxu3 %vm196_vm2, %v512_v12  ;;  %v10273_v42 = vunpack.i.h.bf16 %v10271_v38 }
 0x1ed   :  { %333 = vmatpush.msrb.mxu0 %v10278_v40 }
 0x1ee   :  { %490 = vmatpush.msra.mxu2 %v10272_v41 }
 0x1ef   :  { %8065 = vmatmul.msk.f32.gmra.mxu1 %vm196_vm2, %v668_v30 }
 0x1f0   :  { %491 = vmatpush.msra.mxu2 %v10273_v42 }
 0x1f7   :  { %8066 = vmatmul.msk.f32.gmra.mxu1 %vm196_vm2, %v11028_v59 }
 0x1ff   :  { %8091 = vmatmul.msk.f32.vlgmr.msrb.gmra.mxu1 %vm124_vm1, %v10942_v16 }
 0x207   :  { %8092 = vmatmul.msk.f32.gmra.mxu1 %vm124_vm1, %v10956_v22 }
 0x20f   :  { %8093 = vmatmul.msk.f32.gmra.mxu1 %vm124_vm1, %v10952_v20 }
 0x217   :  { %8094 = vmatmul.msk.f32.gmra.mxu1 %vm124_vm1, %v10963_v25 }
 0x23c   :  { %v396_v43 = vpop.f32.mrf.mxu1 }
 0x23d   :  { %v11116_v45 = vadd.f32 %v396_v43, %v11043_v3 }
 0x23f   :  { %v408_v46 = vsel %vm124_vm1, %v11116_v45, -inf }
 0x240   :  { %409 = vmax.xlane.f32.xlu0 %v408_v46 }
 0x242   :  { %v252_v51 = vpop.xlane.xlu1 %251 }
 0x243   :  { %v262_v54 = vsub.f32 %v11046_v7, %v252_v51 }
 0x244   :  { %v399_v47 = vpop.f32.mrf.mxu1 }
 0x245   :  { %v266_v56 = vmul.f32 1.442695, %v262_v54  ;;  %v11132_v57 = vadd.f32 %v399_v47, %v11056_v9 }
 0x247   :  { %10456 = vpow2.f32 %v266_v56  ;;  %v411_v60 = vsel %vm124_vm1, %v11132_v57, -inf }
 0x24a   :  { %v255_v63 = vpop.xlane.xlu2 %254 }
 0x24b   :  { %v263_v5 = vsub.f32 %v11060_v13, %v255_v63 }
 0x24c   :  { %v402_v48 = vpop.f32.mrf.mxu1 }
 0x24d   :  { %v11121_v49 = vadd.f32 %v402_v48, %v11075_v18  ;;  %v11144_v2 = vpop.eup %10456  ;;  %v268_v10 = vmul.f32 1.442695, %v263_v5 }
 0x24e   :  { %v274_v8 = vsel %vm124_vm1, %v11144_v2, 0.0 }
 0x24f   :  { %v414_v50 = vsel %vm124_vm1, %v11121_v49, -inf  ;;  %10458 = vpow2.f32 %v268_v10 }
 0x250   :  { %415 = vmax.xlane.f32.xlu0 %v414_v50 }
 0x252   :  { %v258_v1 = vpop.xlane.xlu1 %257 }
 0x253   :  { %v264_v6 = vsub.f32 %v11084_v27, %v258_v1 }
 0x254   :  { %v405_v61 = vpop.f32.mrf.mxu1 }
 0x255   :  { %v11142_v0 = vadd.f32 %v405_v61, %v11093_v29  ;;  %v270_v11 = vmul.f32 1.442695, %v264_v6  ;;  %v11162_v21 = vpop.eup %10458 }
 0x256   :  { %v554_v52 = vpop.f32.mrf.mxu3  ;;  %v277_v28 = vsel %vm124_vm1, %v11162_v21, 0.0 }
 0x257   :  { %v11126_v53 = vadd.f32 %v554_v52, %v11043_v3  ;;  %v417_v7 = vsel %vm124_vm1, %v11142_v0, -inf  ;;  %10460 = vpow2.f32 %v270_v11 }
 0x259   :  { %v566_v55 = vsel %vm124_vm1, %v11126_v53, -inf }
 0x25a   :  { %567 = vmax.xlane.f32.xlu2 %v566_v55 }
 0x25b   :  { %v261_v23 = vpop.xlane.xlu0 %260 }
 0x25c   :  { %v712_v12 = vpop.f32.mrf.mxu1  ;;  %v265_v27 = vsub.f32 %v11096_v33, %v261_v23 }
 0x25d   :  { %v11164_v24 = vpop.eup %10460  ;;  %v11172_v32 = vadd.f32 %v712_v12, %v11043_v3 }
 0x25e   :  { %v280_v30 = vsel %vm124_vm1, %v11164_v24, 0.0  ;;  %v272_v31 = vmul.f32 1.442695, %v265_v27 }
 0x25f   :  { %v557_v58 = vpop.f32.mrf.mxu3  ;;  %v724_v33 = vsel %vm124_vm1, %v11172_v32, -inf }
 0x260   :  { %v11135_v59 = vadd.f32 %v557_v58, %v11056_v9  ;;  %10462 = vpow2.f32 %v272_v31 }
 0x262   :  { %412 = vmax.xlane.f32.xlu2 %v411_v60  ;;  %v569_v62 = vsel %vm124_vm1, %v11135_v59, -inf }
 0x263   :  { %570 = vmax.xlane.f32.xlu1 %v569_v62 }
 0x264   :  { %v715_v26 = vpop.f32.mrf.mxu1 }
 0x265   :  { %v11175_v34 = vadd.f32 %v715_v26, %v11056_v9 }
 0x266   :  { %v11183_v37 = vpop.eup %10462 }
 0x267   :  { %v560_v4 = vpop.f32.mrf.mxu3  ;;  %v727_v36 = vsel %vm124_vm1, %v11175_v34, -inf  ;;  %v283_v3 = vsel %vm124_vm1, %v11183_v37, 0.0 }
 0x268   :  { %v11153_v14 = vadd.f32 %v560_v4, %v11075_v18 }
 0x26a   :  { %418 = vmax.xlane.f32.xlu2 %v417_v7  ;;  %v572_v19 = vsel %vm124_vm1, %v11153_v14, -inf }
 0x26b   :  { %275 = vadd.xlane.f32.xlu1 %v274_v8 }
 0x26c   :  { %v718_v35 = vpop.f32.mrf.mxu1 }
 0x26d   :  { %v11195_v41 = vadd.f32 %v718_v35, %v11075_v18 }
 0x26f   :  { %v563_v15 = vpop.f32.mrf.mxu3  ;;  %v730_v42 = vsel %vm124_vm1, %v11195_v41, -inf }
 0x270   :  { %v11156_v13 = vadd.f32 %v563_v15, %v11093_v29 }
 0x272   :  { %v575_v17 = vsel %vm124_vm1, %v11156_v13, -inf }
 0x273   :  { %576 = vmax.xlane.f32.xlu0 %v575_v17  ;;  %573 = vmax.xlane.f32.xlu1 %v572_v19 }
 0x274   :  { %v721_v9 = vpop.f32.mrf.mxu1 }
 0x275   :  { %v11188_v38 = vadd.f32 %v721_v9, %v11093_v29 }
 0x277   :  { %v733_v40 = vsel %vm124_vm1, %v11188_v38, -inf }
 0x27b   :  { %278 = vadd.xlane.f32.xlu1 %v277_v28  ;;  %281 = vadd.xlane.f32.xlu0 %v280_v30 }
 0x282   :  { %10295 = vrot.lane.b32.xlu2 %v10985_v39, %s10805_s30 }
 0x283   :  { %725 = vmax.xlane.f32.xlu1 %v724_v33  ;;  %728 = vmax.xlane.f32.xlu0 %v727_v36 }
 0x28b   :  { %284 = vadd.xlane.f32.xlu0 %v283_v3 }
 0x293   :  { %734 = vmax.xlane.f32.xlu0 %v733_v40 }
 0x29c   :  { %10290 = vrot.lane.b32.xlu1 %v10990_v44, %s10805_s30 }
 0x2ab   :  { %731 = vmax.xlane.f32.xlu2 %v730_v42 }
 0x2b3   :  { %v410_v43 = vpop.xlane.xlu0 %409 }
 0x2b4   :  { %v420_v46 = vsub.f32 %v11116_v45, %v410_v43 }
 0x2b6   :  { %v424_v47 = vmul.f32 1.442695, %v420_v46 }
 0x2b8   :  { %10464 = vpow2.f32 %v424_v47 }
 0x2be   :  { %v11200_v29 = vpop.eup %10464 }
 0x2bf   :  { %v432_v48 = vsel %vm124_vm1, %v11200_v29, 0.0 }
 0x2c0   :  { %433 = vadd.xlane.f32.xlu0 %v432_v48 }
 0x2c3   :  { %v416_v18 = vpop.xlane.xlu0 %415 }
 0x2c4   :  { %v422_v45 = vsub.f32 %v11121_v49, %v416_v18 }
 0x2c6   :  { %v428_v56 = vmul.f32 1.442695, %v422_v45 }
 0x2cd   :  { %v568_v50 = vpop.xlane.xlu2 %567 }
 0x2d4   :  { %10300 = vrot.lane.b32.xlu0 %v10990_v44, %s10806_s16 }
 0x2d5   :  { %v413_v51 = vpop.xlane.xlu2 %412 }
 0x2d6   :  { %v421_v52 = vsub.f32 %v11132_v57, %v413_v51  ;;  %v571_v54 = vpop.xlane.xlu1 %570 }
 0x2d8   :  { %v426_v55 = vmul.f32 1.442695, %v421_v52 }
 0x2da   :  { %10466 = vpow2.f32 %v426_v55 }
 0x2dd   :  { %v419_v58 = vpop.xlane.xlu2 %418 }
 0x2de   :  { %v276_v60 = vpop.xlane.xlu1 %275  ;;  %v423_v62 = vsub.f32 %v11142_v0, %v419_v58  ;;  %v578_v0 = vsub.f32 %v11126_v53, %v568_v50 }
 0x2df   :  { %10468 = vrcp.f32 %v276_v60 }
 0x2e0   :  { %v11208_v61 = vpop.eup %10466  ;;  %10470 = vpow2.f32 %v428_v56  ;;  %v430_v63 = vmul.f32 1.442695, %v423_v62  ;;  %v582_v11 = vmul.f32 1.442695, %v578_v0 }
 0x2e1   :  { %v435_v44 = vsel %vm124_vm1, %v11208_v61, 0.0 }
 0x2e2   :  { %436 = vadd.xlane.f32.xlu2 %v435_v44  ;;  %10472 = vpow2.f32 %v430_v63  ;;  %v1113_v44 = vpop.f32.mrf.mxu1 }
 0x2e5   :  { %v10469_v57 = vpop.eup %10468 }
 0x2e6   :  { %v11213_v1 = vpop.eup %10470  ;;  %v577_v49 = vpop.xlane.xlu0 %576  ;;  %v290_v5 = vmul.f32 %v10469_v57, %v11144_v2  ;;  %v579_v2 = vsub.f32 %v11135_v59, %v571_v54 }
 0x2e7   :  { %v574_v4 = vpop.xlane.xlu1 %573  ;;  %v438_v6 = vsel %vm124_vm1, %v11213_v1, 0.0  ;;  %v581_v3 = vsub.f32 %v11156_v13, %v577_v49 }
 0x2e8   :  { %8031 = vmatmul.msk.f32.vlgmr.msrb.gmra.mxu0 %vm124_vm1, %v290_v5  ;;  %v11220_v7 = vpop.eup %10472  ;;  %v584_v17 = vmul.f32 1.442695, %v579_v2  ;;  %v580_v28 = vsub.f32 %v11153_v14, %v574_v4 }
 0x2e9   :  { %v441_v12 = vsel %vm124_vm1, %v11220_v7, 0.0  ;;  %v588_v43 = vmul.f32 1.442695, %v581_v3 }
 0x2ea   :  { %439 = vadd.xlane.f32.xlu2 %v438_v6  ;;  %v586_v33 = vmul.f32 1.442695, %v580_v28  ;;  %v1116_v63 = vpop.f32.mrf.mxu1 }
 0x2ee   :  { %v282_v8 = vpop.xlane.xlu0 %281 }
 0x2ef   :  { %v279_v10 = vpop.xlane.xlu1 %278 }
 0x2f0   :  { %10474 = vrcp.f32 %v279_v10  ;;  %v10431_v10 = vld [vmem:[%s14369_s7 + $0x1] ss:$0 sm:$0xff] }
 0x2f1   :  { %10476 = vpow2.f32 %v582_v11  ;;  %v11282_v2 = vadd.f32 %v10431_v10, %v1116_v63 }
 0x2f2   :  { %442 = vadd.xlane.f32.xlu2 %v441_v12  ;;  %10478 = vrcp.f32 %v282_v8  ;;  %v1119_v57 = vpop.f32.mrf.mxu1 }
 0x2f3   :  { %10480 = vpow2.f32 %v584_v17 }
 0x2f6   :  { %v10475_v15 = vpop.eup %10474  ;;  %v729_v19 = vpop.xlane.xlu0 %728 }
 0x2f7   :  { %v726_v23 = vpop.xlane.xlu1 %725  ;;  %v737_v53 = vsub.f32 %v11175_v34, %v729_v19  ;;  %v291_v27 = vmul.f32 %v10475_v15, %v11162_v21  ;;  %v11230_v59 = vpop.eup %10476  ;;  %v11288_v19 = vadd.f32 %v10431_v10, %v1113_v44 }
 0x2f8   :  { %v736_v26 = vsub.f32 %v11172_v32, %v726_v23  ;;  %v10479_v35 = vpop.eup %10478  ;;  %v590_v34 = vsel %vm124_vm1, %v11230_v59, 0.0 }
 0x2f9   :  { %v742_v30 = vmul.f32 1.442695, %v737_v53  ;;  %8032 = vmatmul.msk.f32.gmra.mxu0 %vm124_vm1, %v291_v27  ;;  %v292_v21 = vmul.f32 %v10479_v35, %v11164_v24  ;;  %v11235_v14 = vpop.eup %10480 }
 0x2fa   :  { %v740_v31 = vmul.f32 1.442695, %v736_v26  ;;  %v593_v46 = vsel %vm124_vm1, %v11235_v14, 0.0  ;;  %v1122_v0 = vpop.f32.mrf.mxu1 }
 0x2fb   :  { %10482 = vpow2.f32 %v742_v30  ;;  %v11271_v12 = vadd.f32 %v10431_v10, %v1122_v0 }
 0x2fc   :  { %10484 = vpow2.f32 %v740_v31 }
 0x2fe   :  { %591 = vadd.xlane.f32.xlu0 %v590_v34  ;;  %v285_v32 = vpop.xlane.xlu0 %284 }
 0x2ff   :  { %10486 = vrcp.f32 %v285_v32 }
 0x300   :  { %10488 = vpow2.f32 %v586_v33 }
 0x301   :  { %v11237_v36 = vpop.eup %10482  ;;  %8033 = vmatmul.msk.f32.gmra.mxu0 %vm124_vm1, %v292_v21  ;;  %10490 = vpow2.f32 %v588_v43 }
 0x302   :  { %v11241_v9 = vpop.eup %10484  ;;  %v751_v40 = vsel %vm124_vm1, %v11237_v36, 0.0 }
 0x303   :  { %752 = vadd.xlane.f32.xlu1 %v751_v40  ;;  %v748_v42 = vsel %vm124_vm1, %v11241_v9, 0.0 }
 0x304   :  { %749 = vadd.xlane.f32.xlu2 %v748_v42 }
 0x305   :  { %v10487_v24 = vpop.eup %10486 }
 0x306   :  { %v735_v47 = vpop.xlane.xlu0 %734  ;;  %594 = vadd.xlane.f32.xlu0 %v593_v46  ;;  %v293_v13 = vmul.f32 %v10487_v24, %v11183_v37  ;;  %v11250_v48 = vpop.eup %10488 }
 0x307   :  { %v739_v50 = vsub.f32 %v11188_v38, %v735_v47  ;;  %v596_v51 = vsel %vm124_vm1, %v11250_v48, 0.0  ;;  %v11256_v54 = vpop.eup %10490  ;;  %v10296_v37 = vpop.permute.xlu2 %10295 }
 0x308   :  { %v599_v58 = vsel %vm124_vm1, %v11256_v54, 0.0  ;;  %v10297_v60 = vunpack.i.l.bf16 %v10296_v37  ;;  %v10298_v62 = vunpack.i.h.bf16 %v10296_v37 }
 0x309   :  { %v746_v18 = vmul.f32 1.442695, %v739_v50  ;;  %8034 = vmatmul.msk.f32.gmra.mxu0 %vm124_vm1, %v293_v13 }
 0x30b   :  { %10492 = vpow2.f32 %v746_v18  ;;  %597 = vadd.xlane.f32.xlu1 %v596_v51 }
 0x30e   :  { %v10291_v52 = vpop.permute.xlu1 %10290 }
 0x30f   :  { %v10292_v45 = vunpack.i.l.bf16 %v10291_v52  ;;  %v10293_v56 = vunpack.i.h.bf16 %v10291_v52 }
 0x311   :  { %v11258_v55 = vpop.eup %10492  ;;  %804 = vmatpush.msrb.mxu2 %v10292_v45 }
 0x312   :  { %v757_v38 = vsel %vm124_vm1, %v11258_v55, 0.0 }
 0x313   :  { %758 = vadd.xlane.f32.xlu0 %v757_v38  ;;  %600 = vadd.xlane.f32.xlu1 %v599_v58 }
 0x314   :  { %805 = vmatpush.msrb.mxu2 %v10293_v56 }
 0x316   :  { %806 = vmatpush.msrb.mxu2 %v10297_v60 }
 0x318   :  { %807 = vmatpush.msrb.mxu2 %v10298_v62 }
 0x31c   :  { %10305 = vrot.lane.b32.xlu2 %v10985_v39, %s10806_s16  ;;  %v11276_v39 = vadd.f32 %v10431_v10, %v1119_v57 }
 0x31e   :  { %v732_v49 = vpop.xlane.xlu2 %731 }
 0x31f   :  { %v738_v4 = vsub.f32 %v11195_v41, %v732_v49 }
 0x321   :  { %v744_v6 = vmul.f32 1.442695, %v738_v4 }
 0x333   :  { %v434_v5 = vpop.xlane.xlu0 %433 }
 0x334   :  { %10494 = vrcp.f32 %v434_v5 }
 0x335   :  { %10496 = vpow2.f32 %v744_v6 }
 0x33a   :  { %v10495_v8 = vpop.eup %10494 }
 0x33b   :  { %v448_v11 = vmul.f32 %v10495_v8, %v11200_v29  ;;  %v11278_v41 = vpop.eup %10496 }
 0x33c   :  { %v754_v15 = vsel %vm124_vm1, %v11278_v41, 0.0 }
 0x33d   :  { %8043 = vmatmul.msk.f32.vlgmr.msra.gmra.mxu2 %vm124_vm1, %v448_v11 }
 0x33e   :  { %8095 = vmatpush.xpose.msk.msra.mxu2 %vm196_vm2, %v11271_v12 }
 0x342   :  { %8096 = vmatpush.xpose.msk.msra.mxu2 %vm196_vm2, %v11276_v39 }
 0x345   :  { %755 = vadd.xlane.f32.xlu2 %v754_v15  ;;  %v121_v15 = vld [vmem:[%s14370_s8 + $0x18] sm:$0xff] }
 0x346   :  { %8097 = vmatpush.xpose.msk.msra.mxu2 %vm196_vm2, %v11282_v2  ;;  %v10301_v29 = vpop.permute.xlu0 %10300  ;;  %907 = vmatpush.msrb.mxu3 %v121_v15 }
 0x347   :  { %v10302_v17 = vunpack.i.l.bf16 %v10301_v29  ;;  %v10303_v23 = vunpack.i.h.bf16 %v10301_v29  ;;  %v120_v29 = vld [vmem:[%s14370_s8 + $0x10] sm:$0xff] }
 0x348   :  { %908 = vmatpush.msrb.mxu3 %v120_v29 }
 0x349   :  { %646 = vmatpush.msra.mxu0 %v10302_v17  ;;  %v119_v17 = vld [vmem:[%s14370_s8 + $0x8] sm:$0xff] }
 0x34a   :  { %8098 = vmatpush.xpose.msk.msra.mxu2 %vm196_vm2, %v11288_v19  ;;  %909 = vmatpush.msrb.mxu3 %v119_v17 }
 0x34b   :  { %647 = vmatpush.msra.mxu0 %v10303_v23  ;;  %v118_v23 = vld [vmem:[%s14370_s8] sm:$0xff] }
 0x34c   :  { %910 = vmatpush.msrb.mxu3 %v118_v23 }
 0x355   :  { %v437_v53 = vpop.xlane.xlu2 %436 }
 0x356   :  { %10498 = vrcp.f32 %v437_v53 }
 0x35c   :  { %v10499_v26 = vpop.eup %10498 }
 0x35d   :  { %v440_v27 = vpop.xlane.xlu2 %439  ;;  %v449_v28 = vmul.f32 %v10499_v26, %v11208_v61 }
 0x35e   :  { %10500 = vrcp.f32 %v440_v27 }
 0x35f   :  { %8044 = vmatmul.msk.f32.gmra.mxu2 %vm124_vm1, %v449_v28 }
 0x364   :  { %v10501_v30 = vpop.eup %10500 }
 0x365   :  { %v443_v31 = vpop.xlane.xlu2 %442  ;;  %v450_v35 = vmul.f32 %v10501_v30, %v11213_v1 }
 0x366   :  { %10502 = vrcp.f32 %v443_v31 }
 0x367   :  { %8045 = vmatmul.msk.f32.gmra.mxu2 %vm124_vm1, %v450_v35 }
 0x36c   :  { %v10503_v33 = vpop.eup %10502 }
 0x36d   :  { %v451_v34 = vmul.f32 %v10503_v33, %v11220_v7 }
 0x36f   :  { %8046 = vmatmul.msk.f32.gmra.mxu2 %vm124_vm1, %v451_v34 }
 0x371   :  { %v592_v32 = vpop.xlane.xlu0 %591 }
 0x376   :  { %v753_v61 = vpop.xlane.xlu1 %752 }
 0x377   :  { %v750_v21 = vpop.xlane.xlu2 %749 }
 0x378   :  { %10504 = vrcp.f32 %v750_v21 }
 0x379   :  { %10506 = vrcp.f32 %v592_v32  ;;  %v595_v42 = vpop.xlane.xlu0 %594 }
 0x37a   :  { %10508 = vrcp.f32 %v753_v61 }
 0x37b   :  { %10510 = vrcp.f32 %v595_v42 }
 0x37e   :  { %v10505_v3 = vpop.eup %10504  ;;  %v598_v13 = vpop.xlane.xlu1 %597 }
 0x37f   :  { %v764_v40 = vmul.f32 %v10505_v3, %v11241_v9  ;;  %v10306_v24 = vpop.permute.xlu2 %10305  ;;  %v10507_v1 = vpop.eup %10506  ;;  %10512 = vrcp.f32 %v598_v13 }
 0x380   :  { %v10307_v43 = vunpack.i.l.bf16 %v10306_v24  ;;  %v10308_v46 = vunpack.i.h.bf16 %v10306_v24  ;;  %v606_v7 = vmul.f32 %v10507_v1, %v11230_v59  ;;  %v10509_v47 = vpop.eup %10508 }
 0x381   :  { %8067 = vmatmul.msk.f32.vlgmr.msrb.gmra.mxu2 %vm124_vm1, %v764_v40  ;;  %v765_v50 = vmul.f32 %v10509_v47, %v11237_v36  ;;  %v10511_v18 = vpop.eup %10510 }
 0x382   :  { %648 = vmatpush.msra.mxu0 %v10307_v43  ;;  %v607_v9 = vmul.f32 %v10511_v18, %v11235_v14 }
 0x384   :  { %649 = vmatpush.msra.mxu0 %v10308_v46 }
 0x385   :  { %8055 = vmatmul.msk.f32.vlgmr.msra.gmra.mxu0 %vm124_vm1, %v606_v7  ;;  %v10513_v52 = vpop.eup %10512 }
 0x386   :  { %v601_v51 = vpop.xlane.xlu1 %600  ;;  %v608_v59 = vmul.f32 %v10513_v52, %v11250_v48  ;;  %v759_v56 = vpop.xlane.xlu0 %758 }
 0x387   :  { %10514 = vrcp.f32 %v601_v51 }
 0x389   :  { %8068 = vmatmul.msk.f32.gmra.mxu2 %vm124_vm1, %v765_v50 }
 0x38d   :  { %8056 = vmatmul.msk.f32.gmra.mxu0 %vm124_vm1, %v607_v9  ;;  %v10515_v45 = vpop.eup %10514  ;;  %v10432_v9 = vld [vmem:[%s14371_s9] ss:$0 sm:$0xff] }
 0x38e   :  { %v609_v37 = vmul.f32 %v10515_v45, %v11256_v54  ;;  %v335_v54 = vpop.f32.mrf.mxu0 }
 0x395   :  { %8057 = vmatmul.msk.f32.gmra.mxu0 %vm124_vm1, %v608_v59 }
 0x396   :  { %v338_v62 = vpop.f32.mrf.mxu0 }
 0x39d   :  { %8058 = vmatmul.msk.f32.gmra.mxu0 %vm124_vm1, %v609_v37 }
 0x39e   :  { %v341_v63 = vpop.f32.mrf.mxu0 }
 0x3a6   :  { %v344_v49 = vpop.f32.mrf.mxu0 }
 0x3b8   :  { %v756_v36 = vpop.xlane.xlu2 %755 }
 0x3b9   :  { %10516 = vrcp.f32 %v756_v36 }
 0x3ba   :  { %10518 = vrcp.f32 %v759_v56 }
 0x3bf   :  { %v10517_v38 = vpop.eup %10516 }
 0x3c0   :  { %v493_v14 = vpop.f32.mrf.mxu2  ;;  %v766_v58 = vmul.f32 %v10517_v38, %v11278_v41  ;;  %v10519_v48 = vpop.eup %10518 }
 0x3c1   :  { %825 = vrot.lane.b32.xlu2 %v493_v14, %s14380_s19  ;;  %v767_v60 = vmul.f32 %v10519_v48, %v11258_v55 }
 0x3c2   :  { %8069 = vmatmul.msk.f32.gmra.mxu2 %vm124_vm1, %v766_v58 }
 0x3ca   :  { %8070 = vmatmul.msk.f32.gmra.mxu2 %vm124_vm1, %v767_v60 }
 0x3e2   :  { %v496_v44 = vpop.f32.mrf.mxu2 }
 0x3ea   :  { %v499_v57 = vpop.f32.mrf.mxu2 }
 0x3f2   :  { %v502_v4 = vpop.f32.mrf.mxu2 }
 0x402   :  { %v651_v5 = vpop.f32.mrf.mxu0 }
 0x403   :  { %841 = vrot.lane.b32.xlu0 %v651_v5, %s14382_s20 }
 0x404   :  { %v809_v6 = vpop.f32.mrf.mxu2 }
 0x405   :  { %857 = vrot.lane.b32.xlu1 %v809_v6, %s14378_s21 }
 0x40a   :  { %v654_v0 = vpop.f32.mrf.mxu0 }
 0x40b   :  { %827 = vrot.lane.b32.xlu0 %v496_v44, %s14380_s19  ;;  %843 = vrot.lane.b32.xlu2 %v654_v0, %s14382_s20 }
 0x40c   :  { %v812_v55 = vpop.f32.mrf.mxu2 }
 0x40d   :  { %859 = vrot.lane.b32.xlu1 %v812_v55, %s14378_s21 }
 0x412   :  { %v657_v8 = vpop.f32.mrf.mxu0 }
 0x413   :  { %829 = vrot.lane.b32.xlu0 %v499_v57, %s14380_s19  ;;  %845 = vrot.lane.b32.xlu2 %v657_v8, %s14382_s20 }
 0x41a   :  { %v660_v10 = vpop.f32.mrf.mxu0 }
 0x41b   :  { %831 = vrot.lane.b32.xlu0 %v502_v4, %s14380_s19  ;;  %847 = vrot.lane.b32.xlu2 %v660_v10, %s14382_s20  ;;  %v826_v53 = vpop.permute.xlu2 %825 }
 0x41c   :  { %v869_v26 = vsel %vm196_vm2, %v335_v54, %v826_v53 }
 0x445   :  { %v815_v11 = vpop.f32.mrf.mxu2 }
 0x446   :  { %861 = vrot.lane.b32.xlu1 %v815_v11, %s14378_s21 }
 0x44d   :  { %v818_v41 = vpop.f32.mrf.mxu2 }
 0x44e   :  { %863 = vrot.lane.b32.xlu1 %v818_v41, %s14378_s21 }
 0x465   :  { %v844_v33 = vpop.permute.xlu2 %843 }
 0x46d   :  { %v846_v40 = vpop.permute.xlu2 %845 }
 0x475   :  { %v842_v27 = vpop.permute.xlu0 %841  ;;  %v848_v47 = vpop.permute.xlu2 %847 }
 0x476   :  { %v873_v28 = vsel %vm66_vm0, %v869_v26, %v842_v27 }
 0x477   :  { %v858_v30 = vpop.permute.xlu1 %857 }
 0x478   :  { %v878_v31 = vsel %vm877_vm3, %v873_v28, %v858_v30 }
 0x479   :  { %8071 = vmatmul.msk.f32.vlgmr.msrb.gmra.mxu3 %vm124_vm1, %v878_v31 }
 0x47d   :  { %v828_v35 = vpop.permute.xlu0 %827 }
 0x47e   :  { %v870_v34 = vsel %vm196_vm2, %v338_v62, %v828_v35 }
 0x47f   :  { %v860_v32 = vpop.permute.xlu1 %859  ;;  %v874_v21 = vsel %vm66_vm0, %v870_v34, %v844_v33  ;;  %v8078_v34 = vld [vmem:[%s14366_s4 + $0x38] sm:$0xff] }
 0x480   :  { %v879_v61 = vsel %vm877_vm3, %v874_v21, %v860_v32  ;;  %1078 = vmatpush.msrb.mxu0 %v8078_v34  ;;  %v8077_v32 = vld [vmem:[%s14366_s4 + $0x30] sm:$0xff]  ;;  %v8076_v21 = vld [vmem:[%s14366_s4 + $0x28] sm:$0xff] }
 0x481   :  { %8072 = vmatmul.msk.f32.gmra.mxu3 %vm124_vm1, %v879_v61  ;;  %v8075_v61 = vld [vmem:[%s14366_s4 + $0x20] sm:$0xff] }
 0x482   :  { %1079 = vmatpush.msrb.mxu0 %v8077_v32 }
 0x484   :  { %1080 = vmatpush.msrb.mxu0 %v8076_v21 }
 0x485   :  { %v830_v3 = vpop.permute.xlu0 %829 }
 0x486   :  { %v871_v42 = vsel %vm196_vm2, %v341_v63, %v830_v3  ;;  %v10810_v63 = vmov 32.0   ;;  %1081 = vmatpush.msrb.mxu0 %v8075_v61 }
 0x487   :  { %v875_v1 = vsel %vm66_vm0, %v871_v42, %v846_v40  ;;  %10520 = vrcp.f32 %v10810_v63 }
 0x48d   :  { %v832_v46 = vpop.permute.xlu0 %831 }
 0x48e   :  { %v872_v7 = vsel %vm196_vm2, %v344_v49, %v832_v46 }
 0x48f   :  { %v876_v50 = vsel %vm66_vm0, %v872_v7, %v848_v47 }
 0x4b8   :  { %v862_v24 = vpop.permute.xlu1 %861 }
 0x4b9   :  { %v880_v43 = vsel %vm877_vm3, %v875_v1, %v862_v24 }
 0x4ba   :  { %8073 = vmatmul.msk.f32.gmra.mxu3 %vm124_vm1, %v880_v43 }
 0x4c0   :  { %v864_v13 = vpop.permute.xlu1 %863 }
 0x4c1   :  { %v881_v18 = vsel %vm877_vm3, %v876_v50, %v864_v13 }
 0x4c2   :  { %8074 = vmatmul.msk.f32.gmra.mxu3 %vm124_vm1, %v881_v18 }
 0x4fc   :  { %v912_v51 = vpop.f32.mrf.mxu3 }
 0x4fd   :  { %v913_v52 = vadd.f32 %v10432_v9, %v912_v51 }
 0x4ff   :  { %v924_v59 = vadd.f32 %v913_v52, %v10942_v16  ;;  %v11418_v52 = vld [vmem:[%s14371_s9 + $0x2] ss:$0 sm:$0xff] }
 0x501   :  { %v930_v45 = vsel %vm124_vm1, %v924_v59, 0.0 }
 0x502   :  { %931 = vadd.xlane.f32.xlu0 %v930_v45 }
 0x504   :  { %v915_v37 = vpop.f32.mrf.mxu3 }
 0x505   :  { %v916_v36 = vadd.f32 %v10432_v9, %v915_v37 }
 0x507   :  { %v925_v56 = vadd.f32 %v916_v36, %v10956_v22  ;;  %v10521_v22 = vpop.eup %10520  ;;  %v10434_v36 = vld [vmem:[%s14371_s9 + $0x3] ss:$0 sm:$0xff] }
 0x508   :  { %v943_v57 = vmul.f32 32.0, %v10521_v22  ;;  %vm947_vm4 = vweird.f32 %v10521_v22 }
 0x509   :  { %v933_v38 = vsel %vm124_vm1, %v925_v56, 0.0 }
 0x50a   :  { %934 = vadd.xlane.f32.xlu2 %v933_v38  ;;  %v944_v49 = vsub.f32 1.0, %v943_v57 }
 0x50c   :  { %v945_v4 = vmul.f32 %v10521_v22, %v944_v49 }
 0x50e   :  { %v946_v5 = vadd.f32 %v10521_v22, %v945_v4 }
 0x510   :  { %v11365_v6 = vsel %vm947_vm4, %v10521_v22, %v946_v5 }
 0x53d   :  { %v918_v14 = vpop.f32.mrf.mxu3 }
 0x53e   :  { %v919_v58 = vadd.f32 %v10432_v9, %v918_v14 }
 0x540   :  { %v926_v48 = vadd.f32 %v919_v58, %v10952_v20 }
 0x542   :  { %v936_v60 = vsel %vm124_vm1, %v926_v48, 0.0 }
 0x543   :  { %937 = vadd.xlane.f32.xlu1 %v936_v60 }
 0x545   :  { %v921_v54 = vpop.f32.mrf.mxu3 }
 0x546   :  { %v922_v62 = vadd.f32 %v10432_v9, %v921_v54 }
 0x548   :  { %v927_v16 = vadd.f32 %v922_v62, %v10963_v25 }
 0x54a   :  { %v939_v44 = vsel %vm124_vm1, %v927_v16, 0.0 }
 0x54b   :  { %940 = vadd.xlane.f32.xlu0 %v939_v44 }
 0x575   :  { %v932_v20 = vpop.xlane.xlu0 %931 }
 0x576   :  { %v949_v0 = vmul.f32 %v11365_v6, %v932_v20 }
 0x578   :  { %v953_v55 = vsub.f32 %v924_v59, %v949_v0 }
 0x57a   :  { %v957_v8 = vmul.f32 %v953_v55, %v953_v55 }
 0x57c   :  { %v961_v25 = vsel %vm124_vm1, %v957_v8, 0.0 }
 0x57d   :  { %962 = vadd.xlane.f32.xlu2 %v961_v25  ;;  %v935_v10 = vpop.xlane.xlu2 %934 }
 0x57e   :  { %v950_v11 = vmul.f32 %v11365_v6, %v935_v10 }
 0x580   :  { %v11370_v41 = vsub.f32 %v925_v56, %v950_v11 }
 0x582   :  { %v958_v15 = vmul.f32 %v11370_v41, %v11370_v41 }
 0x584   :  { %v964_v29 = vsel %vm124_vm1, %v958_v15, 0.0 }
 0x585   :  { %965 = vadd.xlane.f32.xlu1 %v964_v29 }
 0x59e   :  { %1289 = vrot.lane.b32.xlu1 %v11271_v12, %s10800_s0 }
 0x5b6   :  { %v938_v17 = vpop.xlane.xlu1 %937 }
 0x5b7   :  { %v951_v23 = vmul.f32 %v11365_v6, %v938_v17 }
 0x5b9   :  { %v11378_v53 = vsub.f32 %v926_v48, %v951_v23 }
 0x5bb   :  { %v959_v26 = vmul.f32 %v11378_v53, %v11378_v53 }
 0x5bd   :  { %v967_v27 = vsel %vm124_vm1, %v959_v26, 0.0 }
 0x5be   :  { %v941_v28 = vpop.xlane.xlu0 %940  ;;  %968 = vadd.xlane.f32.xlu0 %v967_v27 }
 0x5bf   :  { %v952_v30 = vmul.f32 %v11365_v6, %v941_v28 }
 0x5c1   :  { %v11384_v31 = vsub.f32 %v927_v16, %v952_v30 }
 0x5c3   :  { %v960_v35 = vmul.f32 %v11384_v31, %v11384_v31 }
 0x5c5   :  { %v970_v33 = vsel %vm124_vm1, %v960_v35, 0.0 }
 0x5c6   :  { %971 = vadd.xlane.f32.xlu2 %v970_v33 }
 0x5d2   :  { %1287 = vrot.lane.b32.xlu0 %v11276_v39, %s10800_s0 }
 0x5da   :  { %1283 = vrot.lane.b32.xlu0 %v11288_v19, %s10800_s0 }
 0x5de   :  { %1285 = vrot.lane.b32.xlu2 %v11282_v2, %s10800_s0 }
 0x5e6   :  { %1447 = vrot.lane.b32.xlu2 %v11271_v12, %s10802_s25 }
 0x5ee   :  { %1443 = vrot.lane.b32.xlu2 %v11282_v2, %s10802_s25 }
 0x5f0   :  { %v963_v3 = vpop.xlane.xlu2 %962 }
 0x5f1   :  { %v973_v40 = vmul.f32 %v963_v3, %v11365_v6 }
 0x5f3   :  { %v977_v42 = vadd.f32 1e-05, %v973_v40 }
 0x5f5   :  { %10522 = vrsqrt.f32 %v977_v42  ;;  %vm987_vm6 = vweird.f32 %v977_v42 }
 0x5f6   :  { %1605 = vrot.lane.b32.xlu2 %v11271_v12, %s10801_s24 }
 0x5f8   :  { %v966_v24 = vpop.xlane.xlu1 %965 }
 0x5f9   :  { %v974_v1 = vmul.f32 %v966_v24, %v11365_v6  ;;  %v10435_v24 = vld [vmem:[%s14367_s5 + $0x1] ss:$0 sm:$0xff] }
 0x5fb   :  { %v10523_v43 = vpop.eup %10522  ;;  %v978_v46 = vadd.f32 1e-05, %v974_v1 }
 0x5fc   :  { %v982_v7 = vmul.f32 %v10523_v43, %v977_v42  ;;  %vm988_vm5 = vweird.f32 %v10523_v43 }
 0x5fd   :  { %10524 = vrsqrt.f32 %v978_v46  ;;  %vm989_vm7 = vmor %vm987_vm6, %vm988_vm5  ;;  %vm997_vm9 = vweird.f32 %v978_v46 }
 0x5fe   :  { %v983_v47 = vmul.f32 %v10523_v43, %v982_v7 }
 0x600   :  { %v984_v13 = vmul.f32 0.5, %v983_v47 }
 0x602   :  { %v985_v50 = vsub.f32 1.5, %v984_v13 }
 0x603   :  { %v10525_v18 = vpop.eup %10524 }
 0x604   :  { %v986_v9 = vmul.f32 %v10523_v43, %v985_v50  ;;  %v992_v51 = vmul.f32 %v10525_v18, %v978_v46  ;;  %vm998_vm8 = vweird.f32 %v10525_v18 }
 0x605   :  { %vm999_vm10 = vmor %vm997_vm9, %vm998_vm8 }
 0x606   :  { %v990_v59 = vsel %vm989_vm7, %v10523_v43, %v986_v9  ;;  %v993_v45 = vmul.f32 %v10525_v18, %v992_v51  ;;  %v11492_v9 = vpack.i.bf16 %v11288_v19, %v11282_v2 }
 0x607   :  { %v1021_v37 = vmul.f32 %v990_v59, %v953_v55 }
 0x608   :  { %v994_v56 = vmul.f32 0.5, %v993_v45 }
 0x609   :  { %v1026_v38 = vmul.f32 %v11418_v52, %v1021_v37  ;;  %v11511_v37 = vld [vmem:[%s14365_s3 + $0x8] sm:$0xff] }
 0x60a   :  { %v995_v14 = vsub.f32 1.5, %v994_v56  ;;  %v11519_v56 = vld [vmem:[%s14365_s3] sm:$0xff] }
 0x60b   :  { %v11424_v58 = vadd.f32 %v10434_v36, %v1026_v38 }
 0x60c   :  { %v996_v48 = vmul.f32 %v10525_v18, %v995_v14 }
 0x60d   :  { %8087 = vmatmul.msk.f32.vlgmr.msrb.gmra.mxu0 %vm124_vm1, %v11424_v58 }
 0x60e   :  { %v1000_v60 = vsel %vm999_vm10, %v10525_v18, %v996_v48  ;;  %v11479_v18 = vpack.i.bf16 %v11276_v39, %v11271_v12 }
 0x60f   :  { %v1022_v54 = vmul.f32 %v1000_v60, %v11370_v41 }
 0x610   :  { %v1290_v62 = vpop.permute.xlu1 %1289 }
 0x611   :  { %8107 = vmatpush.xpose.msk.msra.mxu0 %vm196_vm2, %v1290_v62  ;;  %v1027_v16 = vmul.f32 %v11418_v52, %v1022_v54 }
 0x613   :  { %v11431_v44 = vadd.f32 %v10434_v36, %v1027_v16 }
 0x615   :  { %8088 = vmatmul.msk.f32.gmra.mxu0 %vm124_vm1, %v11431_v44 }
 0x631   :  { %v969_v63 = vpop.xlane.xlu0 %968 }
 0x632   :  { %v975_v22 = vmul.f32 %v969_v63, %v11365_v6 }
 0x634   :  { %v979_v57 = vadd.f32 1e-05, %v975_v22 }
 0x636   :  { %10526 = vrsqrt.f32 %v979_v57  ;;  %vm1007_vm12 = vweird.f32 %v979_v57 }
 0x639   :  { %v972_v49 = vpop.xlane.xlu2 %971 }
 0x63a   :  { %v976_v4 = vmul.f32 %v972_v49, %v11365_v6 }
 0x63c   :  { %v10527_v5 = vpop.eup %10526  ;;  %v980_v20 = vadd.f32 1e-05, %v976_v4 }
 0x63d   :  { %v1002_v0 = vmul.f32 %v10527_v5, %v979_v57  ;;  %vm1008_vm11 = vweird.f32 %v10527_v5 }
 0x63e   :  { %10528 = vrsqrt.f32 %v980_v20  ;;  %vm1009_vm13 = vmor %vm1007_vm12, %vm1008_vm11  ;;  %vm1017_vm15 = vweird.f32 %v980_v20 }
 0x63f   :  { %v1003_v55 = vmul.f32 %v10527_v5, %v1002_v0 }
 0x641   :  { %v1004_v8 = vmul.f32 0.5, %v1003_v55  ;;  %v1286_v25 = vpop.permute.xlu2 %1285  ;;  %v11538_v55 = vld [vmem:[%s14365_s3 + $0x10] sm:$0xff] }
 0x643   :  { %v1005_v10 = vsub.f32 1.5, %v1004_v8 }
 0x644   :  { %v10529_v11 = vpop.eup %10528  ;;  %v1288_v41 = vpop.permute.xlu0 %1287 }
 0x645   :  { %v1006_v15 = vmul.f32 %v10527_v5, %v1005_v10  ;;  %v1012_v29 = vmul.f32 %v10529_v11, %v980_v20  ;;  %8108 = vmatpush.xpose.msk.msra.mxu0 %vm196_vm2, %v1288_v41  ;;  %vm1018_vm14 = vweird.f32 %v10529_v11 }
 0x646   :  { %vm1019_vm4 = vmor %vm1017_vm15, %vm1018_vm14 }
 0x647   :  { %v1013_v17 = vmul.f32 %v10529_v11, %v1012_v29  ;;  %v1010_v23 = vsel %vm1009_vm13, %v10527_v5, %v1006_v15 }
 0x648   :  { %v1023_v26 = vmul.f32 %v1010_v23, %v11378_v53  ;;  %v11550_v23 = vld [vmem:[%s14365_s3 + $0x18] sm:$0xff] }
 0x649   :  { %v1014_v27 = vmul.f32 0.5, %v1013_v17  ;;  %v1448_v28 = vpop.permute.xlu2 %1447  ;;  %8109 = vmatpush.xpose.msk.msra.mxu0 %vm196_vm2, %v1286_v25 }
 0x64a   :  { %8119 = vmatpush.xpose.msk.msrb.mxu2 %vm196_vm2, %v1448_v28  ;;  %v1028_v30 = vmul.f32 %v11418_v52, %v1023_v26 }
 0x64b   :  { %v1015_v35 = vsub.f32 1.5, %v1014_v27 }
 0x64c   :  { %v1284_v33 = vpop.permute.xlu0 %1283  ;;  %v11442_v34 = vadd.f32 %v10434_v36, %v1028_v30 }
 0x64d   :  { %v1016_v32 = vmul.f32 %v10529_v11, %v1015_v35  ;;  %8110 = vmatpush.xpose.msk.msra.mxu0 %vm196_vm2, %v1284_v33 }
 0x64e   :  { %8089 = vmatmul.msk.f32.gmra.mxu0 %vm124_vm1, %v11442_v34 }
 0x64f   :  { %v1020_v53 = vsel %vm1019_vm4, %v10529_v11, %v1016_v32 }
 0x650   :  { %v1024_v21 = vmul.f32 %v1020_v53, %v11384_v31 }
 0x651   :  { %v1444_v61 = vpop.permute.xlu2 %1443 }
 0x652   :  { %v1029_v3 = vmul.f32 %v11418_v52, %v1024_v21 }
 0x654   :  { %v11449_v40 = vadd.f32 %v10434_v36, %v1029_v3 }
 0x656   :  { %8090 = vmatmul.msk.f32.gmra.mxu0 %vm124_vm1, %v11449_v40 }
 0x659   :  { %v1606_v42 = vpop.permute.xlu2 %1605 }
 0x65a   :  { %8131 = vmatpush.xpose.msk.msrb.mxu0 %vm196_vm2, %v1606_v42 }
 0x68a   :  { %v1083_v1 = vpop.f32.mrf.mxu0 }
 0x68b   :  { %v1084_v43 = vadd.f32 %v10435_v24, %v1083_v1 }
 0x68d   :  { %8099 = vmatmul.msk.f32.vlgmr.msra.gmra.mxu2 %vm196_vm2, %v1084_v43  ;;  %1275 = vrot.lane.b32.xlu1 %v1084_v43, %s10800_s0 }
 0x68e   :  { %1433 = vrot.lane.b32.xlu0 %v1084_v43, %s10802_s25 }
 0x692   :  { %v1086_v31 = vpop.f32.mrf.mxu0 }
 0x693   :  { %v1087_v46 = vadd.f32 %v10435_v24, %v1086_v31 }
 0x695   :  { %1445 = vrot.lane.b32.xlu1 %v11276_v39, %s10802_s25  ;;  %8100 = vmatmul.msk.f32.gmra.mxu2 %vm196_vm2, %v1087_v46 }
 0x696   :  { %1277 = vrot.lane.b32.xlu0 %v1087_v46, %s10800_s0 }
 0x69d   :  { %1441 = vrot.lane.b32.xlu1 %v11288_v19, %s10802_s25 }
 0x6a5   :  { %1603 = vrot.lane.b32.xlu1 %v11276_v39, %s10801_s24 }
 0x6ad   :  { %1435 = vrot.lane.b32.xlu1 %v1087_v46, %s10802_s25 }
 0x6cb   :  { %v1089_v7 = vpop.f32.mrf.mxu0 }
 0x6cc   :  { %v1090_v47 = vadd.f32 %v10435_v24, %v1089_v7 }
 0x6ce   :  { %1437 = vrot.lane.b32.xlu1 %v1090_v47, %s10802_s25  ;;  %1279 = vrot.lane.b32.xlu0 %v1090_v47, %s10800_s0 }
 0x6cf   :  { %8101 = vmatmul.msk.f32.gmra.mxu2 %vm196_vm2, %v1090_v47 }
 0x6d3   :  { %v1092_v13 = vpop.f32.mrf.mxu0 }
 0x6d4   :  { %v1093_v50 = vadd.f32 %v10435_v24, %v1092_v13 }
 0x6d6   :  { %1281 = vrot.lane.b32.xlu2 %v1093_v50, %s10800_s0  ;;  %1595 = vrot.lane.b32.xlu1 %v1090_v47, %s10801_s24 }
 0x6d7   :  { %1601 = vrot.lane.b32.xlu0 %v11282_v2, %s10801_s24  ;;  %8102 = vmatmul.msk.f32.gmra.mxu2 %vm196_vm2, %v1093_v50 }
 0x6de   :  { %1599 = vrot.lane.b32.xlu2 %v11288_v19, %s10801_s24  ;;  %10310 = vrot.lane.b32.xlu1 %v11479_v18, %s10804_s27 }
 0x6df   :  { %1591 = vrot.lane.b32.xlu0 %v1084_v43, %s10801_s24 }
 0x6e6   :  { %1593 = vrot.lane.b32.xlu2 %v1087_v46, %s10801_s24  ;;  %10320 = vrot.lane.b32.xlu1 %v11479_v18, %s10803_s26 }
 0x6e7   :  { %1439 = vrot.lane.b32.xlu0 %v1093_v50, %s10802_s25 }
 0x6ee   :  { %1597 = vrot.lane.b32.xlu2 %v1093_v50, %s10801_s24 }
 0x6ef   :  { %10315 = vrot.lane.b32.xlu0 %v11492_v9, %s10804_s27 }
 0x6f6   :  { %10330 = vrot.lane.b32.xlu2 %v11479_v18, %s10806_s16 }
 0x6f7   :  { %10325 = vrot.lane.b32.xlu0 %v11492_v9, %s10803_s26 }
 0x6ff   :  { %v1276_v12 = vpop.permute.xlu1 %1275 }
 0x700   :  { %v1434_v39 = vpop.permute.xlu0 %1433  ;;  %8111 = vmatmul.msk.f32.vlgmr.msra.gmra.mxu0 %vm196_vm2, %v1276_v12 }
 0x707   :  { %v1446_v51 = vpop.permute.xlu1 %1445 }
 0x708   :  { %v1278_v52 = vpop.permute.xlu0 %1277  ;;  %8120 = vmatpush.xpose.msk.msrb.mxu2 %vm196_vm2, %v1446_v51 }
 0x709   :  { %8112 = vmatmul.msk.f32.gmra.mxu0 %vm196_vm2, %v1278_v52 }
 0x70c   :  { %8121 = vmatpush.xpose.msk.msrb.mxu2 %vm196_vm2, %v1444_v61 }
 0x70f   :  { %v1442_v2 = vpop.permute.xlu1 %1441 }
 0x710   :  { %v1166_v19 = vpop.f32.mrf.mxu2  ;;  %8122 = vmatpush.xpose.msk.msrb.mxu2 %vm196_vm2, %v1442_v2 }
 0x711   :  { %v11522_v38 = vadd.f32 %v11519_v56, %v1166_v19 }
 0x713   :  { %8123 = vmatmul.msk.f32.vlgmr.msrb.gmra.mxu2 %vm196_vm2, %v1434_v39  ;;  %v1178_v60 = vsel %vm124_vm1, %v11522_v38, -inf }
 0x717   :  { %v1604_v59 = vpop.permute.xlu1 %1603 }
 0x718   :  { %v1169_v45 = vpop.f32.mrf.mxu2  ;;  %8132 = vmatpush.xpose.msk.msrb.mxu0 %vm196_vm2, %v1604_v59 }
 0x719   :  { %v11514_v36 = vadd.f32 %v11511_v37, %v1169_v45 }
 0x71b   :  { %v1181_v14 = vsel %vm124_vm1, %v11514_v36, -inf }
 0x71f   :  { %v1436_v48 = vpop.permute.xlu1 %1435  ;;  %1182 = vmax.xlane.f32.xlu2 %v1181_v14 }
 0x720   :  { %8124 = vmatmul.msk.f32.gmra.mxu2 %vm196_vm2, %v1436_v48 }
 0x721   :  { %1179 = vmax.xlane.f32.xlu0 %v1178_v60 }
 0x730   :  { %v1282_v54 = vpop.permute.xlu2 %1281 }
 0x738   :  { %v1600_v63 = vpop.permute.xlu2 %1599 }
 0x740   :  { %v1280_v62 = vpop.permute.xlu0 %1279  ;;  %v1438_v16 = vpop.permute.xlu1 %1437 }
 0x741   :  { %8113 = vmatmul.msk.f32.gmra.mxu0 %vm196_vm2, %v1280_v62  ;;  %8125 = vmatmul.msk.f32.gmra.mxu2 %vm196_vm2, %v1438_v16  ;;  %v1594_v49 = vpop.permute.xlu2 %1593 }
 0x748   :  { %v1596_v57 = vpop.permute.xlu1 %1595 }
 0x749   :  { %v1602_v22 = vpop.permute.xlu0 %1601  ;;  %8114 = vmatmul.msk.f32.gmra.mxu0 %vm196_vm2, %v1282_v54  ;;  %v1598_v11 = vpop.permute.xlu2 %1597 }
 0x74a   :  { %8133 = vmatpush.xpose.msk.msrb.mxu0 %vm196_vm2, %v1602_v22 }
 0x74e   :  { %8134 = vmatpush.xpose.msk.msrb.mxu0 %vm196_vm2, %v1600_v63 }
 0x750   :  { %v10311_v5 = vpop.permute.xlu1 %10310 }
 0x751   :  { %v1592_v4 = vpop.permute.xlu0 %1591  ;;  %v10312_v20 = vunpack.i.l.bf16 %v10311_v5  ;;  %v10313_v25 = vunpack.i.h.bf16 %v10311_v5  ;;  %v10331_v35 = vpop.permute.xlu2 %10330 }
 0x752   :  { %v1172_v0 = vpop.f32.mrf.mxu2  ;;  %8135 = vmatmul.msk.f32.vlgmr.msrb.gmra.mxu0 %vm196_vm2, %v1592_v4  ;;  %v10332_v53 = vunpack.i.l.bf16 %v10331_v35  ;;  %v10333_v21 = vunpack.i.h.bf16 %v10331_v35 }
 0x753   :  { %v11541_v8 = vadd.f32 %v11538_v55, %v1172_v0  ;;  %1258 = vmatpush.msra.mxu3 %v10312_v20 }
 0x755   :  { %v1184_v10 = vsel %vm124_vm1, %v11541_v8, -inf  ;;  %1259 = vmatpush.msra.mxu3 %v10313_v25 }
 0x756   :  { %1185 = vmax.xlane.f32.xlu2 %v1184_v10 }
 0x758   :  { %v10321_v15 = vpop.permute.xlu1 %10320 }
 0x759   :  { %v1440_v41 = vpop.permute.xlu0 %1439  ;;  %v10322_v29 = vunpack.i.l.bf16 %v10321_v15  ;;  %v10323_v27 = vunpack.i.h.bf16 %v10321_v15 }
 0x75a   :  { %v1175_v17 = vpop.f32.mrf.mxu2  ;;  %8126 = vmatmul.msk.f32.gmra.mxu2 %vm196_vm2, %v1440_v41  ;;  %8136 = vmatmul.msk.f32.gmra.mxu0 %vm196_vm2, %v1594_v49 }
 0x75b   :  { %v11553_v26 = vadd.f32 %v11550_v23, %v1175_v17  ;;  %1416 = vmatpush.msra.mxu1 %v10322_v29 }
 0x75d   :  { %v1187_v28 = vsel %vm124_vm1, %v11553_v26, -inf  ;;  %1417 = vmatpush.msra.mxu1 %v10323_v27 }
 0x75e   :  { %1188 = vmax.xlane.f32.xlu0 %v1187_v28 }
 0x761   :  { %v10316_v30 = vpop.permute.xlu0 %10315 }
 0x762   :  { %v10317_v33 = vunpack.i.l.bf16 %v10316_v30  ;;  %8137 = vmatmul.msk.f32.gmra.mxu0 %vm196_vm2, %v1596_v57  ;;  %v10318_v32 = vunpack.i.h.bf16 %v10316_v30 }
 0x764   :  { %1260 = vmatpush.msra.mxu3 %v10317_v33 }
 0x766   :  { %1261 = vmatpush.msra.mxu3 %v10318_v32 }
 0x768   :  { %1574 = vmatpush.msrb.mxu3 %v10332_v53 }
 0x769   :  { %v10326_v61 = vpop.permute.xlu0 %10325 }
 0x76a   :  { %1575 = vmatpush.msrb.mxu3 %v10333_v21  ;;  %v10327_v3 = vunpack.i.l.bf16 %v10326_v61  ;;  %8138 = vmatmul.msk.f32.gmra.mxu0 %vm196_vm2, %v1598_v11  ;;  %v10328_v42 = vunpack.i.h.bf16 %v10326_v61 }
 0x76c   :  { %1418 = vmatpush.msra.mxu1 %v10327_v3 }
 0x76e   :  { %1419 = vmatpush.msra.mxu1 %v10328_v42 }
 0x77d   :  { %v1324_v24 = vpop.f32.mrf.mxu0 }
 0x77e   :  { %v11560_v1 = vadd.f32 %v11519_v56, %v1324_v24 }
 0x780   :  { %v1336_v43 = vsel %vm124_vm1, %v11560_v1, -inf }
 0x781   :  { %1337 = vmax.xlane.f32.xlu1 %v1336_v43 }
 0x786   :  { %v1327_v31 = vpop.f32.mrf.mxu0 }
 0x787   :  { %v11565_v46 = vadd.f32 %v11511_v37, %v1327_v31 }
 0x789   :  { %v1339_v7 = vsel %vm124_vm1, %v11565_v46, -inf }
 0x78a   :  { %1340 = vmax.xlane.f32.xlu0 %v1339_v7 }
 0x792   :  { %v1183_v14 = vpop.xlane.xlu2 %1182 }
 0x793   :  { %v1191_v60 = vsub.f32 %v11514_v36, %v1183_v14 }
 0x794   :  { %v1180_v12 = vpop.xlane.xlu0 %1179 }
 0x795   :  { %v1190_v39 = vsub.f32 %v11522_v38, %v1180_v12  ;;  %v1196_v62 = vmul.f32 1.442695, %v1191_v60 }
 0x796   :  { %v1482_v47 = vpop.f32.mrf.mxu2 }
 0x797   :  { %v11570_v13 = vadd.f32 %v11519_v56, %v1482_v47  ;;  %v1194_v51 = vmul.f32 1.442695, %v1190_v39 }
 0x799   :  { %v1494_v50 = vsel %vm124_vm1, %v11570_v13, -inf  ;;  %10530 = vpow2.f32 %v1194_v51 }
 0x79a   :  { %1495 = vmax.xlane.f32.xlu1 %v1494_v50  ;;  %10532 = vpow2.f32 %v1196_v62 }
 0x79f   :  { %v11580_v59 = vpop.eup %10530 }
 0x7a0   :  { %v1202_v45 = vsel %vm124_vm1, %v11580_v59, 0.0  ;;  %v11600_v4 = vpop.eup %10532 }
 0x7a1   :  { %v1205_v0 = vsel %vm124_vm1, %v11600_v4, 0.0 }
 0x7a3   :  { %v1485_v52 = vpop.f32.mrf.mxu2 }
 0x7a4   :  { %v11576_v2 = vadd.f32 %v11511_v37, %v1485_v52 }
 0x7a6   :  { %v1497_v19 = vsel %vm124_vm1, %v11576_v2, -inf }
 0x7a7   :  { %1498 = vmax.xlane.f32.xlu2 %v1497_v19 }
 0x7af   :  { %1203 = vadd.xlane.f32.xlu2 %v1202_v45 }
 0x7be   :  { %v1330_v48 = vpop.f32.mrf.mxu0 }
 0x7bf   :  { %v11585_v38 = vadd.f32 %v11538_v55, %v1330_v48 }
 0x7c1   :  { %v1342_v54 = vsel %vm124_vm1, %v11585_v38, -inf }
 0x7c2   :  { %1343 = vmax.xlane.f32.xlu1 %v1342_v54 }
 0x7c4   :  { %v1488_v16 = vpop.f32.mrf.mxu2 }
 0x7c5   :  { %v11591_v63 = vadd.f32 %v11538_v55, %v1488_v16 }
 0x7c6   :  { %v1333_v22 = vpop.f32.mrf.mxu0 }
 0x7c7   :  { %v11594_v57 = vadd.f32 %v11550_v23, %v1333_v22  ;;  %v1500_v49 = vsel %vm124_vm1, %v11591_v63, -inf }
 0x7c8   :  { %1501 = vmax.xlane.f32.xlu0 %v1500_v49 }
 0x7c9   :  { %v1345_v36 = vsel %vm124_vm1, %v11594_v57, -inf  ;;  %v1186_v10 = vpop.xlane.xlu2 %1185 }
 0x7ca   :  { %1346 = vmax.xlane.f32.xlu2 %v1345_v36  ;;  %v1192_v11 = vsub.f32 %v11541_v8, %v1186_v10 }
 0x7cf   :  { %v1640_v5 = vpop.f32.mrf.mxu0 }
 0x7d0   :  { %v11603_v20 = vadd.f32 %v11519_v56, %v1640_v5  ;;  %v1198_v56 = vmul.f32 1.442695, %v1192_v11 }
 0x7d1   :  { %v1189_v17 = vpop.xlane.xlu0 %1188 }
 0x7d2   :  { %v1652_v25 = vsel %vm124_vm1, %v11603_v20, -inf  ;;  %1206 = vadd.xlane.f32.xlu2 %v1205_v0  ;;  %10534 = vpow2.f32 %v1198_v56  ;;  %v1193_v30 = vsub.f32 %v11553_v26, %v1189_v17 }
 0x7d3   :  { %1653 = vmax.xlane.f32.xlu0 %v1652_v25 }
 0x7d4   :  { %v1200_v32 = vmul.f32 1.442695, %v1193_v30 }
 0x7d6   :  { %10536 = vpow2.f32 %v1200_v32 }
 0x7d7   :  { %v1643_v41 = vpop.f32.mrf.mxu0 }
 0x7d8   :  { %v11611_v15 = vadd.f32 %v11511_v37, %v1643_v41  ;;  %v11626_v53 = vpop.eup %10534 }
 0x7d9   :  { %v1208_v21 = vsel %vm124_vm1, %v11626_v53, 0.0 }
 0x7da   :  { %v1655_v29 = vsel %vm124_vm1, %v11611_v15, -inf }
 0x7db   :  { %1656 = vmax.xlane.f32.xlu1 %v1655_v29 }
 0x7dc   :  { %v11630_v26 = vpop.eup %10536 }
 0x7dd   :  { %v1491_v27 = vpop.f32.mrf.mxu2 }
 0x7de   :  { %v11616_v28 = vadd.f32 %v11550_v23, %v1491_v27 }
 0x7df   :  { %v1646_v35 = vpop.f32.mrf.mxu0 }
 0x7e0   :  { %v11620_v8 = vadd.f32 %v11538_v55, %v1646_v35  ;;  %v1503_v37 = vsel %vm124_vm1, %v11616_v28, -inf  ;;  %v1211_v55 = vsel %vm124_vm1, %v11630_v26, 0.0 }
 0x7e1   :  { %1504 = vmax.xlane.f32.xlu2 %v1503_v37 }
 0x7e2   :  { %v1658_v33 = vsel %vm124_vm1, %v11620_v8, -inf }
 0x7e3   :  { %1659 = vmax.xlane.f32.xlu0 %v1658_v33 }
 0x7e7   :  { %v1649_v61 = vpop.f32.mrf.mxu0 }
 0x7e8   :  { %v11635_v3 = vadd.f32 %v11550_v23, %v1649_v61 }
 0x7e9   :  { %1209 = vadd.xlane.f32.xlu2 %v1208_v21 }
 0x7ea   :  { %v1661_v31 = vsel %vm124_vm1, %v11635_v3, -inf }
 0x7f1   :  { %1212 = vadd.xlane.f32.xlu2 %v1211_v55 }
 0x7f4   :  { %v1338_v42 = vpop.xlane.xlu1 %1337 }
 0x7f5   :  { %v1348_v24 = vsub.f32 %v11560_v1, %v1338_v42 }
 0x7f7   :  { %v1352_v43 = vmul.f32 1.442695, %v1348_v24 }
 0x7f9   :  { %10538 = vpow2.f32 %v1352_v43  ;;  %1662 = vmax.xlane.f32.xlu2 %v1661_v31 }
 0x7fd   :  { %v1341_v7 = vpop.xlane.xlu0 %1340 }
 0x7fe   :  { %v1349_v47 = vsub.f32 %v11565_v46, %v1341_v7 }
 0x7ff   :  { %v11641_v50 = vpop.eup %10538 }
 0x800   :  { %v1354_v12 = vmul.f32 1.442695, %v1349_v47  ;;  %v1360_v39 = vsel %vm124_vm1, %v11641_v50, 0.0 }
 0x801   :  { %1361 = vadd.xlane.f32.xlu2 %v1360_v39 }
 0x802   :  { %10540 = vpow2.f32 %v1354_v12 }
 0x808   :  { %v11645_v23 = vpop.eup %10540 }
 0x809   :  { %v1363_v1 = vsel %vm124_vm1, %v11645_v23, 0.0 }
 0x80a   :  { %1364 = vadd.xlane.f32.xlu1 %v1363_v1 }
 0x80d   :  { %v1496_v51 = vpop.xlane.xlu1 %1495 }
 0x80e   :  { %v1506_v52 = vsub.f32 %v11570_v13, %v1496_v51 }
 0x810   :  { %v1510_v19 = vmul.f32 1.442695, %v1506_v52 }
 0x812   :  { %10542 = vpow2.f32 %v1510_v19 }
 0x818   :  { %v11650_v46 = vpop.eup %10542 }
 0x819   :  { %v1518_v45 = vsel %vm124_vm1, %v11650_v46, 0.0 }
 0x81a   :  { %v1499_v14 = vpop.xlane.xlu2 %1498  ;;  %1519 = vadd.xlane.f32.xlu2 %v1518_v45 }
 0x81b   :  { %v1507_v48 = vsub.f32 %v11576_v2, %v1499_v14 }
 0x81d   :  { %v1512_v60 = vmul.f32 1.442695, %v1507_v48 }
 0x81f   :  { %10544 = vpow2.f32 %v1512_v60 }
 0x822   :  { %v1204_v54 = vpop.xlane.xlu2 %1203 }
 0x823   :  { %10546 = vrcp.f32 %v1204_v54  ;;  %10335 = vrot.lane.b32.xlu1 %v11492_v9, %s10806_s16 }
 0x825   :  { %v11657_v62 = vpop.eup %10544 }
 0x826   :  { %v1521_v13 = vsel %vm124_vm1, %v11657_v62, 0.0 }
 0x827   :  { %1522 = vadd.xlane.f32.xlu0 %v1521_v13 }
 0x829   :  { %v10547_v16 = vpop.eup %10546 }
 0x82a   :  { %v1218_v22 = vmul.f32 %v10547_v16, %v11580_v59 }
 0x82c   :  { %8103 = vmatmul.msk.f32.vlgmr.msra.gmra.mxu3 %vm124_vm1, %v1218_v22 }
 0x835   :  { %v1344_v49 = vpop.xlane.xlu1 %1343 }
 0x836   :  { %v1350_v2 = vsub.f32 %v11585_v38, %v1344_v49 }
 0x838   :  { %v1356_v36 = vmul.f32 1.442695, %v1350_v2 }
 0x83a   :  { %10548 = vpow2.f32 %v1356_v36 }
 0x83b   :  { %v1502_v0 = vpop.xlane.xlu0 %1501 }
 0x83c   :  { %v1508_v1 = vsub.f32 %v11591_v63, %v1502_v0 }
 0x83d   :  { %v1347_v5 = vpop.xlane.xlu2 %1346 }
 0x83e   :  { %v1351_v25 = vsub.f32 %v11594_v57, %v1347_v5  ;;  %v1514_v19 = vmul.f32 1.442695, %v1508_v1 }
 0x840   :  { %v11665_v10 = vpop.eup %10548  ;;  %v1358_v11 = vmul.f32 1.442695, %v1351_v25 }
 0x841   :  { %v1366_v41 = vsel %vm124_vm1, %v11665_v10, 0.0 }
 0x842   :  { %10550 = vpow2.f32 %v1358_v11  ;;  %1367 = vadd.xlane.f32.xlu0 %v1366_v41 }
 0x845   :  { %v1207_v59 = vpop.xlane.xlu2 %1206 }
 0x846   :  { %10552 = vrcp.f32 %v1207_v59  ;;  %v1654_v29 = vpop.xlane.xlu0 %1653 }
 0x847   :  { %v1664_v56 = vsub.f32 %v11603_v20, %v1654_v29 }
 0x848   :  { %v11670_v38 = vpop.eup %10550 }
 0x849   :  { %v1668_v17 = vmul.f32 1.442695, %v1664_v56  ;;  %v1369_v27 = vsel %vm124_vm1, %v11670_v38, 0.0 }
 0x84a   :  { %1370 = vadd.xlane.f32.xlu2 %v1369_v27 }
 0x84b   :  { %10554 = vpow2.f32 %v1668_v17 }
 0x84c   :  { %v10553_v57 = vpop.eup %10552 }
 0x84d   :  { %v1219_v30 = vmul.f32 %v10553_v57, %v11600_v4 }
 0x84e   :  { %v1657_v35 = vpop.xlane.xlu1 %1656 }
 0x84f   :  { %v1665_v37 = vsub.f32 %v11611_v15, %v1657_v35  ;;  %8104 = vmatmul.msk.f32.gmra.mxu3 %vm124_vm1, %v1219_v30 }
 0x851   :  { %v11677_v33 = vpop.eup %10554  ;;  %v1670_v32 = vmul.f32 1.442695, %v1665_v37 }
 0x852   :  { %v1676_v20 = vsel %vm124_vm1, %v11677_v33, 0.0 }
 0x853   :  { %10556 = vpow2.f32 %v1670_v32  ;;  %1677 = vadd.xlane.f32.xlu0 %v1676_v20 }
 0x854   :  { %v1505_v21 = vpop.xlane.xlu2 %1504 }
 0x855   :  { %v1509_v55 = vsub.f32 %v11616_v28, %v1505_v21 }
 0x856   :  { %v1660_v52 = vpop.xlane.xlu0 %1659 }
 0x857   :  { %v1516_v61 = vmul.f32 1.442695, %v1509_v55 }
 0x859   :  { %v11682_v42 = vpop.eup %10556  ;;  %10558 = vpow2.f32 %v1516_v61 }
 0x85a   :  { %v1679_v4 = vsel %vm124_vm1, %v11682_v42, 0.0 }
 0x85b   :  { %1680 = vadd.xlane.f32.xlu1 %v1679_v4 }
 0x85c   :  { %v1210_v15 = vpop.xlane.xlu2 %1209 }
 0x85d   :  { %10560 = vrcp.f32 %v1210_v15 }
 0x85f   :  { %v11686_v24 = vpop.eup %10558 }
 0x860   :  { %v1527_v43 = vsel %vm124_vm1, %v11686_v24, 0.0 }
 0x862   :  { %10340 = vrot.lane.b32.xlu2 %v11479_v18, %s10805_s30 }
 0x863   :  { %v10561_v31 = vpop.eup %10560  ;;  %1528 = vadd.xlane.f32.xlu1 %v1527_v43 }
 0x864   :  { %v1213_v28 = vpop.xlane.xlu2 %1212  ;;  %v1220_v7 = vmul.f32 %v10561_v31, %v11626_v53 }
 0x865   :  { %10562 = vrcp.f32 %v1213_v28 }
 0x866   :  { %8105 = vmatmul.msk.f32.gmra.mxu3 %vm124_vm1, %v1220_v7 }
 0x867   :  { %10345 = vrot.lane.b32.xlu0 %v11492_v9, %s10805_s30  ;;  %v1666_v9 = vsub.f32 %v11620_v8, %v1660_v52 }
 0x869   :  { %v1672_v14 = vmul.f32 1.442695, %v1666_v9 }
 0x86b   :  { %v10563_v47 = vpop.eup %10562 }
 0x86c   :  { %v1663_v12 = vpop.xlane.xlu2 %1662  ;;  %v1221_v39 = vmul.f32 %v10563_v47, %v11630_v26 }
 0x86d   :  { %v1667_v26 = vsub.f32 %v11635_v3, %v1663_v12 }
 0x86e   :  { %8106 = vmatmul.msk.f32.gmra.mxu3 %vm124_vm1, %v1221_v39 }
 0x86f   :  { %v1674_v60 = vmul.f32 1.442695, %v1667_v26 }
 0x874   :  { %v1362_v18 = vpop.xlane.xlu2 %1361 }
 0x875   :  { %10564 = vrcp.f32 %v1362_v18 }
 0x87b   :  { %v10565_v51 = vpop.eup %10564 }
 0x87c   :  { %v1376_v53 = vmul.f32 %v10565_v51, %v11641_v50 }
 0x87d   :  { %v1365_v45 = vpop.xlane.xlu1 %1364 }
 0x87e   :  { %10566 = vrcp.f32 %v1365_v45  ;;  %8115 = vmatmul.msk.f32.vlgmr.msra.gmra.mxu1 %vm124_vm1, %v1376_v53 }
 0x87f   :  { %10568 = vpow2.f32 %v1514_v19 }
 0x880   :  { %10570 = vpow2.f32 %v1672_v14 }
 0x881   :  { %10572 = vpow2.f32 %v1674_v60 }
 0x884   :  { %v10567_v48 = vpop.eup %10566 }
 0x885   :  { %v1377_v54 = vmul.f32 %v10567_v48, %v11645_v23  ;;  %v11704_v63 = vpop.eup %10568 }
 0x886   :  { %v1524_v50 = vsel %vm124_vm1, %v11704_v63, 0.0  ;;  %v11709_v13 = vpop.eup %10570 }
 0x887   :  { %8116 = vmatmul.msk.f32.gmra.mxu1 %vm124_vm1, %v1377_v54  ;;  %v11711_v16 = vpop.eup %10572  ;;  %v1682_v3 = vsel %vm124_vm1, %v11709_v13, 0.0 }
 0x888   :  { %v1685_v23 = vsel %vm124_vm1, %v11711_v16, 0.0 }
 0x88b   :  { %1525 = vadd.xlane.f32.xlu2 %v1524_v50 }
 0x88d   :  { %v1520_v8 = vpop.xlane.xlu2 %1519 }
 0x88e   :  { %10574 = vrcp.f32 %v1520_v8  ;;  %v8085_v8 = vld [vmem:[%s14370_s8 + $0x30] sm:$0xff] }
 0x891   :  { %1683 = vadd.xlane.f32.xlu0 %v1682_v3  ;;  %v8083_v3 = vld [vmem:[%s14370_s8 + $0x20] sm:$0xff] }
 0x893   :  { %1686 = vadd.xlane.f32.xlu2 %v1685_v23 }
 0x894   :  { %v10575_v49 = vpop.eup %10574 }
 0x895   :  { %v10336_v22 = vpop.permute.xlu1 %10335  ;;  %v1534_v5 = vmul.f32 %v10575_v49, %v11650_v46 }
 0x896   :  { %v10337_v2 = vunpack.i.l.bf16 %v10336_v22  ;;  %v10338_v36 = vunpack.i.h.bf16 %v10336_v22 }
 0x898   :  { %1576 = vmatpush.msrb.mxu3 %v10337_v2 }
 0x89a   :  { %1577 = vmatpush.msrb.mxu3 %v10338_v36  ;;  %v1523_v0 = vpop.xlane.xlu0 %1522 }
 0x89b   :  { %8127 = vmatmul.msk.f32.vlgmr.msrb.gmra.mxu3 %vm124_vm1, %v1534_v5  ;;  %10576 = vrcp.f32 %v1523_v0 }
 0x8a1   :  { %v10577_v25 = vpop.eup %10576 }
 0x8a2   :  { %v1535_v11 = vmul.f32 %v10577_v25, %v11657_v62 }
 0x8a4   :  { %8128 = vmatmul.msk.f32.gmra.mxu3 %vm124_vm1, %v1535_v11 }
 0x8af   :  { %v1263_v61 = vpop.f32.mrf.mxu3 }
 0x8b5   :  { %v1368_v41 = vpop.xlane.xlu0 %1367 }
 0x8b6   :  { %10578 = vrcp.f32 %v1368_v41 }
 0x8bc   :  { %v10579_v59 = vpop.eup %10578 }
 0x8bd   :  { %v1371_v29 = vpop.xlane.xlu2 %1370  ;;  %v1378_v56 = vmul.f32 %v10579_v59, %v11665_v10 }
 0x8be   :  { %10580 = vrcp.f32 %v1371_v29 }
 0x8bf   :  { %8117 = vmatmul.msk.f32.gmra.mxu1 %vm124_vm1, %v1378_v56 }
 0x8c4   :  { %v10581_v46 = vpop.eup %10580 }
 0x8c5   :  { %v10341_v17 = vpop.permute.xlu2 %10340  ;;  %v1379_v27 = vmul.f32 %v10581_v46, %v11670_v38 }
 0x8c6   :  { %v10342_v57 = vunpack.i.l.bf16 %v10341_v17  ;;  %v10343_v30 = vunpack.i.h.bf16 %v10341_v17  ;;  %v1678_v62 = vpop.xlane.xlu0 %1677 }
 0x8c7   :  { %8118 = vmatmul.msk.f32.gmra.mxu1 %vm124_vm1, %v1379_v27  ;;  %10582 = vrcp.f32 %v1678_v62 }
 0x8c8   :  { %1732 = vmatpush.msrb.mxu1 %v10342_v57 }
 0x8ca   :  { %1733 = vmatpush.msrb.mxu1 %v10343_v30 }
 0x8cd   :  { %v10583_v32 = vpop.eup %10582 }
 0x8ce   :  { %v1681_v35 = vpop.xlane.xlu1 %1680  ;;  %v1692_v21 = vmul.f32 %v10583_v32, %v11677_v33 }
 0x8cf   :  { %10584 = vrcp.f32 %v1681_v35 }
 0x8d2   :  { %v1266_v31 = vpop.f32.mrf.mxu3 }
 0x8d5   :  { %v10585_v38 = vpop.eup %10584 }
 0x8d6   :  { %v1693_v55 = vmul.f32 %v10585_v38, %v11682_v42  ;;  %v1529_v43 = vpop.xlane.xlu1 %1528 }
 0x8d9   :  { %v10346_v37 = vpop.permute.xlu0 %10345 }
 0x8da   :  { %v10347_v20 = vunpack.i.l.bf16 %v10346_v37  ;;  %v10348_v10 = vunpack.i.h.bf16 %v10346_v37 }
 0x8dc   :  { %1734 = vmatpush.msrb.mxu1 %v10347_v20 }
 0x8de   :  { %1735 = vmatpush.msrb.mxu1 %v10348_v10 }
 0x8df   :  { %8139 = vmatmul.msk.f32.vlgmr.msrb.gmra.mxu1 %vm124_vm1, %v1692_v21  ;;  %v10436_v21 = vld [vmem:[%s14371_s9 + $0x1] ss:$0 sm:$0xff] }
 0x8e7   :  { %8140 = vmatmul.msk.f32.gmra.mxu1 %vm124_vm1, %v1693_v55 }
 0x8e9   :  { %v1269_v18 = vpop.f32.mrf.mxu3 }
 0x8f1   :  { %v1272_v19 = vpop.f32.mrf.mxu3 }
 0x8fb   :  { %v1421_v4 = vpop.f32.mrf.mxu1 }
 0x8fc   :  { %1753 = vrot.lane.b32.xlu1 %v1421_v4, %s14380_s19 }
 0x8fe   :  { %v1526_v15 = vpop.xlane.xlu2 %1525 }
 0x8ff   :  { %10586 = vrcp.f32 %v1526_v15 }
 0x900   :  { %10588 = vrcp.f32 %v1529_v43 }
 0x904   :  { %v1424_v28 = vpop.f32.mrf.mxu1  ;;  %v1684_v7 = vpop.xlane.xlu0 %1683 }
 0x905   :  { %v10587_v33 = vpop.eup %10586  ;;  %10590 = vrcp.f32 %v1684_v7  ;;  %1755 = vrot.lane.b32.xlu1 %v1424_v28, %s14380_s19 }
 0x906   :  { %v1536_v47 = vmul.f32 %v10587_v33, %v11704_v63  ;;  %v1687_v42 = vpop.xlane.xlu2 %1686  ;;  %v10589_v12 = vpop.eup %10588 }
 0x907   :  { %10592 = vrcp.f32 %v1687_v42  ;;  %v1537_v51 = vmul.f32 %v10589_v12, %v11686_v24 }
 0x908   :  { %8129 = vmatmul.msk.f32.gmra.mxu3 %vm124_vm1, %v1536_v47 }
 0x90b   :  { %v10591_v39 = vpop.eup %10590 }
 0x90c   :  { %v1694_v1 = vmul.f32 %v10591_v39, %v11709_v13  ;;  %v8086_v13 = vld [vmem:[%s14370_s8 + $0x38] sm:$0xff] }
 0x90d   :  { %v10593_v52 = vpop.eup %10592  ;;  %1834 = vmatpush.msra.mxu2 %v8086_v13 }
 0x90e   :  { %8141 = vmatmul.msk.f32.gmra.mxu1 %vm124_vm1, %v1694_v1  ;;  %v1695_v53 = vmul.f32 %v10593_v52, %v11711_v16  ;;  %v8084_v16 = vld [vmem:[%s14370_s8 + $0x28] sm:$0xff] }
 0x90f   :  { %1835 = vmatpush.msra.mxu2 %v8085_v8 }
 0x910   :  { %8130 = vmatmul.msk.f32.gmra.mxu3 %vm124_vm1, %v1537_v51 }
 0x911   :  { %1836 = vmatpush.msra.mxu2 %v8084_v16  ;;  %v8214_v16 = vld [vmem:[%s14373_s11 + $0x80] sm:$0xf] }
 0x913   :  { %1837 = vmatpush.msra.mxu2 %v8083_v3  ;;  %v9954_v3 = vld [vmem:[%s14373_s11 + $0xbc] sm:$0xf0] }
 0x916   :  { %8142 = vmatmul.msk.f32.gmra.mxu1 %vm124_vm1, %v1695_v53 }
 0x91e   :  { %v1579_v45 = vpop.f32.mrf.mxu3 }
 0x91f   :  { %1769 = vrot.lane.b32.xlu2 %v1579_v45, %s14382_s20 }
 0x927   :  { %v1582_v9 = vpop.f32.mrf.mxu3 }
 0x928   :  { %1771 = vrot.lane.b32.xlu2 %v1582_v9, %s14382_s20 }
 0x93c   :  { %v1427_v26 = vpop.f32.mrf.mxu1 }
 0x93d   :  { %1757 = vrot.lane.b32.xlu1 %v1427_v26, %s14380_s19 }
 0x944   :  { %v1430_v14 = vpop.f32.mrf.mxu1 }
 0x945   :  { %1759 = vrot.lane.b32.xlu1 %v1430_v14, %s14380_s19  ;;  %s7997_s19 = sshll.u32 %s10811_s17, 4  ;;  %s7998_s19 = int_to_ptr.vmem [resolvable:$true] %s7997_s19 }
 0x95c   :  { %v1737_v24 = vpop.f32.mrf.mxu1 }
 0x95d   :  { %1785 = vrot.lane.b32.xlu0 %v1737_v24, %s14378_s21 }
 0x964   :  { %v1740_v48 = vpop.f32.mrf.mxu1 }
 0x965   :  { %1787 = vrot.lane.b32.xlu0 %v1740_v48, %s14378_s21 }
 0x96e   :  { %v1754_v23 = vpop.permute.xlu1 %1753 }
 0x96f   :  { %v1797_v49 = vsel %vm196_vm2, %v1263_v61, %v1754_v23  ;;  %v9946_v23 = vld [vmem:[%s14373_s11 + $0x84] sm:$0xf] }
 0x977   :  { %v1756_v0 = vpop.permute.xlu1 %1755 }
 0x978   :  { %v1798_v11 = vsel %vm196_vm2, %v1266_v31, %v1756_v0 }
 0x979   :  { %v1770_v22 = vpop.permute.xlu2 %1769 }
 0x97a   :  { %v1801_v2 = vsel %vm66_vm0, %v1797_v49, %v1770_v22  ;;  %v8215_v22 = vor.u32 %v9954_v3, %v8214_v16  ;;  %v8216_v49 = vld [vmem:[%s14373_s11 + $0xc0] sm:$0xf0] }
 0x97c   :  { %2455 = vmatpush.bf16.msra.mxu3 %v8215_v22  ;;  %v8232_v22 = vld [vmem:[%s14373_s11 + $0xd0] sm:$0xf0] }
 0x982   :  { %v1772_v25 = vpop.permute.xlu2 %1771 }
 0x983   :  { %v1802_v41 = vsel %vm66_vm0, %v1798_v11, %v1772_v25  ;;  %v9947_v25 = vld [vmem:[%s14373_s11 + $0x8c] sm:$0xf] }
 0x984   :  { %v8224_v11 = vld [vmem:[%s14373_s11 + $0xc8] sm:$0xf0] }
 0x98b   :  { %v1743_v60 = vpop.f32.mrf.mxu1  ;;  %v1585_v54 = vpop.f32.mrf.mxu3 }
 0x98c   :  { %1789 = vrot.lane.b32.xlu0 %v1743_v60, %s14378_s21  ;;  %1773 = vrot.lane.b32.xlu2 %v1585_v54, %s14382_s20 }
 0x993   :  { %v1746_v63 = vpop.f32.mrf.mxu1  ;;  %v1588_v50 = vpop.f32.mrf.mxu3 }
 0x994   :  { %1791 = vrot.lane.b32.xlu0 %v1746_v63, %s14378_s21  ;;  %1775 = vrot.lane.b32.xlu2 %v1588_v50, %s14382_s20  ;;  %s14385_s20 = smov 8   ;;  %s14386_s21 = smov 24  }
 0x9af   :  { %v1758_v56 = vpop.permute.xlu1 %1757 }
 0x9b0   :  { %v1799_v17 = vsel %vm196_vm2, %v1269_v18, %v1758_v56  ;;  %v8150_v56 = vld [vmem:[%s14373_s11] sm:$0xf] }
 0x9b7   :  { %v1760_v62 = vpop.permute.xlu1 %1759 }
 0x9b8   :  { %v1800_v37 = vsel %vm196_vm2, %v1272_v19, %v1760_v62  ;;  %v9939_v62 = vld [vmem:[%s14373_s11 + $0x44] sm:$0xf0] }
 0x9cf   :  { %v1786_v36 = vpop.permute.xlu0 %1785 }
 0x9d0   :  { %v1805_v5 = vsel %vm877_vm3, %v1801_v2, %v1786_v36  ;;  %v8222_v2 = vld [vmem:[%s14373_s11 + $0x88] sm:$0xf] }
 0x9d1   :  { %8143 = vmatmul.msk.f32.vlgmr.msra.gmra.mxu2 %vm124_vm1, %v1805_v5  ;;  %v9955_v36 = vld [vmem:[%s14373_s11 + $0xc4] sm:$0xf0]  ;;  %v8219_v5 = vor.u32 %v9946_v23, %v8216_v49  ;;  %v9948_v23 = vld [vmem:[%s14373_s11 + $0x94] sm:$0xf]  ;;  %v8166_v49 = vld [vmem:[%s14373_s11 + $0x10] sm:$0xf] }
 0x9d2   :  { %v8223_v0 = vor.u32 %v9955_v36, %v8222_v2  ;;  %v8235_v36 = vor.u32 %v9948_v23, %v8232_v22  ;;  %v9943_v23 = vld [vmem:[%s14373_s11 + $0x64] sm:$0xf0]  ;;  %v9935_v22 = vld [vmem:[%s14373_s11 + $0x2c] sm:$0xf] }
 0x9d3   :  { %2474 = vmatpush.bf16.msra.mxu0 %v8219_v5  ;;  %v9940_v5 = vld [vmem:[%s14373_s11 + $0x4c] sm:$0xf0] }
 0x9d4   :  { %2493 = vmatpush.bf16.msra.mxu1 %v8223_v0  ;;  %v8238_v0 = vld [vmem:[%s14373_s11 + $0x98] sm:$0xf] }
 0x9d7   :  { %v1788_v59 = vpop.permute.xlu0 %1787 }
 0x9d8   :  { %v1806_v29 = vsel %vm877_vm3, %v1802_v41, %v1788_v59  ;;  %v8227_v59 = vor.u32 %v9947_v25, %v8224_v11  ;;  %v9957_v25 = vld [vmem:[%s14373_s11 + $0xd4] sm:$0xf0]  ;;  %v8167_v11 = vor.u32 %v9940_v5, %v8166_v49  ;;  %v8192_v49 = vld [vmem:[%s14373_s11 + $0x68] sm:$0xf0]  ;;  %v8262_v5 = vld [vmem:[%s14373_s11 + $0xb0] sm:$0xf] }
 0x9d9   :  { %8144 = vmatmul.msk.f32.gmra.mxu2 %vm124_vm1, %v1806_v29 }
 0x9da   :  { %2512 = vmatpush.bf16.msrb.mxu2 %v8227_v59  ;;  %v9932_v59 = vld [vmem:[%s14373_s11 + $0x14] sm:$0xf] }
 0x9e6   :  { %v1774_v46 = vpop.permute.xlu2 %1773 }
 0x9e7   :  { %v1803_v27 = vsel %vm66_vm0, %v1799_v17, %v1774_v46  ;;  %v9938_v46 = vld [vmem:[%s14373_s11 + $0x3c] sm:$0xf0]  ;;  %v9930_v17 = vld [vmem:[%s14373_s11 + $0x4] sm:$0xf] }
 0x9ee   :  { %v1776_v35 = vpop.permute.xlu2 %1775 }
 0x9ef   :  { %v1804_v32 = vsel %vm66_vm0, %v1800_v37, %v1776_v35 }
 0x9fe   :  { %v1790_v57 = vpop.permute.xlu0 %1789 }
 0x9ff   :  { %v1807_v30 = vsel %vm877_vm3, %v1803_v27, %v1790_v57  ;;  %v8151_v27 = vor.u32 %v9938_v46, %v8150_v56  ;;  %v8152_v57 = vld [vmem:[%s14373_s11 + $0x40] sm:$0xf0]  ;;  %v8174_v56 = vld [vmem:[%s14373_s11 + $0x18] sm:$0xf] }
 0xa00   :  { %8145 = vmatmul.msk.f32.gmra.mxu2 %vm124_vm1, %v1807_v30  ;;  %v8158_v30 = vld [vmem:[%s14373_s11 + $0x8] sm:$0xf]  ;;  %v8155_v37 = vor.u32 %v9930_v17, %v8152_v57  ;;  %v9941_v57 = vld [vmem:[%s14373_s11 + $0x54] sm:$0xf0] }
 0xa01   :  { %2456 = vmatpush.bf16.msra.mxu3 %v8151_v27 }
 0xa02   :  { %2475 = vmatpush.bf16.msra.mxu0 %v8155_v37  ;;  %v8176_v37 = vld [vmem:[%s14373_s11 + $0x58] sm:$0xf0] }
 0xa06   :  { %v1792_v20 = vpop.permute.xlu0 %1791  ;;  %2550 = vmatpush.bf16.msrb.mxu0 %v8235_v36  ;;  %v8195_v36 = vor.u32 %v9935_v22, %v8192_v49  ;;  %v9970_v22 = vld [vmem:[%s14374_s12 + $0x40] sm:$0xff] }
 0xa07   :  { %v1808_v10 = vsel %vm877_vm3, %v1804_v32, %v1792_v20  ;;  %v8159_v32 = vor.u32 %v9939_v62, %v8158_v30  ;;  %v9931_v20 = vld [vmem:[%s14373_s11 + $0xc] sm:$0xf]  ;;  %v9933_v30 = vld [vmem:[%s14373_s11 + $0x1c] sm:$0xf]  ;;  %v9978_v49 = vld [vmem:[%s14374_s12 + $0x80] sm:$0xff] }
 0xa08   :  { %8146 = vmatmul.msk.f32.gmra.mxu2 %vm124_vm1, %v1808_v10  ;;  %v8160_v10 = vld [vmem:[%s14373_s11 + $0x48] sm:$0xf0] }
 0xa09   :  { %2494 = vmatpush.bf16.msra.mxu1 %v8159_v32  ;;  %v8179_v32 = vor.u32 %v9933_v30, %v8176_v37  ;;  %v9961_v30 = vld [vmem:[%s14373_s11 + $0xf4] sm:$0xf0]  ;;  %v9936_v37 = vld [vmem:[%s14373_s11 + $0x34] sm:$0xf] }
 0xa54   :  { %v1839_v38 = vpop.f32.mrf.mxu2 }
 0xa55   :  { %v1840_v55 = vadd.f32 %v10436_v21, %v1839_v38 }
 0xa57   :  { %v1851_v61 = vadd.f32 %v1840_v55, %v11424_v58 }
 0xa59   :  { %v1857_v4 = vsel %vm124_vm1, %v1851_v61, 0.0 }
 0xa5a   :  { %1858 = vadd.xlane.f32.xlu1 %v1857_v4 }
 0xa5c   :  { %v1842_v15 = vpop.f32.mrf.mxu2 }
 0xa5d   :  { %v1843_v43 = vadd.f32 %v10436_v21, %v1842_v15 }
 0xa5f   :  { %v1852_v31 = vadd.f32 %v1843_v43, %v11431_v44 }
 0xa61   :  { %v1860_v28 = vsel %vm124_vm1, %v1852_v31, 0.0 }
 0xa62   :  { %1861 = vadd.xlane.f32.xlu2 %v1860_v28 }
 0xa83   :  { %v1845_v7 = vpop.f32.mrf.mxu2 }
 0xa84   :  { %v1846_v33 = vadd.f32 %v10436_v21, %v1845_v7 }
 0xa86   :  { %v1853_v47 = vadd.f32 %v1846_v33, %v11442_v34 }
 0xa88   :  { %v1863_v42 = vsel %vm124_vm1, %v1853_v47, 0.0 }
 0xa89   :  { %1864 = vadd.xlane.f32.xlu0 %v1863_v42 }
 0xa8b   :  { %v1848_v12 = vpop.f32.mrf.mxu2 }
 0xa8c   :  { %v1849_v39 = vadd.f32 %v10436_v21, %v1848_v12  ;;  %v8163_v21 = vor.u32 %v9931_v20, %v8160_v10 }
 0xa8e   :  { %v1854_v58 = vadd.f32 %v1849_v39, %v11449_v40  ;;  %2513 = vmatpush.bf16.msrb.mxu2 %v8163_v21 }
 0xa90   :  { %v1866_v18 = vsel %vm124_vm1, %v1854_v58, 0.0 }
 0xa91   :  { %1867 = vadd.xlane.f32.xlu1 %v1866_v18  ;;  %v11865_v18 = vld [vmem:[%s14371_s9 + $0x4] ss:$0 sm:$0xff] }
 0xacd   :  { %v1859_v1 = vpop.xlane.xlu1 %1858 }
 0xace   :  { %v1869_v44 = vmul.f32 %v1859_v1, %v11365_v6 }
 0xad0   :  { %v11789_v51 = vsub.f32 %v1851_v61, %v1869_v44 }
 0xad2   :  { %v1877_v52 = vmul.f32 %v11789_v51, %v11789_v51 }
 0xad4   :  { %v1881_v34 = vsel %vm124_vm1, %v1877_v52, 0.0 }
 0xad5   :  { %1882 = vadd.xlane.f32.xlu2 %v1881_v34  ;;  %v1862_v53 = vpop.xlane.xlu2 %1861  ;;  %v11871_v34 = vld [vmem:[%s14371_s9 + $0x5] ss:$0 sm:$0xff] }
 0xad6   :  { %v1870_v19 = vmul.f32 %v1862_v53, %v11365_v6 }
 0xad8   :  { %v11795_v45 = vsub.f32 %v1852_v31, %v1870_v19 }
 0xada   :  { %v1878_v40 = vmul.f32 %v11795_v45, %v11795_v45 }
 0xadc   :  { %v1884_v9 = vsel %vm124_vm1, %v1878_v40, 0.0 }
 0xadd   :  { %1885 = vadd.xlane.f32.xlu0 %v1884_v9 }
 0xafc   :  { %v1865_v26 = vpop.xlane.xlu0 %1864 }
 0xafd   :  { %v1871_v14 = vmul.f32 %v1865_v26, %v11365_v6 }
 0xaff   :  { %v11801_v24 = vsub.f32 %v1853_v47, %v1871_v14 }
 0xb01   :  { %v1879_v48 = vmul.f32 %v11801_v24, %v11801_v24 }
 0xb03   :  { %v1887_v60 = vsel %vm124_vm1, %v1879_v48, 0.0 }
 0xb04   :  { %v1868_v54 = vpop.xlane.xlu1 %1867  ;;  %1888 = vadd.xlane.f32.xlu1 %v1887_v60  ;;  %v8230_v60 = vld [vmem:[%s14373_s11 + $0x90] sm:$0xf] }
 0xb05   :  { %v1872_v63 = vmul.f32 %v1868_v54, %v11365_v6  ;;  %v9956_v54 = vld [vmem:[%s14373_s11 + $0xcc] sm:$0xf0] }
 0xb07   :  { %v11807_v50 = vsub.f32 %v1854_v58, %v1872_v63  ;;  %v9949_v63 = vld [vmem:[%s14373_s11 + $0x9c] sm:$0xf] }
 0xb09   :  { %v1880_v13 = vmul.f32 %v11807_v50, %v11807_v50 }
 0xb0b   :  { %v1890_v8 = vsel %vm124_vm1, %v1880_v13, 0.0  ;;  %v8231_v13 = vor.u32 %v9956_v54, %v8230_v60  ;;  %v9959_v60 = vld [vmem:[%s14373_s11 + $0xe4] sm:$0xf0] }
 0xb0c   :  { %1891 = vadd.xlane.f32.xlu2 %v1890_v8  ;;  %v8240_v8 = vld [vmem:[%s14373_s11 + $0xd8] sm:$0xf0] }
 0xb0d   :  { %v8243_v16 = vor.u32 %v9949_v63, %v8240_v8  ;;  %2531 = vmatpush.bf16.msrb.mxu3 %v8231_v13  ;;  %v9934_v13 = vld [vmem:[%s14373_s11 + $0x24] sm:$0xf] }
 0xb0e   :  { %v8184_v8 = vld [vmem:[%s14373_s11 + $0x60] sm:$0xf0] }
 0xb0f   :  { %2588 = vmatpush.bf16.msra.mxu2 %v8243_v16  ;;  %v8190_v16 = vld [vmem:[%s14373_s11 + $0x28] sm:$0xf] }
 0xb11   :  { %2532 = vmatpush.bf16.msrb.mxu3 %v8167_v11 }
 0xb13   :  { %2589 = vmatpush.bf16.msra.mxu2 %v8179_v32  ;;  %v8200_v32 = vld [vmem:[%s14373_s11 + $0x70] sm:$0xf0] }
 0xb48   :  { %v1883_v41 = vpop.xlane.xlu2 %1882 }
 0xb49   :  { %v1893_v29 = vmul.f32 %v1883_v41, %v11365_v6  ;;  %v8239_v41 = vor.u32 %v9957_v25, %v8238_v0  ;;  %v9960_v0 = vld [vmem:[%s14373_s11 + $0xec] sm:$0xf0]  ;;  %v9953_v25 = vld [vmem:[%s14373_s11 + $0xbc] sm:$0xf] }
 0xb4a   :  { %v8263_v11 = vor.u32 %v9960_v0, %v8262_v5 }
 0xb4b   :  { %v1897_v35 = vadd.f32 1e-05, %v1893_v29  ;;  %v8168_v29 = vld [vmem:[%s14373_s11 + $0x50] sm:$0xf0]  ;;  %2569 = vmatpush.bf16.msrb.mxu1 %v8239_v41  ;;  %v8272_v41 = vld [vmem:[%s14373_s11 + $0xf8] sm:$0xf0] }
 0xb4c   :  { %v8171_v27 = vor.u32 %v9932_v59, %v8168_v29  ;;  %v8275_v59 = vor.u32 %v9953_v25, %v8272_v41  ;;  %v9952_v29 = vld [vmem:[%s14373_s11 + $0xb4] sm:$0xf]  ;;  %v10017_v41 = vld [vmem:[%s14374_s12 + $0x1b8] sm:$0xff] }
 0xb4d   :  { %10594 = vrsqrt.f32 %v1897_v35  ;;  %vm1907_vm6 = vweird.f32 %v1897_v35 }
 0xb4e   :  { %2551 = vmatpush.bf16.msrb.mxu0 %v8171_v27  ;;  %v9944_v27 = vld [vmem:[%s14373_s11 + $0x6c] sm:$0xf0] }
 0xb50   :  { %v1886_v38 = vpop.xlane.xlu0 %1885 }
 0xb51   :  { %v1894_v55 = vmul.f32 %v1886_v38, %v11365_v6 }
 0xb53   :  { %v10595_v61 = vpop.eup %10594  ;;  %v1898_v4 = vadd.f32 1e-05, %v1894_v55 }
 0xb54   :  { %v1902_v15 = vmul.f32 %v10595_v61, %v1897_v35  ;;  %vm1908_vm5 = vweird.f32 %v10595_v61  ;;  %v8175_v35 = vor.u32 %v9941_v57, %v8174_v56  ;;  %v8264_v56 = vld [vmem:[%s14373_s11 + $0xf0] sm:$0xf0]  ;;  %v8270_v57 = vld [vmem:[%s14373_s11 + $0xb8] sm:$0xf] }
 0xb55   :  { %10596 = vrsqrt.f32 %v1898_v4  ;;  %vm1909_vm7 = vmor %vm1907_vm6, %vm1908_vm5  ;;  %vm1917_vm9 = vweird.f32 %v1898_v4 }
 0xb56   :  { %v1903_v43 = vmul.f32 %v10595_v61, %v1902_v15  ;;  %2570 = vmatpush.bf16.msrb.mxu1 %v8175_v35  ;;  %v8271_v35 = vor.u32 %v9961_v30, %v8270_v57 }
 0xb58   :  { %v1904_v31 = vmul.f32 0.5, %v1903_v43 }
 0xb5a   :  { %v1905_v28 = vsub.f32 1.5, %v1904_v31  ;;  %v8246_v31 = vld [vmem:[%s14373_s11 + $0xa0] sm:$0xf] }
 0xb5b   :  { %v10597_v7 = vpop.eup %10596 }
 0xb5c   :  { %v1906_v33 = vmul.f32 %v10595_v61, %v1905_v28  ;;  %v1912_v47 = vmul.f32 %v10597_v7, %v1898_v4  ;;  %vm1918_vm8 = vweird.f32 %v10597_v7  ;;  %v9958_v28 = vld [vmem:[%s14373_s11 + $0xdc] sm:$0xf0] }
 0xb5d   :  { %vm1919_vm10 = vmor %vm1917_vm9, %vm1918_vm8 }
 0xb5e   :  { %v1913_v42 = vmul.f32 %v10597_v7, %v1912_v47  ;;  %v1910_v12 = vsel %vm1909_vm7, %v10595_v61, %v1906_v33  ;;  %v9951_v33 = vld [vmem:[%s14373_s11 + $0xac] sm:$0xf] }
 0xb5f   :  { %v1941_v1 = vmul.f32 %v1910_v12, %v11789_v51  ;;  %v8256_v47 = vld [vmem:[%s14373_s11 + $0xe8] sm:$0xf0] }
 0xb60   :  { %v1914_v39 = vmul.f32 0.5, %v1913_v42  ;;  %v8259_v12 = vor.u32 %v9951_v33, %v8256_v47  ;;  %v9976_v33 = vld [vmem:[%s14374_s12 + $0x70] sm:$0xff] }
 0xb61   :  { %v1946_v53 = vmul.f32 %v11865_v18, %v1941_v1  ;;  %v9984_v47 = vld [vmem:[%s14374_s12 + $0xb0] sm:$0xff] }
 0xb62   :  { %v1915_v58 = vsub.f32 1.5, %v1914_v39 }
 0xb63   :  { %v11877_v9 = vadd.f32 %v11871_v34, %v1946_v53 }
 0xb64   :  { %v1916_v44 = vmul.f32 %v10597_v7, %v1915_v58 }
 0xb66   :  { %v1920_v52 = vsel %vm1919_vm10, %v10597_v7, %v1916_v44  ;;  %v8247_v7 = vor.u32 %v9958_v28, %v8246_v31  ;;  %v9985_v31 = vld [vmem:[%s14374_s12 + $0xb8] sm:$0xff] }
 0xb67   :  { %v1942_v19 = vmul.f32 %v1920_v52, %v11795_v45  ;;  %v9993_v28 = vld [vmem:[%s14374_s12 + $0xf8] sm:$0xff] }
 0xb69   :  { %v1947_v40 = vmul.f32 %v11865_v18, %v1942_v19 }
 0xb6b   :  { %v11880_v51 = vadd.f32 %v11871_v34, %v1947_v40 }
 0xb6d   :  { %v11884_v26 = vpack.c.bf16 %v11880_v51, %v11877_v9 }
 0xb6f   :  { %8276 = vmatmul.msk.bf16.vlgmr.msra.gmra.mxu3 %vm124_vm1, %v11884_v26  ;;  %8278 = vmatmul.msk.bf16.vlgmr.msra.gmra.mxu0 %vm124_vm1, %v11884_v26 }
 0xb70   :  { %8280 = vmatmul.msk.bf16.vlgmr.msra.gmra.mxu1 %vm124_vm1, %v11884_v26  ;;  %8282 = vmatmul.msk.bf16.vlgmr.msrb.gmra.mxu2 %vm124_vm1, %v11884_v26 }
 0xb71   :  { %2607 = vmatpush.bf16.msra.mxu3 %v8247_v7  ;;  %2664 = vmatpush.bf16.msrb.mxu2 %v8259_v12  ;;  %v9968_v7 = vld [vmem:[%s14374_s12 + $0x30] sm:$0xff]  ;;  %v9967_v12 = vld [vmem:[%s14374_s12 + $0x28] sm:$0xff] }
 0xb75   :  { %2665 = vmatpush.bf16.msrb.mxu2 %v8195_v36 }
 0xb77   :  { %v1889_v45 = vpop.xlane.xlu1 %1888 }
 0xb78   :  { %v1895_v14 = vmul.f32 %v1889_v45, %v11365_v6 }
 0xb7a   :  { %v1899_v48 = vadd.f32 1e-05, %v1895_v14  ;;  %v9942_v14 = vld [vmem:[%s14373_s11 + $0x5c] sm:$0xf0] }
 0xb7c   :  { %10598 = vrsqrt.f32 %v1899_v48  ;;  %vm1927_vm12 = vweird.f32 %v1899_v48 }
 0xb7f   :  { %v1892_v3 = vpop.xlane.xlu2 %1891 }
 0xb80   :  { %v1896_v2 = vmul.f32 %v1892_v3, %v11365_v6  ;;  %v8187_v3 = vor.u32 %v9934_v13, %v8184_v8  ;;  %v9963_v13 = vld [vmem:[%s14374_s12 + $0x8] sm:$0xff] }
 0xb81   :  { %v9971_v8 = vld [vmem:[%s14374_s12 + $0x48] sm:$0xff] }
 0xb82   :  { %v10599_v46 = vpop.eup %10598  ;;  %v1900_v17 = vadd.f32 1e-05, %v1896_v2  ;;  %v8191_v2 = vor.u32 %v9943_v23, %v8190_v16  ;;  %v9979_v16 = vld [vmem:[%s14374_s12 + $0x88] sm:$0xff]  ;;  %v9962_v23 = vld [vmem:[%s14374_s12] sm:$0xff] }
 0xb83   :  { %v1922_v62 = vmul.f32 %v10599_v46, %v1899_v48  ;;  %vm1928_vm11 = vweird.f32 %v10599_v46  ;;  %v8254_v48 = vld [vmem:[%s14373_s11 + $0xa8] sm:$0xf] }
 0xb84   :  { %10600 = vrsqrt.f32 %v1900_v17  ;;  %vm1929_vm13 = vmor %vm1927_vm12, %vm1928_vm11  ;;  %vm1937_vm15 = vweird.f32 %v1900_v17  ;;  %v8255_v63 = vor.u32 %v9959_v60, %v8254_v48  ;;  %v9964_v48 = vld [vmem:[%s14374_s12 + $0x10] sm:$0xff] }
 0xb85   :  { %v1923_v20 = vmul.f32 %v10599_v46, %v1922_v62  ;;  %v9972_v60 = vld [vmem:[%s14374_s12 + $0x50] sm:$0xff] }
 0xb86   :  { %2645 = vmatpush.bf16.msra.mxu1 %v8255_v63  ;;  %v9988_v63 = vld [vmem:[%s14374_s12 + $0xd0] sm:$0xff] }
 0xb87   :  { %v1924_v10 = vmul.f32 0.5, %v1923_v20  ;;  %v8206_v20 = vld [vmem:[%s14373_s11 + $0x38] sm:$0xf] }
 0xb89   :  { %v1925_v21 = vsub.f32 1.5, %v1924_v10  ;;  %v8203_v10 = vor.u32 %v9936_v37, %v8200_v32  ;;  %v10015_v37 = vld [vmem:[%s14374_s12 + $0x1a8] sm:$0xff] }
 0xb8a   :  { %v10601_v38 = vpop.eup %10600  ;;  %2646 = vmatpush.bf16.msra.mxu1 %v8191_v2  ;;  %v9986_v2 = vld [vmem:[%s14374_s12 + $0xc0] sm:$0xff] }
 0xb8b   :  { %v1926_v55 = vmul.f32 %v10599_v46, %v1925_v21  ;;  %v1932_v61 = vmul.f32 %v10601_v38, %v1900_v17  ;;  %vm1938_vm14 = vweird.f32 %v10601_v38  ;;  %v8267_v17 = vor.u32 %v9952_v29, %v8264_v56  ;;  %v9945_v21 = vld [vmem:[%s14373_s11 + $0x74] sm:$0xf0]  ;;  %v12217_v29 = vld [vmem:[%s14372_s10] ss:$2 sm:$0xff] }
 0xb8c   :  { %vm1939_vm4 = vmor %vm1937_vm15, %vm1938_vm14  ;;  %v10001_v56 = vld [vmem:[%s14374_s12 + $0x138] sm:$0xff]  ;;  %v12230_v57 = vperm.slane %v12217_v29, 1  ;;  %v12233_v30 = vperm.slane %v12217_v29, 0  ;;  %v12242_v32 = vperm.slane %v12217_v29, 2 }
 0xb8d   :  { %v1933_v4 = vmul.f32 %v10601_v38, %v1932_v61  ;;  %v1930_v15 = vsel %vm1929_vm13, %v10599_v46, %v1926_v55  ;;  %v8198_v46 = vld [vmem:[%s14373_s11 + $0x30] sm:$0xf]  ;;  %v8208_v55 = vld [vmem:[%s14373_s11 + $0x78] sm:$0xf0]  ;;  %v8207_v61 = vor.u32 %v9945_v21, %v8206_v20  ;;  %v12245_v20 = vperm.slane %v12217_v29, 3 }
 0xb8e   :  { %v1943_v39 = vmul.f32 %v1930_v15, %v11801_v24  ;;  %v8199_v62 = vor.u32 %v9944_v27, %v8198_v46  ;;  %v9969_v15 = vld [vmem:[%s14374_s12 + $0x38] sm:$0xff] }
 0xb8f   :  { %v1934_v43 = vmul.f32 0.5, %v1933_v4  ;;  %v10025_v46 = vld [vmem:[%s14374_s12 + $0x1f8] sm:$0xff] }
 0xb90   :  { %v1948_v44 = vmul.f32 %v11865_v18, %v1943_v39  ;;  %v9975_v39 = vld [vmem:[%s14374_s12 + $0x68] sm:$0xff] }
 0xb91   :  { %v1935_v42 = vsub.f32 1.5, %v1934_v43  ;;  %v9977_v43 = vld [vmem:[%s14374_s12 + $0x78] sm:$0xff] }
 0xb92   :  { %v11961_v19 = vadd.f32 %v11871_v34, %v1948_v44  ;;  %v9966_v44 = vld [vmem:[%s14374_s12 + $0x20] sm:$0xff] }
 0xb93   :  { %v1936_v58 = vmul.f32 %v10601_v38, %v1935_v42  ;;  %v9992_v42 = vld [vmem:[%s14374_s12 + $0xf0] sm:$0xff] }
 0xb95   :  { %v1940_v1 = vsel %vm1939_vm4, %v10601_v38, %v1936_v58  ;;  %v9937_v38 = vld [vmem:[%s14373_s11 + $0x3c] sm:$0xf]  ;;  %v9983_v58 = vld [vmem:[%s14374_s12 + $0xa8] sm:$0xff] }
 0xb96   :  { %v1944_v52 = vmul.f32 %v1940_v1, %v11807_v50  ;;  %v9950_v50 = vld [vmem:[%s14373_s11 + $0xa4] sm:$0xf]  ;;  %v8211_v4 = vor.u32 %v9937_v38, %v8208_v55  ;;  %v9991_v1 = vld [vmem:[%s14374_s12 + $0xe8] sm:$0xff]  ;;  %v10000_v38 = vld [vmem:[%s14374_s12 + $0x130] sm:$0xff] }
 0xb97   :  { %v10024_v55 = vld [vmem:[%s14374_s12 + $0x1f0] sm:$0xff] }
 0xb98   :  { %v1949_v53 = vmul.f32 %v11865_v18, %v1944_v52  ;;  %v8248_v18 = vld [vmem:[%s14373_s11 + $0xe0] sm:$0xf0] }
 0xb99   :  { %v8251_v45 = vor.u32 %v9950_v50, %v8248_v18  ;;  %v9974_v52 = vld [vmem:[%s14374_s12 + $0x60] sm:$0xff]  ;;  %v9965_v18 = vld [vmem:[%s14374_s12 + $0x18] sm:$0xff] }
 0xb9a   :  { %v11964_v40 = vadd.f32 %v11871_v34, %v1949_v53  ;;  %v8182_v34 = vld [vmem:[%s14373_s11 + $0x20] sm:$0xf] }
 0xb9b   :  { %v8183_v54 = vor.u32 %v9942_v14, %v8182_v34  ;;  %2626 = vmatpush.bf16.msra.mxu0 %v8251_v45  ;;  %v9982_v53 = vld [vmem:[%s14374_s12 + $0xa0] sm:$0xff]  ;;  %v9973_v34 = vld [vmem:[%s14374_s12 + $0x58] sm:$0xff] }
 0xb9c   :  { %v11968_v24 = vpack.c.bf16 %v11964_v40, %v11961_v19  ;;  %v9990_v50 = vld [vmem:[%s14374_s12 + $0xe0] sm:$0xff]  ;;  %v9981_v45 = vld [vmem:[%s14374_s12 + $0x98] sm:$0xff] }
 0xb9d   :  { %2608 = vmatpush.bf16.msra.mxu3 %v8183_v54  ;;  %v9989_v14 = vld [vmem:[%s14374_s12 + $0xd8] sm:$0xff]  ;;  %v9980_v54 = vld [vmem:[%s14374_s12 + $0x90] sm:$0xff] }
 0xb9e   :  { %8277 = vmatmul.msk.bf16.gmra.mxu3 %vm124_vm1, %v11968_v24  ;;  %8279 = vmatmul.msk.bf16.gmra.mxu0 %vm124_vm1, %v11968_v24 }
 0xb9f   :  { %8281 = vmatmul.msk.bf16.gmra.mxu1 %vm124_vm1, %v11968_v24  ;;  %8283 = vmatmul.msk.bf16.gmra.mxu2 %vm124_vm1, %v11968_v24 }
 0xba0   :  { %2627 = vmatpush.bf16.msra.mxu0 %v8187_v3  ;;  %v9987_v3 = vld [vmem:[%s14374_s12 + $0xc8] sm:$0xff] }
 0xbae   :  { %8284 = vmatmul.msk.bf16.vlgmr.msrb.gmra.mxu3 %vm124_vm1, %v11884_v26  ;;  %8286 = vmatmul.msk.bf16.vlgmr.msrb.gmra.mxu0 %vm124_vm1, %v11884_v26 }
 0xbaf   :  { %8288 = vmatmul.msk.bf16.vlgmr.msrb.gmra.mxu1 %vm124_vm1, %v11884_v26  ;;  %8290 = vmatmul.msk.bf16.vlgmr.msra.gmra.mxu2 %vm124_vm1, %v11884_v26 }
 0xbb0   :  { %2683 = vmatpush.bf16.msrb.mxu3 %v8263_v11  ;;  %2740 = vmatpush.bf16.msra.mxu2 %v8275_v59  ;;  %v10009_v11 = vld [vmem:[%s14374_s12 + $0x178] sm:$0xff]  ;;  %v10016_v59 = vld [vmem:[%s14374_s12 + $0x1b0] sm:$0xff] }
 0xbb1   :  { %2702 = vmatpush.bf16.msrb.mxu0 %v8267_v17  ;;  %2721 = vmatpush.bf16.msrb.mxu1 %v8271_v35  ;;  %v10007_v35 = vld [vmem:[%s14374_s12 + $0x168] sm:$0xff] }
 0xbb4   :  { %2684 = vmatpush.bf16.msrb.mxu3 %v8199_v62  ;;  %2741 = vmatpush.bf16.msra.mxu2 %v8211_v4 }
 0xbb5   :  { %2703 = vmatpush.bf16.msrb.mxu0 %v8203_v10  ;;  %2722 = vmatpush.bf16.msrb.mxu1 %v8207_v61 }
 0xbbe   :  { %8285 = vmatmul.msk.bf16.gmra.mxu3 %vm124_vm1, %v11968_v24  ;;  %8287 = vmatmul.msk.bf16.gmra.mxu0 %vm124_vm1, %v11968_v24 }
 0xbbf   :  { %8289 = vmatmul.msk.bf16.gmra.mxu1 %vm124_vm1, %v11968_v24  ;;  %8291 = vmatmul.msk.bf16.gmra.mxu2 %vm124_vm1, %v11968_v24 }
 0xbce   :  { %8292 = vmatmul.msk.bf16.vlgmr.msra.gmra.mxu3 %vm124_vm1, %v11884_v26  ;;  %8294 = vmatmul.msk.bf16.vlgmr.msra.gmra.mxu0 %vm124_vm1, %v11884_v26 }
 0xbcf   :  { %8296 = vmatmul.msk.bf16.vlgmr.msra.gmra.mxu1 %vm124_vm1, %v11884_v26  ;;  %8298 = vmatmul.msk.bf16.vlgmr.msrb.gmra.mxu2 %vm124_vm1, %v11884_v26 }
 0xbd0   :  { %3618 = vmatpush.bf16.msra.mxu3 %v9969_v15  ;;  %3637 = vmatpush.bf16.msra.mxu0 %v9977_v43 }
 0xbd1   :  { %3656 = vmatpush.bf16.msra.mxu1 %v9985_v31  ;;  %3675 = vmatpush.bf16.msrb.mxu2 %v9993_v28  ;;  %v10006_v31 = vld [vmem:[%s14374_s12 + $0x160] sm:$0xff] }
 0xbd2   :  { %v10014_v28 = vld [vmem:[%s14374_s12 + $0x1a0] sm:$0xff] }
 0xbd4   :  { %3619 = vmatpush.bf16.msra.mxu3 %v9968_v7  ;;  %3638 = vmatpush.bf16.msra.mxu0 %v9976_v33 }
 0xbd5   :  { %3657 = vmatpush.bf16.msra.mxu1 %v9984_v47  ;;  %3676 = vmatpush.bf16.msrb.mxu2 %v9992_v42 }
 0xbd8   :  { %3620 = vmatpush.bf16.msra.mxu3 %v9967_v12  ;;  %3639 = vmatpush.bf16.msra.mxu0 %v9975_v39  ;;  %v9999_v12 = vld [vmem:[%s14374_s12 + $0x128] sm:$0xff] }
 0xbd9   :  { %3658 = vmatpush.bf16.msra.mxu1 %v9983_v58  ;;  %3677 = vmatpush.bf16.msrb.mxu2 %v9991_v1  ;;  %v10023_v39 = vld [vmem:[%s14374_s12 + $0x1e8] sm:$0xff] }
 0xbdc   :  { %3621 = vmatpush.bf16.msra.mxu3 %v9966_v44  ;;  %3640 = vmatpush.bf16.msra.mxu0 %v9974_v52 }
 0xbdd   :  { %3659 = vmatpush.bf16.msra.mxu1 %v9982_v53  ;;  %3678 = vmatpush.bf16.msrb.mxu2 %v9990_v50  ;;  %v10005_v53 = vld [vmem:[%s14374_s12 + $0x158] sm:$0xff] }
 0xbde   :  { %8293 = vmatmul.msk.bf16.gmra.mxu3 %vm124_vm1, %v11968_v24  ;;  %8295 = vmatmul.msk.bf16.gmra.mxu0 %vm124_vm1, %v11968_v24  ;;  %v10013_v50 = vld [vmem:[%s14374_s12 + $0x198] sm:$0xff] }
 0xbdf   :  { %8297 = vmatmul.msk.bf16.gmra.mxu1 %vm124_vm1, %v11968_v24  ;;  %8299 = vmatmul.msk.bf16.gmra.mxu2 %vm124_vm1, %v11968_v24 }
 0xbe0   :  { %3622 = vmatpush.bf16.msra.mxu3 %v9965_v18  ;;  %3641 = vmatpush.bf16.msra.mxu0 %v9973_v34 }
 0xbe1   :  { %3660 = vmatpush.bf16.msra.mxu1 %v9981_v45  ;;  %3679 = vmatpush.bf16.msrb.mxu2 %v9989_v14 }
 0xbe4   :  { %3623 = vmatpush.bf16.msra.mxu3 %v9964_v48  ;;  %3642 = vmatpush.bf16.msra.mxu0 %v9972_v60  ;;  %v9998_v48 = vld [vmem:[%s14374_s12 + $0x120] sm:$0xff] }
 0xbe5   :  { %3661 = vmatpush.bf16.msra.mxu1 %v9980_v54  ;;  %3680 = vmatpush.bf16.msrb.mxu2 %v9988_v63  ;;  %v10022_v60 = vld [vmem:[%s14374_s12 + $0x1e0] sm:$0xff] }
 0xbe8   :  { %3624 = vmatpush.bf16.msra.mxu3 %v9963_v13  ;;  %3643 = vmatpush.bf16.msra.mxu0 %v9971_v8  ;;  %v10004_v13 = vld [vmem:[%s14374_s12 + $0x150] sm:$0xff] }
 0xbe9   :  { %3662 = vmatpush.bf16.msra.mxu1 %v9979_v16  ;;  %3681 = vmatpush.bf16.msrb.mxu2 %v9987_v3  ;;  %v10012_v8 = vld [vmem:[%s14374_s12 + $0x190] sm:$0xff]  ;;  %v9997_v16 = vld [vmem:[%s14374_s12 + $0x118] sm:$0xff] }
 0xbea   :  { %v10021_v3 = vld [vmem:[%s14374_s12 + $0x1d8] sm:$0xff] }
 0xbec   :  { %3625 = vmatpush.bf16.msra.mxu3 %v9962_v23  ;;  %3644 = vmatpush.bf16.msra.mxu0 %v9970_v22  ;;  %v2477_v36 = vpop.f32.mrf.mxu0  ;;  %v10003_v23 = vld [vmem:[%s14374_s12 + $0x148] sm:$0xff] }
 0xbed   :  { %3663 = vmatpush.bf16.msra.mxu1 %v9978_v49  ;;  %3682 = vmatpush.bf16.msrb.mxu2 %v9986_v2  ;;  %v2496_v0 = vpop.f32.mrf.mxu1  ;;  %v2478_v15 = vadd.f32 %v2477_v36, %v12230_v57  ;;  %v10011_v22 = vld [vmem:[%s14374_s12 + $0x188] sm:$0xff]  ;;  %v9996_v49 = vld [vmem:[%s14374_s12 + $0x110] sm:$0xff]  ;;  %v10002_v36 = vld [vmem:[%s14374_s12 + $0x140] sm:$0xff] }
 0xbee   :  { %8300 = vmatmul.msk.bf16.vlgmr.msrb.gmra.mxu3 %vm124_vm1, %v11884_v26  ;;  %8302 = vmatmul.msk.bf16.vlgmr.msrb.gmra.mxu0 %vm124_vm1, %v11884_v26  ;;  %v2497_v7 = vadd.f32 %v2496_v0, %v12242_v32  ;;  %v10020_v2 = vld [vmem:[%s14374_s12 + $0x1d0] sm:$0xff]  ;;  %v9995_v0 = vld [vmem:[%s14374_s12 + $0x108] sm:$0xff] }
 0xbef   :  { %8304 = vmatmul.msk.bf16.vlgmr.msrb.gmra.mxu1 %vm124_vm1, %v11884_v26  ;;  %8306 = vmatmul.msk.bf16.vlgmr.msra.gmra.mxu2 %vm124_vm1, %v11884_v26  ;;  %v10008_v26 = vld [vmem:[%s14374_s12 + $0x170] sm:$0xff]  ;;  %v2754_v44 = vmax.f32 %v2478_v15, 0.0 }
 0xbf0   :  { %3713 = vmatpush.bf16.msrb.mxu0 %v10009_v11  ;;  %3694 = vmatpush.bf16.msrb.mxu3 %v10001_v56  ;;  %v2755_v18 = vmax.f32 %v2497_v7, 0.0  ;;  %v10041_v11 = vld [vmem:[%s14374_s12 + $0x278] sm:$0xff]  ;;  %v9994_v56 = vld [vmem:[%s14374_s12 + $0x100] sm:$0xff] }
 0xbf1   :  { %3732 = vmatpush.bf16.msrb.mxu1 %v10017_v41  ;;  %3751 = vmatpush.bf16.msra.mxu2 %v10025_v46  ;;  %v10049_v41 = vld [vmem:[%s14374_s12 + $0x2b8] sm:$0xff]  ;;  %v10018_v46 = vld [vmem:[%s14374_s12 + $0x1c0] sm:$0xff] }
 0xbf2   :  { %v2458_v5 = vpop.f32.mrf.mxu3 }
 0xbf3   :  { %v2515_v25 = vpop.f32.mrf.mxu2  ;;  %v2459_v43 = vadd.f32 %v2458_v5, %v12233_v30  ;;  %v10010_v5 = vld [vmem:[%s14374_s12 + $0x180] sm:$0xff] }
 0xbf4   :  { %3714 = vmatpush.bf16.msrb.mxu0 %v10008_v26  ;;  %v2479_v17 = vpop.f32.mrf.mxu0  ;;  %3695 = vmatpush.bf16.msrb.mxu3 %v10000_v38  ;;  %v2516_v33 = vadd.f32 %v2515_v25, %v12245_v20  ;;  %v10019_v25 = vld [vmem:[%s14374_s12 + $0x1c8] sm:$0xff] }
 0xbf5   :  { %3733 = vmatpush.bf16.msrb.mxu1 %v10016_v59  ;;  %v2498_v62 = vpop.f32.mrf.mxu1  ;;  %v2480_v10 = vadd.f32 %v2479_v17, %v12230_v57  ;;  %3752 = vmatpush.bf16.msra.mxu2 %v10024_v55  ;;  %v2753_v52 = vmax.f32 %v2459_v43, 0.0  ;;  %v10040_v17 = vld [vmem:[%s14374_s12 + $0x270] sm:$0xff]  ;;  %v10047_v38 = vld [vmem:[%s14374_s12 + $0x2a8] sm:$0xff] }
 0xbf6   :  { %v2499_v61 = vadd.f32 %v2498_v62, %v12242_v32  ;;  %v2756_v34 = vmax.f32 %v2516_v33, 0.0  ;;  %v10033_v62 = vld [vmem:[%s14374_s12 + $0x238] sm:$0xff]  ;;  %v10032_v43 = vld [vmem:[%s14374_s12 + $0x230] sm:$0xff] }
 0xbf7   :  { %v2770_v47 = vmax.f32 %v2480_v10, 0.0 }
 0xbf8   :  { %3715 = vmatpush.bf16.msrb.mxu0 %v10007_v35  ;;  %v2771_v58 = vmax.f32 %v2499_v61, 0.0  ;;  %3696 = vmatpush.bf16.msrb.mxu3 %v9999_v12 }
 0xbf9   :  { %3734 = vmatpush.bf16.msrb.mxu1 %v10015_v37  ;;  %3753 = vmatpush.bf16.msra.mxu2 %v10023_v39  ;;  %v2818_v45 = vpack.c.bf16 %v2770_v47, %v2754_v44  ;;  %v10046_v47 = vld [vmem:[%s14374_s12 + $0x2a0] sm:$0xff] }
 0xbfa   :  { %v2460_v27 = vpop.f32.mrf.mxu3  ;;  %v2819_v54 = vpack.c.bf16 %v2771_v58, %v2755_v18 }
 0xbfb   :  { %v2461_v21 = vadd.f32 %v2460_v27, %v12233_v30  ;;  %v10048_v27 = vld [vmem:[%s14374_s12 + $0x2b0] sm:$0xff] }
 0xbfc   :  { %3716 = vmatpush.bf16.msrb.mxu0 %v10006_v31  ;;  %3697 = vmatpush.bf16.msrb.mxu3 %v9998_v48  ;;  %v10056_v31 = vld [vmem:[%s14374_s12 + $0x2f0] sm:$0xff] }
 0xbfd   :  { %v2769_v42 = vmax.f32 %v2461_v21, 0.0  ;;  %3735 = vmatpush.bf16.msrb.mxu1 %v10014_v28  ;;  %3754 = vmatpush.bf16.msra.mxu2 %v10022_v60  ;;  %v10039_v21 = vld [vmem:[%s14374_s12 + $0x268] sm:$0xff] }
 0xbfe   :  { %8301 = vmatmul.msk.bf16.gmra.mxu3 %vm124_vm1, %v11968_v24  ;;  %8303 = vmatmul.msk.bf16.gmra.mxu0 %vm124_vm1, %v11968_v24 }
 0xbff   :  { %8305 = vmatmul.msk.bf16.gmra.mxu1 %vm124_vm1, %v11968_v24  ;;  %8307 = vmatmul.msk.bf16.gmra.mxu2 %vm124_vm1, %v11968_v24  ;;  %v2517_v24 = vpop.f32.mrf.mxu2  ;;  %v2817_v14 = vpack.c.bf16 %v2769_v42, %v2753_v52 }
 0xc00   :  { %v2518_v4 = vadd.f32 %v2517_v24, %v12245_v20  ;;  %3717 = vmatpush.bf16.msrb.mxu0 %v10005_v53  ;;  %3698 = vmatpush.bf16.msrb.mxu3 %v9997_v16  ;;  %v10057_v24 = vld [vmem:[%s14374_s12 + $0x2f8] sm:$0xff] }
 0xc01   :  { %3736 = vmatpush.bf16.msrb.mxu1 %v10013_v50  ;;  %3755 = vmatpush.bf16.msra.mxu2 %v10021_v3 }
 0xc02   :  { %v2772_v1 = vmax.f32 %v2518_v4, 0.0 }
 0xc04   :  { %v2820_v63 = vpack.c.bf16 %v2772_v1, %v2756_v34  ;;  %3718 = vmatpush.bf16.msrb.mxu0 %v10004_v13  ;;  %3699 = vmatpush.bf16.msrb.mxu3 %v9996_v49  ;;  %v10055_v1 = vld [vmem:[%s14374_s12 + $0x2e8] sm:$0xff]  ;;  %v10037_v34 = vld [vmem:[%s14374_s12 + $0x258] sm:$0xff]  ;;  %v10054_v13 = vld [vmem:[%s14374_s12 + $0x2e0] sm:$0xff]  ;;  %v12399_v49 = vperm.slane %v12217_v29, 6 }
 0xc05   :  { %3737 = vmatpush.bf16.msrb.mxu1 %v10012_v8  ;;  %3756 = vmatpush.bf16.msra.mxu2 %v10020_v2 }
 0xc08   :  { %3719 = vmatpush.bf16.msrb.mxu0 %v10003_v23  ;;  %3700 = vmatpush.bf16.msrb.mxu3 %v9995_v0  ;;  %v10036_v23 = vld [vmem:[%s14374_s12 + $0x250] sm:$0xff] }
 0xc09   :  { %3738 = vmatpush.bf16.msrb.mxu1 %v10011_v22  ;;  %3757 = vmatpush.bf16.msra.mxu2 %v10019_v25  ;;  %v10044_v22 = vld [vmem:[%s14374_s12 + $0x290] sm:$0xff] }
 0xc0c   :  { %3720 = vmatpush.bf16.msrb.mxu0 %v10002_v36  ;;  %3701 = vmatpush.bf16.msrb.mxu3 %v9994_v56  ;;  %v10029_v36 = vld [vmem:[%s14374_s12 + $0x218] sm:$0xff] }
 0xc0d   :  { %3739 = vmatpush.bf16.msrb.mxu1 %v10010_v5  ;;  %3758 = vmatpush.bf16.msra.mxu2 %v10018_v46  ;;  %v10053_v5 = vld [vmem:[%s14374_s12 + $0x2d8] sm:$0xff]  ;;  %v12416_v46 = vperm.slane %v12217_v29, 4 }
 0xc0e   :  { %3626 = vmatmul.bf16.vlgmr.msra.gmra.mxu3 %v2817_v14  ;;  %3645 = vmatmul.bf16.vlgmr.msra.gmra.mxu0 %v2818_v45  ;;  %v10045_v45 = vld [vmem:[%s14374_s12 + $0x298] sm:$0xff] }
 0xc0f   :  { %3664 = vmatmul.bf16.vlgmr.msra.gmra.mxu1 %v2819_v54  ;;  %3683 = vmatmul.bf16.vlgmr.msrb.gmra.mxu2 %v2820_v63 }
 0xc10   :  { %3789 = vmatpush.bf16.msra.mxu0 %v10041_v11  ;;  %3770 = vmatpush.bf16.msra.mxu3 %v10033_v62  ;;  %v10028_v62 = vld [vmem:[%s14374_s12 + $0x210] sm:$0xff] }
 0xc11   :  { %3808 = vmatpush.bf16.msra.mxu1 %v10049_v41  ;;  %3827 = vmatpush.bf16.msrb.mxu2 %v10057_v24  ;;  %v10035_v41 = vld [vmem:[%s14374_s12 + $0x248] sm:$0xff]  ;;  %v10052_v24 = vld [vmem:[%s14374_s12 + $0x2d0] sm:$0xff] }
 0xc14   :  { %3790 = vmatpush.bf16.msra.mxu0 %v10040_v17  ;;  %3771 = vmatpush.bf16.msra.mxu3 %v10032_v43  ;;  %v10027_v43 = vld [vmem:[%s14374_s12 + $0x208] sm:$0xff] }
 0xc15   :  { %3809 = vmatpush.bf16.msra.mxu1 %v10048_v27  ;;  %3828 = vmatpush.bf16.msrb.mxu2 %v10056_v31  ;;  %v10051_v31 = vld [vmem:[%s14374_s12 + $0x2c8] sm:$0xff] }
 0xc18   :  { %3791 = vmatpush.bf16.msra.mxu0 %v10039_v21 }
 0xc19   :  { %3810 = vmatpush.bf16.msra.mxu1 %v10047_v38  ;;  %3829 = vmatpush.bf16.msrb.mxu2 %v10055_v1  ;;  %v10034_v38 = vld [vmem:[%s14374_s12 + $0x240] sm:$0xff] }
 0xc1b   :  { %v2482_v26 = vpop.f32.mrf.mxu0 }
 0xc1c   :  { %v2501_v59 = vpop.f32.mrf.mxu1  ;;  %v2483_v37 = vadd.f32 %v2482_v26, %v12230_v57  ;;  %v10043_v26 = vld [vmem:[%s14374_s12 + $0x288] sm:$0xff] }
 0xc1d   :  { %v2502_v55 = vadd.f32 %v2501_v59, %v12242_v32  ;;  %3811 = vmatpush.bf16.msra.mxu1 %v10046_v47  ;;  %3830 = vmatpush.bf16.msrb.mxu2 %v10054_v13 }
 0xc1e   :  { %v2786_v7 = vmax.f32 %v2483_v37, 0.0 }
 0xc1f   :  { %v2787_v42 = vmax.f32 %v2502_v55, 0.0  ;;  %v10042_v55 = vld [vmem:[%s14374_s12 + $0x280] sm:$0xff] }
 0xc21   :  { %v2463_v35 = vpop.f32.mrf.mxu3  ;;  %3812 = vmatpush.bf16.msra.mxu1 %v10045_v45  ;;  %3831 = vmatpush.bf16.msrb.mxu2 %v10053_v5  ;;  %v10072_v45 = vld [vmem:[%s14374_s12 + $0x370] sm:$0xff] }
 0xc22   :  { %v2520_v10 = vpop.f32.mrf.mxu2  ;;  %v2464_v39 = vadd.f32 %v2463_v35, %v12233_v30  ;;  %v12426_v35 = vperm.slane %v12217_v29, 7  ;;  %v10088_v5 = vld [vmem:[%s14374_s12 + $0x3f0] sm:$0xff] }
 0xc23   :  { %v2484_v61 = vpop.f32.mrf.mxu0  ;;  %v2521_v44 = vadd.f32 %v2520_v10, %v12245_v20 }
 0xc24   :  { %v2485_v4 = vadd.f32 %v2484_v61, %v12230_v57  ;;  %v2503_v15 = vpop.f32.mrf.mxu1  ;;  %v10038_v57 = vld [vmem:[%s14374_s12 + $0x260] sm:$0xff]  ;;  %v2785_v60 = vmax.f32 %v2464_v39, 0.0 }
 0xc25   :  { %v2504_v28 = vadd.f32 %v2503_v15, %v12242_v32  ;;  %v10031_v32 = vld [vmem:[%s14374_s12 + $0x228] sm:$0xff]  ;;  %3792 = vmatpush.bf16.msra.mxu0 %v10038_v57  ;;  %v2788_v8 = vmax.f32 %v2521_v44, 0.0  ;;  %3813 = vmatpush.bf16.msra.mxu1 %v10044_v22 }
 0xc26   :  { %v2802_v33 = vmax.f32 %v2485_v4, 0.0  ;;  %3772 = vmatpush.bf16.msra.mxu3 %v10031_v32  ;;  %3832 = vmatpush.bf16.msrb.mxu2 %v10052_v24 }
 0xc27   :  { %v2803_v12 = vmax.f32 %v2504_v28, 0.0 }
 0xc28   :  { %v2834_v58 = vpack.c.bf16 %v2802_v33, %v2786_v7 }
 0xc29   :  { %v2465_v52 = vpop.f32.mrf.mxu3  ;;  %v2835_v53 = vpack.c.bf16 %v2803_v12, %v2787_v42  ;;  %3793 = vmatpush.bf16.msra.mxu0 %v10037_v34  ;;  %3814 = vmatpush.bf16.msra.mxu1 %v10043_v26  ;;  %v10073_v42 = vld [vmem:[%s14374_s12 + $0x378] sm:$0xff] }
 0xc2a   :  { %v2466_v50 = vadd.f32 %v2465_v52, %v12233_v30  ;;  %v2522_v18 = vpop.f32.mrf.mxu2  ;;  %3650 = vmatmul.bf16.gmra.mxu0 %v2834_v58  ;;  %v10030_v30 = vld [vmem:[%s14374_s12 + $0x220] sm:$0xff]  ;;  %v10081_v12 = vld [vmem:[%s14374_s12 + $0x3b8] sm:$0xff]  ;;  %3833 = vmatpush.bf16.msrb.mxu2 %v10051_v31 }
 0xc2b   :  { %v2523_v14 = vadd.f32 %v2522_v18, %v12245_v20  ;;  %3669 = vmatmul.bf16.gmra.mxu1 %v2835_v53  ;;  %v2553_v48 = vpop.f32.mrf.mxu0  ;;  %v12390_v20 = vperm.slane %v12217_v29, 5  ;;  %3773 = vmatpush.bf16.msra.mxu3 %v10030_v30  ;;  %v10026_v52 = vld [vmem:[%s14374_s12 + $0x200] sm:$0xff] }
 0xc2c   :  { %v2801_v54 = vmax.f32 %v2466_v50, 0.0  ;;  %v2572_v63 = vpop.f32.mrf.mxu1  ;;  %v10050_v53 = vld [vmem:[%s14374_s12 + $0x2c0] sm:$0xff] }
 0xc2d   :  { %v2804_v16 = vmax.f32 %v2523_v14, 0.0  ;;  %3794 = vmatpush.bf16.msra.mxu0 %v10036_v23  ;;  %v2554_v25 = vadd.f32 %v2553_v48, %v12390_v20  ;;  %v2573_v59 = vadd.f32 %v2572_v63, %v12399_v49  ;;  %3815 = vmatpush.bf16.msra.mxu1 %v10042_v55  ;;  %v10080_v14 = vld [vmem:[%s14374_s12 + $0x3b0] sm:$0xff]  ;;  %v10077_v55 = vld [vmem:[%s14374_s12 + $0x398] sm:$0xff]  ;;  %v10062_v31 = vld [vmem:[%s14374_s12 + $0x320] sm:$0xff] }
 0xc2e   :  { %v2833_v3 = vpack.c.bf16 %v2801_v54, %v2785_v60  ;;  %3834 = vmatpush.bf16.msrb.mxu2 %v10050_v53  ;;  %v10065_v60 = vld [vmem:[%s14374_s12 + $0x338] sm:$0xff]  ;;  %v10067_v53 = vld [vmem:[%s14374_s12 + $0x348] sm:$0xff] }
 0xc2f   :  { %v2836_v2 = vpack.c.bf16 %v2804_v16, %v2788_v8  ;;  %3774 = vmatpush.bf16.msra.mxu3 %v10029_v36  ;;  %v2758_v10 = vmax.f32 %v2554_v25, 0.0  ;;  %v2759_v61 = vmax.f32 %v2573_v59, 0.0  ;;  %v10089_v54 = vld [vmem:[%s14374_s12 + $0x3f8] sm:$0xff]  ;;  %v10071_v8 = vld [vmem:[%s14374_s12 + $0x368] sm:$0xff]  ;;  %v10064_v36 = vld [vmem:[%s14374_s12 + $0x330] sm:$0xff] }
 0xc30   :  { %3631 = vmatmul.bf16.gmra.mxu3 %v2833_v3  ;;  %v10079_v16 = vld [vmem:[%s14374_s12 + $0x3a8] sm:$0xff] }
 0xc31   :  { %3688 = vmatmul.bf16.gmra.mxu2 %v2836_v2  ;;  %v2534_v0 = vpop.f32.mrf.mxu3  ;;  %3795 = vmatpush.bf16.msra.mxu0 %v10035_v41  ;;  %v10078_v41 = vld [vmem:[%s14374_s12 + $0x3a0] sm:$0xff] }
 0xc32   :  { %v2591_v11 = vpop.f32.mrf.mxu2  ;;  %v2535_v29 = vadd.f32 %v2534_v0, %v12416_v46 }
 0xc33   :  { %v2555_v56 = vpop.f32.mrf.mxu0  ;;  %3775 = vmatpush.bf16.msra.mxu3 %v10028_v62  ;;  %v2592_v28 = vadd.f32 %v2591_v11, %v12426_v35 }
 0xc34   :  { %v2556_v17 = vadd.f32 %v2555_v56, %v12390_v20  ;;  %v2574_v27 = vpop.f32.mrf.mxu1  ;;  %v2757_v32 = vmax.f32 %v2535_v29, 0.0 }
 0xc35   :  { %v2575_v37 = vadd.f32 %v2574_v27, %v12399_v49  ;;  %3796 = vmatpush.bf16.msra.mxu0 %v10034_v38  ;;  %v2760_v50 = vmax.f32 %v2592_v28, 0.0  ;;  %v10087_v27 = vld [vmem:[%s14374_s12 + $0x3e8] sm:$0xff]  ;;  %v10069_v38 = vld [vmem:[%s14374_s12 + $0x358] sm:$0xff] }
 0xc36   :  { %v2774_v21 = vmax.f32 %v2556_v17, 0.0 }
 0xc37   :  { %v2775_v4 = vmax.f32 %v2575_v37, 0.0  ;;  %3776 = vmatpush.bf16.msra.mxu3 %v10027_v43 }
 0xc38   :  { %v2822_v15 = vpack.c.bf16 %v2774_v21, %v2758_v10 }
 0xc39   :  { %v2823_v7 = vpack.c.bf16 %v2775_v4, %v2759_v61  ;;  %v2536_v33 = vpop.f32.mrf.mxu3  ;;  %v12510_v4 = vld [vmem:[%s14372_s10 + $0x10] ss:$2 sm:$0xff] }
 0xc3a   :  { %v2537_v57 = vadd.f32 %v2536_v33, %v12416_v46  ;;  %v2593_v47 = vpop.f32.mrf.mxu2  ;;  %3721 = vmatmul.bf16.vlgmr.msrb.gmra.mxu0 %v2822_v15  ;;  %v12519_v33 = vperm.slane %v12510_v4, 1 }
 0xc3b   :  { %v2594_v39 = vadd.f32 %v2593_v47, %v12426_v35  ;;  %3740 = vmatmul.bf16.vlgmr.msrb.gmra.mxu1 %v2823_v7  ;;  %v2558_v58 = vpop.f32.mrf.mxu0  ;;  %3865 = vmatpush.bf16.msrb.mxu0 %v10073_v42  ;;  %v10068_v47 = vld [vmem:[%s14374_s12 + $0x350] sm:$0xff] }
 0xc3c   :  { %v2773_v1 = vmax.f32 %v2537_v57, 0.0  ;;  %v2577_v44 = vpop.f32.mrf.mxu1  ;;  %3884 = vmatpush.bf16.msrb.mxu1 %v10081_v12  ;;  %3777 = vmatpush.bf16.msra.mxu3 %v10026_v52  ;;  %v2559_v30 = vadd.f32 %v2558_v58, %v12390_v20  ;;  %v10076_v42 = vld [vmem:[%s14374_s12 + $0x390] sm:$0xff]  ;;  %v12528_v12 = vperm.slane %v12510_v4, 2  ;;  %v10061_v58 = vld [vmem:[%s14374_s12 + $0x318] sm:$0xff] }
 0xc3d   :  { %v2776_v18 = vmax.f32 %v2594_v39, 0.0  ;;  %v2578_v3 = vadd.f32 %v2577_v44, %v12399_v49 }
 0xc3e   :  { %v2821_v34 = vpack.c.bf16 %v2773_v1, %v2757_v32  ;;  %v2790_v25 = vmax.f32 %v2559_v30, 0.0  ;;  %v10085_v32 = vld [vmem:[%s14374_s12 + $0x3d8] sm:$0xff] }
 0xc3f   :  { %v2824_v48 = vpack.c.bf16 %v2776_v18, %v2760_v50  ;;  %3866 = vmatpush.bf16.msrb.mxu0 %v10072_v45  ;;  %v2791_v26 = vmax.f32 %v2578_v3, 0.0  ;;  %v10075_v50 = vld [vmem:[%s14374_s12 + $0x388] sm:$0xff]  ;;  %v12545_v45 = vperm.slane %v12510_v4, 0  ;;  %v10074_v3 = vld [vmem:[%s14374_s12 + $0x380] sm:$0xff] }
 0xc40   :  { %3702 = vmatmul.bf16.vlgmr.msrb.gmra.mxu3 %v2821_v34  ;;  %3885 = vmatpush.bf16.msrb.mxu1 %v10080_v14 }
 0xc41   :  { %3759 = vmatmul.bf16.vlgmr.msra.gmra.mxu2 %v2824_v48  ;;  %v2539_v63 = vpop.f32.mrf.mxu3  ;;  %3846 = vmatpush.bf16.msrb.mxu3 %v10065_v60  ;;  %v10060_v60 = vld [vmem:[%s14374_s12 + $0x310] sm:$0xff] }
 0xc42   :  { %v2596_v13 = vpop.f32.mrf.mxu2  ;;  %3903 = vmatpush.bf16.msra.mxu2 %v10089_v54  ;;  %v2540_v56 = vadd.f32 %v2539_v63, %v12416_v46  ;;  %v10084_v54 = vld [vmem:[%s14374_s12 + $0x3d0] sm:$0xff]  ;;  %v2262_v63 = vperm.slane %v12510_v4, 3 }
 0xc43   :  { %v2560_v23 = vpop.f32.mrf.mxu0  ;;  %3867 = vmatpush.bf16.msrb.mxu0 %v10071_v8  ;;  %v2597_v62 = vadd.f32 %v2596_v13, %v12426_v35 }
 0xc44   :  { %v2561_v22 = vadd.f32 %v2560_v23, %v12390_v20  ;;  %v2579_v2 = vpop.f32.mrf.mxu1  ;;  %3886 = vmatpush.bf16.msrb.mxu1 %v10079_v16  ;;  %v10070_v20 = vld [vmem:[%s14374_s12 + $0x360] sm:$0xff]  ;;  %v2789_v29 = vmax.f32 %v2540_v56, 0.0 }
 0xc45   :  { %v2580_v0 = vadd.f32 %v2579_v2, %v12399_v49  ;;  %3847 = vmatpush.bf16.msrb.mxu3 %v10064_v36  ;;  %v10063_v49 = vld [vmem:[%s14374_s12 + $0x328] sm:$0xff]  ;;  %v2792_v28 = vmax.f32 %v2597_v62, 0.0  ;;  %v10066_v16 = vld [vmem:[%s14374_s12 + $0x340] sm:$0xff] }
 0xc46   :  { %v2806_v11 = vmax.f32 %v2561_v22, 0.0  ;;  %3904 = vmatpush.bf16.msra.mxu2 %v10088_v5  ;;  %v10059_v5 = vld [vmem:[%s14374_s12 + $0x308] sm:$0xff]  ;;  %v10058_v62 = vld [vmem:[%s14374_s12 + $0x300] sm:$0xff] }
 0xc47   :  { %v2807_v59 = vmax.f32 %v2580_v0, 0.0  ;;  %3868 = vmatpush.bf16.msrb.mxu0 %v10070_v20  ;;  %v10083_v0 = vld [vmem:[%s14374_s12 + $0x3c8] sm:$0xff] }
 0xc48   :  { %v2838_v17 = vpack.c.bf16 %v2806_v11, %v2790_v25  ;;  %3887 = vmatpush.bf16.msrb.mxu1 %v10078_v41 }
 0xc49   :  { %v2541_v24 = vpop.f32.mrf.mxu3  ;;  %v2839_v37 = vpack.c.bf16 %v2807_v59, %v2791_v26  ;;  %3848 = vmatpush.bf16.msrb.mxu3 %v10063_v49 }
 0xc4a   :  { %v2542_v10 = vadd.f32 %v2541_v24, %v12416_v46  ;;  %v2598_v21 = vpop.f32.mrf.mxu2  ;;  %3726 = vmatmul.bf16.gmra.mxu0 %v2838_v17  ;;  %3905 = vmatpush.bf16.msra.mxu2 %v10087_v27  ;;  %v10082_v24 = vld [vmem:[%s14374_s12 + $0x3c0] sm:$0xff] }
 0xc4b   :  { %v2599_v61 = vadd.f32 %v2598_v21, %v12426_v35  ;;  %3745 = vmatmul.bf16.gmra.mxu1 %v2839_v37  ;;  %v2629_v46 = vpop.f32.mrf.mxu0  ;;  %v10086_v35 = vld [vmem:[%s14374_s12 + $0x3e0] sm:$0xff]  ;;  %3869 = vmatpush.bf16.msrb.mxu0 %v10069_v38 }
 0xc4c   :  { %v2805_v15 = vmax.f32 %v2542_v10, 0.0  ;;  %v2648_v43 = vpop.f32.mrf.mxu1  ;;  %3888 = vmatpush.bf16.msrb.mxu1 %v10077_v55  ;;  %v2630_v44 = vadd.f32 %v2629_v46, %v12519_v33 }
 0xc4d   :  { %v2808_v7 = vmax.f32 %v2599_v61, 0.0  ;;  %3849 = vmatpush.bf16.msrb.mxu3 %v10062_v31  ;;  %v2649_v18 = vadd.f32 %v2648_v43, %v12528_v12 }
 0xc4e   :  { %v2837_v57 = vpack.c.bf16 %v2805_v15, %v2789_v29  ;;  %3906 = vmatpush.bf16.msra.mxu2 %v10086_v35  ;;  %v2762_v13 = vmax.f32 %v2630_v44, 0.0 }
 0xc4f   :  { %v2840_v39 = vpack.c.bf16 %v2808_v7, %v2792_v28  ;;  %3870 = vmatpush.bf16.msrb.mxu0 %v10068_v47  ;;  %v2763_v23 = vmax.f32 %v2649_v18, 0.0 }
 0xc50   :  { %3707 = vmatmul.bf16.gmra.mxu3 %v2837_v57  ;;  %3889 = vmatpush.bf16.msrb.mxu1 %v10076_v42 }
 0xc51   :  { %3764 = vmatmul.bf16.gmra.mxu2 %v2840_v39  ;;  %v2610_v1 = vpop.f32.mrf.mxu3  ;;  %3850 = vmatpush.bf16.msrb.mxu3 %v10061_v58 }
 0xc52   :  { %v2667_v52 = vpop.f32.mrf.mxu2  ;;  %3907 = vmatpush.bf16.msra.mxu2 %v10085_v32  ;;  %v2611_v2 = vadd.f32 %v2610_v1, %v12545_v45 }
 0xc53   :  { %v2631_v34 = vpop.f32.mrf.mxu0  ;;  %3871 = vmatpush.bf16.msrb.mxu0 %v10067_v53  ;;  %v2668_v25 = vadd.f32 %v2667_v52, %v2262_v63 }
 0xc54   :  { %v2632_v14 = vadd.f32 %v2631_v34, %v12519_v33  ;;  %v2650_v48 = vpop.f32.mrf.mxu1  ;;  %3890 = vmatpush.bf16.msrb.mxu1 %v10075_v50  ;;  %v2761_v17 = vmax.f32 %v2611_v2, 0.0  ;;  %v2266_v2 = vperm.slane %v12510_v4, 7 }
 0xc55   :  { %v2651_v30 = vadd.f32 %v2650_v48, %v12528_v12  ;;  %3851 = vmatpush.bf16.msrb.mxu3 %v10060_v60  ;;  %v2764_v37 = vmax.f32 %v2668_v25, 0.0  ;;  %v2264_v48 = vperm.slane %v12510_v4, 5 }
 0xc56   :  { %v2778_v8 = vmax.f32 %v2632_v14, 0.0  ;;  %3908 = vmatpush.bf16.msra.mxu2 %v10084_v54  ;;  %v2265_v54 = vperm.slane %v12510_v4, 6 }
 0xc57   :  { %v2779_v22 = vmax.f32 %v2651_v30, 0.0  ;;  %3872 = vmatpush.bf16.msrb.mxu0 %v10066_v16 }
 0xc58   :  { %v2826_v36 = vpack.c.bf16 %v2778_v8, %v2762_v13  ;;  %3891 = vmatpush.bf16.msrb.mxu1 %v10074_v3  ;;  %v2263_v3 = vperm.slane %v12510_v4, 4 }
 0xc59   :  { %v2827_v11 = vpack.c.bf16 %v2779_v22, %v2763_v23  ;;  %v2612_v20 = vpop.f32.mrf.mxu3  ;;  %3852 = vmatpush.bf16.msrb.mxu3 %v10059_v5 }
 0xc5a   :  { %v2613_v41 = vadd.f32 %v2612_v20, %v12545_v45  ;;  %v2669_v26 = vpop.f32.mrf.mxu2  ;;  %3797 = vmatmul.bf16.vlgmr.msra.gmra.mxu0 %v2826_v36  ;;  %3909 = vmatpush.bf16.msra.mxu2 %v10083_v0 }
 0xc5b   :  { %v2670_v59 = vadd.f32 %v2669_v26, %v2262_v63  ;;  %3816 = vmatmul.bf16.vlgmr.msra.gmra.mxu1 %v2827_v11  ;;  %v2634_v56 = vpop.f32.mrf.mxu0 }
 0xc5c   :  { %v2777_v49 = vmax.f32 %v2613_v41, 0.0  ;;  %v2653_v27 = vpop.f32.mrf.mxu1  ;;  %v2635_v61 = vadd.f32 %v2634_v56, %v12519_v33 }
 0xc5d   :  { %v2780_v10 = vmax.f32 %v2670_v59, 0.0  ;;  %3853 = vmatpush.bf16.msrb.mxu3 %v10058_v62  ;;  %v2654_v29 = vadd.f32 %v2653_v27, %v12528_v12 }
 0xc5e   :  { %v2825_v21 = vpack.c.bf16 %v2777_v49, %v2761_v17  ;;  %3910 = vmatpush.bf16.msra.mxu2 %v10082_v24  ;;  %v2794_v28 = vmax.f32 %v2635_v61, 0.0 }
 0xc5f   :  { %v2828_v38 = vpack.c.bf16 %v2780_v10, %v2764_v37  ;;  %v2795_v57 = vmax.f32 %v2654_v29, 0.0 }
 0xc60   :  { %3778 = vmatmul.bf16.vlgmr.msra.gmra.mxu3 %v2825_v21 }
 0xc61   :  { %3835 = vmatmul.bf16.vlgmr.msrb.gmra.mxu2 %v2828_v38  ;;  %v2615_v55 = vpop.f32.mrf.mxu3 }
 0xc62   :  { %v2672_v46 = vpop.f32.mrf.mxu2  ;;  %v2616_v42 = vadd.f32 %v2615_v55, %v12545_v45 }
 0xc63   :  { %v2636_v15 = vpop.f32.mrf.mxu0  ;;  %v2673_v58 = vadd.f32 %v2672_v46, %v2262_v63 }
 0xc64   :  { %v2637_v43 = vadd.f32 %v2636_v15, %v12519_v33  ;;  %v2655_v31 = vpop.f32.mrf.mxu1  ;;  %v2793_v50 = vmax.f32 %v2616_v42, 0.0 }
 0xc65   :  { %v2656_v35 = vadd.f32 %v2655_v31, %v12528_v12  ;;  %v2796_v34 = vmax.f32 %v2673_v58, 0.0 }
 0xc66   :  { %v2810_v7 = vmax.f32 %v2637_v43, 0.0 }
 0xc67   :  { %v2811_v47 = vmax.f32 %v2656_v35, 0.0 }
 0xc68   :  { %v2842_v39 = vpack.c.bf16 %v2810_v7, %v2794_v28 }
 0xc69   :  { %v2617_v32 = vpop.f32.mrf.mxu3  ;;  %v2843_v1 = vpack.c.bf16 %v2811_v47, %v2795_v57 }
 0xc6a   :  { %v2618_v44 = vadd.f32 %v2617_v32, %v12545_v45  ;;  %v2674_v52 = vpop.f32.mrf.mxu2  ;;  %3802 = vmatmul.bf16.gmra.mxu0 %v2842_v39 }
 0xc6b   :  { %v2675_v53 = vadd.f32 %v2674_v52, %v2262_v63  ;;  %3821 = vmatmul.bf16.gmra.mxu1 %v2843_v1  ;;  %v2705_v33 = vpop.f32.mrf.mxu0 }
 0xc6c   :  { %v2809_v18 = vmax.f32 %v2618_v44, 0.0  ;;  %v2724_v12 = vpop.f32.mrf.mxu1  ;;  %v2706_v45 = vadd.f32 %v2705_v33, %v2264_v48 }
 0xc6d   :  { %v2812_v14 = vmax.f32 %v2675_v53, 0.0  ;;  %v2725_v16 = vadd.f32 %v2724_v12, %v2265_v54 }
 0xc6e   :  { %v2841_v60 = vpack.c.bf16 %v2809_v18, %v2793_v50  ;;  %v2766_v5 = vmax.f32 %v2706_v45, 0.0 }
 0xc6f   :  { %v2844_v30 = vpack.c.bf16 %v2812_v14, %v2796_v34  ;;  %v2767_v25 = vmax.f32 %v2725_v16, 0.0 }
 0xc70   :  { %3783 = vmatmul.bf16.gmra.mxu3 %v2841_v60 }
 0xc71   :  { %3840 = vmatmul.bf16.gmra.mxu2 %v2844_v30  ;;  %v2686_v13 = vpop.f32.mrf.mxu3 }
 0xc72   :  { %v2743_v8 = vpop.f32.mrf.mxu2  ;;  %v2687_v20 = vadd.f32 %v2686_v13, %v2263_v3 }
 0xc73   :  { %v2707_v63 = vpop.f32.mrf.mxu0  ;;  %v2744_v26 = vadd.f32 %v2743_v8, %v2266_v2 }
 0xc74   :  { %v2708_v23 = vadd.f32 %v2707_v63, %v2264_v48  ;;  %v2726_v22 = vpop.f32.mrf.mxu1  ;;  %v2765_v24 = vmax.f32 %v2687_v20, 0.0 }
 0xc75   :  { %v2727_v36 = vadd.f32 %v2726_v22, %v2265_v54  ;;  %v2768_v4 = vmax.f32 %v2744_v26, 0.0 }
 0xc76   :  { %v2782_v0 = vmax.f32 %v2708_v23, 0.0 }
 0xc77   :  { %v2783_v11 = vmax.f32 %v2727_v36, 0.0 }
 0xc78   :  { %v2830_v41 = vpack.c.bf16 %v2782_v0, %v2766_v5 }
 0xc79   :  { %v2831_v59 = vpack.c.bf16 %v2783_v11, %v2767_v25  ;;  %v2688_v56 = vpop.f32.mrf.mxu3 }
 0xc7a   :  { %v2689_v17 = vadd.f32 %v2688_v56, %v2263_v3  ;;  %v2745_v49 = vpop.f32.mrf.mxu2  ;;  %3873 = vmatmul.bf16.vlgmr.msrb.gmra.mxu0 %v2830_v41 }
 0xc7b   :  { %v2746_v27 = vadd.f32 %v2745_v49, %v2266_v2  ;;  %3892 = vmatmul.bf16.vlgmr.msrb.gmra.mxu1 %v2831_v59  ;;  %v2710_v62 = vpop.f32.mrf.mxu0 }
 0xc7c   :  { %v2781_v37 = vmax.f32 %v2689_v17, 0.0  ;;  %v2729_v10 = vpop.f32.mrf.mxu1  ;;  %v2711_v46 = vadd.f32 %v2710_v62, %v2264_v48 }
 0xc7d   :  { %v2784_v21 = vmax.f32 %v2746_v27, 0.0  ;;  %v2730_v15 = vadd.f32 %v2729_v10, %v2265_v54 }
 0xc7e   :  { %v2829_v38 = vpack.c.bf16 %v2781_v37, %v2765_v24  ;;  %v2798_v7 = vmax.f32 %v2711_v46, 0.0 }
 0xc7f   :  { %v2832_v55 = vpack.c.bf16 %v2784_v21, %v2768_v4  ;;  %v2799_v47 = vmax.f32 %v2730_v15, 0.0  ;;  %v10439_v21 = vld [vmem:[%s14371_s9 + $0x8] ss:$0 sm:$0xff] }
 0xc80   :  { %3854 = vmatmul.bf16.vlgmr.msrb.gmra.mxu3 %v2829_v38 }
 0xc81   :  { %3911 = vmatmul.bf16.vlgmr.msra.gmra.mxu2 %v2832_v55  ;;  %v2691_v61 = vpop.f32.mrf.mxu3 }
 0xc82   :  { %v2748_v29 = vpop.f32.mrf.mxu2  ;;  %v2692_v39 = vadd.f32 %v2691_v61, %v2263_v3 }
 0xc83   :  { %v2712_v43 = vpop.f32.mrf.mxu0  ;;  %v2749_v32 = vadd.f32 %v2748_v29, %v2266_v2 }
 0xc84   :  { %v2713_v31 = vadd.f32 %v2712_v43, %v2264_v48  ;;  %v2731_v35 = vpop.f32.mrf.mxu1  ;;  %v2797_v50 = vmax.f32 %v2692_v39, 0.0 }
 0xc85   :  { %v2732_v28 = vadd.f32 %v2731_v35, %v2265_v54  ;;  %v2800_v12 = vmax.f32 %v2749_v32, 0.0 }
 0xc86   :  { %v2814_v57 = vmax.f32 %v2713_v31, 0.0 }
 0xc87   :  { %v2815_v42 = vmax.f32 %v2732_v28, 0.0 }
 0xc88   :  { %v2846_v58 = vpack.c.bf16 %v2814_v57, %v2798_v7 }
 0xc89   :  { %v2693_v1 = vpop.f32.mrf.mxu3  ;;  %v2847_v44 = vpack.c.bf16 %v2815_v42, %v2799_v47 }
 0xc8a   :  { %v2694_v52 = vadd.f32 %v2693_v1, %v2263_v3  ;;  %v2750_v53 = vpop.f32.mrf.mxu2  ;;  %3878 = vmatmul.bf16.gmra.mxu0 %v2846_v58 }
 0xc8b   :  { %v2751_v33 = vadd.f32 %v2750_v53, %v2266_v2  ;;  %3897 = vmatmul.bf16.gmra.mxu1 %v2847_v44  ;;  %v3646_v60 = vpop.f32.mrf.mxu0 }
 0xc8c   :  { %v2813_v18 = vmax.f32 %v2694_v52, 0.0  ;;  %v3665_v54 = vpop.f32.mrf.mxu1 }
 0xc8d   :  { %v2816_v34 = vmax.f32 %v2751_v33, 0.0 }
 0xc8e   :  { %v2845_v14 = vpack.c.bf16 %v2813_v18, %v2797_v50 }
 0xc8f   :  { %v2848_v48 = vpack.c.bf16 %v2816_v34, %v2800_v12 }
 0xc90   :  { %3859 = vmatmul.bf16.gmra.mxu3 %v2845_v14 }
 0xc91   :  { %3916 = vmatmul.bf16.gmra.mxu2 %v2848_v48  ;;  %v3627_v45 = vpop.f32.mrf.mxu3 }
 0xc92   :  { %v3684_v8 = vpop.f32.mrf.mxu2  ;;  %v3628_v61 = vadd.f32 %v10439_v21, %v3627_v45 }
 0xc93   :  { %v3648_v30 = vpop.f32.mrf.mxu0 }
 0xc94   :  { %v3667_v13 = vpop.f32.mrf.mxu1  ;;  %v3647_v15 = vadd.f32 %v3646_v60, %v3628_v61 }
 0xc96   :  { %v3666_v31 = vadd.f32 %v3665_v54, %v3647_v15 }
 0xc98   :  { %v3685_v47 = vadd.f32 %v3684_v8, %v3666_v31 }
 0xc99   :  { %v3629_v3 = vpop.f32.mrf.mxu3 }
 0xc9a   :  { %v3686_v23 = vpop.f32.mrf.mxu2  ;;  %v3630_v35 = vadd.f32 %v10439_v21, %v3629_v3 }
 0xc9c   :  { %v3649_v42 = vadd.f32 %v3648_v30, %v3630_v35 }
 0xc9e   :  { %v3668_v58 = vadd.f32 %v3667_v13, %v3649_v42 }
 0xca0   :  { %v3687_v50 = vadd.f32 %v3686_v23, %v3668_v58 }
 0xca7   :  { %v3651_v16 = vpop.f32.mrf.mxu0 }
 0xca8   :  { %v3670_v63 = vpop.f32.mrf.mxu1 }
 0xcaf   :  { %v3653_v22 = vpop.f32.mrf.mxu0 }
 0xcb0   :  { %v3672_v2 = vpop.f32.mrf.mxu1 }
 0xcb3   :  { %v3632_v36 = vpop.f32.mrf.mxu3 }
 0xcb4   :  { %v3689_v5 = vpop.f32.mrf.mxu2  ;;  %v3633_v32 = vadd.f32 %v10439_v21, %v3632_v36 }
 0xcb6   :  { %v3652_v18 = vadd.f32 %v3651_v16, %v3633_v32 }
 0xcb7   :  { %v3722_v0 = vpop.f32.mrf.mxu0 }
 0xcb8   :  { %v3741_v25 = vpop.f32.mrf.mxu1  ;;  %v3671_v14 = vadd.f32 %v3670_v63, %v3652_v18 }
 0xcba   :  { %v3690_v30 = vadd.f32 %v3689_v5, %v3671_v14 }
 0xcbb   :  { %v3634_v11 = vpop.f32.mrf.mxu3 }
 0xcbc   :  { %v3691_v20 = vpop.f32.mrf.mxu2  ;;  %v3635_v48 = vadd.f32 %v10439_v21, %v3634_v11 }
 0xcbf   :  { %v3724_v41 = vpop.f32.mrf.mxu0 }
 0xcc0   :  { %v3743_v26 = vpop.f32.mrf.mxu1 }
 0xcc3   :  { %v3703_v59 = vpop.f32.mrf.mxu3 }
 0xcc4   :  { %v3760_v56 = vpop.f32.mrf.mxu2  ;;  %v3704_v39 = vadd.f32 %v3703_v59, %v3685_v47  ;;  %v3654_v59 = vadd.f32 %v3653_v22, %v3635_v48 }
 0xcc6   :  { %v3723_v52 = vadd.f32 %v3722_v0, %v3704_v39  ;;  %v3673_v0 = vadd.f32 %v3672_v2, %v3654_v59 }
 0xcc7   :  { %v3727_v17 = vpop.f32.mrf.mxu0 }
 0xcc8   :  { %v3746_v49 = vpop.f32.mrf.mxu1  ;;  %v3742_v12 = vadd.f32 %v3741_v25, %v3723_v52 }
 0xcca   :  { %v3761_v54 = vadd.f32 %v3760_v56, %v3742_v12 }
 0xccb   :  { %v3705_v27 = vpop.f32.mrf.mxu3 }
 0xccc   :  { %v3762_v62 = vpop.f32.mrf.mxu2  ;;  %v3706_v34 = vadd.f32 %v3705_v27, %v3687_v50  ;;  %v3692_v27 = vadd.f32 %v3691_v20, %v3673_v0 }
 0xcce   :  { %v3725_v45 = vadd.f32 %v3724_v41, %v3706_v34 }
 0xccf   :  { %v3729_v24 = vpop.f32.mrf.mxu0 }
 0xcd0   :  { %v12586_v37 = vpop.f32.mrf.mxu1  ;;  %v3744_v61 = vadd.f32 %v3743_v26, %v3725_v45 }
 0xcd2   :  { %v3763_v23 = vadd.f32 %v3762_v62, %v3744_v61 }
 0xcd3   :  { %v3708_v10 = vpop.f32.mrf.mxu3 }
 0xcd4   :  { %v3765_v4 = vpop.f32.mrf.mxu2  ;;  %v3709_v15 = vadd.f32 %v3708_v10, %v3690_v30 }
 0xcd6   :  { %v3728_v16 = vadd.f32 %v3727_v17, %v3709_v15 }
 0xcd7   :  { %v3798_v38 = vpop.f32.mrf.mxu0 }
 0xcd8   :  { %v3817_v55 = vpop.f32.mrf.mxu1  ;;  %v3747_v56 = vadd.f32 %v3746_v49, %v3728_v16 }
 0xcdb   :  { %v3710_v46 = vpop.f32.mrf.mxu3 }
 0xcdc   :  { %v12591_v29 = vpop.f32.mrf.mxu2  ;;  %v3711_v41 = vadd.f32 %v3710_v46, %v3692_v27 }
 0xcde   :  { %v3730_v39 = vadd.f32 %v3729_v24, %v3711_v41 }
 0xcdf   :  { %v3800_v43 = vpop.f32.mrf.mxu0 }
 0xce0   :  { %v3819_v28 = vpop.f32.mrf.mxu1  ;;  %v3749_v17 = vadd.f32 %v12586_v37, %v3730_v39 }
 0xce3   :  { %v3779_v7 = vpop.f32.mrf.mxu3 }
 0xce4   :  { %v3836_v57 = vpop.f32.mrf.mxu2  ;;  %v3780_v13 = vadd.f32 %v3779_v7, %v3761_v54  ;;  %v3766_v7 = vadd.f32 %v3765_v4, %v3747_v56 }
 0xce6   :  { %v3799_v31 = vadd.f32 %v3798_v38, %v3780_v13 }
 0xce7   :  { %v3803_v1 = vpop.f32.mrf.mxu0 }
 0xce8   :  { %v3822_v33 = vpop.f32.mrf.mxu1  ;;  %v3818_v63 = vadd.f32 %v3817_v55, %v3799_v31 }
 0xcea   :  { %v3837_v42 = vadd.f32 %v3836_v57, %v3818_v63  ;;  %v3768_v57 = vadd.f32 %v12591_v29, %v3749_v17 }
 0xceb   :  { %v3781_v44 = vpop.f32.mrf.mxu3 }
 0xcec   :  { %v3838_v53 = vpop.f32.mrf.mxu2  ;;  %v3782_v11 = vadd.f32 %v3781_v44, %v3763_v23 }
 0xcee   :  { %v3801_v5 = vadd.f32 %v3800_v43, %v3782_v11 }
 0xcef   :  { %v3805_v8 = vpop.f32.mrf.mxu0 }
 0xcf0   :  { %v3824_v36 = vpop.f32.mrf.mxu1  ;;  %v3820_v2 = vadd.f32 %v3819_v28, %v3801_v5 }
 0xcf2   :  { %v3839_v55 = vadd.f32 %v3838_v53, %v3820_v2 }
 0xcf3   :  { %v3784_v60 = vpop.f32.mrf.mxu3 }
 0xcf4   :  { %v3841_v3 = vpop.f32.mrf.mxu2  ;;  %v3785_v38 = vadd.f32 %v3784_v60, %v3766_v7 }
 0xcf6   :  { %v3804_v32 = vadd.f32 %v3803_v1, %v3785_v38 }
 0xcf7   :  { %v3874_v21 = vpop.f32.mrf.mxu0 }
 0xcf8   :  { %v3893_v47 = vpop.f32.mrf.mxu1  ;;  %v3823_v52 = vadd.f32 %v3822_v33, %v3804_v32  ;;  %v8822_v32 = vld [vmem:[%s14366_s4 + $0x50] sm:$0xff] }
 0xcfa   :  { %v3842_v12 = vadd.f32 %v3841_v3, %v3823_v52 }
 0xcfb   :  { %v3786_v35 = vpop.f32.mrf.mxu3 }
 0xcfc   :  { %v3843_v25 = vpop.f32.mrf.mxu2  ;;  %v3787_v50 = vadd.f32 %v3786_v35, %v3768_v57  ;;  %v8824_v57 = vld [vmem:[%s14368_s6 + $0x40] sm:$0xff] }
 0xcfe   :  { %v3806_v34 = vadd.f32 %v3805_v8, %v3787_v50 }
 0xcff   :  { %v3876_v20 = vpop.f32.mrf.mxu0 }
 0xd00   :  { %v3895_v49 = vpop.f32.mrf.mxu1  ;;  %v3825_v54 = vadd.f32 %v3824_v36, %v3806_v34 }
 0xd02   :  { %v3844_v59 = vadd.f32 %v3843_v25, %v3825_v54 }
 0xd03   :  { %v3855_v22 = vpop.f32.mrf.mxu3 }
 0xd04   :  { %v3856_v26 = vadd.f32 %v3855_v22, %v3837_v42  ;;  %v3912_v10 = vpop.f32.mrf.mxu2 }
 0xd06   :  { %v3875_v58 = vadd.f32 %v3874_v21, %v3856_v26 }
 0xd07   :  { %v3879_v1 = vpop.f32.mrf.mxu0 }
 0xd08   :  { %v3894_v62 = vadd.f32 %v3893_v47, %v3875_v58  ;;  %v3898_v29 = vpop.f32.mrf.mxu1 }
 0xd0a   :  { %v3913_v44 = vadd.f32 %v3912_v10, %v3894_v62  ;;  %v8827_v62 = vld [vmem:[%s14368_s6 + $0x58] sm:$0xff] }
 0xd0b   :  { %v3857_v46 = vpop.f32.mrf.mxu3  ;;  %4099 = vmatpush.msra.mxu0 %v8827_v62 }
 0xd0c   :  { %v3922_v43 = vadd.f32 %v3913_v44, %v11877_v9  ;;  %v3858_v4 = vadd.f32 %v3857_v46, %v3839_v55  ;;  %v3914_v24 = vpop.f32.mrf.mxu2  ;;  %v8826_v55 = vld [vmem:[%s14368_s6 + $0x50] sm:$0xff]  ;;  %v8825_v44 = vld [vmem:[%s14368_s6 + $0x48] sm:$0xff]  ;;  %v8820_v46 = vld [vmem:[%s14366_s4 + $0x40] sm:$0xff] }
 0xd0d   :  { %4100 = vmatpush.msra.mxu0 %v8826_v55 }
 0xd0e   :  { %v3877_v28 = vadd.f32 %v3876_v20, %v3858_v4  ;;  %v3928_v18 = vsel %vm124_vm1, %v3922_v43, 0.0  ;;  %v8823_v20 = vld [vmem:[%s14366_s4 + $0x58] sm:$0xff] }
 0xd0f   :  { %3929 = vadd.xlane.f32.xlu0 %v3928_v18  ;;  %v3881_v15 = vpop.f32.mrf.mxu0  ;;  %4069 = vmatpush.msra.mxu3 %v8823_v20  ;;  %v10442_v20 = vld [vmem:[%s14369_s7 + $0x2] ss:$0 sm:$0xff] }
 0xd10   :  { %v3896_v37 = vadd.f32 %v3895_v49, %v3877_v28  ;;  %v3900_v35 = vpop.f32.mrf.mxu1  ;;  %v8821_v49 = vld [vmem:[%s14366_s4 + $0x48] sm:$0xff]  ;;  %4101 = vmatpush.msra.mxu0 %v8825_v44 }
 0xd11   :  { %4070 = vmatpush.msra.mxu3 %v8822_v32 }
 0xd12   :  { %v3915_v53 = vadd.f32 %v3914_v24, %v3896_v37  ;;  %4102 = vmatpush.msra.mxu0 %v8824_v57 }
 0xd13   :  { %v3860_v14 = vpop.f32.mrf.mxu3  ;;  %4071 = vmatpush.msra.mxu3 %v8821_v49 }
 0xd14   :  { %v3861_v48 = vadd.f32 %v3860_v14, %v3842_v12  ;;  %v3923_v60 = vadd.f32 %v3915_v53, %v11880_v51  ;;  %v3917_v33 = vpop.f32.mrf.mxu2 }
 0xd15   :  { %4072 = vmatpush.msra.mxu3 %v8820_v46 }
 0xd16   :  { %v3880_v9 = vadd.f32 %v3879_v1, %v3861_v48  ;;  %v3931_v45 = vsel %vm124_vm1, %v3923_v60, 0.0 }
 0xd17   :  { %3932 = vadd.xlane.f32.xlu1 %v3931_v45 }
 0xd18   :  { %v3899_v30 = vadd.f32 %v3898_v29, %v3880_v9  ;;  %v10440_v9 = vld [vmem:[%s14371_s9 + $0x6] ss:$0 sm:$0xff] }
 0xd1a   :  { %v3918_v13 = vadd.f32 %v3917_v33, %v3899_v30  ;;  %v10441_v30 = vld [vmem:[%s14371_s9 + $0x7] ss:$0 sm:$0xff] }
 0xd1b   :  { %v3862_v61 = vpop.f32.mrf.mxu3 }
 0xd1c   :  { %v3924_v3 = vadd.f32 %v3918_v13, %v11961_v19  ;;  %v3863_v8 = vadd.f32 %v3862_v61, %v3844_v59  ;;  %v3919_v36 = vpop.f32.mrf.mxu2 }
 0xd1e   :  { %v3882_v0 = vadd.f32 %v3881_v15, %v3863_v8  ;;  %v3934_v31 = vsel %vm124_vm1, %v3924_v3, 0.0 }
 0xd1f   :  { %3935 = vadd.xlane.f32.xlu2 %v3934_v31 }
 0xd20   :  { %v3901_v51 = vadd.f32 %v3900_v35, %v3882_v0 }
 0xd22   :  { %v3920_v23 = vadd.f32 %v3919_v36, %v3901_v51 }
 0xd24   :  { %v3925_v16 = vadd.f32 %v3920_v23, %v11964_v40 }
 0xd26   :  { %v3937_v27 = vsel %vm124_vm1, %v3925_v16, 0.0 }
 0xd27   :  { %3938 = vadd.xlane.f32.xlu0 %v3937_v27 }
 0xd82   :  { %v3930_v25 = vpop.xlane.xlu0 %3929 }
 0xd83   :  { %v3940_v63 = vmul.f32 %v3930_v25, %v11365_v6 }
 0xd85   :  { %v12604_v11 = vsub.f32 %v3922_v43, %v3940_v63 }
 0xd87   :  { %v3948_v19 = vmul.f32 %v12604_v11, %v12604_v11 }
 0xd89   :  { %v3952_v21 = vsel %vm124_vm1, %v3948_v19, 0.0 }
 0xd8a   :  { %v3933_v56 = vpop.xlane.xlu1 %3932  ;;  %3953 = vadd.xlane.f32.xlu1 %v3952_v21 }
 0xd8b   :  { %v3941_v41 = vmul.f32 %v3933_v56, %v11365_v6 }
 0xd8d   :  { %v12610_v47 = vsub.f32 %v3923_v60, %v3941_v41 }
 0xd8f   :  { %v3949_v40 = vmul.f32 %v12610_v47, %v12610_v47 }
 0xd91   :  { %v3955_v42 = vsel %vm124_vm1, %v3949_v40, 0.0 }
 0xd92   :  { %v3936_v5 = vpop.xlane.xlu2 %3935  ;;  %3956 = vadd.xlane.f32.xlu2 %v3955_v42 }
 0xd93   :  { %v3942_v22 = vmul.f32 %v3936_v5, %v11365_v6 }
 0xd95   :  { %v12616_v7 = vsub.f32 %v3924_v3, %v3942_v22 }
 0xd97   :  { %v3950_v39 = vmul.f32 %v12616_v7, %v12616_v7 }
 0xd99   :  { %v3958_v26 = vsel %vm124_vm1, %v3950_v39, 0.0 }
 0xd9a   :  { %3959 = vadd.xlane.f32.xlu0 %v3958_v26  ;;  %v3939_v10 = vpop.xlane.xlu0 %3938 }
 0xd9b   :  { %v3943_v2 = vmul.f32 %v3939_v10, %v11365_v6 }
 0xd9d   :  { %v12622_v38 = vsub.f32 %v3925_v16, %v3943_v2 }
 0xd9f   :  { %v3951_v58 = vmul.f32 %v12622_v38, %v12622_v38 }
 0xda1   :  { %v3961_v17 = vsel %vm124_vm1, %v3951_v58, 0.0 }
 0xda2   :  { %3962 = vadd.xlane.f32.xlu1 %v3961_v17 }
 0xdfd   :  { %v3954_v43 = vpop.xlane.xlu1 %3953 }
 0xdfe   :  { %v3964_v4 = vmul.f32 %v3954_v43, %v11365_v6 }
 0xe00   :  { %v3968_v24 = vadd.f32 1e-05, %v3964_v4  ;;  %v10443_v4 = vld [vmem:[%s14367_s5 + $0x2] ss:$0 sm:$0xff] }
 0xe02   :  { %10602 = vrsqrt.f32 %v3968_v24  ;;  %vm3978_vm6 = vweird.f32 %v3968_v24 }
 0xe05   :  { %v3957_v52 = vpop.xlane.xlu2 %3956 }
 0xe06   :  { %v3965_v50 = vmul.f32 %v3957_v52, %v11365_v6 }
 0xe08   :  { %v10603_v28 = vpop.eup %10602  ;;  %v3969_v18 = vadd.f32 1e-05, %v3965_v50 }
 0xe09   :  { %v3973_v37 = vmul.f32 %v10603_v28, %v3968_v24  ;;  %vm3979_vm5 = vweird.f32 %v10603_v28 }
 0xe0a   :  { %10604 = vrsqrt.f32 %v3969_v18  ;;  %vm3980_vm7 = vmor %vm3978_vm6, %vm3979_vm5  ;;  %vm3988_vm9 = vweird.f32 %v3969_v18 }
 0xe0b   :  { %v3974_v12 = vmul.f32 %v10603_v28, %v3973_v37 }
 0xe0d   :  { %v3975_v34 = vmul.f32 0.5, %v3974_v12  ;;  %v3960_v53 = vpop.xlane.xlu0 %3959 }
 0xe0e   :  { %v3966_v1 = vmul.f32 %v3960_v53, %v11365_v6 }
 0xe0f   :  { %v3976_v14 = vsub.f32 1.5, %v3975_v34 }
 0xe10   :  { %v10605_v48 = vpop.eup %10604  ;;  %v3970_v60 = vadd.f32 1e-05, %v3966_v1 }
 0xe11   :  { %v3977_v29 = vmul.f32 %v10603_v28, %v3976_v14  ;;  %v3983_v54 = vmul.f32 %v10605_v48, %v3969_v18  ;;  %vm3989_vm8 = vweird.f32 %v10605_v48 }
 0xe12   :  { %10606 = vrsqrt.f32 %v3970_v60  ;;  %vm3990_vm10 = vmor %vm3988_vm9, %vm3989_vm8  ;;  %vm3998_vm12 = vweird.f32 %v3970_v60 }
 0xe13   :  { %v3981_v45 = vsel %vm3980_vm7, %v10603_v28, %v3977_v29  ;;  %v3984_v33 = vmul.f32 %v10605_v48, %v3983_v54 }
 0xe14   :  { %v4012_v59 = vmul.f32 %v3981_v45, %v12604_v11 }
 0xe15   :  { %v3985_v13 = vmul.f32 0.5, %v3984_v33  ;;  %v3963_v61 = vpop.xlane.xlu1 %3962 }
 0xe16   :  { %v4017_v3 = vmul.f32 %v10440_v9, %v4012_v59  ;;  %v3967_v8 = vmul.f32 %v3963_v61, %v11365_v6 }
 0xe17   :  { %v3986_v15 = vsub.f32 1.5, %v3985_v13 }
 0xe18   :  { %v10607_v0 = vpop.eup %10606  ;;  %v12662_v31 = vadd.f32 %v10441_v30, %v4017_v3  ;;  %v3971_v35 = vadd.f32 1e-05, %v3967_v8 }
 0xe19   :  { %v3987_v51 = vmul.f32 %v10605_v48, %v3986_v15  ;;  %v3993_v36 = vmul.f32 %v10607_v0, %v3970_v60  ;;  %vm3999_vm11 = vweird.f32 %v10607_v0 }
 0xe1a   :  { %10608 = vrsqrt.f32 %v3971_v35  ;;  %8832 = vmatmul.msk.f32.vlgmr.msra.gmra.mxu3 %vm124_vm1, %v12662_v31  ;;  %8836 = vmatmul.msk.f32.vlgmr.msra.gmra.mxu0 %vm124_vm1, %v12662_v31  ;;  %vm4000_vm13 = vmor %vm3998_vm12, %vm3999_vm11  ;;  %vm4008_vm15 = vweird.f32 %v3971_v35 }
 0xe1b   :  { %v3991_v23 = vsel %vm3990_vm10, %v10605_v48, %v3987_v51  ;;  %v3994_v16 = vmul.f32 %v10607_v0, %v3993_v36 }
 0xe1c   :  { %v4013_v27 = vmul.f32 %v3991_v23, %v12610_v47 }
 0xe1d   :  { %v3995_v25 = vmul.f32 0.5, %v3994_v16 }
 0xe1e   :  { %v4018_v63 = vmul.f32 %v10440_v9, %v4013_v27  ;;  %v8899_v27 = vld [vmem:[%s14368_s6 + $0x78] sm:$0xff] }
 0xe1f   :  { %v3996_v11 = vsub.f32 1.5, %v3995_v25 }
 0xe20   :  { %v10609_v19 = vpop.eup %10608  ;;  %v12669_v21 = vadd.f32 %v10441_v30, %v4018_v63 }
 0xe21   :  { %v3997_v56 = vmul.f32 %v10607_v0, %v3996_v11  ;;  %v4003_v41 = vmul.f32 %v10609_v19, %v3971_v35  ;;  %vm4009_vm14 = vweird.f32 %v10609_v19  ;;  %v12757_v35 = vld [vmem:[%s14365_s3] sm:$0xff]  ;;  %v12774_v11 = vld [vmem:[%s14365_s3 + $0x8] sm:$0xff] }
 0xe22   :  { %8833 = vmatmul.msk.f32.gmra.mxu3 %vm124_vm1, %v12669_v21  ;;  %8837 = vmatmul.msk.f32.gmra.mxu0 %vm124_vm1, %v12669_v21  ;;  %vm4010_vm4 = vmor %vm4008_vm15, %vm4009_vm14 }
 0xe23   :  { %v4001_v40 = vsel %vm4000_vm13, %v10607_v0, %v3997_v56  ;;  %v4004_v42 = vmul.f32 %v10609_v19, %v4003_v41  ;;  %v8898_v56 = vld [vmem:[%s14368_s6 + $0x70] sm:$0xff] }
 0xe24   :  { %v4014_v47 = vmul.f32 %v4001_v40, %v12616_v7  ;;  %v8897_v40 = vld [vmem:[%s14368_s6 + $0x68] sm:$0xff] }
 0xe25   :  { %v4005_v5 = vmul.f32 0.5, %v4004_v42 }
 0xe26   :  { %v4019_v22 = vmul.f32 %v10440_v9, %v4014_v47  ;;  %v8896_v47 = vld [vmem:[%s14368_s6 + $0x60] sm:$0xff] }
 0xe27   :  { %v4006_v39 = vsub.f32 1.5, %v4005_v5 }
 0xe28   :  { %v12676_v26 = vadd.f32 %v10441_v30, %v4019_v22 }
 0xe29   :  { %v4007_v10 = vmul.f32 %v10609_v19, %v4006_v39 }
 0xe2a   :  { %8834 = vmatmul.msk.f32.gmra.mxu3 %vm124_vm1, %v12676_v26  ;;  %8838 = vmatmul.msk.f32.gmra.mxu0 %vm124_vm1, %v12676_v26 }
 0xe2b   :  { %v4011_v2 = vsel %vm4010_vm4, %v10609_v19, %v4007_v10  ;;  %v12795_v10 = vld [vmem:[%s14365_s3 + $0x10] sm:$0xff] }
 0xe2c   :  { %v4015_v58 = vmul.f32 %v4011_v2, %v12622_v38 }
 0xe2e   :  { %v4020_v17 = vmul.f32 %v10440_v9, %v4015_v58 }
 0xe30   :  { %v12683_v7 = vadd.f32 %v10441_v30, %v4020_v17 }
 0xe32   :  { %8835 = vmatmul.msk.f32.gmra.mxu3 %vm124_vm1, %v12683_v7  ;;  %8839 = vmatmul.msk.f32.gmra.mxu0 %vm124_vm1, %v12683_v7 }
 0xe97   :  { %v4104_v62 = vpop.f32.mrf.mxu0 }
 0xe98   :  { %v4105_v32 = vadd.f32 %v10442_v20, %v4104_v62 }
 0xe9d   :  { %v4074_v49 = vpop.f32.mrf.mxu3 }
 0xe9e   :  { %v4075_v50 = vadd.f32 %v10443_v4, %v4074_v49  ;;  %v12807_v49 = vld [vmem:[%s14365_s3 + $0x18] sm:$0xff] }
 0xe9f   :  { %v4107_v55 = vpop.f32.mrf.mxu0 }
 0xea0   :  { %v4108_v44 = vadd.f32 %v10442_v20, %v4107_v55 }
 0xea2   :  { %4276 = vrot.lane.b32.xlu1 %v4108_v44, %s10800_s0  ;;  %v12693_v38 = vpack.i.bf16 %v4105_v32, %v4108_v44 }
 0xea5   :  { %v4077_v43 = vpop.f32.mrf.mxu3 }
 0xea6   :  { %v4078_v12 = vadd.f32 %v10443_v4, %v4077_v43 }
 0xea7   :  { %v4110_v46 = vpop.f32.mrf.mxu0 }
 0xea8   :  { %v4111_v57 = vadd.f32 %v10442_v20, %v4110_v46 }
 0xeaa   :  { %4594 = vrot.lane.b32.xlu1 %v4111_v57, %s10801_s24  ;;  %4278 = vrot.lane.b32.xlu0 %v4111_v57, %s10800_s0 }
 0xead   :  { %v4080_v18 = vpop.f32.mrf.mxu3 }
 0xeae   :  { %v4081_v37 = vadd.f32 %v10443_v4, %v4080_v18 }
 0xeaf   :  { %v4113_v24 = vpop.f32.mrf.mxu0 }
 0xeb0   :  { %v4114_v52 = vadd.f32 %v10442_v20, %v4113_v24 }
 0xeb2   :  { %4280 = vrot.lane.b32.xlu2 %v4114_v52, %s10800_s0  ;;  %8840 = vmatpush.xpose.msk.msra.mxu1 %vm196_vm2, %v4114_v52  ;;  %v12702_v28 = vpack.i.bf16 %v4111_v57, %v4114_v52 }
 0xeb3   :  { %4438 = vrot.lane.b32.xlu1 %v4114_v52, %s10802_s25  ;;  %4266 = vrot.lane.b32.xlu0 %v4075_v50, %s10800_s0 }
 0xeb5   :  { %v4083_v34 = vpop.f32.mrf.mxu3 }
 0xeb6   :  { %8841 = vmatpush.xpose.msk.msra.mxu1 %vm196_vm2, %v4111_v57  ;;  %v4084_v53 = vadd.f32 %v10443_v4, %v4083_v34 }
 0xeba   :  { %4274 = vrot.lane.b32.xlu2 %v4105_v32, %s10800_s0  ;;  %8842 = vmatpush.xpose.msk.msra.mxu1 %vm196_vm2, %v4108_v44 }
 0xebb   :  { %4592 = vrot.lane.b32.xlu1 %v4108_v44, %s10801_s24  ;;  %4270 = vrot.lane.b32.xlu0 %v4081_v37, %s10800_s0 }
 0xebe   :  { %8843 = vmatpush.xpose.msk.msra.mxu1 %vm196_vm2, %v4105_v32 }
 0xec1   :  { %8844 = vmatmul.msk.f32.vlgmr.msra.gmra.mxu1 %vm196_vm2, %v4075_v50 }
 0xec2   :  { %4268 = vrot.lane.b32.xlu2 %v4078_v12, %s10800_s0 }
 0xec3   :  { %4424 = vrot.lane.b32.xlu1 %v4075_v50, %s10802_s25  ;;  %4436 = vrot.lane.b32.xlu0 %v4111_v57, %s10802_s25 }
 0xec9   :  { %8845 = vmatmul.msk.f32.gmra.mxu1 %vm196_vm2, %v4078_v12 }
 0xeca   :  { %4432 = vrot.lane.b32.xlu2 %v4105_v32, %s10802_s25 }
 0xecb   :  { %4584 = vrot.lane.b32.xlu1 %v4078_v12, %s10801_s24  ;;  %4434 = vrot.lane.b32.xlu0 %v4108_v44, %s10802_s25 }
 0xed1   :  { %8846 = vmatmul.msk.f32.gmra.mxu1 %vm196_vm2, %v4081_v37 }
 0xed2   :  { %4596 = vrot.lane.b32.xlu2 %v4114_v52, %s10801_s24 }
 0xed3   :  { %4430 = vrot.lane.b32.xlu1 %v4084_v53, %s10802_s25  ;;  %4590 = vrot.lane.b32.xlu0 %v4105_v32, %s10801_s24 }
 0xed9   :  { %8847 = vmatmul.msk.f32.gmra.mxu1 %vm196_vm2, %v4084_v53 }
 0xeda   :  { %4272 = vrot.lane.b32.xlu2 %v4084_v53, %s10800_s0 }
 0xedb   :  { %10370 = vrot.lane.b32.xlu1 %v12702_v28, %s10806_s16  ;;  %4426 = vrot.lane.b32.xlu0 %v4078_v12, %s10802_s25 }
 0xee2   :  { %4582 = vrot.lane.b32.xlu2 %v4075_v50, %s10801_s24 }
 0xee3   :  { %4586 = vrot.lane.b32.xlu0 %v4081_v37, %s10801_s24 }
 0xeea   :  { %4428 = vrot.lane.b32.xlu2 %v4081_v37, %s10802_s25 }
 0xeeb   :  { %10355 = vrot.lane.b32.xlu0 %v12693_v38, %s10804_s27 }
 0xef2   :  { %4588 = vrot.lane.b32.xlu2 %v4084_v53, %s10801_s24 }
 0xef3   :  { %10365 = vrot.lane.b32.xlu0 %v12693_v38, %s10803_s26 }
 0xefa   :  { %10350 = vrot.lane.b32.xlu2 %v12702_v28, %s10804_s27 }
 0xf02   :  { %10360 = vrot.lane.b32.xlu2 %v12702_v28, %s10803_s26 }
 0xf0c   :  { %v4281_v1 = vpop.permute.xlu2 %4280 }
 0xf0d   :  { %8852 = vmatpush.xpose.msk.msrb.mxu3 %vm196_vm2, %v4281_v1 }
 0xf14   :  { %v4277_v14 = vpop.permute.xlu1 %4276  ;;  %v4275_v48 = vpop.permute.xlu2 %4274 }
 0xf1c   :  { %v4269_v60 = vpop.permute.xlu2 %4268  ;;  %v4595_v29 = vpop.permute.xlu1 %4594 }
 0xf1d   :  { %v4279_v54 = vpop.permute.xlu0 %4278 }
 0xf1e   :  { %8853 = vmatpush.xpose.msk.msrb.mxu3 %vm196_vm2, %v4279_v54 }
 0xf22   :  { %8854 = vmatpush.xpose.msk.msrb.mxu3 %vm196_vm2, %v4277_v14 }
 0xf24   :  { %v4433_v9 = vpop.permute.xlu2 %4432 }
 0xf25   :  { %v4439_v45 = vpop.permute.xlu1 %4438  ;;  %v4267_v33 = vpop.permute.xlu0 %4266 }
 0xf26   :  { %8855 = vmatpush.xpose.msk.msrb.mxu3 %vm196_vm2, %v4275_v48  ;;  %8864 = vmatpush.xpose.msk.msrb.mxu1 %vm196_vm2, %v4439_v45 }
 0xf29   :  { %8856 = vmatmul.msk.f32.vlgmr.msrb.gmra.mxu3 %vm196_vm2, %v4267_v33 }
 0xf2c   :  { %v4597_v30 = vpop.permute.xlu2 %4596 }
 0xf2d   :  { %v4271_v59 = vpop.permute.xlu0 %4270  ;;  %8876 = vmatpush.xpose.msk.msra.mxu3 %vm196_vm2, %v4597_v30  ;;  %v4593_v61 = vpop.permute.xlu1 %4592 }
 0xf31   :  { %8857 = vmatmul.msk.f32.gmra.mxu3 %vm196_vm2, %v4269_v60 }
 0xf32   :  { %8877 = vmatpush.xpose.msk.msra.mxu3 %vm196_vm2, %v4595_v29 }
 0xf34   :  { %v4273_v13 = vpop.permute.xlu2 %4272 }
 0xf35   :  { %v4437_v3 = vpop.permute.xlu0 %4436  ;;  %v4425_v36 = vpop.permute.xlu1 %4424 }
 0xf36   :  { %8865 = vmatpush.xpose.msk.msrb.mxu1 %vm196_vm2, %v4437_v3  ;;  %8878 = vmatpush.xpose.msk.msra.mxu3 %vm196_vm2, %v4593_v61 }
 0xf39   :  { %8858 = vmatmul.msk.f32.gmra.mxu3 %vm196_vm2, %v4271_v59 }
 0xf3c   :  { %v4583_v8 = vpop.permute.xlu2 %4582 }
 0xf3d   :  { %v4435_v15 = vpop.permute.xlu0 %4434  ;;  %v4585_v42 = vpop.permute.xlu1 %4584 }
 0xf3e   :  { %8866 = vmatpush.xpose.msk.msrb.mxu1 %vm196_vm2, %v4435_v15  ;;  %v4157_v0 = vpop.f32.mrf.mxu1 }
 0xf3f   :  { %v12760_v51 = vadd.f32 %v12757_v35, %v4157_v0 }
 0xf41   :  { %8859 = vmatmul.msk.f32.gmra.mxu3 %vm196_vm2, %v4273_v13  ;;  %v4169_v23 = vsel %vm124_vm1, %v12760_v51, -inf }
 0xf42   :  { %8867 = vmatpush.xpose.msk.msrb.mxu1 %vm196_vm2, %v4433_v9  ;;  %4170 = vmax.xlane.f32.xlu0 %v4169_v23 }
 0xf44   :  { %v4429_v16 = vpop.permute.xlu2 %4428 }
 0xf45   :  { %v4591_v25 = vpop.permute.xlu0 %4590  ;;  %8868 = vmatmul.msk.f32.vlgmr.msrb.gmra.mxu1 %vm196_vm2, %v4425_v36  ;;  %v4431_v17 = vpop.permute.xlu1 %4430 }
 0xf46   :  { %8879 = vmatpush.xpose.msk.msra.mxu3 %vm196_vm2, %v4591_v25  ;;  %v4160_v63 = vpop.f32.mrf.mxu1 }
 0xf47   :  { %v12777_v19 = vadd.f32 %v12774_v11, %v4160_v63 }
 0xf49   :  { %8880 = vmatmul.msk.f32.vlgmr.msra.gmra.mxu3 %vm196_vm2, %v4583_v8  ;;  %v4172_v41 = vsel %vm124_vm1, %v12777_v19, -inf }
 0xf4a   :  { %5019 = vmatpush.msrb.mxu3 %v8899_v27  ;;  %4173 = vmax.xlane.f32.xlu2 %v4172_v41 }
 0xf4c   :  { %5020 = vmatpush.msrb.mxu3 %v8898_v56  ;;  %v4589_v5 = vpop.permute.xlu2 %4588 }
 0xf4d   :  { %v4427_v22 = vpop.permute.xlu0 %4426  ;;  %v10371_v52 = vpop.permute.xlu1 %10370 }
 0xf4e   :  { %5021 = vmatpush.msrb.mxu3 %v8897_v40  ;;  %8869 = vmatmul.msk.f32.gmra.mxu1 %vm196_vm2, %v4427_v22  ;;  %v4163_v39 = vpop.f32.mrf.mxu1  ;;  %v10372_v12 = vunpack.i.l.bf16 %v10371_v52  ;;  %v10373_v34 = vunpack.i.h.bf16 %v10371_v52 }
 0xf4f   :  { %v12798_v2 = vadd.f32 %v12795_v10, %v4163_v39 }
 0xf50   :  { %5022 = vmatpush.msrb.mxu3 %v8896_v47 }
 0xf51   :  { %8881 = vmatmul.msk.f32.gmra.mxu3 %vm196_vm2, %v4585_v42  ;;  %v4175_v58 = vsel %vm124_vm1, %v12798_v2, -inf }
 0xf52   :  { %4176 = vmax.xlane.f32.xlu1 %v4175_v58 }
 0xf54   :  { %v10351_v62 = vpop.permute.xlu2 %10350 }
 0xf55   :  { %v10352_v20 = vunpack.i.l.bf16 %v10351_v62  ;;  %v4587_v55 = vpop.permute.xlu0 %4586  ;;  %v10353_v44 = vunpack.i.h.bf16 %v10351_v62 }
 0xf56   :  { %8870 = vmatmul.msk.f32.gmra.mxu1 %vm196_vm2, %v4429_v16  ;;  %v4166_v32 = vpop.f32.mrf.mxu1 }
 0xf57   :  { %v12810_v46 = vadd.f32 %v12807_v49, %v4166_v32  ;;  %4249 = vmatpush.msrb.mxu2 %v10352_v20 }
 0xf59   :  { %8882 = vmatmul.msk.f32.gmra.mxu3 %vm196_vm2, %v4587_v55  ;;  %4250 = vmatpush.msrb.mxu2 %v10353_v44  ;;  %v4178_v57 = vsel %vm124_vm1, %v12810_v46, -inf }
 0xf5a   :  { %4179 = vmax.xlane.f32.xlu0 %v4178_v57 }
 0xf5c   :  { %v10361_v43 = vpop.permute.xlu2 %10360 }
 0xf5d   :  { %v10362_v4 = vunpack.i.l.bf16 %v10361_v43  ;;  %v10356_v24 = vpop.permute.xlu0 %10355  ;;  %v10363_v18 = vunpack.i.h.bf16 %v10361_v43 }
 0xf5e   :  { %v10357_v50 = vunpack.i.l.bf16 %v10356_v24  ;;  %8871 = vmatmul.msk.f32.gmra.mxu1 %vm196_vm2, %v4431_v17  ;;  %v10358_v37 = vunpack.i.h.bf16 %v10356_v24 }
 0xf5f   :  { %4407 = vmatpush.msrb.mxu0 %v10362_v4 }
 0xf60   :  { %4251 = vmatpush.msrb.mxu2 %v10357_v50 }
 0xf61   :  { %8883 = vmatmul.msk.f32.gmra.mxu3 %vm196_vm2, %v4589_v5  ;;  %4408 = vmatpush.msrb.mxu0 %v10363_v18 }
 0xf62   :  { %4252 = vmatpush.msrb.mxu2 %v10358_v37 }
 0xf64   :  { %4565 = vmatpush.msra.mxu2 %v10372_v12 }
 0xf65   :  { %v10366_v53 = vpop.permute.xlu0 %10365 }
 0xf66   :  { %4566 = vmatpush.msra.mxu2 %v10373_v34  ;;  %v10367_v1 = vunpack.i.l.bf16 %v10366_v53  ;;  %v10368_v14 = vunpack.i.h.bf16 %v10366_v53 }
 0xf68   :  { %4409 = vmatpush.msrb.mxu0 %v10367_v1 }
 0xf69   :  { %8908 = vmatmul.msk.f32.vlgmr.msrb.gmra.mxu3 %vm124_vm1, %v12662_v31 }
 0xf6a   :  { %4410 = vmatpush.msrb.mxu0 %v10368_v14 }
 0xf71   :  { %8909 = vmatmul.msk.f32.gmra.mxu3 %vm124_vm1, %v12669_v21 }
 0xf79   :  { %8910 = vmatmul.msk.f32.gmra.mxu3 %vm124_vm1, %v12676_v26 }
 0xf81   :  { %8911 = vmatmul.msk.f32.gmra.mxu3 %vm124_vm1, %v12683_v7 }
 0xfac   :  { %v4315_v48 = vpop.f32.mrf.mxu3 }
 0xfad   :  { %v12826_v60 = vadd.f32 %v12757_v35, %v4315_v48 }
 0xfaf   :  { %v4327_v29 = vsel %vm124_vm1, %v12826_v60, -inf }
 0xfb0   :  { %4328 = vmax.xlane.f32.xlu1 %v4327_v29 }
 0xfb4   :  { %v4318_v54 = vpop.f32.mrf.mxu3 }
 0xfb5   :  { %v12831_v9 = vadd.f32 %v12774_v11, %v4318_v54  ;;  %v4171_v30 = vpop.xlane.xlu0 %4170 }
 0xfb6   :  { %v4181_v3 = vsub.f32 %v12760_v51, %v4171_v30 }
 0xfb7   :  { %v4330_v45 = vsel %vm124_vm1, %v12831_v9, -inf }
 0xfb8   :  { %4331 = vmax.xlane.f32.xlu0 %v4330_v45  ;;  %v4185_v15 = vmul.f32 1.442695, %v4181_v3 }
 0xfba   :  { %10610 = vpow2.f32 %v4185_v15 }
 0xfbc   :  { %v4321_v33 = vpop.f32.mrf.mxu3 }
 0xfbd   :  { %v12842_v0 = vadd.f32 %v12795_v10, %v4321_v33  ;;  %v4174_v36 = vpop.xlane.xlu2 %4173 }
 0xfbe   :  { %v4182_v25 = vsub.f32 %v12777_v19, %v4174_v36 }
 0xfbf   :  { %v4333_v51 = vsel %vm124_vm1, %v12842_v0, -inf }
 0xfc0   :  { %v4187_v56 = vmul.f32 1.442695, %v4182_v25  ;;  %v12852_v41 = vpop.eup %10610 }
 0xfc1   :  { %v4193_v22 = vsel %vm124_vm1, %v12852_v41, 0.0 }
 0xfc2   :  { %v4473_v59 = vpop.f32.mrf.mxu1  ;;  %10612 = vpow2.f32 %v4187_v56 }
 0xfc3   :  { %v12836_v13 = vadd.f32 %v12757_v35, %v4473_v59 }
 0xfc4   :  { %v4324_v61 = vpop.f32.mrf.mxu3 }
 0xfc5   :  { %v4485_v8 = vsel %vm124_vm1, %v12836_v13, -inf  ;;  %v4177_v58 = vpop.xlane.xlu1 %4176  ;;  %v12892_v37 = vadd.f32 %v12807_v49, %v4324_v61 }
 0xfc6   :  { %4486 = vmax.xlane.f32.xlu2 %v4485_v8 }
 0xfc7   :  { %v4336_v12 = vsel %vm124_vm1, %v12892_v37, -inf }
 0xfc8   :  { %v12869_v62 = vpop.eup %10612 }
 0xfc9   :  { %v4196_v55 = vsel %vm124_vm1, %v12869_v62, 0.0 }
 0xfcb   :  { %v4476_v23 = vpop.f32.mrf.mxu1 }
 0xfcc   :  { %v12845_v16 = vadd.f32 %v12774_v11, %v4476_v23  ;;  %v4631_v27 = vpop.f32.mrf.mxu3 }
 0xfcd   :  { %v12867_v17 = vadd.f32 %v12757_v35, %v4631_v27  ;;  %v4180_v24 = vpop.xlane.xlu0 %4179 }
 0xfce   :  { %4334 = vmax.xlane.f32.xlu2 %v4333_v51  ;;  %v4488_v63 = vsel %vm124_vm1, %v12845_v16, -inf  ;;  %v4184_v50 = vsub.f32 %v12810_v46, %v4180_v24 }
 0xfcf   :  { %4489 = vmax.xlane.f32.xlu1 %v4488_v63  ;;  %v4643_v20 = vsel %vm124_vm1, %v12867_v17, -inf }
 0xfd3   :  { %v4479_v40 = vpop.f32.mrf.mxu1 }
 0xfd4   :  { %v12855_v42 = vadd.f32 %v12795_v10, %v4479_v40  ;;  %v4634_v47 = vpop.f32.mrf.mxu3 }
 0xfd5   :  { %v12858_v5 = vadd.f32 %v12774_v11, %v4634_v47  ;;  %v4183_v11 = vsub.f32 %v12798_v2, %v4177_v58 }
 0xfd6   :  { %v4491_v19 = vsel %vm124_vm1, %v12855_v42, -inf }
 0xfd7   :  { %4492 = vmax.xlane.f32.xlu0 %v4491_v19  ;;  %4194 = vadd.xlane.f32.xlu1 %v4193_v22  ;;  %v4646_v39 = vsel %vm124_vm1, %v12858_v5, -inf  ;;  %v4189_v57 = vmul.f32 1.442695, %v4183_v11 }
 0xfd8   :  { %4647 = vmax.xlane.f32.xlu2 %v4646_v39 }
 0xfd9   :  { %10614 = vpow2.f32 %v4189_v57 }
 0xfdb   :  { %v4482_v32 = vpop.f32.mrf.mxu1 }
 0xfdc   :  { %v4637_v44 = vpop.f32.mrf.mxu3  ;;  %v12877_v43 = vadd.f32 %v12807_v49, %v4482_v32 }
 0xfdd   :  { %v12880_v35 = vadd.f32 %v12795_v10, %v4637_v44  ;;  %v4191_v10 = vmul.f32 1.442695, %v4184_v50 }
 0xfde   :  { %v4494_v4 = vsel %vm124_vm1, %v12877_v43, -inf }
 0xfdf   :  { %4644 = vmax.xlane.f32.xlu0 %v4643_v20  ;;  %4197 = vadd.xlane.f32.xlu1 %v4196_v55  ;;  %v4649_v2 = vsel %vm124_vm1, %v12880_v35, -inf  ;;  %v12886_v52 = vpop.eup %10614  ;;  %10616 = vpow2.f32 %v4191_v10 }
 0xfe0   :  { %v4199_v18 = vsel %vm124_vm1, %v12886_v52, 0.0 }
 0xfe4   :  { %v4640_v1 = vpop.f32.mrf.mxu3 }
 0xfe5   :  { %v12896_v34 = vpop.eup %10616  ;;  %v12901_v46 = vadd.f32 %v12807_v49, %v4640_v1 }
 0xfe6   :  { %v4202_v53 = vsel %vm124_vm1, %v12896_v34, 0.0 }
 0xfe7   :  { %4650 = vmax.xlane.f32.xlu0 %v4649_v2  ;;  %4495 = vmax.xlane.f32.xlu1 %v4494_v4  ;;  %v4652_v14 = vsel %vm124_vm1, %v12901_v46, -inf }
 0xfef   :  { %4200 = vadd.xlane.f32.xlu1 %v4199_v18 }
 0xff7   :  { %4337 = vmax.xlane.f32.xlu1 %v4336_v12 }
 0xfff   :  { %4203 = vadd.xlane.f32.xlu1 %v4202_v53 }
0x1007   :  { %4653 = vmax.xlane.f32.xlu1 %v4652_v14 }
0x1023   :  { %v4329_v30 = vpop.xlane.xlu1 %4328 }
0x1024   :  { %v4339_v61 = vsub.f32 %v12826_v60, %v4329_v30 }
0x1026   :  { %v4343_v8 = vmul.f32 1.442695, %v4339_v61 }
0x102b   :  { %v4332_v48 = vpop.xlane.xlu0 %4331 }
0x102c   :  { %v4340_v29 = vsub.f32 %v12831_v9, %v4332_v48 }
0x102e   :  { %v4345_v54 = vmul.f32 1.442695, %v4340_v29 }
0x1030   :  { %10618 = vpow2.f32 %v4345_v54 }
0x1036   :  { %v12906_v45 = vpop.eup %10618 }
0x1037   :  { %v4354_v33 = vsel %vm124_vm1, %v12906_v45, 0.0 }
0x1038   :  { %4355 = vadd.xlane.f32.xlu2 %v4354_v33 }
0x1039   :  { %v4487_v59 = vpop.xlane.xlu2 %4486 }
0x103a   :  { %v4497_v49 = vsub.f32 %v12836_v13, %v4487_v59 }
0x103c   :  { %v4501_v3 = vmul.f32 1.442695, %v4497_v49 }
0x103e   :  { %10620 = vpow2.f32 %v4501_v3 }
0x103f   :  { %10622 = vpow2.f32 %v4343_v8 }
0x1041   :  { %v4335_v15 = vpop.xlane.xlu2 %4334 }
0x1042   :  { %v4490_v36 = vpop.xlane.xlu1 %4489  ;;  %v4341_v27 = vsub.f32 %v12842_v0, %v4335_v15 }
0x1043   :  { %v4498_v9 = vsub.f32 %v12845_v16, %v4490_v36 }
0x1044   :  { %v12913_v23 = vpop.eup %10620  ;;  %v4347_v13 = vmul.f32 1.442695, %v4341_v27 }
0x1045   :  { %v4503_v25 = vmul.f32 1.442695, %v4498_v9  ;;  %v4509_v51 = vsel %vm124_vm1, %v12913_v23, 0.0  ;;  %v12918_v60 = vpop.eup %10622 }
0x1046   :  { %4510 = vadd.xlane.f32.xlu1 %v4509_v51  ;;  %v4351_v16 = vsel %vm124_vm1, %v12918_v60, 0.0 }
0x1047   :  { %10624 = vpow2.f32 %v4503_v25 }
0x104a   :  { %v12920_v63 = vpop.xlane.xlu0 %4492  ;;  %v4195_v56 = vpop.xlane.xlu1 %4194 }
0x104b   :  { %10626 = vrcp.f32 %v4195_v56  ;;  %v4648_v4 = vpop.xlane.xlu2 %4647  ;;  %v4499_v3 = vsub.f32 %v12855_v42, %v12920_v63 }
0x104c   :  { %10628 = vpow2.f32 %v4347_v13  ;;  %v4656_v24 = vsub.f32 %v12858_v5, %v4648_v4 }
0x104d   :  { %v12922_v40 = vpop.eup %10624  ;;  %v4505_v15 = vmul.f32 1.442695, %v4499_v3 }
0x104e   :  { %4352 = vadd.xlane.f32.xlu1 %v4351_v16  ;;  %v4512_v0 = vsel %vm124_vm1, %v12922_v40, 0.0  ;;  %v4661_v18 = vmul.f32 1.442695, %v4656_v24 }
0x104f   :  { %4513 = vadd.xlane.f32.xlu0 %v4512_v0 }
0x1050   :  { %10375 = vrot.lane.b32.xlu2 %v12693_v38, %s10806_s16 }
0x1051   :  { %v10627_v47 = vpop.eup %10626 }
0x1052   :  { %v4209_v19 = vmul.f32 %v10627_v47, %v12852_v41  ;;  %v4645_v22 = vpop.xlane.xlu0 %4644  ;;  %v4198_v39 = vpop.xlane.xlu1 %4197 }
0x1053   :  { %v12931_v58 = vpop.eup %10628  ;;  %v4655_v11 = vsub.f32 %v12867_v17, %v4645_v22  ;;  %10630 = vrcp.f32 %v4198_v39 }
0x1054   :  { %8848 = vmatmul.msk.f32.vlgmr.msrb.gmra.mxu2 %vm124_vm1, %v4209_v19  ;;  %v4357_v55 = vsel %vm124_vm1, %v12931_v58, 0.0 }
0x1055   :  { %v4659_v20 = vmul.f32 1.442695, %v4655_v11 }
0x1057   :  { %10632 = vpow2.f32 %v4659_v20  ;;  %4358 = vadd.xlane.f32.xlu0 %v4357_v55 }
0x1059   :  { %v10631_v32 = vpop.eup %10630 }
0x105a   :  { %v4496_v44 = vpop.xlane.xlu1 %4495  ;;  %v4210_v57 = vmul.f32 %v10631_v32, %v12869_v62  ;;  %v4651_v30 = vpop.xlane.xlu0 %4650 }
0x105b   :  { %v4500_v1 = vsub.f32 %v12877_v43, %v4496_v44  ;;  %v4657_v59 = vsub.f32 %v12880_v35, %v4651_v30 }
0x105c   :  { %8849 = vmatmul.msk.f32.gmra.mxu2 %vm124_vm1, %v4210_v57  ;;  %v5024_v57 = vpop.f32.mrf.mxu3 }
0x105d   :  { %v12939_v41 = vpop.eup %10632  ;;  %v4507_v48 = vmul.f32 1.442695, %v4500_v1  ;;  %v4663_v49 = vmul.f32 1.442695, %v4657_v59  ;;  %v10444_v1 = vld [vmem:[%s14369_s7 + $0x3] ss:$0 sm:$0xff] }
0x105e   :  { %v4667_v17 = vsel %vm124_vm1, %v12939_v41, 0.0  ;;  %v13013_v30 = vadd.f32 %v10444_v1, %v5024_v57  ;;  %s14384_s7 = smov 16  }
0x105f   :  { %4668 = vadd.xlane.f32.xlu0 %v4667_v17 }
0x1062   :  { %v4201_v2 = vpop.xlane.xlu1 %4200 }
0x1063   :  { %10634 = vrcp.f32 %v4201_v2 }
0x1064   :  { %10636 = vpow2.f32 %v4661_v18  ;;  %v5027_v2 = vpop.f32.mrf.mxu3 }
0x1069   :  { %v10635_v50 = vpop.eup %10634 }
0x106a   :  { %v4338_v10 = vpop.xlane.xlu1 %4337  ;;  %v4211_v12 = vmul.f32 %v10635_v50, %v12886_v52  ;;  %v12950_v5 = vpop.eup %10636 }
0x106b   :  { %v4342_v62 = vsub.f32 %v12892_v37, %v4338_v10  ;;  %v4670_v37 = vsel %vm124_vm1, %v12950_v5, 0.0 }
0x106c   :  { %8850 = vmatmul.msk.f32.gmra.mxu2 %vm124_vm1, %v4211_v12  ;;  %v5030_v24 = vpop.f32.mrf.mxu3 }
0x106d   :  { %v4349_v53 = vmul.f32 1.442695, %v4342_v62 }
0x106f   :  { %10638 = vpow2.f32 %v4349_v53 }
0x1072   :  { %v4204_v14 = vpop.xlane.xlu1 %4203 }
0x1073   :  { %10640 = vrcp.f32 %v4204_v14  ;;  %10385 = vrot.lane.b32.xlu0 %v12693_v38, %s10805_s30 }
0x1074   :  { %10642 = vpow2.f32 %v4507_v48  ;;  %v5033_v53 = vpop.f32.mrf.mxu3 }
0x1075   :  { %v12952_v29 = vpop.eup %10638  ;;  %10644 = vpow2.f32 %v4663_v49 }
0x1076   :  { %v4360_v52 = vsel %vm124_vm1, %v12952_v29, 0.0  ;;  %10646 = vpow2.f32 %v4505_v15 }
0x1077   :  { %4361 = vadd.xlane.f32.xlu1 %v4360_v52 }
0x1079   :  { %v10641_v43 = vpop.eup %10640  ;;  %4671 = vadd.xlane.f32.xlu2 %v4670_v37  ;;  %v13003_v37 = vadd.f32 %v10444_v1, %v5030_v24 }
0x107a   :  { %v4212_v54 = vmul.f32 %v10641_v43, %v12896_v34  ;;  %v12960_v33 = vpop.eup %10642  ;;  %v4654_v36 = vpop.xlane.xlu1 %4653 }
0x107b   :  { %v4518_v38 = vsel %vm124_vm1, %v12960_v33, 0.0  ;;  %v12967_v61 = vpop.eup %10644  ;;  %v4658_v35 = vsub.f32 %v12901_v46, %v4654_v36 }
0x107c   :  { %8851 = vmatmul.msk.f32.gmra.mxu2 %vm124_vm1, %v4212_v54  ;;  %v4673_v34 = vsel %vm124_vm1, %v12967_v61, 0.0 }
0x107d   :  { %v4665_v27 = vmul.f32 1.442695, %v4658_v35 }
0x107f   :  { %10648 = vpow2.f32 %v4665_v27 }
0x1081   :  { %4519 = vadd.xlane.f32.xlu2 %v4518_v38  ;;  %v13008_v38 = vadd.f32 %v10444_v1, %v5027_v2 }
0x1090   :  { %10380 = vrot.lane.b32.xlu1 %v12702_v28, %s10805_s30  ;;  %v12974_v28 = vpop.eup %10646 }
0x1091   :  { %v4515_v56 = vsel %vm124_vm1, %v12974_v28, 0.0  ;;  %v12978_v42 = vpop.eup %10648 }
0x1092   :  { %v4676_v0 = vsel %vm124_vm1, %v12978_v42, 0.0 }
0x109d   :  { %4674 = vadd.xlane.f32.xlu0 %v4673_v34 }
0x10ab   :  { %v4356_v8 = vpop.xlane.xlu2 %4355 }
0x10b3   :  { %v10376_v9 = vpop.permute.xlu2 %10375 }
0x10b4   :  { %v10377_v25 = vunpack.i.l.bf16 %v10376_v9  ;;  %v10378_v51 = vunpack.i.h.bf16 %v10376_v9 }
0x10b6   :  { %4567 = vmatpush.msra.mxu2 %v10377_v25 }
0x10b8   :  { %4568 = vmatpush.msra.mxu2 %v10378_v51 }
0x10b9   :  { %v4511_v13 = vpop.xlane.xlu1 %4510 }
0x10ba   :  { %10650 = vrcp.f32 %v4511_v13  ;;  %4516 = vadd.xlane.f32.xlu1 %v4515_v56 }
0x10c0   :  { %v10651_v63 = vpop.eup %10650 }
0x10c1   :  { %v4525_v46 = vmul.f32 %v10651_v63, %v12913_v23  ;;  %v4353_v16 = vpop.xlane.xlu1 %4352 }
0x10c2   :  { %10652 = vrcp.f32 %v4353_v16  ;;  %v4514_v47 = vpop.xlane.xlu0 %4513  ;;  %4677 = vadd.xlane.f32.xlu1 %v4676_v0 }
0x10c3   :  { %10654 = vrcp.f32 %v4514_v47  ;;  %8872 = vmatmul.msk.f32.vlgmr.msra.gmra.mxu2 %vm124_vm1, %v4525_v46  ;;  %v8831_v47 = vld [vmem:[%s14370_s8 + $0x58] sm:$0xff] }
0x10c4   :  { %10656 = vrcp.f32 %v4356_v8  ;;  %4825 = vmatpush.msra.mxu1 %v8831_v47 }
0x10c8   :  { %v10653_v19 = vpop.eup %10652 }
0x10c9   :  { %v10655_v22 = vpop.eup %10654  ;;  %v4367_v39 = vmul.f32 %v10653_v19, %v12918_v60  ;;  %v8830_v19 = vld [vmem:[%s14370_s8 + $0x50] sm:$0xff] }
0x10ca   :  { %v4526_v11 = vmul.f32 %v10655_v22, %v12922_v40  ;;  %v4359_v23 = vpop.xlane.xlu0 %4358  ;;  %v10657_v20 = vpop.eup %10656  ;;  %v8829_v22 = vld [vmem:[%s14370_s8 + $0x48] sm:$0xff]  ;;  %4826 = vmatpush.msra.mxu1 %v8830_v19 }
0x10cb   :  { %8860 = vmatmul.msk.f32.vlgmr.msrb.gmra.mxu0 %vm124_vm1, %v4367_v39  ;;  %10658 = vrcp.f32 %v4359_v23  ;;  %v4368_v55 = vmul.f32 %v10657_v20, %v12906_v45  ;;  %v8828_v20 = vld [vmem:[%s14370_s8 + $0x40] sm:$0xff] }
0x10cc   :  { %8873 = vmatmul.msk.f32.gmra.mxu2 %vm124_vm1, %v4526_v11  ;;  %4827 = vmatpush.msra.mxu1 %v8829_v22 }
0x10ce   :  { %4828 = vmatpush.msra.mxu1 %v8828_v20 }
0x10d1   :  { %v10659_v32 = vpop.eup %10658 }
0x10d2   :  { %v4369_v44 = vmul.f32 %v10659_v32, %v12931_v58  ;;  %v4669_v4 = vpop.xlane.xlu0 %4668 }
0x10d3   :  { %8861 = vmatmul.msk.f32.gmra.mxu0 %vm124_vm1, %v4368_v55 }
0x10d7   :  { %v4254_v49 = vpop.f32.mrf.mxu2 }
0x10db   :  { %8862 = vmatmul.msk.f32.gmra.mxu0 %vm124_vm1, %v4369_v44 }
0x10e5   :  { %v10386_v18 = vpop.permute.xlu0 %10385 }
0x10e6   :  { %v10387_v62 = vunpack.i.l.bf16 %v10386_v18  ;;  %v10388_v14 = vunpack.i.h.bf16 %v10386_v18 }
0x10ea   :  { %v4362_v60 = vpop.xlane.xlu1 %4361 }
0x10eb   :  { %10660 = vrcp.f32 %v4362_v60 }
0x10ec   :  { %10662 = vrcp.f32 %v4669_v4  ;;  %v4672_v58 = vpop.xlane.xlu2 %4671 }
0x10ed   :  { %10664 = vrcp.f32 %v4672_v58 }
0x10f1   :  { %v10661_v40 = vpop.eup %10660 }
0x10f2   :  { %v4370_v17 = vmul.f32 %v10661_v40, %v12952_v29  ;;  %v10663_v12 = vpop.eup %10662  ;;  %v12998_v29 = vadd.f32 %v10444_v1, %v5033_v53 }
0x10f3   :  { %v4683_v48 = vmul.f32 %v10663_v12, %v12939_v41  ;;  %v10665_v52 = vpop.eup %10664 }
0x10f4   :  { %8863 = vmatmul.msk.f32.gmra.mxu0 %vm124_vm1, %v4370_v17  ;;  %v4684_v54 = vmul.f32 %v10665_v52, %v12950_v5  ;;  %v4257_v5 = vpop.f32.mrf.mxu2  ;;  %v4520_v3 = vpop.xlane.xlu2 %4519 }
0x10fc   :  { %v4260_v35 = vpop.f32.mrf.mxu2 }
0x1102   :  { %v10381_v45 = vpop.permute.xlu1 %10380 }
0x1103   :  { %v10382_v50 = vunpack.i.l.bf16 %v10381_v45  ;;  %v10383_v10 = vunpack.i.h.bf16 %v10381_v45 }
0x1104   :  { %v4263_v51 = vpop.f32.mrf.mxu2 }
0x1105   :  { %4723 = vmatpush.msra.mxu0 %v10382_v50 }
0x1107   :  { %4724 = vmatpush.msra.mxu0 %v10383_v10 }
0x1109   :  { %4725 = vmatpush.msra.mxu0 %v10387_v62 }
0x110b   :  { %4726 = vmatpush.msra.mxu0 %v10388_v14 }
0x110c   :  { %8884 = vmatmul.msk.f32.vlgmr.msra.gmra.mxu0 %vm124_vm1, %v4683_v48 }
0x110d   :  { %8912 = vmatpush.xpose.msk.msrb.mxu0 %vm196_vm2, %v12998_v29 }
0x1110   :  { %v4675_v43 = vpop.xlane.xlu0 %4674 }
0x1111   :  { %10666 = vrcp.f32 %v4675_v43  ;;  %8913 = vmatpush.xpose.msk.msrb.mxu0 %vm196_vm2, %v13003_v37 }
0x1114   :  { %8885 = vmatmul.msk.f32.gmra.mxu0 %vm124_vm1, %v4684_v54 }
0x1115   :  { %8914 = vmatpush.xpose.msk.msrb.mxu0 %vm196_vm2, %v13008_v38 }
0x1117   :  { %v10667_v41 = vpop.eup %10666 }
0x1118   :  { %v4685_v59 = vmul.f32 %v10667_v41, %v12967_v61  ;;  %v10445_v41 = vld [vmem:[%s14371_s9 + $0x9] ss:$0 sm:$0xff] }
0x1119   :  { %8915 = vmatpush.xpose.msk.msrb.mxu0 %vm196_vm2, %v13013_v30 }
0x111c   :  { %8886 = vmatmul.msk.f32.gmra.mxu0 %vm124_vm1, %v4685_v59 }
0x112d   :  { %v4517_v34 = vpop.xlane.xlu1 %4516 }
0x112e   :  { %10668 = vrcp.f32 %v4517_v34 }
0x112f   :  { %10670 = vrcp.f32 %v4520_v3 }
0x1134   :  { %v10669_v8 = vpop.eup %10668 }
0x1135   :  { %v4678_v15 = vpop.xlane.xlu1 %4677  ;;  %v4527_v36 = vmul.f32 %v10669_v8, %v12974_v28  ;;  %v10671_v9 = vpop.eup %10670 }
0x1136   :  { %10672 = vrcp.f32 %v4678_v15  ;;  %v4528_v61 = vmul.f32 %v10671_v9, %v12960_v33 }
0x1137   :  { %8874 = vmatmul.msk.f32.gmra.mxu2 %vm124_vm1, %v4527_v36 }
0x113c   :  { %v10673_v27 = vpop.eup %10672 }
0x113d   :  { %v4686_v25 = vmul.f32 %v10673_v27, %v12978_v42 }
0x113f   :  { %8875 = vmatmul.msk.f32.gmra.mxu2 %vm124_vm1, %v4528_v61  ;;  %8887 = vmatmul.msk.f32.gmra.mxu0 %vm124_vm1, %v4686_v25 }
0x1146   :  { %v4570_v13 = vpop.f32.mrf.mxu2 }
0x1147   :  { %4760 = vrot.lane.b32.xlu1 %v4570_v13, %s14384_s7 }
0x1148   :  { %v4412_v56 = vpop.f32.mrf.mxu0 }
0x1149   :  { %4744 = vrot.lane.b32.xlu2 %v4412_v56, %s14385_s20 }
0x114f   :  { %v4573_v28 = vpop.f32.mrf.mxu2 }
0x1150   :  { %4762 = vrot.lane.b32.xlu1 %v4573_v28, %s14384_s7  ;;  %v4415_v63 = vpop.f32.mrf.mxu0 }
0x1151   :  { %4746 = vrot.lane.b32.xlu2 %v4415_v63, %s14385_s20 }
0x1158   :  { %v4418_v33 = vpop.f32.mrf.mxu0 }
0x1159   :  { %4748 = vrot.lane.b32.xlu2 %v4418_v33, %s14385_s20 }
0x1171   :  { %v4421_v42 = vpop.f32.mrf.mxu0 }
0x1172   :  { %4750 = vrot.lane.b32.xlu2 %v4421_v42, %s14385_s20 }
0x1189   :  { %v4728_v46 = vpop.f32.mrf.mxu0 }
0x118a   :  { %4776 = vrot.lane.b32.xlu0 %v4728_v46, %s14386_s21 }
0x1191   :  { %v4731_v16 = vpop.f32.mrf.mxu0 }
0x1192   :  { %4778 = vrot.lane.b32.xlu0 %v4731_v16, %s14386_s21 }
0x1199   :  { %v4734_v0 = vpop.f32.mrf.mxu0 }
0x119a   :  { %4780 = vrot.lane.b32.xlu0 %v4734_v0, %s14386_s21 }
0x11a3   :  { %v4745_v55 = vpop.permute.xlu2 %4744 }
0x11a4   :  { %v4788_v44 = vsel %vm196_vm2, %v4254_v49, %v4745_v55 }
0x11ab   :  { %v4747_v17 = vpop.permute.xlu2 %4746 }
0x11ac   :  { %v4789_v4 = vsel %vm196_vm2, %v4257_v5, %v4747_v17 }
0x11b3   :  { %v4749_v18 = vpop.permute.xlu2 %4748 }
0x11b4   :  { %v4790_v10 = vsel %vm196_vm2, %v4260_v35, %v4749_v18 }
0x11b9   :  { %v4761_v32 = vpop.permute.xlu1 %4760 }
0x11ba   :  { %v4576_v39 = vpop.f32.mrf.mxu2  ;;  %v4792_v57 = vsel %vm66_vm0, %v4788_v44, %v4761_v32  ;;  %v8895_v44 = vld [vmem:[%s14366_s4 + $0x78] sm:$0xff] }
0x11bb   :  { %4764 = vrot.lane.b32.xlu1 %v4576_v39, %s14384_s7  ;;  %4989 = vmatpush.msrb.mxu2 %v8895_v44 }
0x11bc   :  { %v4737_v11 = vpop.f32.mrf.mxu0 }
0x11bd   :  { %4782 = vrot.lane.b32.xlu0 %v4737_v11, %s14386_s21 }
0x11c2   :  { %v4579_v23 = vpop.f32.mrf.mxu2  ;;  %v4763_v2 = vpop.permute.xlu1 %4762 }
0x11c3   :  { %4766 = vrot.lane.b32.xlu1 %v4579_v23, %s14384_s7  ;;  %v4793_v24 = vsel %vm66_vm0, %v4789_v4, %v4763_v2 }
0x11cc   :  { %v4751_v1 = vpop.permute.xlu2 %4750 }
0x11cd   :  { %v4791_v14 = vsel %vm196_vm2, %v4263_v51, %v4751_v1 }
0x11fc   :  { %v4777_v60 = vpop.permute.xlu0 %4776 }
0x11fd   :  { %v4796_v40 = vsel %vm877_vm3, %v4792_v57, %v4777_v60  ;;  %v8894_v57 = vld [vmem:[%s14366_s4 + $0x70] sm:$0xff]  ;;  %v8893_v60 = vld [vmem:[%s14366_s4 + $0x68] sm:$0xff] }
0x11fe   :  { %8888 = vmatmul.msk.f32.vlgmr.msra.gmra.mxu1 %vm124_vm1, %v4796_v40  ;;  %4990 = vmatpush.msrb.mxu2 %v8894_v57  ;;  %v8892_v40 = vld [vmem:[%s14366_s4 + $0x60] sm:$0xff] }
0x1200   :  { %4991 = vmatpush.msrb.mxu2 %v8893_v60 }
0x1202   :  { %4992 = vmatpush.msrb.mxu2 %v8892_v40 }
0x1204   :  { %v4779_v45 = vpop.permute.xlu0 %4778 }
0x1205   :  { %v4797_v50 = vsel %vm877_vm3, %v4793_v24, %v4779_v45 }
0x1206   :  { %8889 = vmatmul.msk.f32.gmra.mxu1 %vm124_vm1, %v4797_v50 }
0x120c   :  { %v4781_v12 = vpop.permute.xlu0 %4780 }
0x122d   :  { %v4765_v58 = vpop.permute.xlu1 %4764 }
0x122e   :  { %v4794_v62 = vsel %vm66_vm0, %v4790_v10, %v4765_v58 }
0x122f   :  { %v4798_v53 = vsel %vm877_vm3, %v4794_v62, %v4781_v12  ;;  %v4783_v52 = vpop.permute.xlu0 %4782 }
0x1230   :  { %8890 = vmatmul.msk.f32.gmra.mxu1 %vm124_vm1, %v4798_v53 }
0x1235   :  { %v4767_v48 = vpop.permute.xlu1 %4766 }
0x1236   :  { %v4795_v43 = vsel %vm66_vm0, %v4791_v14, %v4767_v48 }
0x1237   :  { %v4799_v54 = vsel %vm877_vm3, %v4795_v43, %v4783_v52  ;;  %v10446_v52 = vld [vmem:[%s14371_s9 + $0xb] ss:$0 sm:$0xff] }
0x1238   :  { %8891 = vmatmul.msk.f32.gmra.mxu1 %vm124_vm1, %v4799_v54 }
0x127b   :  { %v4830_v59 = vpop.f32.mrf.mxu1 }
0x127c   :  { %v4831_v49 = vadd.f32 %v10445_v41, %v4830_v59 }
0x127e   :  { %v4842_v34 = vadd.f32 %v4831_v49, %v12662_v31 }
0x1280   :  { %v4848_v5 = vsel %vm124_vm1, %v4842_v34, 0.0 }
0x1281   :  { %4849 = vadd.xlane.f32.xlu2 %v4848_v5 }
0x1283   :  { %v4833_v3 = vpop.f32.mrf.mxu1 }
0x1284   :  { %v4834_v8 = vadd.f32 %v10445_v41, %v4833_v3 }
0x1286   :  { %v4843_v15 = vadd.f32 %v4834_v8, %v12669_v21 }
0x1288   :  { %v4851_v36 = vsel %vm124_vm1, %v4843_v15, 0.0 }
0x1289   :  { %4852 = vadd.xlane.f32.xlu1 %v4851_v36 }
0x12ad   :  { %v4836_v35 = vpop.f32.mrf.mxu1 }
0x12ae   :  { %v4837_v9 = vadd.f32 %v10445_v41, %v4836_v35 }
0x12b0   :  { %v4844_v27 = vadd.f32 %v4837_v9, %v12676_v26 }
0x12b2   :  { %v4854_v61 = vsel %vm124_vm1, %v4844_v27, 0.0 }
0x12b3   :  { %4855 = vadd.xlane.f32.xlu0 %v4854_v61 }
0x12b5   :  { %v4839_v25 = vpop.f32.mrf.mxu1 }
0x12b6   :  { %v4840_v51 = vadd.f32 %v10445_v41, %v4839_v25  ;;  %v10447_v41 = vld [vmem:[%s14371_s9 + $0xc] ss:$0 sm:$0xff] }
0x12b8   :  { %v4845_v31 = vadd.f32 %v4840_v51, %v12683_v7 }
0x12ba   :  { %v4857_v13 = vsel %vm124_vm1, %v4845_v31, 0.0 }
0x12bb   :  { %4858 = vadd.xlane.f32.xlu2 %v4857_v13 }
0x12f4   :  { %v4850_v56 = vpop.xlane.xlu2 %4849 }
0x12f5   :  { %v4860_v21 = vmul.f32 %v4850_v56, %v11365_v6 }
0x12f7   :  { %v4864_v28 = vsub.f32 %v4842_v34, %v4860_v21 }
0x12f9   :  { %v4868_v63 = vmul.f32 %v4864_v28, %v4864_v28 }
0x12fb   :  { %v4872_v33 = vsel %vm124_vm1, %v4868_v63, 0.0 }
0x12fc   :  { %4873 = vadd.xlane.f32.xlu1 %v4872_v33  ;;  %v4853_v42 = vpop.xlane.xlu1 %4852 }
0x12fd   :  { %v4861_v26 = vmul.f32 %v4853_v42, %v11365_v6 }
0x12ff   :  { %v13079_v46 = vsub.f32 %v4843_v15, %v4861_v26 }
0x1301   :  { %v4869_v16 = vmul.f32 %v13079_v46, %v13079_v46 }
0x1303   :  { %v4875_v7 = vsel %vm124_vm1, %v4869_v16, 0.0 }
0x1304   :  { %4876 = vadd.xlane.f32.xlu2 %v4875_v7 }
0x131c   :  { %5200 = vrot.lane.b32.xlu2 %v12998_v29, %s10800_s0 }
0x1326   :  { %v4856_v0 = vpop.xlane.xlu0 %4855 }
0x1327   :  { %v4862_v47 = vmul.f32 %v4856_v0, %v11365_v6 }
0x1329   :  { %v13087_v19 = vsub.f32 %v4844_v27, %v4862_v47 }
0x132b   :  { %v4870_v22 = vmul.f32 %v13087_v19, %v13087_v19 }
0x132d   :  { %v4878_v39 = vsel %vm124_vm1, %v4870_v22, 0.0 }
0x132e   :  { %v4859_v11 = vpop.xlane.xlu2 %4858  ;;  %4879 = vadd.xlane.f32.xlu0 %v4878_v39 }
0x132f   :  { %v4863_v23 = vmul.f32 %v4859_v11, %v11365_v6 }
0x1331   :  { %v13093_v20 = vsub.f32 %v4845_v31, %v4863_v23 }
0x1333   :  { %v4871_v55 = vmul.f32 %v13093_v20, %v13093_v20 }
0x1335   :  { %v4881_v32 = vsel %vm124_vm1, %v4871_v55, 0.0 }
0x1336   :  { %4882 = vadd.xlane.f32.xlu1 %v4881_v32 }
0x1342   :  { %5198 = vrot.lane.b32.xlu0 %v13003_v37, %s10800_s0 }
0x134a   :  { %5194 = vrot.lane.b32.xlu0 %v13013_v30, %s10800_s0 }
0x134f   :  { %5196 = vrot.lane.b32.xlu1 %v13008_v38, %s10800_s0 }
0x136f   :  { %v4874_v17 = vpop.xlane.xlu1 %4873 }
0x1370   :  { %v4884_v2 = vmul.f32 %v4874_v17, %v11365_v6  ;;  %v10448_v17 = vld [vmem:[%s14367_s5 + $0x3] ss:$0 sm:$0xff] }
0x1372   :  { %v4888_v4 = vadd.f32 1e-05, %v4884_v2 }
0x1374   :  { %10674 = vrsqrt.f32 %v4888_v4  ;;  %vm4898_vm6 = vweird.f32 %v4888_v4 }
0x1377   :  { %v4877_v24 = vpop.xlane.xlu2 %4876 }
0x1378   :  { %v4885_v45 = vmul.f32 %v4877_v24, %v11365_v6 }
0x137a   :  { %v10675_v50 = vpop.eup %10674  ;;  %v4889_v18 = vadd.f32 1e-05, %v4885_v45 }
0x137b   :  { %v4893_v10 = vmul.f32 %v10675_v50, %v4888_v4  ;;  %vm4899_vm5 = vweird.f32 %v10675_v50 }
0x137c   :  { %10676 = vrsqrt.f32 %v4889_v18  ;;  %vm4900_vm7 = vmor %vm4898_vm6, %vm4899_vm5  ;;  %vm4908_vm9 = vweird.f32 %v4889_v18 }
0x137d   :  { %v4894_v58 = vmul.f32 %v10675_v50, %v4893_v10 }
0x137f   :  { %v4895_v12 = vmul.f32 0.5, %v4894_v58  ;;  %v5201_v62 = vpop.permute.xlu2 %5200  ;;  %v13180_v58 = vpack.i.bf16 %v13003_v37, %v12998_v29 }
0x1380   :  { %8924 = vmatpush.xpose.msk.msra.mxu2 %vm196_vm2, %v5201_v62 }
0x1381   :  { %v4896_v53 = vsub.f32 1.5, %v4895_v12  ;;  %v13184_v12 = vpack.i.bf16 %v13013_v30, %v13008_v38 }
0x1382   :  { %v10677_v1 = vpop.eup %10676 }
0x1383   :  { %v4897_v14 = vmul.f32 %v10675_v50, %v4896_v53  ;;  %v4903_v48 = vmul.f32 %v10677_v1, %v4889_v18  ;;  %vm4909_vm8 = vweird.f32 %v10677_v1 }
0x1384   :  { %vm4910_vm10 = vmor %vm4908_vm9, %vm4909_vm8 }
0x1385   :  { %v4901_v43 = vsel %vm4900_vm7, %v10675_v50, %v4897_v14  ;;  %v4904_v54 = vmul.f32 %v10677_v1, %v4903_v48 }
0x1386   :  { %v4932_v59 = vmul.f32 %v4901_v43, %v4864_v28  ;;  %v13217_v43 = vld [vmem:[%s14365_s3 + $0x8] sm:$0xff] }
0x1387   :  { %v4905_v49 = vmul.f32 0.5, %v4904_v54 }
0x1388   :  { %v4937_v34 = vmul.f32 %v10446_v52, %v4932_v59 }
0x1389   :  { %v4906_v5 = vsub.f32 1.5, %v4905_v49 }
0x138a   :  { %v13125_v3 = vadd.f32 %v10447_v41, %v4937_v34 }
0x138b   :  { %v4907_v8 = vmul.f32 %v10677_v1, %v4906_v5 }
0x138c   :  { %8904 = vmatmul.msk.f32.vlgmr.msrb.gmra.mxu2 %vm124_vm1, %v13125_v3 }
0x138d   :  { %v4911_v15 = vsel %vm4910_vm10, %v10677_v1, %v4907_v8 }
0x138e   :  { %v4933_v36 = vmul.f32 %v4911_v15, %v13079_v46 }
0x1390   :  { %v4938_v35 = vmul.f32 %v10446_v52, %v4933_v36 }
0x1392   :  { %v13130_v9 = vadd.f32 %v10447_v41, %v4938_v35 }
0x1394   :  { %8905 = vmatmul.msk.f32.gmra.mxu2 %vm124_vm1, %v13130_v9 }
0x13a1   :  { %v4880_v27 = vpop.xlane.xlu0 %4879 }
0x13a2   :  { %v4886_v61 = vmul.f32 %v4880_v27, %v11365_v6 }
0x13a4   :  { %v4890_v25 = vadd.f32 1e-05, %v4886_v61  ;;  %v13232_v61 = vld [vmem:[%s14365_s3 + $0x10] sm:$0xff] }
0x13a6   :  { %10678 = vrsqrt.f32 %v4890_v25  ;;  %vm4918_vm12 = vweird.f32 %v4890_v25 }
0x13a9   :  { %v4883_v51 = vpop.xlane.xlu1 %4882 }
0x13aa   :  { %v4887_v31 = vmul.f32 %v4883_v51, %v11365_v6 }
0x13ac   :  { %v10679_v13 = vpop.eup %10678  ;;  %v4891_v56 = vadd.f32 1e-05, %v4887_v31 }
0x13ad   :  { %v4913_v21 = vmul.f32 %v10679_v13, %v4890_v25  ;;  %vm4919_vm11 = vweird.f32 %v10679_v13 }
0x13ae   :  { %10680 = vrsqrt.f32 %v4891_v56  ;;  %vm4920_vm13 = vmor %vm4918_vm12, %vm4919_vm11  ;;  %vm4928_vm15 = vweird.f32 %v4891_v56 }
0x13af   :  { %v4914_v28 = vmul.f32 %v10679_v13, %v4913_v21 }
0x13b1   :  { %v4915_v63 = vmul.f32 0.5, %v4914_v28 }
0x13b3   :  { %v4916_v33 = vsub.f32 1.5, %v4915_v63  ;;  %v13243_v63 = vld [vmem:[%s14365_s3 + $0x18] sm:$0xff] }
0x13b4   :  { %v10681_v42 = vpop.eup %10680  ;;  %v5199_v26 = vpop.permute.xlu0 %5198 }
0x13b5   :  { %v4917_v46 = vmul.f32 %v10679_v13, %v4916_v33  ;;  %v4923_v16 = vmul.f32 %v10681_v42, %v4891_v56  ;;  %8925 = vmatpush.xpose.msk.msra.mxu2 %vm196_vm2, %v5199_v26  ;;  %vm4929_vm14 = vweird.f32 %v10681_v42 }
0x13b6   :  { %vm4930_vm4 = vmor %vm4928_vm15, %vm4929_vm14 }
0x13b7   :  { %v4921_v7 = vsel %vm4920_vm13, %v10679_v13, %v4917_v46  ;;  %v4924_v0 = vmul.f32 %v10681_v42, %v4923_v16 }
0x13b8   :  { %v4934_v47 = vmul.f32 %v4921_v7, %v13087_v19 }
0x13b9   :  { %v4925_v22 = vmul.f32 0.5, %v4924_v0 }
0x13ba   :  { %v4939_v39 = vmul.f32 %v10446_v52, %v4934_v47 }
0x13bb   :  { %v4926_v11 = vsub.f32 1.5, %v4925_v22 }
0x13bc   :  { %v13138_v23 = vadd.f32 %v10447_v41, %v4939_v39  ;;  %v5195_v40 = vpop.permute.xlu0 %5194 }
0x13bd   :  { %v4927_v55 = vmul.f32 %v10681_v42, %v4926_v11 }
0x13be   :  { %8906 = vmatmul.msk.f32.gmra.mxu2 %vm124_vm1, %v13138_v23 }
0x13bf   :  { %v4931_v32 = vsel %vm4930_vm4, %v10681_v42, %v4927_v55 }
0x13c0   :  { %v4935_v44 = vmul.f32 %v4931_v32, %v13093_v20 }
0x13c1   :  { %v5197_v57 = vpop.permute.xlu1 %5196 }
0x13c2   :  { %8926 = vmatpush.xpose.msk.msra.mxu2 %vm196_vm2, %v5197_v57  ;;  %v4940_v60 = vmul.f32 %v10446_v52, %v4935_v44 }
0x13c4   :  { %v13144_v19 = vadd.f32 %v10447_v41, %v4940_v60 }
0x13c6   :  { %8907 = vmatmul.msk.f32.gmra.mxu2 %vm124_vm1, %v13144_v19 }
0x13c7   :  { %8927 = vmatpush.xpose.msk.msra.mxu2 %vm196_vm2, %v5195_v40 }
0x140f   :  { %v4994_v2 = vpop.f32.mrf.mxu2 }
0x1410   :  { %v4995_v4 = vadd.f32 %v10448_v17, %v4994_v2 }
0x1412   :  { %8916 = vmatmul.msk.f32.vlgmr.msrb.gmra.mxu0 %vm196_vm2, %v4995_v4  ;;  %5186 = vrot.lane.b32.xlu2 %v4995_v4, %s10800_s0 }
0x1417   :  { %v4997_v20 = vpop.f32.mrf.mxu2 }
0x1418   :  { %v4998_v24 = vadd.f32 %v10448_v17, %v4997_v20 }
0x141a   :  { %5516 = vrot.lane.b32.xlu2 %v12998_v29, %s10801_s24  ;;  %8917 = vmatmul.msk.f32.gmra.mxu0 %vm196_vm2, %v4998_v24 }
0x141b   :  { %5188 = vrot.lane.b32.xlu0 %v4998_v24, %s10800_s0 }
0x1422   :  { %5512 = vrot.lane.b32.xlu2 %v13008_v38, %s10801_s24 }
0x1423   :  { %5514 = vrot.lane.b32.xlu0 %v13003_v37, %s10801_s24 }
0x142a   :  { %5356 = vrot.lane.b32.xlu2 %v13003_v37, %s10802_s25 }
0x142b   :  { %5358 = vrot.lane.b32.xlu0 %v12998_v29, %s10802_s25 }
0x1432   :  { %5352 = vrot.lane.b32.xlu2 %v13013_v30, %s10802_s25 }
0x1433   :  { %5502 = vrot.lane.b32.xlu0 %v4995_v4, %s10801_s24 }
0x143b   :  { %5504 = vrot.lane.b32.xlu0 %v4998_v24, %s10801_s24 }
0x1441   :  { %v5000_v45 = vpop.f32.mrf.mxu2 }
0x1442   :  { %v5001_v50 = vadd.f32 %v10448_v17, %v5000_v45 }
0x1443   :  { %5346 = vrot.lane.b32.xlu0 %v4998_v24, %s10802_s25 }
0x1444   :  { %5506 = vrot.lane.b32.xlu2 %v5001_v50, %s10801_s24  ;;  %5190 = vrot.lane.b32.xlu1 %v5001_v50, %s10800_s0 }
0x1445   :  { %8918 = vmatmul.msk.f32.gmra.mxu0 %vm196_vm2, %v5001_v50 }
0x1449   :  { %v5003_v18 = vpop.f32.mrf.mxu2 }
0x144a   :  { %v5004_v10 = vadd.f32 %v10448_v17, %v5003_v18 }
0x144c   :  { %5350 = vrot.lane.b32.xlu0 %v5004_v10, %s10802_s25  ;;  %5348 = vrot.lane.b32.xlu2 %v5001_v50, %s10802_s25 }
0x144d   :  { %5192 = vrot.lane.b32.xlu1 %v5004_v10, %s10800_s0  ;;  %8919 = vmatmul.msk.f32.gmra.mxu0 %vm196_vm2, %v5004_v10 }
0x1454   :  { %10400 = vrot.lane.b32.xlu0 %v13180_v58, %s10804_s27  ;;  %10395 = vrot.lane.b32.xlu2 %v13184_v12, %s10803_s26 }
0x1455   :  { %5510 = vrot.lane.b32.xlu1 %v13013_v30, %s10801_s24 }
0x145c   :  { %10405 = vrot.lane.b32.xlu0 %v13184_v12, %s10804_s27 }
0x145d   :  { %5354 = vrot.lane.b32.xlu1 %v13008_v38, %s10802_s25  ;;  %v13206_v38 = vld [vmem:[%s14365_s3] sm:$0xff] }
0x1465   :  { %5344 = vrot.lane.b32.xlu1 %v4995_v4, %s10802_s25 }
0x146c   :  { %v5187_v29 = vpop.permute.xlu2 %5186 }
0x146d   :  { %5508 = vrot.lane.b32.xlu1 %v5004_v10, %s10801_s24  ;;  %8928 = vmatmul.msk.f32.vlgmr.msra.gmra.mxu2 %vm196_vm2, %v5187_v29 }
0x1474   :  { %v5517_v37 = vpop.permute.xlu2 %5516 }
0x1475   :  { %10390 = vrot.lane.b32.xlu1 %v13180_v58, %s10803_s26  ;;  %8948 = vmatpush.xpose.msk.msrb.mxu2 %vm196_vm2, %v5517_v37 }
0x147c   :  { %v5513_v48 = vpop.permute.xlu2 %5512 }
0x1484   :  { %v5357_v49 = vpop.permute.xlu2 %5356 }
0x148c   :  { %v5353_v42 = vpop.permute.xlu2 %5352 }
0x148d   :  { %v5189_v30 = vpop.permute.xlu0 %5188 }
0x148e   :  { %8929 = vmatmul.msk.f32.gmra.mxu2 %vm196_vm2, %v5189_v30 }
0x148f   :  { %v5077_v62 = vpop.f32.mrf.mxu0 }
0x1490   :  { %v13209_v53 = vadd.f32 %v13206_v38, %v5077_v62 }
0x1492   :  { %v5089_v1 = vsel %vm124_vm1, %v13209_v53, -inf }
0x1493   :  { %5090 = vmax.xlane.f32.xlu2 %v5089_v1 }
0x1495   :  { %v5515_v14 = vpop.permute.xlu0 %5514 }
0x1496   :  { %8949 = vmatpush.xpose.msk.msrb.mxu2 %vm196_vm2, %v5515_v14 }
0x1497   :  { %v5080_v52 = vpop.f32.mrf.mxu0 }
0x1498   :  { %v13220_v54 = vadd.f32 %v13217_v43, %v5080_v52 }
0x149a   :  { %8950 = vmatpush.xpose.msk.msrb.mxu2 %vm196_vm2, %v5513_v48  ;;  %v5092_v59 = vsel %vm124_vm1, %v13220_v54, -inf }
0x149d   :  { %v5359_v41 = vpop.permute.xlu0 %5358 }
0x149e   :  { %8936 = vmatpush.xpose.msk.msra.mxu0 %vm196_vm2, %v5359_v41  ;;  %v5507_v47 = vpop.permute.xlu2 %5506 }
0x149f   :  { %5093 = vmax.xlane.f32.xlu1 %v5092_v59 }
0x14a2   :  { %8937 = vmatpush.xpose.msk.msra.mxu0 %vm196_vm2, %v5357_v49 }
0x14a5   :  { %v5503_v34 = vpop.permute.xlu0 %5502 }
0x14a6   :  { %v5349_v39 = vpop.permute.xlu2 %5348 }
0x14ad   :  { %v5505_v5 = vpop.permute.xlu0 %5504 }
0x14ae   :  { %v10396_v44 = vpop.permute.xlu2 %10395 }
0x14af   :  { %v10397_v60 = vunpack.i.l.bf16 %v10396_v44  ;;  %v10398_v40 = vunpack.i.h.bf16 %v10396_v44 }
0x14b5   :  { %v5347_v8 = vpop.permute.xlu0 %5346 }
0x14b6   :  { %v5191_v15 = vpop.permute.xlu1 %5190 }
0x14b7   :  { %8930 = vmatmul.msk.f32.gmra.mxu2 %vm196_vm2, %v5191_v15 }
0x14be   :  { %v5351_v36 = vpop.permute.xlu0 %5350 }
0x14bf   :  { %v5193_v35 = vpop.permute.xlu1 %5192 }
0x14c0   :  { %8931 = vmatmul.msk.f32.gmra.mxu2 %vm196_vm2, %v5193_v35 }
0x14c2   :  { %v5083_v27 = vpop.f32.mrf.mxu0 }
0x14c3   :  { %v13235_v25 = vadd.f32 %v13232_v61, %v5083_v27 }
0x14c5   :  { %v5095_v51 = vsel %vm124_vm1, %v13235_v25, -inf }
0x14c6   :  { %5096 = vmax.xlane.f32.xlu0 %v5095_v51  ;;  %v10401_v31 = vpop.permute.xlu0 %10400 }
0x14c7   :  { %v5511_v13 = vpop.permute.xlu1 %5510  ;;  %v10402_v56 = vunpack.i.l.bf16 %v10401_v31  ;;  %v10403_v21 = vunpack.i.h.bf16 %v10401_v31 }
0x14c8   :  { %8951 = vmatpush.xpose.msk.msrb.mxu2 %vm196_vm2, %v5511_v13 }
0x14c9   :  { %5169 = vmatpush.msrb.mxu1 %v10402_v56 }
0x14ca   :  { %v5086_v28 = vpop.f32.mrf.mxu0 }
0x14cb   :  { %v13246_v33 = vadd.f32 %v13243_v63, %v5086_v28  ;;  %8952 = vmatmul.msk.f32.vlgmr.msrb.gmra.mxu2 %vm196_vm2, %v5503_v34  ;;  %5170 = vmatpush.msrb.mxu1 %v10403_v21 }
0x14cd   :  { %v5098_v26 = vsel %vm124_vm1, %v13246_v33, -inf }
0x14ce   :  { %5099 = vmax.xlane.f32.xlu2 %v5098_v26  ;;  %v10406_v46 = vpop.permute.xlu0 %10405 }
0x14cf   :  { %v5355_v16 = vpop.permute.xlu1 %5354  ;;  %v10407_v7 = vunpack.i.l.bf16 %v10406_v46  ;;  %v10408_v0 = vunpack.i.h.bf16 %v10406_v46 }
0x14d0   :  { %8938 = vmatpush.xpose.msk.msra.mxu0 %vm196_vm2, %v5355_v16 }
0x14d1   :  { %5171 = vmatpush.msrb.mxu1 %v10407_v7 }
0x14d3   :  { %8953 = vmatmul.msk.f32.gmra.mxu2 %vm196_vm2, %v5505_v5  ;;  %5172 = vmatpush.msrb.mxu1 %v10408_v0 }
0x14d4   :  { %8939 = vmatpush.xpose.msk.msra.mxu0 %vm196_vm2, %v5353_v42 }
0x14d7   :  { %v5345_v22 = vpop.permute.xlu1 %5344 }
0x14d8   :  { %8940 = vmatmul.msk.f32.vlgmr.msra.gmra.mxu0 %vm196_vm2, %v5345_v22 }
0x14db   :  { %8954 = vmatmul.msk.f32.gmra.mxu2 %vm196_vm2, %v5507_v47 }
0x14df   :  { %v5509_v11 = vpop.permute.xlu1 %5508 }
0x14e0   :  { %8941 = vmatmul.msk.f32.gmra.mxu0 %vm196_vm2, %v5347_v8 }
0x14e3   :  { %8955 = vmatmul.msk.f32.gmra.mxu2 %vm196_vm2, %v5509_v11 }
0x14e7   :  { %v10391_v55 = vpop.permute.xlu1 %10390 }
0x14e8   :  { %v10392_v32 = vunpack.i.l.bf16 %v10391_v55  ;;  %8942 = vmatmul.msk.f32.gmra.mxu0 %vm196_vm2, %v5349_v39  ;;  %v10393_v57 = vunpack.i.h.bf16 %v10391_v55 }
0x14ea   :  { %5327 = vmatpush.msra.mxu3 %v10392_v32 }
0x14ec   :  { %5328 = vmatpush.msra.mxu3 %v10393_v57 }
0x14ee   :  { %5329 = vmatpush.msra.mxu3 %v10397_v60 }
0x14f0   :  { %5330 = vmatpush.msra.mxu3 %v10398_v40  ;;  %8943 = vmatmul.msk.f32.gmra.mxu0 %vm196_vm2, %v5351_v36  ;;  %v5235_v17 = vpop.f32.mrf.mxu2 }
0x14f1   :  { %v13272_v30 = vadd.f32 %v13206_v38, %v5235_v17 }
0x14f3   :  { %v5247_v48 = vsel %vm124_vm1, %v13272_v30, -inf }
0x1506   :  { %v5091_v45 = vpop.xlane.xlu2 %5090 }
0x1507   :  { %v5101_v10 = vsub.f32 %v13209_v53, %v5091_v45 }
0x1509   :  { %v5105_v37 = vmul.f32 1.442695, %v5101_v10 }
0x150b   :  { %10682 = vpow2.f32 %v5105_v37 }
0x1511   :  { %v5238_v2 = vpop.f32.mrf.mxu2  ;;  %v13284_v59 = vpop.eup %10682 }
0x1512   :  { %v5113_v8 = vsel %vm124_vm1, %v13284_v59, 0.0  ;;  %v5094_v15 = vpop.xlane.xlu1 %5093  ;;  %v13292_v27 = vadd.f32 %v13217_v43, %v5238_v2 }
0x1513   :  { %v5102_v13 = vsub.f32 %v13220_v54, %v5094_v15 }
0x1514   :  { %v5250_v28 = vsel %vm124_vm1, %v13292_v27, -inf }
0x1515   :  { %v5107_v42 = vmul.f32 1.442695, %v5102_v13 }
0x1539   :  { %v5097_v52 = vpop.xlane.xlu0 %5096 }
0x153a   :  { %v5241_v4 = vpop.f32.mrf.mxu2  ;;  %v5103_v34 = vsub.f32 %v13235_v25, %v5097_v52 }
0x153b   :  { %v13261_v20 = vadd.f32 %v13232_v61, %v5241_v4 }
0x153c   :  { %v5109_v36 = vmul.f32 1.442695, %v5103_v34 }
0x153d   :  { %v5253_v24 = vsel %vm124_vm1, %v13261_v20, -inf }
0x153e   :  { %5254 = vmax.xlane.f32.xlu2 %v5253_v24  ;;  %10684 = vpow2.f32 %v5109_v36 }
0x153f   :  { %10686 = vpow2.f32 %v5107_v42 }
0x1541   :  { %v5100_v51 = vpop.xlane.xlu2 %5099 }
0x1542   :  { %v5104_v56 = vsub.f32 %v13246_v33, %v5100_v51 }
0x1543   :  { %v5244_v53 = vpop.f32.mrf.mxu2 }
0x1544   :  { %v13282_v41 = vadd.f32 %v13243_v63, %v5244_v53  ;;  %v5111_v26 = vmul.f32 1.442695, %v5104_v56  ;;  %v13306_v54 = vpop.eup %10684 }
0x1545   :  { %v5119_v33 = vsel %vm124_vm1, %v13306_v54, 0.0  ;;  %v13312_v0 = vpop.eup %10686 }
0x1546   :  { %v5256_v5 = vsel %vm124_vm1, %v13282_v41, -inf  ;;  %10688 = vpow2.f32 %v5111_v26  ;;  %v5116_v39 = vsel %vm124_vm1, %v13312_v0, 0.0 }
0x154c   :  { %v13314_v47 = vpop.eup %10688 }
0x154d   :  { %v5122_v11 = vsel %vm124_vm1, %v13314_v47, 0.0 }
0x154e   :  { %v5551_v35 = vpop.f32.mrf.mxu2 }
0x154f   :  { %v13323_v55 = vadd.f32 %v13206_v38, %v5551_v35 }
0x1551   :  { %v5563_v44 = vsel %vm124_vm1, %v13323_v55, -inf }
0x1555   :  { %v5393_v50 = vpop.f32.mrf.mxu0 }
0x1556   :  { %v13266_v18 = vadd.f32 %v13206_v38, %v5393_v50  ;;  %v5554_v16 = vpop.f32.mrf.mxu2 }
0x1557   :  { %v13326_v32 = vadd.f32 %v13217_v43, %v5554_v16 }
0x1558   :  { %v5405_v29 = vsel %vm124_vm1, %v13266_v18, -inf }
0x1559   :  { %5406 = vmax.xlane.f32.xlu1 %v5405_v29  ;;  %v5566_v57 = vsel %vm124_vm1, %v13326_v32, -inf }
0x155d   :  { %v5396_v62 = vpop.f32.mrf.mxu0 }
0x155e   :  { %v13275_v1 = vadd.f32 %v13217_v43, %v5396_v62  ;;  %v5557_v22 = vpop.f32.mrf.mxu2 }
0x155f   :  { %v13340_v38 = vadd.f32 %v13232_v61, %v5557_v22 }
0x1560   :  { %v5408_v14 = vsel %vm124_vm1, %v13275_v1, -inf }
0x1561   :  { %5409 = vmax.xlane.f32.xlu0 %v5408_v14  ;;  %5248 = vmax.xlane.f32.xlu1 %v5247_v48  ;;  %v5569_v43 = vsel %vm124_vm1, %v13340_v38, -inf }
0x1565   :  { %v5399_v49 = vpop.f32.mrf.mxu0 }
0x1566   :  { %v13304_v46 = vadd.f32 %v13232_v61, %v5399_v49  ;;  %v5560_v60 = vpop.f32.mrf.mxu2 }
0x1567   :  { %v13333_v40 = vadd.f32 %v13243_v63, %v5560_v60 }
0x1568   :  { %v5411_v7 = vsel %vm124_vm1, %v13304_v46, -inf }
0x1569   :  { %5257 = vmax.xlane.f32.xlu1 %v5256_v5  ;;  %5114 = vadd.xlane.f32.xlu0 %v5113_v8  ;;  %v5572_v17 = vsel %vm124_vm1, %v13333_v40, -inf }
0x156d   :  { %v5402_v31 = vpop.f32.mrf.mxu0 }
0x156e   :  { %v13296_v25 = vadd.f32 %v13243_v63, %v5402_v31 }
0x1570   :  { %v5414_v21 = vsel %vm124_vm1, %v13296_v25, -inf }
0x1571   :  { %5415 = vmax.xlane.f32.xlu2 %v5414_v21  ;;  %5251 = vmax.xlane.f32.xlu0 %v5250_v28 }
0x1579   :  { %5120 = vadd.xlane.f32.xlu2 %v5119_v33  ;;  %5412 = vmax.xlane.f32.xlu0 %v5411_v7 }
0x1581   :  { %5117 = vadd.xlane.f32.xlu0 %v5116_v39  ;;  %5123 = vadd.xlane.f32.xlu2 %v5122_v11 }
0x1582   :  { %10415 = vrot.lane.b32.xlu1 %v13184_v12, %s10805_s30 }
0x1589   :  { %5564 = vmax.xlane.f32.xlu0 %v5563_v44  ;;  %5567 = vmax.xlane.f32.xlu2 %v5566_v57 }
0x1591   :  { %5573 = vmax.xlane.f32.xlu2 %v5572_v17 }
0x159d   :  { %10410 = vrot.lane.b32.xlu0 %v13180_v58, %s10805_s30 }
0x15ac   :  { %5570 = vmax.xlane.f32.xlu1 %v5569_v43 }
0x15b1   :  { %v5255_v37 = vpop.xlane.xlu2 %5254 }
0x15b2   :  { %v5261_v34 = vsub.f32 %v13261_v20, %v5255_v37 }
0x15b4   :  { %v5267_v8 = vmul.f32 1.442695, %v5261_v34 }
0x15cc   :  { %v5407_v2 = vpop.xlane.xlu1 %5406 }
0x15cd   :  { %v5417_v4 = vsub.f32 %v13266_v18, %v5407_v2 }
0x15cf   :  { %v5421_v24 = vmul.f32 1.442695, %v5417_v4 }
0x15d1   :  { %10690 = vpow2.f32 %v5421_v24 }
0x15d4   :  { %v13345_v63 = vpop.xlane.xlu0 %5409  ;;  %v5249_v45 = vpop.xlane.xlu1 %5248 }
0x15d5   :  { %v5259_v50 = vsub.f32 %v13272_v30, %v5249_v45 }
0x15d7   :  { %v13348_v10 = vpop.eup %10690  ;;  %v5263_v29 = vmul.f32 1.442695, %v5259_v50 }
0x15d8   :  { %v5429_v61 = vsel %vm124_vm1, %v13348_v10, 0.0 }
0x15d9   :  { %5430 = vadd.xlane.f32.xlu2 %v5429_v61  ;;  %10692 = vpow2.f32 %v5263_v29  ;;  %v5418_v29 = vsub.f32 %v13275_v1, %v13345_v63 }
0x15dc   :  { %v5115_v62 = vpop.xlane.xlu0 %5114  ;;  %v5258_v15 = vpop.xlane.xlu1 %5257 }
0x15dd   :  { %10694 = vrcp.f32 %v5115_v62 }
0x15df   :  { %v13352_v14 = vpop.eup %10692 }
0x15e0   :  { %v5271_v18 = vsel %vm124_vm1, %v13352_v14, 0.0 }
0x15e1   :  { %5272 = vadd.xlane.f32.xlu2 %v5271_v18 }
0x15e3   :  { %v10695_v48 = vpop.eup %10694 }
0x15e4   :  { %v5129_v30 = vmul.f32 %v10695_v48, %v13284_v59  ;;  %v5252_v53 = vpop.xlane.xlu0 %5251  ;;  %v13357_v52 = vpop.xlane.xlu2 %5415  ;;  %v5262_v59 = vsub.f32 %v13282_v41, %v5258_v15  ;;  %v5423_v48 = vmul.f32 1.442695, %v5418_v29 }
0x15e5   :  { %v5260_v49 = vsub.f32 %v13292_v27, %v5252_v53 }
0x15e6   :  { %8920 = vmatmul.msk.f32.vlgmr.msrb.gmra.mxu1 %vm124_vm1, %v5129_v30  ;;  %v5269_v27 = vmul.f32 1.442695, %v5262_v59 }
0x15e7   :  { %v5265_v5 = vmul.f32 1.442695, %v5260_v49 }
0x15e9   :  { %10696 = vpow2.f32 %v5265_v5 }
0x15ea   :  { %10698 = vpow2.f32 %v5267_v8 }
0x15ec   :  { %v5413_v36 = vpop.xlane.xlu0 %5412  ;;  %v5121_v35 = vpop.xlane.xlu2 %5120 }
0x15ed   :  { %v5419_v39 = vsub.f32 %v13304_v46, %v5413_v36 }
0x15ef   :  { %v13362_v51 = vpop.eup %10696 }
0x15f0   :  { %v5274_v31 = vsel %vm124_vm1, %v13362_v51, 0.0  ;;  %v13367_v56 = vpop.eup %10698 }
0x15f1   :  { %5275 = vadd.xlane.f32.xlu1 %v5274_v31  ;;  %v5277_v21 = vsel %vm124_vm1, %v13367_v56, 0.0 }
0x15f4   :  { %v5118_v13 = vpop.xlane.xlu0 %5117  ;;  %v5124_v20 = vpop.xlane.xlu2 %5123 }
0x15f5   :  { %10700 = vrcp.f32 %v5118_v13  ;;  %v10416_v61 = vpop.permute.xlu1 %10415 }
0x15f6   :  { %10702 = vpow2.f32 %v5269_v27  ;;  %v10417_v18 = vunpack.i.l.bf16 %v10416_v61  ;;  %v10418_v53 = vunpack.i.h.bf16 %v10416_v61 }
0x15f7   :  { %10704 = vrcp.f32 %v5121_v35 }
0x15f9   :  { %5278 = vadd.xlane.f32.xlu1 %v5277_v21  ;;  %10420 = vrot.lane.b32.xlu2 %v13180_v58, %s10806_s16 }
0x15fb   :  { %v10701_v28 = vpop.eup %10700 }
0x15fc   :  { %v5565_v41 = vpop.xlane.xlu0 %5564  ;;  %v5130_v42 = vmul.f32 %v10701_v28, %v13312_v0  ;;  %v13374_v26 = vpop.eup %10702  ;;  %v5425_v0 = vmul.f32 1.442695, %v5419_v39 }
0x15fd   :  { %v5575_v16 = vsub.f32 %v13323_v55, %v5565_v41  ;;  %v5568_v33 = vpop.xlane.xlu2 %5567  ;;  %v5280_v58 = vsel %vm124_vm1, %v13374_v26, 0.0  ;;  %v10705_v44 = vpop.eup %10704 }
0x15fe   :  { %v5576_v7 = vsub.f32 %v13326_v32, %v5568_v33  ;;  %8921 = vmatmul.msk.f32.gmra.mxu1 %vm124_vm1, %v5130_v42  ;;  %v5131_v55 = vmul.f32 %v10705_v44, %v13306_v54 }
0x15ff   :  { %v5579_v22 = vmul.f32 1.442695, %v5575_v16 }
0x1600   :  { %v5581_v11 = vmul.f32 1.442695, %v5576_v7 }
0x1601   :  { %10706 = vpow2.f32 %v5579_v22  ;;  %5281 = vadd.xlane.f32.xlu1 %v5280_v58 }
0x1602   :  { %10708 = vpow2.f32 %v5581_v11 }
0x1603   :  { %10710 = vrcp.f32 %v5124_v20 }
0x1604   :  { %10712 = vpow2.f32 %v5425_v0 }
0x1605   :  { %v5574_v57 = vpop.xlane.xlu2 %5573 }
0x1606   :  { %8922 = vmatmul.msk.f32.gmra.mxu1 %vm124_vm1, %v5131_v55  ;;  %v5578_v46 = vsub.f32 %v13333_v40, %v5574_v57  ;;  %v5420_v40 = vsub.f32 %v13296_v25, %v13357_v52 }
0x1607   :  { %v13384_v32 = vpop.eup %10706 }
0x1608   :  { %v13386_v60 = vpop.eup %10708  ;;  %v5587_v17 = vsel %vm124_vm1, %v13384_v32, 0.0  ;;  %v5585_v54 = vmul.f32 1.442695, %v5578_v46 }
0x1609   :  { %v10711_v43 = vpop.eup %10710  ;;  %5588 = vadd.xlane.f32.xlu1 %v5587_v17  ;;  %v5590_v2 = vsel %vm124_vm1, %v13386_v60, 0.0 }
0x160a   :  { %5591 = vadd.xlane.f32.xlu0 %v5590_v2  ;;  %v5132_v4 = vmul.f32 %v10711_v43, %v13314_v47  ;;  %v13394_v24 = vpop.eup %10712  ;;  %10714 = vpow2.f32 %v5585_v54  ;;  %v5427_v47 = vmul.f32 1.442695, %v5420_v40 }
0x160b   :  { %v5435_v37 = vsel %vm124_vm1, %v13394_v24, 0.0 }
0x160c   :  { %10716 = vpow2.f32 %v5427_v47 }
0x160d   :  { %10718 = vpow2.f32 %v5423_v48 }
0x160e   :  { %8923 = vmatmul.msk.f32.gmra.mxu1 %vm124_vm1, %v5132_v4 }
0x160f   :  { %v10411_v45 = vpop.permute.xlu0 %10410 }
0x1610   :  { %v10412_v50 = vunpack.i.l.bf16 %v10411_v45  ;;  %v10413_v62 = vunpack.i.h.bf16 %v10411_v45  ;;  %v13403_v30 = vpop.eup %10714 }
0x1611   :  { %v5596_v1 = vsel %vm124_vm1, %v13403_v30, 0.0 }
0x1612   :  { %5436 = vadd.xlane.f32.xlu0 %v5435_v37  ;;  %5643 = vmatpush.msrb.mxu3 %v10412_v50  ;;  %v13407_v25 = vpop.eup %10716 }
0x1613   :  { %v13409_v63 = vpop.eup %10718  ;;  %v5438_v52 = vsel %vm124_vm1, %v13407_v25, 0.0 }
0x1614   :  { %5644 = vmatpush.msrb.mxu3 %v10413_v62  ;;  %v5432_v49 = vsel %vm124_vm1, %v13409_v63, 0.0 }
0x1616   :  { %5645 = vmatpush.msrb.mxu3 %v10417_v18 }
0x1618   :  { %5646 = vmatpush.msrb.mxu3 %v10418_v53 }
0x161a   :  { %5597 = vadd.xlane.f32.xlu0 %v5596_v1 }
0x161f   :  { %v5571_v34 = vpop.xlane.xlu1 %5570 }
0x1620   :  { %v5577_v5 = vsub.f32 %v13340_v38, %v5571_v34 }
0x1622   :  { %5439 = vadd.xlane.f32.xlu0 %v5438_v52  ;;  %10425 = vrot.lane.b32.xlu1 %v13184_v12, %s10806_s16  ;;  %v5583_v8 = vmul.f32 1.442695, %v5577_v5 }
0x1623   :  { %5433 = vadd.xlane.f32.xlu2 %v5432_v49 }
0x1624   :  { %10720 = vpow2.f32 %v5583_v8 }
0x162a   :  { %v13418_v15 = vpop.eup %10720 }
0x162b   :  { %v5593_v36 = vsel %vm124_vm1, %v13418_v15, 0.0 }
0x164c   :  { %5594 = vadd.xlane.f32.xlu1 %v5593_v36  ;;  %v5431_v35 = vpop.xlane.xlu2 %5430  ;;  %v8903_v36 = vld [vmem:[%s14370_s8 + $0x78] sm:$0xff] }
0x164d   :  { %5745 = vmatpush.msrb.mxu0 %v8903_v36 }
0x1654   :  { %v5273_v59 = vpop.xlane.xlu2 %5272 }
0x1655   :  { %10722 = vrcp.f32 %v5273_v59  ;;  %v8901_v59 = vld [vmem:[%s14370_s8 + $0x68] sm:$0xff] }
0x165b   :  { %v10723_v31 = vpop.eup %10722 }
0x165c   :  { %v5287_v27 = vmul.f32 %v10723_v31, %v13352_v14  ;;  %v10421_v13 = vpop.permute.xlu2 %10420  ;;  %v8900_v31 = vld [vmem:[%s14370_s8 + $0x60] sm:$0xff] }
0x165d   :  { %v10422_v12 = vunpack.i.l.bf16 %v10421_v13  ;;  %v10423_v20 = vunpack.i.h.bf16 %v10421_v13 }
0x165e   :  { %8932 = vmatmul.msk.f32.vlgmr.msra.gmra.mxu3 %vm124_vm1, %v5287_v27 }
0x165f   :  { %5485 = vmatpush.msra.mxu1 %v10422_v12 }
0x1661   :  { %5486 = vmatpush.msra.mxu1 %v10423_v20 }
0x1663   :  { %v5174_v47 = vpop.f32.mrf.mxu1 }
0x1664   :  { %v5276_v38 = vpop.xlane.xlu1 %5275 }
0x1665   :  { %10724 = vrcp.f32 %v5276_v38 }
0x166b   :  { %v10725_v21 = vpop.eup %10724 }
0x166c   :  { %v5279_v28 = vpop.xlane.xlu1 %5278  ;;  %v5288_v41 = vmul.f32 %v10725_v21, %v13362_v51 }
0x166d   :  { %10726 = vrcp.f32 %v5279_v28 }
0x166e   :  { %8933 = vmatmul.msk.f32.gmra.mxu3 %vm124_vm1, %v5288_v41 }
0x1673   :  { %v10727_v42 = vpop.eup %10726 }
0x1674   :  { %v5282_v16 = vpop.xlane.xlu1 %5281  ;;  %v5289_v14 = vmul.f32 %v10727_v42, %v13367_v56 }
0x1675   :  { %10728 = vrcp.f32 %v5282_v16 }
0x1676   :  { %8934 = vmatmul.msk.f32.gmra.mxu3 %vm124_vm1, %v5289_v14 }
0x167b   :  { %v10729_v33 = vpop.eup %10728  ;;  %v5177_v48 = vpop.f32.mrf.mxu1 }
0x167c   :  { %v5589_v7 = vpop.xlane.xlu1 %5588  ;;  %v5290_v22 = vmul.f32 %v10729_v33, %v13374_v26 }
0x167d   :  { %10730 = vrcp.f32 %v5589_v7  ;;  %v5592_v39 = vpop.xlane.xlu0 %5591 }
0x167e   :  { %8935 = vmatmul.msk.f32.gmra.mxu3 %vm124_vm1, %v5290_v22  ;;  %10732 = vrcp.f32 %v5592_v39 }
0x167f   :  { %10734 = vrcp.f32 %v5431_v35  ;;  %v8902_v35 = vld [vmem:[%s14370_s8 + $0x70] sm:$0xff] }
0x1680   :  { %5746 = vmatpush.msrb.mxu0 %v8902_v35 }
0x1682   :  { %5747 = vmatpush.msrb.mxu0 %v8901_v59  ;;  %v9320_v59 = vld [vmem:[%s14373_s11 + $0x180] sm:$0xf] }
0x1683   :  { %v10731_v11 = vpop.eup %10730  ;;  %v5180_v1 = vpop.f32.mrf.mxu1 }
0x1684   :  { %v5603_v51 = vmul.f32 %v10731_v11, %v13384_v32  ;;  %v10733_v58 = vpop.eup %10732  ;;  %5748 = vmatpush.msrb.mxu0 %v8900_v31  ;;  %v10114_v31 = vld [vmem:[%s14373_s11 + $0x1bc] sm:$0xf0] }
0x1685   :  { %v5604_v56 = vmul.f32 %v10733_v58, %v13386_v60  ;;  %v5437_v44 = vpop.xlane.xlu0 %5436  ;;  %v10735_v55 = vpop.eup %10734 }
0x1686   :  { %8956 = vmatmul.msk.f32.vlgmr.msrb.gmra.mxu3 %vm124_vm1, %v5603_v51  ;;  %v5445_v17 = vmul.f32 %v10735_v55, %v13348_v10 }
0x168d   :  { %v5598_v32 = vpop.xlane.xlu0 %5597 }
0x168e   :  { %8957 = vmatmul.msk.f32.gmra.mxu3 %vm124_vm1, %v5604_v56 }
0x1694   :  { %v10426_v0 = vpop.permute.xlu1 %10425 }
0x1695   :  { %v10427_v26 = vunpack.i.l.bf16 %v10426_v0  ;;  %v10428_v46 = vunpack.i.h.bf16 %v10426_v0  ;;  %v5440_v2 = vpop.xlane.xlu0 %5439 }
0x1696   :  { %v5434_v57 = vpop.xlane.xlu2 %5433 }
0x1697   :  { %10736 = vrcp.f32 %v5434_v57  ;;  %5487 = vmatpush.msra.mxu1 %v10427_v26 }
0x1698   :  { %10738 = vrcp.f32 %v5437_v44 }
0x1699   :  { %5488 = vmatpush.msra.mxu1 %v10428_v46  ;;  %10740 = vrcp.f32 %v5440_v2  ;;  %v10449_v46 = vld [vmem:[%s14371_s9 + $0xa] ss:$0 sm:$0xff] }
0x169a   :  { %8944 = vmatmul.msk.f32.vlgmr.msra.gmra.mxu1 %vm124_vm1, %v5445_v17 }
0x169d   :  { %v10737_v43 = vpop.eup %10736 }
0x169e   :  { %v5446_v60 = vmul.f32 %v10737_v43, %v13409_v63  ;;  %v10739_v54 = vpop.eup %10738 }
0x169f   :  { %v5447_v4 = vmul.f32 %v10739_v54, %v13394_v24  ;;  %v10741_v45 = vpop.eup %10740 }
0x16a0   :  { %v5448_v10 = vmul.f32 %v10741_v45, %v13407_v25 }
0x16a2   :  { %8945 = vmatmul.msk.f32.gmra.mxu1 %vm124_vm1, %v5446_v60 }
0x16aa   :  { %8946 = vmatmul.msk.f32.gmra.mxu1 %vm124_vm1, %v5447_v4 }
0x16b2   :  { %8947 = vmatmul.msk.f32.gmra.mxu1 %vm124_vm1, %v5448_v10 }
0x16bf   :  { %v5595_v40 = vpop.xlane.xlu1 %5594 }
0x16c0   :  { %10742 = vrcp.f32 %v5595_v40 }
0x16c1   :  { %10744 = vrcp.f32 %v5598_v32 }
0x16c6   :  { %v10743_v50 = vpop.eup %10742 }
0x16c7   :  { %v5605_v29 = vmul.f32 %v10743_v50, %v13418_v15  ;;  %v10745_v61 = vpop.eup %10744 }
0x16c8   :  { %v5606_v37 = vmul.f32 %v10745_v61, %v13403_v30  ;;  %v5183_v30 = vpop.f32.mrf.mxu1 }
0x16c9   :  { %8958 = vmatmul.msk.f32.gmra.mxu3 %vm124_vm1, %v5605_v29 }
0x16d1   :  { %8959 = vmatmul.msk.f32.gmra.mxu3 %vm124_vm1, %v5606_v37 }
0x16e1   :  { %v5332_v24 = vpop.f32.mrf.mxu3 }
0x16e2   :  { %5664 = vrot.lane.b32.xlu2 %v5332_v24, %s14385_s20 }
0x16f1   :  { %v5335_v62 = vpop.f32.mrf.mxu3 }
0x16f2   :  { %5666 = vrot.lane.b32.xlu2 %v5335_v62, %s14385_s20 }
0x16f9   :  { %v5338_v18 = vpop.f32.mrf.mxu3 }
0x16fa   :  { %5668 = vrot.lane.b32.xlu2 %v5338_v18, %s14385_s20 }
0x1701   :  { %v5341_v53 = vpop.f32.mrf.mxu3 }
0x1702   :  { %5670 = vrot.lane.b32.xlu2 %v5341_v53, %s14385_s20 }
0x1709   :  { %v5648_v25 = vpop.f32.mrf.mxu3 }
0x170a   :  { %5696 = vrot.lane.b32.xlu0 %v5648_v25, %s14386_s21 }
0x1711   :  { %v5651_v52 = vpop.f32.mrf.mxu3 }
0x1717   :  { %v5490_v63 = vpop.f32.mrf.mxu1 }
0x1718   :  { %5680 = vrot.lane.b32.xlu1 %v5490_v63, %s14384_s7 }
0x171f   :  { %v5493_v49 = vpop.f32.mrf.mxu1 }
0x1720   :  { %5698 = vrot.lane.b32.xlu1 %v5651_v52, %s14386_s21  ;;  %5682 = vrot.lane.b32.xlu0 %v5493_v49, %s14384_s7 }
0x1727   :  { %v5496_v34 = vpop.f32.mrf.mxu1 }
0x1728   :  { %5684 = vrot.lane.b32.xlu0 %v5496_v34, %s14384_s7 }
0x172f   :  { %v5499_v5 = vpop.f32.mrf.mxu1 }
0x1730   :  { %5686 = vrot.lane.b32.xlu0 %v5499_v5, %s14384_s7 }
0x173c   :  { %v5665_v27 = vpop.permute.xlu2 %5664 }
0x173d   :  { %v5708_v13 = vsel %vm196_vm2, %v5174_v47, %v5665_v27  ;;  %v10106_v27 = vld [vmem:[%s14373_s11 + $0x184] sm:$0xf] }
0x174c   :  { %v5654_v8 = vpop.f32.mrf.mxu3  ;;  %v5667_v28 = vpop.permute.xlu2 %5666 }
0x174d   :  { %5700 = vrot.lane.b32.xlu1 %v5654_v8, %s14386_s21  ;;  %v5709_v41 = vsel %vm196_vm2, %v5177_v48, %v5667_v28 }
0x1754   :  { %v5657_v15 = vpop.f32.mrf.mxu3  ;;  %v5669_v7 = vpop.permute.xlu2 %5668 }
0x1755   :  { %5702 = vrot.lane.b32.xlu1 %v5657_v15, %s14386_s21  ;;  %v5710_v39 = vsel %vm196_vm2, %v5180_v1, %v5669_v7  ;;  %v9256_v7 = vld [vmem:[%s14373_s11 + $0x100] sm:$0xf] }
0x175c   :  { %v5671_v56 = vpop.permute.xlu2 %5670 }
0x175d   :  { %v5711_v0 = vsel %vm196_vm2, %v5183_v30, %v5671_v56  ;;  %v9264_v56 = vld [vmem:[%s14373_s11 + $0x108] sm:$0xf] }
0x177c   :  { %v5697_v12 = vpop.permute.xlu0 %5696 }
0x178a   :  { %v5681_v20 = vpop.permute.xlu1 %5680 }
0x178b   :  { %v5712_v38 = vsel %vm66_vm0, %v5708_v13, %v5681_v20  ;;  %v9321_v13 = vor.u32 %v10114_v31, %v9320_v59  ;;  %v9328_v20 = vld [vmem:[%s14373_s11 + $0x188] sm:$0xf] }
0x178c   :  { %v5716_v21 = vsel %vm877_vm3, %v5712_v38, %v5697_v12  ;;  %v9322_v12 = vld [vmem:[%s14373_s11 + $0x1c0] sm:$0xf0]  ;;  %v10115_v38 = vld [vmem:[%s14373_s11 + $0x1c4] sm:$0xf0] }
0x178d   :  { %8960 = vmatmul.msk.f32.vlgmr.msrb.gmra.mxu0 %vm124_vm1, %v5716_v21  ;;  %v9325_v28 = vor.u32 %v10106_v27, %v9322_v12  ;;  %6369 = vmatpush.bf16.msrb.mxu1 %v9321_v13  ;;  %v9336_v27 = vld [vmem:[%s14373_s11 + $0x190] sm:$0xf]  ;;  %v10092_v12 = vld [vmem:[%s14373_s11 + $0x114] sm:$0xf] }
0x178e   :  { %v10116_v13 = vld [vmem:[%s14373_s11 + $0x1cc] sm:$0xf0] }
0x178f   :  { %6388 = vmatpush.bf16.msra.mxu2 %v9325_v28  ;;  %v10109_v28 = vld [vmem:[%s14373_s11 + $0x19c] sm:$0xf] }
0x1792   :  { %v5699_v42 = vpop.permute.xlu1 %5698  ;;  %v5683_v16 = vpop.permute.xlu0 %5682 }
0x1793   :  { %v5713_v14 = vsel %vm66_vm0, %v5709_v41, %v5683_v16  ;;  %v9329_v41 = vor.u32 %v10115_v38, %v9328_v20  ;;  %v9330_v16 = vld [vmem:[%s14373_s11 + $0x1c8] sm:$0xf0]  ;;  %v9337_v38 = vor.u32 %v10116_v13, %v9336_v27  ;;  %v10102_v27 = vld [vmem:[%s14373_s11 + $0x15c] sm:$0xf0] }
0x1794   :  { %v5717_v33 = vsel %vm877_vm3, %v5713_v14, %v5699_v42  ;;  %v10107_v42 = vld [vmem:[%s14373_s11 + $0x18c] sm:$0xf] }
0x1795   :  { %8961 = vmatmul.msk.f32.gmra.mxu0 %vm124_vm1, %v5717_v33  ;;  %v9333_v33 = vor.u32 %v10107_v42, %v9330_v16  ;;  %6407 = vmatpush.bf16.msra.mxu3 %v9329_v41  ;;  %v9346_v41 = vld [vmem:[%s14373_s11 + $0x1d8] sm:$0xf0]  ;;  %v10095_v13 = vld [vmem:[%s14373_s11 + $0x12c] sm:$0xf] }
0x1796   :  { %v9349_v16 = vor.u32 %v10109_v28, %v9346_v41  ;;  %v9370_v28 = vld [vmem:[%s14373_s11 + $0x1f0] sm:$0xf0]  ;;  %v9376_v41 = vld [vmem:[%s14373_s11 + $0x1b8] sm:$0xf] }
0x1797   :  { %6426 = vmatpush.bf16.msra.mxu0 %v9333_v33  ;;  %v10101_v33 = vld [vmem:[%s14373_s11 + $0x154] sm:$0xf0] }
0x179a   :  { %v5685_v22 = vpop.permute.xlu0 %5684 }
0x179b   :  { %v5714_v11 = vsel %vm66_vm0, %v5710_v39, %v5685_v22  ;;  %v10098_v22 = vld [vmem:[%s14373_s11 + $0x13c] sm:$0xf0]  ;;  %v10090_v39 = vld [vmem:[%s14373_s11 + $0x104] sm:$0xf] }
0x17a2   :  { %v5687_v44 = vpop.permute.xlu0 %5686 }
0x17a3   :  { %v5715_v55 = vsel %vm66_vm0, %v5711_v0, %v5687_v44  ;;  %v10099_v0 = vld [vmem:[%s14373_s11 + $0x144] sm:$0xf0] }
0x17bf   :  { %v5701_v51 = vpop.permute.xlu1 %5700 }
0x17c0   :  { %v5718_v58 = vsel %vm877_vm3, %v5714_v11, %v5701_v51  ;;  %v9257_v51 = vor.u32 %v10098_v22, %v9256_v7  ;;  %v9272_v7 = vld [vmem:[%s14373_s11 + $0x110] sm:$0xf] }
0x17c1   :  { %8962 = vmatmul.msk.f32.gmra.mxu0 %vm124_vm1, %v5718_v58  ;;  %v9258_v58 = vld [vmem:[%s14373_s11 + $0x140] sm:$0xf0] }
0x17c2   :  { %v9261_v44 = vor.u32 %v10090_v39, %v9258_v58  ;;  %6370 = vmatpush.bf16.msrb.mxu1 %v9257_v51  ;;  %v10100_v51 = vld [vmem:[%s14373_s11 + $0x14c] sm:$0xf0]  ;;  %v10093_v58 = vld [vmem:[%s14373_s11 + $0x11c] sm:$0xf] }
0x17c4   :  { %6389 = vmatpush.bf16.msra.mxu2 %v9261_v44  ;;  %v9273_v44 = vor.u32 %v10100_v51, %v9272_v7  ;;  %v10120_v7 = vld [vmem:[%s14373_s11 + $0x1ec] sm:$0xf0]  ;;  %v10113_v51 = vld [vmem:[%s14373_s11 + $0x1bc] sm:$0xf] }
0x17c6   :  { %6445 = vmatpush.bf16.msra.mxu1 %v9337_v38 }
0x17c7   :  { %v5703_v26 = vpop.permute.xlu1 %5702 }
0x17c8   :  { %v5719_v57 = vsel %vm877_vm3, %v5715_v55, %v5703_v26  ;;  %v10091_v55 = vld [vmem:[%s14373_s11 + $0x10c] sm:$0xf] }
0x17c9   :  { %8963 = vmatmul.msk.f32.gmra.mxu0 %vm124_vm1, %v5719_v57  ;;  %v9266_v26 = vld [vmem:[%s14373_s11 + $0x148] sm:$0xf0]  ;;  %v9265_v57 = vor.u32 %v10099_v0, %v9264_v56  ;;  %v9282_v0 = vld [vmem:[%s14373_s11 + $0x158] sm:$0xf0] }
0x17ca   :  { %6446 = vmatpush.bf16.msra.mxu1 %v9273_v44 }
0x17cb   :  { %6408 = vmatpush.bf16.msra.mxu3 %v9265_v57 }
0x180a   :  { %v5750_v17 = vpop.f32.mrf.mxu0 }
0x180b   :  { %v5751_v32 = vadd.f32 %v10449_v46, %v5750_v17 }
0x180d   :  { %v5762_v43 = vadd.f32 %v5751_v32, %v13125_v3 }
0x180f   :  { %v5768_v60 = vsel %vm124_vm1, %v5762_v43, 0.0 }
0x1810   :  { %5769 = vadd.xlane.f32.xlu2 %v5768_v60 }
0x1812   :  { %v5753_v2 = vpop.f32.mrf.mxu0 }
0x1813   :  { %v5754_v54 = vadd.f32 %v10449_v46, %v5753_v2 }
0x1815   :  { %v5763_v4 = vadd.f32 %v5754_v54, %v13130_v9 }
0x1817   :  { %v5771_v45 = vsel %vm124_vm1, %v5763_v4, 0.0 }
0x1818   :  { %5772 = vadd.xlane.f32.xlu0 %v5771_v45 }
0x183e   :  { %v5756_v10 = vpop.f32.mrf.mxu0 }
0x183f   :  { %v5757_v40 = vadd.f32 %v10449_v46, %v5756_v10 }
0x1841   :  { %v5764_v50 = vadd.f32 %v5757_v40, %v13138_v23 }
0x1843   :  { %v5774_v29 = vsel %vm124_vm1, %v5764_v50, 0.0 }
0x1844   :  { %5775 = vadd.xlane.f32.xlu1 %v5774_v29 }
0x1846   :  { %v5759_v61 = vpop.f32.mrf.mxu0 }
0x1847   :  { %v5760_v37 = vadd.f32 %v10449_v46, %v5759_v61  ;;  %v9269_v46 = vor.u32 %v10091_v55, %v9266_v26  ;;  %v9285_v55 = vor.u32 %v10093_v58, %v9282_v0  ;;  %v9378_v58 = vld [vmem:[%s14373_s11 + $0x1f8] sm:$0xf0]  ;;  %v9312_v0 = vld [vmem:[%s14373_s11 + $0x138] sm:$0xf] }
0x1848   :  { %v9381_v44 = vor.u32 %v10113_v51, %v9378_v58 }
0x1849   :  { %v5765_v3 = vadd.f32 %v5760_v37, %v13144_v19  ;;  %6427 = vmatpush.bf16.msra.mxu0 %v9269_v46 }
0x184b   :  { %v5777_v24 = vsel %vm124_vm1, %v5765_v3, 0.0 }
0x184c   :  { %5778 = vadd.xlane.f32.xlu2 %v5777_v24  ;;  %v13574_v24 = vld [vmem:[%s14371_s9 + $0xd] ss:$0 sm:$0xff] }
0x184d   :  { %6502 = vmatpush.bf16.msrb.mxu0 %v9349_v16  ;;  %v10121_v16 = vld [vmem:[%s14373_s11 + $0x1f4] sm:$0xf0] }
0x1851   :  { %6503 = vmatpush.bf16.msrb.mxu0 %v9285_v55  ;;  %v10105_v55 = vld [vmem:[%s14373_s11 + $0x174] sm:$0xf0] }
0x1883   :  { %v5770_v62 = vpop.xlane.xlu2 %5769 }
0x1884   :  { %v5780_v9 = vmul.f32 %v5770_v62, %v11365_v6 }
0x1886   :  { %v13498_v47 = vsub.f32 %v5762_v43, %v5780_v9 }
0x1888   :  { %v5788_v18 = vmul.f32 %v13498_v47, %v13498_v47 }
0x188a   :  { %v5792_v23 = vsel %vm124_vm1, %v5788_v18, 0.0 }
0x188b   :  { %5793 = vadd.xlane.f32.xlu0 %v5792_v23  ;;  %v5773_v48 = vpop.xlane.xlu0 %5772  ;;  %v13580_v23 = vld [vmem:[%s14371_s9 + $0xe] ss:$0 sm:$0xff] }
0x188c   :  { %v5781_v53 = vmul.f32 %v5773_v48, %v11365_v6 }
0x188e   :  { %v13504_v1 = vsub.f32 %v5763_v4, %v5781_v53 }
0x1890   :  { %v5789_v19 = vmul.f32 %v13504_v1, %v13504_v1 }
0x1892   :  { %v5795_v25 = vsel %vm124_vm1, %v5789_v19, 0.0 }
0x1893   :  { %5796 = vadd.xlane.f32.xlu1 %v5795_v25 }
0x18b7   :  { %v5776_v30 = vpop.xlane.xlu1 %5775 }
0x18b8   :  { %v5782_v63 = vmul.f32 %v5776_v30, %v11365_v6 }
0x18ba   :  { %v13510_v52 = vsub.f32 %v5764_v50, %v5782_v63 }
0x18bc   :  { %v5790_v49 = vmul.f32 %v13510_v52, %v13510_v52 }
0x18be   :  { %v5798_v34 = vsel %vm124_vm1, %v5790_v49, 0.0 }
0x18bf   :  { %5799 = vadd.xlane.f32.xlu2 %v5798_v34  ;;  %v5779_v5 = vpop.xlane.xlu2 %5778  ;;  %v10108_v34 = vld [vmem:[%s14373_s11 + $0x194] sm:$0xf] }
0x18c0   :  { %v5783_v8 = vmul.f32 %v5779_v5, %v11365_v6  ;;  %v9338_v5 = vld [vmem:[%s14373_s11 + $0x1d0] sm:$0xf0] }
0x18c2   :  { %v13516_v15 = vsub.f32 %v5765_v3, %v5783_v8  ;;  %v9344_v8 = vld [vmem:[%s14373_s11 + $0x198] sm:$0xf] }
0x18c4   :  { %v5791_v36 = vmul.f32 %v13516_v15, %v13516_v15 }
0x18c6   :  { %v5801_v35 = vsel %vm124_vm1, %v5791_v36, 0.0  ;;  %v9341_v36 = vor.u32 %v10108_v34, %v9338_v5  ;;  %v9362_v34 = vld [vmem:[%s14373_s11 + $0x1e8] sm:$0xf0] }
0x18c7   :  { %5802 = vadd.xlane.f32.xlu0 %v5801_v35  ;;  %v10117_v35 = vld [vmem:[%s14373_s11 + $0x1d4] sm:$0xf0] }
0x18c8   :  { %v9345_v59 = vor.u32 %v10117_v35, %v9344_v8  ;;  %6464 = vmatpush.bf16.msrb.mxu2 %v9341_v36  ;;  %v9296_v36 = vld [vmem:[%s14373_s11 + $0x128] sm:$0xf] }
0x18c9   :  { %v10103_v35 = vld [vmem:[%s14373_s11 + $0x164] sm:$0xf0] }
0x18ca   :  { %6483 = vmatpush.bf16.msrb.mxu3 %v9345_v59  ;;  %v9288_v59 = vld [vmem:[%s14373_s11 + $0x120] sm:$0xf] }
0x18fe   :  { %v5794_v21 = vpop.xlane.xlu0 %5793 }
0x18ff   :  { %v5804_v14 = vmul.f32 %v5794_v21, %v11365_v6  ;;  %v9274_v21 = vld [vmem:[%s14373_s11 + $0x150] sm:$0xf0] }
0x1900   :  { %v9277_v42 = vor.u32 %v10092_v12, %v9274_v21  ;;  %v9298_v12 = vld [vmem:[%s14373_s11 + $0x168] sm:$0xf0]  ;;  %v10112_v21 = vld [vmem:[%s14373_s11 + $0x1b4] sm:$0xf] }
0x1901   :  { %v5808_v11 = vadd.f32 1e-05, %v5804_v14  ;;  %v9280_v14 = vld [vmem:[%s14373_s11 + $0x118] sm:$0xf]  ;;  %v9301_v38 = vor.u32 %v10095_v13, %v9298_v12  ;;  %v10130_v13 = vld [vmem:[%s14374_s12 + $0x440] sm:$0xff] }
0x1902   :  { %6465 = vmatpush.bf16.msrb.mxu2 %v9277_v42  ;;  %v9373_v42 = vor.u32 %v10112_v21, %v9370_v28  ;;  %v10138_v12 = vld [vmem:[%s14374_s12 + $0x480] sm:$0xff] }
0x1903   :  { %10746 = vrsqrt.f32 %v5808_v11  ;;  %vm5818_vm2 = vweird.f32 %v5808_v11 }
0x1906   :  { %v5797_v17 = vpop.xlane.xlu1 %5796 }
0x1907   :  { %v5805_v32 = vmul.f32 %v5797_v17, %v11365_v6 }
0x1909   :  { %v10747_v43 = vpop.eup %10746  ;;  %v5809_v60 = vadd.f32 1e-05, %v5805_v32 }
0x190a   :  { %v5813_v2 = vmul.f32 %v10747_v43, %v5808_v11  ;;  %vm5819_vm0 = vweird.f32 %v10747_v43  ;;  %v9281_v11 = vor.u32 %v10101_v33, %v9280_v14  ;;  %v9377_v14 = vor.u32 %v10121_v16, %v9376_v41  ;;  %v9368_v33 = vld [vmem:[%s14373_s11 + $0x1b0] sm:$0xf]  ;;  %v10185_v16 = vld [vmem:[%s14374_s12 + $0x5f8] sm:$0xff] }
0x190b   :  { %10748 = vrsqrt.f32 %v5809_v60  ;;  %vm5820_vm3 = vmor %vm5818_vm2, %vm5819_vm0  ;;  %vm5828_vm6 = vweird.f32 %v5809_v60 }
0x190c   :  { %v5814_v54 = vmul.f32 %v10747_v43, %v5813_v2  ;;  %6484 = vmatpush.bf16.msrb.mxu3 %v9281_v11  ;;  %v9306_v11 = vld [vmem:[%s14373_s11 + $0x170] sm:$0xf0] }
0x190e   :  { %v5815_v4 = vmul.f32 0.5, %v5814_v54 }
0x1910   :  { %v5816_v45 = vsub.f32 1.5, %v5815_v4  ;;  %v10110_v4 = vld [vmem:[%s14373_s11 + $0x1a4] sm:$0xf] }
0x1911   :  { %v10749_v10 = vpop.eup %10748 }
0x1912   :  { %v5817_v40 = vmul.f32 %v10747_v43, %v5816_v45  ;;  %v5823_v50 = vmul.f32 %v10749_v10, %v5809_v60  ;;  %vm5829_vm5 = vweird.f32 %v10749_v10  ;;  %v9354_v45 = vld [vmem:[%s14373_s11 + $0x1e0] sm:$0xf0] }
0x1913   :  { %vm5830_vm7 = vmor %vm5828_vm6, %vm5829_vm5 }
0x1914   :  { %v5824_v29 = vmul.f32 %v10749_v10, %v5823_v50  ;;  %v5821_v61 = vsel %vm5820_vm3, %v10747_v43, %v5817_v40  ;;  %v9360_v40 = vld [vmem:[%s14373_s11 + $0x1a8] sm:$0xf] }
0x1915   :  { %v5852_v62 = vmul.f32 %v5821_v61, %v13498_v47  ;;  %v10119_v50 = vld [vmem:[%s14373_s11 + $0x1e4] sm:$0xf0] }
0x1916   :  { %v5825_v37 = vmul.f32 0.5, %v5824_v29  ;;  %v9361_v61 = vor.u32 %v10119_v50, %v9360_v40  ;;  %v10136_v40 = vld [vmem:[%s14374_s12 + $0x470] sm:$0xff] }
0x1917   :  { %v5857_v48 = vmul.f32 %v13574_v24, %v5852_v62  ;;  %v10144_v50 = vld [vmem:[%s14374_s12 + $0x4b0] sm:$0xff] }
0x1918   :  { %v5826_v3 = vsub.f32 1.5, %v5825_v37 }
0x1919   :  { %v13586_v25 = vadd.f32 %v13580_v23, %v5857_v48 }
0x191a   :  { %v5827_v9 = vmul.f32 %v10749_v10, %v5826_v3 }
0x191c   :  { %v5831_v18 = vsel %vm5830_vm7, %v10749_v10, %v5827_v9  ;;  %v9357_v10 = vor.u32 %v10110_v4, %v9354_v45  ;;  %v10145_v4 = vld [vmem:[%s14374_s12 + $0x4b8] sm:$0xff] }
0x191d   :  { %v5853_v53 = vmul.f32 %v5831_v18, %v13504_v1  ;;  %v10153_v45 = vld [vmem:[%s14374_s12 + $0x4f8] sm:$0xff] }
0x191f   :  { %v5858_v19 = vmul.f32 %v13574_v24, %v5853_v53 }
0x1921   :  { %v13589_v47 = vadd.f32 %v13580_v23, %v5858_v19 }
0x1923   :  { %v13593_v30 = vpack.c.bf16 %v13589_v47, %v13586_v25 }
0x1925   :  { %9382 = vmatmul.msk.bf16.vlgmr.msrb.gmra.mxu1 %vm124_vm1, %v13593_v30  ;;  %9384 = vmatmul.msk.bf16.vlgmr.msra.gmra.mxu2 %vm124_vm1, %v13593_v30 }
0x1926   :  { %9386 = vmatmul.msk.bf16.vlgmr.msra.gmra.mxu3 %vm124_vm1, %v13593_v30  ;;  %9388 = vmatmul.msk.bf16.vlgmr.msra.gmra.mxu0 %vm124_vm1, %v13593_v30 }
0x1927   :  { %6540 = vmatpush.bf16.msra.mxu2 %v9357_v10  ;;  %6559 = vmatpush.bf16.msra.mxu3 %v9361_v61  ;;  %v10128_v10 = vld [vmem:[%s14374_s12 + $0x430] sm:$0xff]  ;;  %v10127_v61 = vld [vmem:[%s14374_s12 + $0x428] sm:$0xff] }
0x1932   :  { %v5800_v1 = vpop.xlane.xlu2 %5799 }
0x1933   :  { %v5806_v63 = vmul.f32 %v5800_v1, %v11365_v6 }
0x1935   :  { %v5810_v49 = vadd.f32 1e-05, %v5806_v63  ;;  %v9290_v63 = vld [vmem:[%s14373_s11 + $0x160] sm:$0xf0] }
0x1937   :  { %10750 = vrsqrt.f32 %v5810_v49  ;;  %vm5838_vm9 = vweird.f32 %v5810_v49 }
0x193a   :  { %v5803_v31 = vpop.xlane.xlu0 %5802 }
0x193b   :  { %v5807_v20 = vmul.f32 %v5803_v31, %v11365_v6  ;;  %v9297_v31 = vor.u32 %v10103_v35, %v9296_v36  ;;  %v10123_v36 = vld [vmem:[%s14374_s12 + $0x408] sm:$0xff] }
0x193c   :  { %v10131_v35 = vld [vmem:[%s14374_s12 + $0x448] sm:$0xff] }
0x193d   :  { %v10751_v22 = vpop.eup %10750  ;;  %v5811_v39 = vadd.f32 1e-05, %v5807_v20  ;;  %v9289_v20 = vor.u32 %v10102_v27, %v9288_v59  ;;  %6560 = vmatpush.bf16.msra.mxu3 %v9297_v31  ;;  %v10139_v59 = vld [vmem:[%s14374_s12 + $0x488] sm:$0xff]  ;;  %v10122_v27 = vld [vmem:[%s14374_s12 + $0x400] sm:$0xff] }
0x193e   :  { %v5833_v56 = vmul.f32 %v10751_v22, %v5810_v49  ;;  %vm5839_vm8 = vweird.f32 %v10751_v22  ;;  %v10111_v49 = vld [vmem:[%s14373_s11 + $0x1ac] sm:$0xf] }
0x193f   :  { %10752 = vrsqrt.f32 %v5811_v39  ;;  %vm5840_vm10 = vmor %vm5838_vm9, %vm5839_vm8  ;;  %vm5848_vm12 = vweird.f32 %v5811_v39  ;;  %v9365_v8 = vor.u32 %v10111_v49, %v9362_v34  ;;  %v10124_v49 = vld [vmem:[%s14374_s12 + $0x410] sm:$0xff]  ;;  %v10147_v31 = vld [vmem:[%s14374_s12 + $0x4c8] sm:$0xff] }
0x1940   :  { %v5834_v26 = vmul.f32 %v10751_v22, %v5833_v56  ;;  %v10132_v34 = vld [vmem:[%s14374_s12 + $0x450] sm:$0xff] }
0x1941   :  { %6578 = vmatpush.bf16.msra.mxu0 %v9365_v8  ;;  %v10148_v8 = vld [vmem:[%s14374_s12 + $0x4d0] sm:$0xff] }
0x1942   :  { %v5835_v57 = vmul.f32 0.5, %v5834_v26  ;;  %v9304_v26 = vld [vmem:[%s14373_s11 + $0x130] sm:$0xf] }
0x1944   :  { %v5836_v46 = vsub.f32 1.5, %v5835_v57  ;;  %v9313_v57 = vor.u32 %v10105_v55, %v9312_v0  ;;  %v10183_v0 = vld [vmem:[%s14374_s12 + $0x5e8] sm:$0xff] }
0x1945   :  { %v10753_v17 = vpop.eup %10752  ;;  %6579 = vmatpush.bf16.msra.mxu0 %v9301_v38 }
0x1946   :  { %v5837_v32 = vmul.f32 %v10751_v22, %v5836_v46  ;;  %v5843_v43 = vmul.f32 %v10753_v17, %v5811_v39  ;;  %vm5849_vm11 = vweird.f32 %v10753_v17  ;;  %v9369_v39 = vor.u32 %v10120_v7, %v9368_v33  ;;  %v10104_v46 = vld [vmem:[%s14373_s11 + $0x16c] sm:$0xf0]  ;;  %v13926_v33 = vld [vmem:[%s14372_s10 + $0x1] ss:$2 sm:$0xff]  ;;  %v10169_v7 = vld [vmem:[%s14374_s12 + $0x578] sm:$0xff] }
0x1947   :  { %vm5850_vm13 = vmor %vm5848_vm12, %vm5849_vm11  ;;  %v13939_v51 = vperm.slane %v13926_v33, 0  ;;  %v13942_v58 = vperm.slane %v13926_v33, 1  ;;  %v13951_v55 = vperm.slane %v13926_v33, 3 }
0x1948   :  { %v5844_v60 = vmul.f32 %v10753_v17, %v5843_v43  ;;  %v5841_v2 = vsel %vm5840_vm10, %v10751_v22, %v5837_v32  ;;  %v10096_v22 = vld [vmem:[%s14373_s11 + $0x134] sm:$0xf]  ;;  %v9314_v32 = vld [vmem:[%s14373_s11 + $0x178] sm:$0xf0]  ;;  %v9305_v43 = vor.u32 %v10104_v46, %v9304_v26  ;;  %v13954_v26 = vperm.slane %v13926_v33, 2 }
0x1949   :  { %v5854_v37 = vmul.f32 %v5841_v2, %v13510_v52  ;;  %v9309_v56 = vor.u32 %v10096_v22, %v9306_v11  ;;  %v10129_v2 = vld [vmem:[%s14374_s12 + $0x438] sm:$0xff] }
0x194a   :  { %v5845_v54 = vmul.f32 0.5, %v5844_v60  ;;  %v10177_v22 = vld [vmem:[%s14374_s12 + $0x5b8] sm:$0xff] }
0x194b   :  { %v5859_v9 = vmul.f32 %v13574_v24, %v5854_v37  ;;  %v10135_v37 = vld [vmem:[%s14374_s12 + $0x468] sm:$0xff] }
0x194c   :  { %v5846_v29 = vsub.f32 1.5, %v5845_v54  ;;  %v10137_v54 = vld [vmem:[%s14374_s12 + $0x478] sm:$0xff] }
0x194d   :  { %v13670_v53 = vadd.f32 %v13580_v23, %v5859_v9  ;;  %v10126_v9 = vld [vmem:[%s14374_s12 + $0x420] sm:$0xff] }
0x194e   :  { %v5847_v3 = vmul.f32 %v10753_v17, %v5846_v29  ;;  %v10152_v29 = vld [vmem:[%s14374_s12 + $0x4f0] sm:$0xff] }
0x1950   :  { %v5851_v62 = vsel %vm5850_vm13, %v10753_v17, %v5847_v3  ;;  %v10097_v17 = vld [vmem:[%s14373_s11 + $0x13c] sm:$0xf]  ;;  %v10143_v3 = vld [vmem:[%s14374_s12 + $0x4a8] sm:$0xff] }
0x1951   :  { %v5855_v18 = vmul.f32 %v5851_v62, %v13516_v15  ;;  %v9352_v15 = vld [vmem:[%s14373_s11 + $0x1a0] sm:$0xf]  ;;  %v9317_v60 = vor.u32 %v10097_v17, %v9314_v32  ;;  %v10151_v62 = vld [vmem:[%s14374_s12 + $0x4e8] sm:$0xff]  ;;  %v10168_v17 = vld [vmem:[%s14374_s12 + $0x570] sm:$0xff] }
0x1952   :  { %v10176_v32 = vld [vmem:[%s14374_s12 + $0x5b0] sm:$0xff] }
0x1953   :  { %v5860_v48 = vmul.f32 %v13574_v24, %v5855_v18  ;;  %v10118_v24 = vld [vmem:[%s14373_s11 + $0x1dc] sm:$0xf0] }
0x1954   :  { %v9353_v1 = vor.u32 %v10118_v24, %v9352_v15  ;;  %v10134_v18 = vld [vmem:[%s14374_s12 + $0x460] sm:$0xff]  ;;  %v10125_v24 = vld [vmem:[%s14374_s12 + $0x418] sm:$0xff] }
0x1955   :  { %v13673_v19 = vadd.f32 %v13580_v23, %v5860_v48  ;;  %v10094_v23 = vld [vmem:[%s14373_s11 + $0x124] sm:$0xf] }
0x1956   :  { %v9293_v5 = vor.u32 %v10094_v23, %v9290_v63  ;;  %6521 = vmatpush.bf16.msrb.mxu1 %v9353_v1  ;;  %v10142_v48 = vld [vmem:[%s14374_s12 + $0x4a0] sm:$0xff]  ;;  %v10133_v23 = vld [vmem:[%s14374_s12 + $0x458] sm:$0xff] }
0x1957   :  { %v13677_v52 = vpack.c.bf16 %v13673_v19, %v13670_v53  ;;  %v10150_v15 = vld [vmem:[%s14374_s12 + $0x4e0] sm:$0xff]  ;;  %v10141_v1 = vld [vmem:[%s14374_s12 + $0x498] sm:$0xff] }
0x1958   :  { %6541 = vmatpush.bf16.msra.mxu2 %v9293_v5  ;;  %v10149_v63 = vld [vmem:[%s14374_s12 + $0x4d8] sm:$0xff]  ;;  %v10140_v5 = vld [vmem:[%s14374_s12 + $0x490] sm:$0xff] }
0x1959   :  { %9383 = vmatmul.msk.bf16.gmra.mxu1 %vm124_vm1, %v13677_v52  ;;  %9385 = vmatmul.msk.bf16.gmra.mxu2 %vm124_vm1, %v13677_v52 }
0x195a   :  { %9387 = vmatmul.msk.bf16.gmra.mxu3 %vm124_vm1, %v13677_v52  ;;  %9389 = vmatmul.msk.bf16.gmra.mxu0 %vm124_vm1, %v13677_v52 }
0x195b   :  { %6522 = vmatpush.bf16.msrb.mxu1 %v9289_v20  ;;  %v10146_v20 = vld [vmem:[%s14374_s12 + $0x4c0] sm:$0xff] }
0x1969   :  { %9390 = vmatmul.msk.bf16.vlgmr.msra.gmra.mxu1 %vm124_vm1, %v13593_v30  ;;  %9392 = vmatmul.msk.bf16.vlgmr.msrb.gmra.mxu2 %vm124_vm1, %v13593_v30 }
0x196a   :  { %9394 = vmatmul.msk.bf16.vlgmr.msrb.gmra.mxu3 %vm124_vm1, %v13593_v30  ;;  %9396 = vmatmul.msk.bf16.vlgmr.msrb.gmra.mxu0 %vm124_vm1, %v13593_v30 }
0x196b   :  { %6616 = vmatpush.bf16.msrb.mxu2 %v9373_v42  ;;  %6635 = vmatpush.bf16.msrb.mxu3 %v9377_v14  ;;  %v10161_v42 = vld [vmem:[%s14374_s12 + $0x538] sm:$0xff]  ;;  %v10184_v14 = vld [vmem:[%s14374_s12 + $0x5f0] sm:$0xff] }
0x196c   :  { %6597 = vmatpush.bf16.msra.mxu1 %v9369_v39  ;;  %6654 = vmatpush.bf16.msrb.mxu0 %v9381_v44  ;;  %v10159_v44 = vld [vmem:[%s14374_s12 + $0x528] sm:$0xff] }
0x196f   :  { %6617 = vmatpush.bf16.msrb.mxu2 %v9309_v56  ;;  %6636 = vmatpush.bf16.msrb.mxu3 %v9313_v57 }
0x1970   :  { %6598 = vmatpush.bf16.msra.mxu1 %v9305_v43  ;;  %6655 = vmatpush.bf16.msrb.mxu0 %v9317_v60 }
0x1979   :  { %9391 = vmatmul.msk.bf16.gmra.mxu1 %vm124_vm1, %v13677_v52  ;;  %9393 = vmatmul.msk.bf16.gmra.mxu2 %vm124_vm1, %v13677_v52 }
0x197a   :  { %9395 = vmatmul.msk.bf16.gmra.mxu3 %vm124_vm1, %v13677_v52  ;;  %9397 = vmatmul.msk.bf16.gmra.mxu0 %vm124_vm1, %v13677_v52 }
0x1989   :  { %9398 = vmatmul.msk.bf16.vlgmr.msrb.gmra.mxu1 %vm124_vm1, %v13593_v30  ;;  %9400 = vmatmul.msk.bf16.vlgmr.msra.gmra.mxu2 %vm124_vm1, %v13593_v30 }
0x198a   :  { %9402 = vmatmul.msk.bf16.vlgmr.msra.gmra.mxu3 %vm124_vm1, %v13593_v30  ;;  %9404 = vmatmul.msk.bf16.vlgmr.msra.gmra.mxu0 %vm124_vm1, %v13593_v30 }
0x198b   :  { %7532 = vmatpush.bf16.msrb.mxu1 %v10129_v2  ;;  %7551 = vmatpush.bf16.msra.mxu2 %v10137_v54 }
0x198c   :  { %7570 = vmatpush.bf16.msra.mxu3 %v10145_v4  ;;  %7589 = vmatpush.bf16.msra.mxu0 %v10153_v45  ;;  %v10158_v4 = vld [vmem:[%s14374_s12 + $0x520] sm:$0xff] }
0x198d   :  { %v10182_v45 = vld [vmem:[%s14374_s12 + $0x5e0] sm:$0xff] }
0x198f   :  { %7533 = vmatpush.bf16.msrb.mxu1 %v10128_v10  ;;  %7552 = vmatpush.bf16.msra.mxu2 %v10136_v40 }
0x1990   :  { %7571 = vmatpush.bf16.msra.mxu3 %v10144_v50  ;;  %7590 = vmatpush.bf16.msra.mxu0 %v10152_v29 }
0x1993   :  { %7534 = vmatpush.bf16.msrb.mxu1 %v10127_v61  ;;  %7553 = vmatpush.bf16.msra.mxu2 %v10135_v37  ;;  %v10167_v61 = vld [vmem:[%s14374_s12 + $0x568] sm:$0xff] }
0x1994   :  { %7572 = vmatpush.bf16.msra.mxu3 %v10143_v3  ;;  %7591 = vmatpush.bf16.msra.mxu0 %v10151_v62  ;;  %v10175_v37 = vld [vmem:[%s14374_s12 + $0x5a8] sm:$0xff] }
0x1997   :  { %7535 = vmatpush.bf16.msrb.mxu1 %v10126_v9  ;;  %7554 = vmatpush.bf16.msra.mxu2 %v10134_v18 }
0x1998   :  { %7573 = vmatpush.bf16.msra.mxu3 %v10142_v48  ;;  %7592 = vmatpush.bf16.msra.mxu0 %v10150_v15  ;;  %v10157_v48 = vld [vmem:[%s14374_s12 + $0x518] sm:$0xff] }
0x1999   :  { %9399 = vmatmul.msk.bf16.gmra.mxu1 %vm124_vm1, %v13677_v52  ;;  %9401 = vmatmul.msk.bf16.gmra.mxu2 %vm124_vm1, %v13677_v52  ;;  %v10181_v15 = vld [vmem:[%s14374_s12 + $0x5d8] sm:$0xff] }
0x199a   :  { %9403 = vmatmul.msk.bf16.gmra.mxu3 %vm124_vm1, %v13677_v52  ;;  %9405 = vmatmul.msk.bf16.gmra.mxu0 %vm124_vm1, %v13677_v52 }
0x199b   :  { %7536 = vmatpush.bf16.msrb.mxu1 %v10125_v24  ;;  %7555 = vmatpush.bf16.msra.mxu2 %v10133_v23 }
0x199c   :  { %7574 = vmatpush.bf16.msra.mxu3 %v10141_v1  ;;  %7593 = vmatpush.bf16.msra.mxu0 %v10149_v63 }
0x199f   :  { %7537 = vmatpush.bf16.msrb.mxu1 %v10124_v49  ;;  %7556 = vmatpush.bf16.msra.mxu2 %v10132_v34  ;;  %v10166_v49 = vld [vmem:[%s14374_s12 + $0x560] sm:$0xff] }
0x19a0   :  { %7575 = vmatpush.bf16.msra.mxu3 %v10140_v5  ;;  %7594 = vmatpush.bf16.msra.mxu0 %v10148_v8  ;;  %v10174_v34 = vld [vmem:[%s14374_s12 + $0x5a0] sm:$0xff] }
0x19a2   :  { %v6372_v38 = vpop.f32.mrf.mxu1 }
0x19a3   :  { %7538 = vmatpush.bf16.msrb.mxu1 %v10123_v36  ;;  %7557 = vmatpush.bf16.msra.mxu2 %v10131_v35  ;;  %v6429_v28 = vpop.f32.mrf.mxu0  ;;  %v6373_v2 = vadd.f32 %v6372_v38, %v13939_v51  ;;  %v10156_v36 = vld [vmem:[%s14374_s12 + $0x510] sm:$0xff]  ;;  %v10154_v38 = vld [vmem:[%s14374_s12 + $0x500] sm:$0xff] }
0x19a4   :  { %7576 = vmatpush.bf16.msra.mxu3 %v10139_v59  ;;  %7595 = vmatpush.bf16.msra.mxu0 %v10147_v31  ;;  %v6430_v10 = vadd.f32 %v6429_v28, %v13951_v55  ;;  %v10180_v35 = vld [vmem:[%s14374_s12 + $0x5d0] sm:$0xff]  ;;  %v10165_v59 = vld [vmem:[%s14374_s12 + $0x558] sm:$0xff]  ;;  %v10163_v28 = vld [vmem:[%s14374_s12 + $0x548] sm:$0xff] }
0x19a5   :  { %v6667_v9 = vmax.f32 %v6373_v2, 0.0  ;;  %v10173_v31 = vld [vmem:[%s14374_s12 + $0x598] sm:$0xff] }
0x19a6   :  { %v6670_v24 = vmax.f32 %v6430_v10, 0.0 }
0x19a7   :  { %7539 = vmatpush.bf16.msrb.mxu1 %v10122_v27  ;;  %7558 = vmatpush.bf16.msra.mxu2 %v10130_v13  ;;  %v10155_v27 = vld [vmem:[%s14374_s12 + $0x508] sm:$0xff] }
0x19a8   :  { %7577 = vmatpush.bf16.msra.mxu3 %v10138_v12  ;;  %7596 = vmatpush.bf16.msra.mxu0 %v10146_v20  ;;  %v6391_v21 = vpop.f32.mrf.mxu2  ;;  %v10179_v13 = vld [vmem:[%s14374_s12 + $0x5c8] sm:$0xff]  ;;  %v10164_v12 = vld [vmem:[%s14374_s12 + $0x550] sm:$0xff] }
0x19a9   :  { %9406 = vmatmul.msk.bf16.vlgmr.msra.gmra.mxu1 %vm124_vm1, %v13593_v30  ;;  %9408 = vmatmul.msk.bf16.vlgmr.msrb.gmra.mxu2 %vm124_vm1, %v13593_v30  ;;  %v6410_v41 = vpop.f32.mrf.mxu3  ;;  %v6392_v54 = vadd.f32 %v6391_v21, %v13942_v58  ;;  %v10172_v20 = vld [vmem:[%s14374_s12 + $0x590] sm:$0xff]  ;;  %v10178_v21 = vld [vmem:[%s14374_s12 + $0x5c0] sm:$0xff] }
0x19aa   :  { %9410 = vmatmul.msk.bf16.vlgmr.msrb.gmra.mxu3 %vm124_vm1, %v13593_v30  ;;  %9412 = vmatmul.msk.bf16.vlgmr.msrb.gmra.mxu0 %vm124_vm1, %v13593_v30  ;;  %v10160_v30 = vld [vmem:[%s14374_s12 + $0x530] sm:$0xff]  ;;  %v6374_v39 = vpop.f32.mrf.mxu1  ;;  %v6411_v40 = vadd.f32 %v6410_v41, %v13954_v26  ;;  %v10171_v41 = vld [vmem:[%s14374_s12 + $0x588] sm:$0xff] }
0x19ab   :  { %7608 = vmatpush.bf16.msra.mxu1 %v10161_v42  ;;  %v6431_v56 = vpop.f32.mrf.mxu0  ;;  %7627 = vmatpush.bf16.msrb.mxu2 %v10169_v7  ;;  %v6375_v57 = vadd.f32 %v6374_v39, %v13939_v51  ;;  %v6668_v18 = vmax.f32 %v6392_v54, 0.0  ;;  %v10193_v42 = vld [vmem:[%s14374_s12 + $0x638] sm:$0xff]  ;;  %v10162_v7 = vld [vmem:[%s14374_s12 + $0x540] sm:$0xff]  ;;  %v10192_v39 = vld [vmem:[%s14374_s12 + $0x630] sm:$0xff] }
0x19ac   :  { %7665 = vmatpush.bf16.msrb.mxu0 %v10185_v16  ;;  %7646 = vmatpush.bf16.msrb.mxu3 %v10177_v22  ;;  %v6432_v43 = vadd.f32 %v6431_v56, %v13951_v55  ;;  %v6669_v23 = vmax.f32 %v6411_v40, 0.0  ;;  %v10217_v16 = vld [vmem:[%s14374_s12 + $0x6f8] sm:$0xff]  ;;  %v10170_v22 = vld [vmem:[%s14374_s12 + $0x580] sm:$0xff]  ;;  %v10200_v54 = vld [vmem:[%s14374_s12 + $0x670] sm:$0xff] }
0x19ad   :  { %v6683_v50 = vmax.f32 %v6375_v57, 0.0  ;;  %v10201_v56 = vld [vmem:[%s14374_s12 + $0x678] sm:$0xff] }
0x19ae   :  { %v6686_v3 = vmax.f32 %v6432_v43, 0.0 }
0x19af   :  { %7609 = vmatpush.bf16.msra.mxu1 %v10160_v30  ;;  %7628 = vmatpush.bf16.msrb.mxu2 %v10168_v17  ;;  %v6731_v1 = vpack.c.bf16 %v6683_v50, %v6667_v9  ;;  %v10215_v17 = vld [vmem:[%s14374_s12 + $0x6e8] sm:$0xff]  ;;  %v10214_v50 = vld [vmem:[%s14374_s12 + $0x6e0] sm:$0xff] }
0x19b0   :  { %7666 = vmatpush.bf16.msrb.mxu0 %v10184_v14  ;;  %v6393_v11 = vpop.f32.mrf.mxu2  ;;  %7647 = vmatpush.bf16.msrb.mxu3 %v10176_v32  ;;  %v6734_v5 = vpack.c.bf16 %v6686_v3, %v6670_v24 }
0x19b1   :  { %v6394_v46 = vadd.f32 %v6393_v11, %v13942_v58  ;;  %v10216_v11 = vld [vmem:[%s14374_s12 + $0x6f0] sm:$0xff] }
0x19b3   :  { %7610 = vmatpush.bf16.msra.mxu1 %v10159_v44  ;;  %v6684_v29 = vmax.f32 %v6394_v46, 0.0  ;;  %7629 = vmatpush.bf16.msrb.mxu2 %v10167_v61  ;;  %v10191_v46 = vld [vmem:[%s14374_s12 + $0x628] sm:$0xff] }
0x19b4   :  { %7667 = vmatpush.bf16.msrb.mxu0 %v10183_v0  ;;  %7648 = vmatpush.bf16.msrb.mxu3 %v10175_v37 }
0x19b5   :  { %v6732_v63 = vpack.c.bf16 %v6684_v29, %v6668_v18 }
0x19b7   :  { %7611 = vmatpush.bf16.msra.mxu1 %v10158_v4  ;;  %7630 = vmatpush.bf16.msrb.mxu2 %v10166_v49  ;;  %v10208_v4 = vld [vmem:[%s14374_s12 + $0x6b0] sm:$0xff] }
0x19b8   :  { %7668 = vmatpush.bf16.msrb.mxu0 %v10182_v45  ;;  %7649 = vmatpush.bf16.msrb.mxu3 %v10174_v34 }
0x19b9   :  { %9407 = vmatmul.msk.bf16.gmra.mxu1 %vm124_vm1, %v13677_v52  ;;  %9409 = vmatmul.msk.bf16.gmra.mxu2 %vm124_vm1, %v13677_v52 }
0x19ba   :  { %9411 = vmatmul.msk.bf16.gmra.mxu3 %vm124_vm1, %v13677_v52  ;;  %9413 = vmatmul.msk.bf16.gmra.mxu0 %vm124_vm1, %v13677_v52  ;;  %v6412_v52 = vpop.f32.mrf.mxu3 }
0x19bb   :  { %v6413_v60 = vadd.f32 %v6412_v52, %v13954_v26  ;;  %7612 = vmatpush.bf16.msra.mxu1 %v10157_v48  ;;  %7631 = vmatpush.bf16.msrb.mxu2 %v10165_v59  ;;  %v10209_v52 = vld [vmem:[%s14374_s12 + $0x6b8] sm:$0xff] }
0x19bc   :  { %7669 = vmatpush.bf16.msrb.mxu0 %v10181_v15  ;;  %7650 = vmatpush.bf16.msrb.mxu3 %v10173_v31 }
0x19bd   :  { %v6685_v62 = vmax.f32 %v6413_v60, 0.0 }
0x19bf   :  { %v6733_v8 = vpack.c.bf16 %v6685_v62, %v6669_v23  ;;  %7613 = vmatpush.bf16.msra.mxu1 %v10156_v36  ;;  %7632 = vmatpush.bf16.msrb.mxu2 %v10164_v12  ;;  %v10207_v62 = vld [vmem:[%s14374_s12 + $0x6a8] sm:$0xff]  ;;  %v10189_v23 = vld [vmem:[%s14374_s12 + $0x618] sm:$0xff]  ;;  %v10206_v36 = vld [vmem:[%s14374_s12 + $0x6a0] sm:$0xff]  ;;  %v14108_v12 = vperm.slane %v13926_v33, 7 }
0x19c0   :  { %7670 = vmatpush.bf16.msrb.mxu0 %v10180_v35  ;;  %7651 = vmatpush.bf16.msrb.mxu3 %v10172_v20 }
0x19c3   :  { %7614 = vmatpush.bf16.msra.mxu1 %v10155_v27  ;;  %7633 = vmatpush.bf16.msrb.mxu2 %v10163_v28  ;;  %v10188_v27 = vld [vmem:[%s14374_s12 + $0x610] sm:$0xff] }
0x19c4   :  { %7671 = vmatpush.bf16.msrb.mxu0 %v10179_v13  ;;  %7652 = vmatpush.bf16.msrb.mxu3 %v10171_v41  ;;  %v10212_v13 = vld [vmem:[%s14374_s12 + $0x6d0] sm:$0xff] }
0x19c7   :  { %7615 = vmatpush.bf16.msra.mxu1 %v10154_v38  ;;  %7634 = vmatpush.bf16.msrb.mxu2 %v10162_v7  ;;  %v10197_v38 = vld [vmem:[%s14374_s12 + $0x658] sm:$0xff] }
0x19c8   :  { %7672 = vmatpush.bf16.msrb.mxu0 %v10178_v21  ;;  %7653 = vmatpush.bf16.msrb.mxu3 %v10170_v22  ;;  %v10205_v21 = vld [vmem:[%s14374_s12 + $0x698] sm:$0xff]  ;;  %v14125_v22 = vperm.slane %v13926_v33, 5 }
0x19c9   :  { %7540 = vmatmul.bf16.vlgmr.msrb.gmra.mxu1 %v6731_v1  ;;  %7559 = vmatmul.bf16.vlgmr.msra.gmra.mxu2 %v6732_v63  ;;  %v10213_v1 = vld [vmem:[%s14374_s12 + $0x6d8] sm:$0xff] }
0x19ca   :  { %7578 = vmatmul.bf16.vlgmr.msra.gmra.mxu3 %v6733_v8  ;;  %7597 = vmatmul.bf16.vlgmr.msra.gmra.mxu0 %v6734_v5 }
0x19cb   :  { %7684 = vmatpush.bf16.msrb.mxu1 %v10193_v42  ;;  %7703 = vmatpush.bf16.msra.mxu2 %v10201_v56  ;;  %v10196_v56 = vld [vmem:[%s14374_s12 + $0x650] sm:$0xff] }
0x19cc   :  { %7741 = vmatpush.bf16.msra.mxu0 %v10217_v16  ;;  %7722 = vmatpush.bf16.msra.mxu3 %v10209_v52  ;;  %v10187_v16 = vld [vmem:[%s14374_s12 + $0x608] sm:$0xff]  ;;  %v10204_v52 = vld [vmem:[%s14374_s12 + $0x690] sm:$0xff] }
0x19cf   :  { %7685 = vmatpush.bf16.msrb.mxu1 %v10192_v39  ;;  %7704 = vmatpush.bf16.msra.mxu2 %v10200_v54  ;;  %v10195_v54 = vld [vmem:[%s14374_s12 + $0x648] sm:$0xff] }
0x19d0   :  { %7742 = vmatpush.bf16.msra.mxu0 %v10216_v11  ;;  %7723 = vmatpush.bf16.msra.mxu3 %v10208_v4  ;;  %v10203_v4 = vld [vmem:[%s14374_s12 + $0x688] sm:$0xff] }
0x19d3   :  { %7686 = vmatpush.bf16.msrb.mxu1 %v10191_v46 }
0x19d4   :  { %7743 = vmatpush.bf16.msra.mxu0 %v10215_v17  ;;  %7724 = vmatpush.bf16.msra.mxu3 %v10207_v62  ;;  %v10186_v17 = vld [vmem:[%s14374_s12 + $0x600] sm:$0xff] }
0x19d6   :  { %v6377_v30 = vpop.f32.mrf.mxu1 }
0x19d7   :  { %v6434_v14 = vpop.f32.mrf.mxu0  ;;  %v6378_v0 = vadd.f32 %v6377_v30, %v13939_v51  ;;  %v10211_v30 = vld [vmem:[%s14374_s12 + $0x6c8] sm:$0xff] }
0x19d8   :  { %v6435_v32 = vadd.f32 %v6434_v14, %v13951_v55  ;;  %7744 = vmatpush.bf16.msra.mxu0 %v10214_v50  ;;  %7725 = vmatpush.bf16.msra.mxu3 %v10206_v36 }
0x19d9   :  { %v6699_v10 = vmax.f32 %v6378_v0, 0.0 }
0x19da   :  { %v6702_v29 = vmax.f32 %v6435_v32, 0.0  ;;  %v10210_v32 = vld [vmem:[%s14374_s12 + $0x6c0] sm:$0xff] }
0x19dc   :  { %v6396_v44 = vpop.f32.mrf.mxu2  ;;  %7745 = vmatpush.bf16.msra.mxu0 %v10213_v1  ;;  %7726 = vmatpush.bf16.msra.mxu3 %v10205_v21  ;;  %v10224_v1 = vld [vmem:[%s14374_s12 + $0x730] sm:$0xff] }
0x19dd   :  { %v6415_v57 = vpop.f32.mrf.mxu3  ;;  %v6397_v37 = vadd.f32 %v6396_v44, %v13942_v58  ;;  %v14135_v44 = vperm.slane %v13926_v33, 6  ;;  %v10240_v21 = vld [vmem:[%s14374_s12 + $0x7b0] sm:$0xff] }
0x19de   :  { %v6379_v43 = vpop.f32.mrf.mxu1  ;;  %v6416_v9 = vadd.f32 %v6415_v57, %v13954_v26 }
0x19df   :  { %v6380_v60 = vadd.f32 %v6379_v43, %v13939_v51  ;;  %v6436_v2 = vpop.f32.mrf.mxu0  ;;  %v10190_v51 = vld [vmem:[%s14374_s12 + $0x620] sm:$0xff]  ;;  %v6700_v34 = vmax.f32 %v6397_v37, 0.0 }
0x19e0   :  { %v6437_v45 = vadd.f32 %v6436_v2, %v13951_v55  ;;  %v10199_v55 = vld [vmem:[%s14374_s12 + $0x668] sm:$0xff]  ;;  %7687 = vmatpush.bf16.msrb.mxu1 %v10190_v51  ;;  %v6701_v35 = vmax.f32 %v6416_v9, 0.0  ;;  %7746 = vmatpush.bf16.msra.mxu0 %v10212_v13 }
0x19e1   :  { %v6715_v40 = vmax.f32 %v6380_v60, 0.0  ;;  %7705 = vmatpush.bf16.msra.mxu2 %v10199_v55  ;;  %7727 = vmatpush.bf16.msra.mxu3 %v10204_v52 }
0x19e2   :  { %v6718_v61 = vmax.f32 %v6437_v45, 0.0 }
0x19e3   :  { %v6747_v3 = vpack.c.bf16 %v6715_v40, %v6699_v10 }
0x19e4   :  { %v6398_v18 = vpop.f32.mrf.mxu2  ;;  %v6750_v48 = vpack.c.bf16 %v6718_v61, %v6702_v29  ;;  %7688 = vmatpush.bf16.msrb.mxu1 %v10189_v23  ;;  %7747 = vmatpush.bf16.msra.mxu0 %v10211_v30  ;;  %v10225_v29 = vld [vmem:[%s14374_s12 + $0x738] sm:$0xff] }
0x19e5   :  { %v6399_v15 = vadd.f32 %v6398_v18, %v13942_v58  ;;  %v6417_v24 = vpop.f32.mrf.mxu3  ;;  %7545 = vmatmul.bf16.gmra.mxu1 %v6747_v3  ;;  %v10198_v58 = vld [vmem:[%s14374_s12 + $0x660] sm:$0xff]  ;;  %v10249_v61 = vld [vmem:[%s14374_s12 + $0x7f8] sm:$0xff]  ;;  %7728 = vmatpush.bf16.msra.mxu3 %v10203_v4 }
0x19e6   :  { %v6418_v63 = vadd.f32 %v6417_v24, %v13954_v26  ;;  %7602 = vmatmul.bf16.gmra.mxu0 %v6750_v48  ;;  %v6448_v49 = vpop.f32.mrf.mxu1  ;;  %v14099_v26 = vperm.slane %v13926_v33, 4  ;;  %7706 = vmatpush.bf16.msra.mxu2 %v10198_v58  ;;  %v10194_v18 = vld [vmem:[%s14374_s12 + $0x640] sm:$0xff] }
0x19e7   :  { %v6716_v5 = vmax.f32 %v6399_v15, 0.0  ;;  %v6505_v8 = vpop.f32.mrf.mxu0  ;;  %v10202_v48 = vld [vmem:[%s14374_s12 + $0x680] sm:$0xff] }
0x19e8   :  { %v6717_v59 = vmax.f32 %v6418_v63, 0.0  ;;  %7689 = vmatpush.bf16.msrb.mxu1 %v10188_v27  ;;  %v6449_v41 = vadd.f32 %v6448_v49, %v14099_v26  ;;  %v6506_v14 = vadd.f32 %v6505_v8, %v14108_v12  ;;  %7748 = vmatpush.bf16.msra.mxu0 %v10210_v32  ;;  %v10248_v63 = vld [vmem:[%s14374_s12 + $0x7f0] sm:$0xff]  ;;  %v10245_v32 = vld [vmem:[%s14374_s12 + $0x7d8] sm:$0xff]  ;;  %v10230_v4 = vld [vmem:[%s14374_s12 + $0x760] sm:$0xff] }
0x19e9   :  { %v6748_v31 = vpack.c.bf16 %v6716_v5, %v6700_v34  ;;  %7729 = vmatpush.bf16.msra.mxu3 %v10202_v48  ;;  %v10233_v34 = vld [vmem:[%s14374_s12 + $0x778] sm:$0xff]  ;;  %v10219_v48 = vld [vmem:[%s14374_s12 + $0x708] sm:$0xff] }
0x19ea   :  { %v6749_v20 = vpack.c.bf16 %v6717_v59, %v6701_v35  ;;  %7707 = vmatpush.bf16.msra.mxu2 %v10197_v38  ;;  %v6671_v57 = vmax.f32 %v6449_v41, 0.0  ;;  %v6674_v43 = vmax.f32 %v6506_v14, 0.0  ;;  %v10241_v5 = vld [vmem:[%s14374_s12 + $0x7b8] sm:$0xff]  ;;  %v10223_v35 = vld [vmem:[%s14374_s12 + $0x728] sm:$0xff]  ;;  %v10232_v38 = vld [vmem:[%s14374_s12 + $0x770] sm:$0xff] }
0x19eb   :  { %7564 = vmatmul.bf16.gmra.mxu2 %v6748_v31  ;;  %v10247_v59 = vld [vmem:[%s14374_s12 + $0x7e8] sm:$0xff] }
0x19ec   :  { %7583 = vmatmul.bf16.gmra.mxu3 %v6749_v20  ;;  %v6467_v28 = vpop.f32.mrf.mxu2  ;;  %7690 = vmatpush.bf16.msrb.mxu1 %v10187_v16  ;;  %v10246_v16 = vld [vmem:[%s14374_s12 + $0x7e0] sm:$0xff] }
0x19ed   :  { %v6486_v42 = vpop.f32.mrf.mxu3  ;;  %v6468_v33 = vadd.f32 %v6467_v28, %v14125_v22 }
0x19ee   :  { %v6450_v7 = vpop.f32.mrf.mxu1  ;;  %7708 = vmatpush.bf16.msra.mxu2 %v10196_v56  ;;  %v6487_v45 = vadd.f32 %v6486_v42, %v14135_v44 }
0x19ef   :  { %v6451_v39 = vadd.f32 %v6450_v7, %v14099_v26  ;;  %v6507_v11 = vpop.f32.mrf.mxu0  ;;  %v6672_v55 = vmax.f32 %v6468_v33, 0.0 }
0x19f0   :  { %v6508_v0 = vadd.f32 %v6507_v11, %v14108_v12  ;;  %7691 = vmatpush.bf16.msrb.mxu1 %v10186_v17  ;;  %v6673_v15 = vmax.f32 %v6487_v45, 0.0  ;;  %v10239_v11 = vld [vmem:[%s14374_s12 + $0x7a8] sm:$0xff]  ;;  %v10221_v17 = vld [vmem:[%s14374_s12 + $0x718] sm:$0xff] }
0x19f1   :  { %v6687_v46 = vmax.f32 %v6451_v39, 0.0 }
0x19f2   :  { %v6690_v60 = vmax.f32 %v6508_v0, 0.0  ;;  %7709 = vmatpush.bf16.msra.mxu2 %v10195_v54 }
0x19f3   :  { %v6735_v2 = vpack.c.bf16 %v6687_v46, %v6671_v57 }
0x19f4   :  { %v6738_v10 = vpack.c.bf16 %v6690_v60, %v6674_v43  ;;  %v6469_v40 = vpop.f32.mrf.mxu2  ;;  %v14219_v60 = vld [vmem:[%s14372_s10 + $0x11] ss:$2 sm:$0xff] }
0x19f5   :  { %v6470_v51 = vadd.f32 %v6469_v40, %v14125_v22  ;;  %v6488_v50 = vpop.f32.mrf.mxu3  ;;  %7616 = vmatmul.bf16.vlgmr.msra.gmra.mxu1 %v6735_v2  ;;  %v14228_v40 = vperm.slane %v14219_v60, 0 }
0x19f6   :  { %v6489_v37 = vadd.f32 %v6488_v50, %v14135_v44  ;;  %7673 = vmatmul.bf16.vlgmr.msrb.gmra.mxu0 %v6738_v10  ;;  %v6453_v3 = vpop.f32.mrf.mxu1  ;;  %7760 = vmatpush.bf16.msra.mxu1 %v10225_v29  ;;  %v10220_v50 = vld [vmem:[%s14374_s12 + $0x710] sm:$0xff] }
0x19f7   :  { %v6688_v62 = vmax.f32 %v6470_v51, 0.0  ;;  %v6510_v9 = vpop.f32.mrf.mxu0  ;;  %7817 = vmatpush.bf16.msrb.mxu0 %v10249_v61  ;;  %7710 = vmatpush.bf16.msra.mxu2 %v10194_v18  ;;  %v6454_v58 = vadd.f32 %v6453_v3, %v14099_v26  ;;  %v10244_v29 = vld [vmem:[%s14374_s12 + $0x7d0] sm:$0xff]  ;;  %v14237_v61 = vperm.slane %v14219_v60, 3  ;;  %v10229_v3 = vld [vmem:[%s14374_s12 + $0x758] sm:$0xff] }
0x19f8   :  { %v6689_v24 = vmax.f32 %v6489_v37, 0.0  ;;  %v6511_v31 = vadd.f32 %v6510_v9, %v14108_v12 }
0x19f9   :  { %v6736_v23 = vpack.c.bf16 %v6688_v62, %v6672_v55  ;;  %v6703_v41 = vmax.f32 %v6454_v58, 0.0  ;;  %v10237_v55 = vld [vmem:[%s14374_s12 + $0x798] sm:$0xff] }
0x19fa   :  { %v6737_v49 = vpack.c.bf16 %v6689_v24, %v6673_v15  ;;  %7761 = vmatpush.bf16.msra.mxu1 %v10224_v1  ;;  %v6706_v30 = vmax.f32 %v6511_v31, 0.0  ;;  %v10243_v15 = vld [vmem:[%s14374_s12 + $0x7c8] sm:$0xff]  ;;  %v14254_v1 = vperm.slane %v14219_v60, 1  ;;  %v10242_v31 = vld [vmem:[%s14374_s12 + $0x7c0] sm:$0xff] }
0x19fb   :  { %7635 = vmatmul.bf16.vlgmr.msrb.gmra.mxu2 %v6736_v23  ;;  %7818 = vmatpush.bf16.msrb.mxu0 %v10248_v63 }
0x19fc   :  { %7654 = vmatmul.bf16.vlgmr.msrb.gmra.mxu3 %v6737_v49  ;;  %v6472_v8 = vpop.f32.mrf.mxu2  ;;  %7779 = vmatpush.bf16.msrb.mxu2 %v10233_v34  ;;  %v10228_v34 = vld [vmem:[%s14374_s12 + $0x750] sm:$0xff] }
0x19fd   :  { %v6491_v36 = vpop.f32.mrf.mxu3  ;;  %7798 = vmatpush.bf16.msrb.mxu3 %v10241_v5  ;;  %v6473_v7 = vadd.f32 %v6472_v8, %v14125_v22  ;;  %v10236_v5 = vld [vmem:[%s14374_s12 + $0x790] sm:$0xff]  ;;  %v6175_v8 = vperm.slane %v14219_v60, 2 }
0x19fe   :  { %v6455_v27 = vpop.f32.mrf.mxu1  ;;  %7762 = vmatpush.bf16.msra.mxu1 %v10223_v35  ;;  %v6492_v56 = vadd.f32 %v6491_v36, %v14135_v44 }
0x19ff   :  { %v6456_v13 = vadd.f32 %v6455_v27, %v14099_v26  ;;  %v6512_v20 = vpop.f32.mrf.mxu0  ;;  %7819 = vmatpush.bf16.msrb.mxu0 %v10247_v59  ;;  %v10222_v26 = vld [vmem:[%s14374_s12 + $0x720] sm:$0xff]  ;;  %v6704_v33 = vmax.f32 %v6473_v7, 0.0 }
0x1a00   :  { %v6513_v28 = vadd.f32 %v6512_v20, %v14108_v12  ;;  %7780 = vmatpush.bf16.msrb.mxu2 %v10232_v38  ;;  %v10231_v12 = vld [vmem:[%s14374_s12 + $0x768] sm:$0xff]  ;;  %v6705_v45 = vmax.f32 %v6492_v56, 0.0  ;;  %v10218_v59 = vld [vmem:[%s14374_s12 + $0x700] sm:$0xff] }
0x1a01   :  { %v6719_v42 = vmax.f32 %v6456_v13, 0.0  ;;  %7799 = vmatpush.bf16.msrb.mxu3 %v10240_v21  ;;  %v10227_v21 = vld [vmem:[%s14374_s12 + $0x748] sm:$0xff]  ;;  %v10226_v56 = vld [vmem:[%s14374_s12 + $0x740] sm:$0xff] }
0x1a02   :  { %v6722_v14 = vmax.f32 %v6513_v28, 0.0  ;;  %7763 = vmatpush.bf16.msra.mxu1 %v10222_v26  ;;  %v10235_v28 = vld [vmem:[%s14374_s12 + $0x788] sm:$0xff] }
0x1a03   :  { %v6751_v39 = vpack.c.bf16 %v6719_v42, %v6703_v41  ;;  %7820 = vmatpush.bf16.msrb.mxu0 %v10246_v16 }
0x1a04   :  { %v6474_v52 = vpop.f32.mrf.mxu2  ;;  %v6754_v0 = vpack.c.bf16 %v6722_v14, %v6706_v30  ;;  %7781 = vmatpush.bf16.msrb.mxu2 %v10231_v12 }
0x1a05   :  { %v6475_v57 = vadd.f32 %v6474_v52, %v14125_v22  ;;  %v6493_v46 = vpop.f32.mrf.mxu3  ;;  %7621 = vmatmul.bf16.gmra.mxu1 %v6751_v39  ;;  %7800 = vmatpush.bf16.msrb.mxu3 %v10239_v11  ;;  %v10234_v52 = vld [vmem:[%s14374_s12 + $0x780] sm:$0xff] }
0x1a06   :  { %v6494_v43 = vadd.f32 %v6493_v46, %v14135_v44  ;;  %7678 = vmatmul.bf16.gmra.mxu0 %v6754_v0  ;;  %v6524_v22 = vpop.f32.mrf.mxu1  ;;  %v10238_v44 = vld [vmem:[%s14374_s12 + $0x7a0] sm:$0xff]  ;;  %7764 = vmatpush.bf16.msra.mxu1 %v10221_v17 }
0x1a07   :  { %v6720_v2 = vmax.f32 %v6475_v57, 0.0  ;;  %v6581_v54 = vpop.f32.mrf.mxu0  ;;  %7821 = vmatpush.bf16.msrb.mxu0 %v10245_v32  ;;  %v6525_v9 = vadd.f32 %v6524_v22, %v14228_v40 }
0x1a08   :  { %v6721_v10 = vmax.f32 %v6494_v43, 0.0  ;;  %7782 = vmatpush.bf16.msrb.mxu2 %v10230_v4  ;;  %v6582_v24 = vadd.f32 %v6581_v54, %v14237_v61 }
0x1a09   :  { %v6752_v51 = vpack.c.bf16 %v6720_v2, %v6704_v33  ;;  %7801 = vmatpush.bf16.msrb.mxu3 %v10238_v44  ;;  %v6675_v36 = vmax.f32 %v6525_v9, 0.0 }
0x1a0a   :  { %v6753_v37 = vpack.c.bf16 %v6721_v10, %v6705_v45  ;;  %7765 = vmatpush.bf16.msra.mxu1 %v10220_v50  ;;  %v6678_v27 = vmax.f32 %v6582_v24, 0.0 }
0x1a0b   :  { %7640 = vmatmul.bf16.gmra.mxu2 %v6752_v51  ;;  %7822 = vmatpush.bf16.msrb.mxu0 %v10244_v29 }
0x1a0c   :  { %7659 = vmatmul.bf16.gmra.mxu3 %v6753_v37  ;;  %v6543_v62 = vpop.f32.mrf.mxu2  ;;  %7783 = vmatpush.bf16.msrb.mxu2 %v10229_v3 }
0x1a0d   :  { %v6562_v18 = vpop.f32.mrf.mxu3  ;;  %7802 = vmatpush.bf16.msrb.mxu3 %v10237_v55  ;;  %v6544_v20 = vadd.f32 %v6543_v62, %v14254_v1 }
0x1a0e   :  { %v6526_v23 = vpop.f32.mrf.mxu1  ;;  %7766 = vmatpush.bf16.msra.mxu1 %v10219_v48  ;;  %v6563_v41 = vadd.f32 %v6562_v18, %v6175_v8 }
0x1a0f   :  { %v6527_v63 = vadd.f32 %v6526_v23, %v14228_v40  ;;  %v6583_v49 = vpop.f32.mrf.mxu0  ;;  %7823 = vmatpush.bf16.msrb.mxu0 %v10243_v15  ;;  %v6676_v39 = vmax.f32 %v6544_v20, 0.0  ;;  %v6179_v20 = vperm.slane %v14219_v60, 6 }
0x1a10   :  { %v6584_v58 = vadd.f32 %v6583_v49, %v14237_v61  ;;  %7784 = vmatpush.bf16.msrb.mxu2 %v10228_v34  ;;  %v6677_v0 = vmax.f32 %v6563_v41, 0.0  ;;  %v6177_v34 = vperm.slane %v14219_v60, 4 }
0x1a11   :  { %v6691_v35 = vmax.f32 %v6527_v63, 0.0  ;;  %7803 = vmatpush.bf16.msrb.mxu3 %v10236_v5 }
0x1a12   :  { %v6694_v13 = vmax.f32 %v6584_v58, 0.0  ;;  %7767 = vmatpush.bf16.msra.mxu1 %v10218_v59  ;;  %v6180_v58 = vperm.slane %v14219_v60, 7 }
0x1a13   :  { %v6739_v38 = vpack.c.bf16 %v6691_v35, %v6675_v36  ;;  %7824 = vmatpush.bf16.msrb.mxu0 %v10242_v31  ;;  %v6178_v31 = vperm.slane %v14219_v60, 5 }
0x1a14   :  { %v6742_v42 = vpack.c.bf16 %v6694_v13, %v6678_v27  ;;  %v6545_v26 = vpop.f32.mrf.mxu2  ;;  %7785 = vmatpush.bf16.msrb.mxu2 %v10227_v21 }
0x1a15   :  { %v6546_v16 = vadd.f32 %v6545_v26, %v14254_v1  ;;  %v6564_v30 = vpop.f32.mrf.mxu3  ;;  %7692 = vmatmul.bf16.vlgmr.msrb.gmra.mxu1 %v6739_v38  ;;  %7804 = vmatpush.bf16.msrb.mxu3 %v10235_v28 }
0x1a16   :  { %v6565_v14 = vadd.f32 %v6564_v30, %v6175_v8  ;;  %7749 = vmatmul.bf16.vlgmr.msra.gmra.mxu0 %v6742_v42  ;;  %v6529_v7 = vpop.f32.mrf.mxu1 }
0x1a17   :  { %v6692_v12 = vmax.f32 %v6546_v16, 0.0  ;;  %v6586_v11 = vpop.f32.mrf.mxu0  ;;  %v6530_v43 = vadd.f32 %v6529_v7, %v14228_v40 }
0x1a18   :  { %v6693_v57 = vmax.f32 %v6565_v14, 0.0  ;;  %7786 = vmatpush.bf16.msrb.mxu2 %v10226_v56  ;;  %v6587_v33 = vadd.f32 %v6586_v11, %v14237_v61 }
0x1a19   :  { %v6740_v46 = vpack.c.bf16 %v6692_v12, %v6676_v39  ;;  %7805 = vmatpush.bf16.msrb.mxu3 %v10234_v52  ;;  %v6707_v45 = vmax.f32 %v6530_v43, 0.0 }
0x1a1a   :  { %v6741_v17 = vpack.c.bf16 %v6693_v57, %v6677_v0  ;;  %v6710_v51 = vmax.f32 %v6587_v33, 0.0 }
0x1a1b   :  { %7711 = vmatmul.bf16.vlgmr.msra.gmra.mxu2 %v6740_v46 }
0x1a1c   :  { %7730 = vmatmul.bf16.vlgmr.msra.gmra.mxu3 %v6741_v17  ;;  %v6548_v32 = vpop.f32.mrf.mxu2 }
0x1a1d   :  { %v6567_v22 = vpop.f32.mrf.mxu3  ;;  %v6549_v29 = vadd.f32 %v6548_v32, %v14254_v1 }
0x1a1e   :  { %v6531_v2 = vpop.f32.mrf.mxu1  ;;  %v6568_v3 = vadd.f32 %v6567_v22, %v6175_v8 }
0x1a1f   :  { %v6532_v54 = vadd.f32 %v6531_v2, %v14228_v40  ;;  %v6588_v4 = vpop.f32.mrf.mxu0  ;;  %v6708_v15 = vmax.f32 %v6549_v29, 0.0 }
0x1a20   :  { %v6589_v44 = vadd.f32 %v6588_v4, %v14237_v61  ;;  %v6709_v23 = vmax.f32 %v6568_v3, 0.0 }
0x1a21   :  { %v6723_v10 = vmax.f32 %v6532_v54, 0.0 }
0x1a22   :  { %v6726_v50 = vmax.f32 %v6589_v44, 0.0 }
0x1a23   :  { %v6755_v37 = vpack.c.bf16 %v6723_v10, %v6707_v45 }
0x1a24   :  { %v6758_v55 = vpack.c.bf16 %v6726_v50, %v6710_v51  ;;  %v6550_v62 = vpop.f32.mrf.mxu2 }
0x1a25   :  { %v6551_v9 = vadd.f32 %v6550_v62, %v14254_v1  ;;  %v6569_v18 = vpop.f32.mrf.mxu3  ;;  %7697 = vmatmul.bf16.gmra.mxu1 %v6755_v37 }
0x1a26   :  { %v6570_v48 = vadd.f32 %v6569_v18, %v6175_v8  ;;  %7754 = vmatmul.bf16.gmra.mxu0 %v6758_v55  ;;  %v6600_v40 = vpop.f32.mrf.mxu1 }
0x1a27   :  { %v6724_v24 = vmax.f32 %v6551_v9, 0.0  ;;  %v6657_v61 = vpop.f32.mrf.mxu0  ;;  %v6601_v1 = vadd.f32 %v6600_v40, %v6177_v34 }
0x1a28   :  { %v6725_v63 = vmax.f32 %v6570_v48, 0.0  ;;  %v6658_v59 = vadd.f32 %v6657_v61, %v6180_v58 }
0x1a29   :  { %v6756_v49 = vpack.c.bf16 %v6724_v24, %v6708_v15  ;;  %v6679_v21 = vmax.f32 %v6601_v1, 0.0 }
0x1a2a   :  { %v6757_v5 = vpack.c.bf16 %v6725_v63, %v6709_v23  ;;  %v6682_v41 = vmax.f32 %v6658_v59, 0.0  ;;  %v10452_v23 = vld [vmem:[%s14371_s9 + $0x11] ss:$0 sm:$0xff] }
0x1a2b   :  { %7716 = vmatmul.bf16.gmra.mxu2 %v6756_v49 }
0x1a2c   :  { %7735 = vmatmul.bf16.gmra.mxu3 %v6757_v5  ;;  %v6619_v36 = vpop.f32.mrf.mxu2 }
0x1a2d   :  { %v6638_v35 = vpop.f32.mrf.mxu3  ;;  %v6620_v26 = vadd.f32 %v6619_v36, %v6178_v31 }
0x1a2e   :  { %v6602_v8 = vpop.f32.mrf.mxu1  ;;  %v6639_v30 = vadd.f32 %v6638_v35, %v6179_v20 }
0x1a2f   :  { %v6603_v27 = vadd.f32 %v6602_v8, %v6177_v34  ;;  %v6659_v13 = vpop.f32.mrf.mxu0  ;;  %v6680_v52 = vmax.f32 %v6620_v26, 0.0 }
0x1a30   :  { %v6660_v38 = vadd.f32 %v6659_v13, %v6180_v58  ;;  %v6681_v60 = vmax.f32 %v6639_v30, 0.0 }
0x1a31   :  { %v6695_v28 = vmax.f32 %v6603_v27, 0.0 }
0x1a32   :  { %v6698_v42 = vmax.f32 %v6660_v38, 0.0 }
0x1a33   :  { %v6743_v16 = vpack.c.bf16 %v6695_v28, %v6679_v21 }
0x1a34   :  { %v6746_v14 = vpack.c.bf16 %v6698_v42, %v6682_v41  ;;  %v6621_v7 = vpop.f32.mrf.mxu2 }
0x1a35   :  { %v6622_v39 = vadd.f32 %v6621_v7, %v6178_v31  ;;  %v6640_v12 = vpop.f32.mrf.mxu3  ;;  %7768 = vmatmul.bf16.vlgmr.msra.gmra.mxu1 %v6743_v16 }
0x1a36   :  { %v6641_v11 = vadd.f32 %v6640_v12, %v6179_v20  ;;  %7825 = vmatmul.bf16.vlgmr.msrb.gmra.mxu0 %v6746_v14  ;;  %v6605_v56 = vpop.f32.mrf.mxu1 }
0x1a37   :  { %v6696_v0 = vmax.f32 %v6622_v39, 0.0  ;;  %v6662_v57 = vpop.f32.mrf.mxu0  ;;  %v6606_v22 = vadd.f32 %v6605_v56, %v6177_v34 }
0x1a38   :  { %v6697_v46 = vmax.f32 %v6641_v11, 0.0  ;;  %v6663_v2 = vadd.f32 %v6662_v57, %v6180_v58 }
0x1a39   :  { %v6744_v17 = vpack.c.bf16 %v6696_v0, %v6680_v52  ;;  %v6711_v10 = vmax.f32 %v6606_v22, 0.0 }
0x1a3a   :  { %v6745_v32 = vpack.c.bf16 %v6697_v46, %v6681_v60  ;;  %v6714_v50 = vmax.f32 %v6663_v2, 0.0 }
0x1a3b   :  { %7787 = vmatmul.bf16.vlgmr.msrb.gmra.mxu2 %v6744_v17 }
0x1a3c   :  { %7806 = vmatmul.bf16.vlgmr.msrb.gmra.mxu3 %v6745_v32  ;;  %v6624_v43 = vpop.f32.mrf.mxu2 }
0x1a3d   :  { %v6643_v33 = vpop.f32.mrf.mxu3  ;;  %v6625_v37 = vadd.f32 %v6624_v43, %v6178_v31 }
0x1a3e   :  { %v6607_v54 = vpop.f32.mrf.mxu1  ;;  %v6644_v55 = vadd.f32 %v6643_v33, %v6179_v20 }
0x1a3f   :  { %v6608_v4 = vadd.f32 %v6607_v54, %v6177_v34  ;;  %v6664_v44 = vpop.f32.mrf.mxu0  ;;  %v6712_v24 = vmax.f32 %v6625_v37, 0.0 }
0x1a40   :  { %v6665_v45 = vadd.f32 %v6664_v44, %v6180_v58  ;;  %v6713_v63 = vmax.f32 %v6644_v55, 0.0 }
0x1a41   :  { %v6727_v51 = vmax.f32 %v6608_v4, 0.0 }
0x1a42   :  { %v6730_v29 = vmax.f32 %v6665_v45, 0.0 }
0x1a43   :  { %v6759_v3 = vpack.c.bf16 %v6727_v51, %v6711_v10 }
0x1a44   :  { %v6762_v62 = vpack.c.bf16 %v6730_v29, %v6714_v50  ;;  %v6626_v9 = vpop.f32.mrf.mxu2 }
0x1a45   :  { %v6627_v18 = vadd.f32 %v6626_v9, %v6178_v31  ;;  %v6645_v48 = vpop.f32.mrf.mxu3  ;;  %7773 = vmatmul.bf16.gmra.mxu1 %v6759_v3 }
0x1a46   :  { %v6646_v40 = vadd.f32 %v6645_v48, %v6179_v20  ;;  %7830 = vmatmul.bf16.gmra.mxu0 %v6762_v62  ;;  %v7541_v15 = vpop.f32.mrf.mxu1 }
0x1a47   :  { %v6728_v61 = vmax.f32 %v6627_v18, 0.0  ;;  %v7542_v58 = vadd.f32 %v10452_v23, %v7541_v15  ;;  %v7598_v59 = vpop.f32.mrf.mxu0 }
0x1a48   :  { %v6729_v49 = vmax.f32 %v6646_v40, 0.0 }
0x1a49   :  { %v6760_v34 = vpack.c.bf16 %v6728_v61, %v6712_v24 }
0x1a4a   :  { %v6761_v5 = vpack.c.bf16 %v6729_v49, %v6713_v63 }
0x1a4b   :  { %7792 = vmatmul.bf16.gmra.mxu2 %v6760_v34 }
0x1a4c   :  { %7811 = vmatmul.bf16.gmra.mxu3 %v6761_v5  ;;  %v7560_v36 = vpop.f32.mrf.mxu2 }
0x1a4d   :  { %v7561_v1 = vadd.f32 %v7560_v36, %v7542_v58  ;;  %v7579_v35 = vpop.f32.mrf.mxu3 }
0x1a4e   :  { %v7543_v31 = vpop.f32.mrf.mxu1 }
0x1a4f   :  { %v7580_v8 = vadd.f32 %v7579_v35, %v7561_v1  ;;  %v7544_v13 = vadd.f32 %v10452_v23, %v7543_v31  ;;  %v7600_v41 = vpop.f32.mrf.mxu0 }
0x1a51   :  { %v7599_v27 = vadd.f32 %v7598_v59, %v7580_v8 }
0x1a54   :  { %v7562_v20 = vpop.f32.mrf.mxu2 }
0x1a55   :  { %v7563_v38 = vadd.f32 %v7562_v20, %v7544_v13  ;;  %v7581_v21 = vpop.f32.mrf.mxu3 }
0x1a57   :  { %v7582_v28 = vadd.f32 %v7581_v21, %v7563_v38 }
0x1a59   :  { %v7601_v42 = vadd.f32 %v7600_v41, %v7582_v28 }
0x1a62   :  { %v7546_v26 = vpop.f32.mrf.mxu1 }
0x1a63   :  { %v7603_v16 = vpop.f32.mrf.mxu0  ;;  %v7547_v7 = vadd.f32 %v10452_v23, %v7546_v26 }
0x1a6a   :  { %v7548_v30 = vpop.f32.mrf.mxu1 }
0x1a6b   :  { %v7605_v14 = vpop.f32.mrf.mxu0  ;;  %v7549_v60 = vadd.f32 %v10452_v23, %v7548_v30 }
0x1a6e   :  { %v7565_v39 = vpop.f32.mrf.mxu2 }
0x1a6f   :  { %v7566_v12 = vadd.f32 %v7565_v39, %v7547_v7  ;;  %v7584_v11 = vpop.f32.mrf.mxu3 }
0x1a71   :  { %v7585_v56 = vadd.f32 %v7584_v11, %v7566_v12 }
0x1a72   :  { %v7617_v52 = vpop.f32.mrf.mxu1 }
0x1a73   :  { %v7674_v0 = vpop.f32.mrf.mxu0  ;;  %v7604_v57 = vadd.f32 %v7603_v16, %v7585_v56  ;;  %v7618_v23 = vadd.f32 %v7617_v52, %v7599_v27 }
0x1a76   :  { %v7567_v46 = vpop.f32.mrf.mxu2 }
0x1a77   :  { %v7568_v17 = vadd.f32 %v7567_v46, %v7549_v60  ;;  %v7586_v32 = vpop.f32.mrf.mxu3 }
0x1a79   :  { %v7587_v43 = vadd.f32 %v7586_v32, %v7568_v17 }
0x1a7a   :  { %v7619_v22 = vpop.f32.mrf.mxu1 }
0x1a7b   :  { %v7676_v33 = vpop.f32.mrf.mxu0  ;;  %v7606_v2 = vadd.f32 %v7605_v14, %v7587_v43  ;;  %v7620_v1 = vadd.f32 %v7619_v22, %v7601_v42 }
0x1a7e   :  { %v7636_v54 = vpop.f32.mrf.mxu2 }
0x1a7f   :  { %v7655_v4 = vpop.f32.mrf.mxu3  ;;  %v7637_v49 = vadd.f32 %v7636_v54, %v7618_v23 }
0x1a81   :  { %v7656_v36 = vadd.f32 %v7655_v4, %v7637_v49 }
0x1a82   :  { %v7622_v44 = vpop.f32.mrf.mxu1 }
0x1a83   :  { %v7679_v45 = vpop.f32.mrf.mxu0  ;;  %v7675_v8 = vadd.f32 %v7674_v0, %v7656_v36  ;;  %v7623_v41 = vadd.f32 %v7622_v44, %v7604_v57 }
0x1a86   :  { %v7638_v10 = vpop.f32.mrf.mxu2 }
0x1a87   :  { %v7657_v51 = vpop.f32.mrf.mxu3  ;;  %v7639_v59 = vadd.f32 %v7638_v10, %v7620_v1 }
0x1a89   :  { %v7658_v38 = vadd.f32 %v7657_v51, %v7639_v59 }
0x1a8a   :  { %v7624_v50 = vpop.f32.mrf.mxu1 }
0x1a8b   :  { %v7681_v29 = vpop.f32.mrf.mxu0  ;;  %v7677_v27 = vadd.f32 %v7676_v33, %v7658_v38  ;;  %v7625_v56 = vadd.f32 %v7624_v50, %v7606_v2 }
0x1a8e   :  { %v7641_v37 = vpop.f32.mrf.mxu2 }
0x1a8f   :  { %v7660_v3 = vpop.f32.mrf.mxu3  ;;  %v7642_v16 = vadd.f32 %v7641_v37, %v7623_v41 }
0x1a91   :  { %v7661_v39 = vadd.f32 %v7660_v3, %v7642_v16 }
0x1a92   :  { %v7693_v55 = vpop.f32.mrf.mxu1 }
0x1a93   :  { %v7750_v62 = vpop.f32.mrf.mxu0  ;;  %v7694_v13 = vadd.f32 %v7693_v55, %v7675_v8  ;;  %v7680_v17 = vadd.f32 %v7679_v45, %v7661_v39 }
0x1a96   :  { %v7643_v9 = vpop.f32.mrf.mxu2 }
0x1a97   :  { %v7662_v18 = vpop.f32.mrf.mxu3  ;;  %v7644_v46 = vadd.f32 %v7643_v9, %v7625_v56 }
0x1a99   :  { %v7663_v4 = vadd.f32 %v7662_v18, %v7644_v46 }
0x1a9a   :  { %v7695_v48 = vpop.f32.mrf.mxu1 }
0x1a9b   :  { %v7752_v40 = vpop.f32.mrf.mxu0  ;;  %v7696_v7 = vadd.f32 %v7695_v48, %v7677_v27  ;;  %v7682_v2 = vadd.f32 %v7681_v29, %v7663_v4  ;;  %v7942_v4 = vld [vmem:[%s14375_s13 + $0x10] sm:$0xff] }
0x1a9e   :  { %v7712_v15 = vpop.f32.mrf.mxu2 }
0x1a9f   :  { %v7731_v24 = vpop.f32.mrf.mxu3  ;;  %v7713_v21 = vadd.f32 %v7712_v15, %v7694_v13 }
0x1aa1   :  { %v7732_v30 = vadd.f32 %v7731_v24, %v7713_v21 }
0x1aa2   :  { %v7698_v61 = vpop.f32.mrf.mxu1 }
0x1aa3   :  { %v7755_v5 = vpop.f32.mrf.mxu0  ;;  %v7751_v11 = vadd.f32 %v7750_v62, %v7732_v30  ;;  %v7699_v57 = vadd.f32 %v7698_v61, %v7680_v17 }
0x1aa6   :  { %v7714_v63 = vpop.f32.mrf.mxu2 }
0x1aa7   :  { %v7733_v34 = vpop.f32.mrf.mxu3  ;;  %v7715_v12 = vadd.f32 %v7714_v63, %v7696_v7 }
0x1aa9   :  { %v7734_v32 = vadd.f32 %v7733_v34, %v7715_v12 }
0x1aaa   :  { %v7700_v58 = vpop.f32.mrf.mxu1 }
0x1aab   :  { %v7757_v20 = vpop.f32.mrf.mxu0  ;;  %v7753_v44 = vadd.f32 %v7752_v40, %v7734_v32  ;;  %v7701_v15 = vadd.f32 %v7700_v58, %v7682_v2 }
0x1aae   :  { %v7717_v35 = vpop.f32.mrf.mxu2 }
0x1aaf   :  { %v7736_v31 = vpop.f32.mrf.mxu3  ;;  %v7718_v33 = vadd.f32 %v7717_v35, %v7699_v57 }
0x1ab1   :  { %v7737_v50 = vadd.f32 %v7736_v31, %v7718_v33  ;;  %v7941_v33 = vld [vmem:[%s14375_s13 + $0x8] sm:$0xff] }
0x1ab2   :  { %v7769_v28 = vpop.f32.mrf.mxu1 }
0x1ab3   :  { %v7826_v42 = vpop.f32.mrf.mxu0  ;;  %v7770_v52 = vadd.f32 %v7769_v28, %v7751_v11  ;;  %v7756_v18 = vadd.f32 %v7755_v5, %v7737_v50 }
0x1ab6   :  { %v7719_v26 = vpop.f32.mrf.mxu2 }
0x1ab7   :  { %v7738_v14 = vpop.f32.mrf.mxu3  ;;  %v7720_v61 = vadd.f32 %v7719_v26, %v7701_v15 }
0x1aba   :  { %v7771_v0 = vpop.f32.mrf.mxu1 }
0x1abb   :  { %v7772_v51 = vadd.f32 %v7771_v0, %v7753_v44  ;;  %v7828_v3 = vpop.f32.mrf.mxu0  ;;  %v7940_v44 = vld [vmem:[%s14375_s13] sm:$0xff] }
0x1abe   :  { %v7788_v60 = vpop.f32.mrf.mxu2 }
0x1abf   :  { %v7789_v43 = vadd.f32 %v7788_v60, %v7770_v52  ;;  %v7807_v22 = vpop.f32.mrf.mxu3 }
0x1ac1   :  { %v7808_v54 = vadd.f32 %v7807_v22, %v7789_v43 }
0x1ac2   :  { %v7774_v9 = vpop.f32.mrf.mxu1 }
0x1ac3   :  { %v7827_v10 = vadd.f32 %v7826_v42, %v7808_v54  ;;  %v7775_v40 = vadd.f32 %v7774_v9, %v7756_v18  ;;  %v7831_v1 = vpop.f32.mrf.mxu0  ;;  %v7943_v54 = vld [vmem:[%s14375_s13 + $0x18] sm:$0xff] }
0x1ac4   :  { %7972 = vmatpush.msrb.mxu1 %v7943_v54 }
0x1ac5   :  { %v7836_v37 = vadd.f32 %v7827_v10, %v13586_v25  ;;  %v7739_v25 = vadd.f32 %v7738_v14, %v7720_v61 }
0x1ac6   :  { %v7790_v55 = vpop.f32.mrf.mxu2  ;;  %7973 = vmatpush.msrb.mxu1 %v7942_v4 }
0x1ac7   :  { %v7791_v62 = vadd.f32 %v7790_v55, %v7772_v51  ;;  %v7809_v48 = vpop.f32.mrf.mxu3  ;;  %v7842_v45 = vsel %vm124_vm1, %v7836_v37, 0.0  ;;  %v7758_v8 = vadd.f32 %v7757_v20, %v7739_v25 }
0x1ac8   :  { %7843 = vadd.xlane.f32.xlu1 %v7842_v45  ;;  %7974 = vmatpush.msrb.mxu1 %v7941_v33 }
0x1ac9   :  { %v7810_v24 = vadd.f32 %v7809_v48, %v7791_v62 }
0x1aca   :  { %v7776_v59 = vpop.f32.mrf.mxu1  ;;  %7975 = vmatpush.msrb.mxu1 %v7940_v44 }
0x1acb   :  { %v7829_v23 = vadd.f32 %v7828_v3, %v7810_v24  ;;  %v7777_v58 = vadd.f32 %v7776_v59, %v7758_v8  ;;  %v7833_v41 = vpop.f32.mrf.mxu0 }
0x1acd   :  { %v7837_v63 = vadd.f32 %v7829_v23, %v13589_v47 }
0x1ace   :  { %v7793_v49 = vpop.f32.mrf.mxu2 }
0x1acf   :  { %v7794_v34 = vadd.f32 %v7793_v49, %v7775_v40  ;;  %v7812_v36 = vpop.f32.mrf.mxu3  ;;  %v7845_v29 = vsel %vm124_vm1, %v7837_v63, 0.0 }
0x1ad0   :  { %7846 = vadd.xlane.f32.xlu2 %v7845_v29 }
0x1ad1   :  { %v7813_v35 = vadd.f32 %v7812_v36, %v7794_v34  ;;  %v10454_v34 = vld [vmem:[%s14371_s9 + $0x10] ss:$0 sm:$0xff] }
0x1ad3   :  { %v7832_v31 = vadd.f32 %v7831_v1, %v7813_v35 }
0x1ad5   :  { %v7838_v13 = vadd.f32 %v7832_v31, %v13670_v53 }
0x1ad6   :  { %v7795_v5 = vpop.f32.mrf.mxu2 }
0x1ad7   :  { %v7796_v38 = vadd.f32 %v7795_v5, %v7777_v58  ;;  %v7848_v21 = vsel %vm124_vm1, %v7838_v13, 0.0  ;;  %v7814_v47 = vpop.f32.mrf.mxu3 }
0x1ad8   :  { %7849 = vadd.xlane.f32.xlu0 %v7848_v21 }
0x1ad9   :  { %v7815_v28 = vadd.f32 %v7814_v47, %v7796_v38 }
0x1adb   :  { %v7834_v26 = vadd.f32 %v7833_v41, %v7815_v28 }
0x1add   :  { %v7839_v16 = vadd.f32 %v7834_v26, %v13673_v19 }
0x1adf   :  { %v7851_v27 = vsel %vm124_vm1, %v7839_v16, 0.0 }
0x1ae0   :  { %7852 = vadd.xlane.f32.xlu1 %v7851_v27 }
0x1b3b   :  { %v7844_v30 = vpop.xlane.xlu1 %7843 }
0x1b3c   :  { %v7854_v20 = vmul.f32 %v7844_v30, %v11365_v6 }
0x1b3e   :  { %v7858_v14 = vsub.f32 %v7836_v37, %v7854_v20 }
0x1b40   :  { %v7862_v7 = vmul.f32 %v7858_v14, %v7858_v14 }
0x1b42   :  { %v7866_v53 = vsel %vm124_vm1, %v7862_v7, 0.0 }
0x1b43   :  { %v7847_v39 = vpop.xlane.xlu2 %7846  ;;  %7867 = vadd.xlane.f32.xlu2 %v7866_v53 }
0x1b44   :  { %v7855_v12 = vmul.f32 %v7847_v39, %v11365_v6 }
0x1b46   :  { %v14309_v11 = vsub.f32 %v7837_v63, %v7855_v12  ;;  %v10453_v63 = vld [vmem:[%s14371_s9 + $0xf] ss:$0 sm:$0xff] }
0x1b48   :  { %v7863_v42 = vmul.f32 %v14309_v11, %v14309_v11 }
0x1b4a   :  { %v7869_v19 = vsel %vm124_vm1, %v7863_v42, 0.0 }
0x1b4b   :  { %7870 = vadd.xlane.f32.xlu0 %v7869_v19  ;;  %v7850_v56 = vpop.xlane.xlu0 %7849 }
0x1b4c   :  { %v7856_v52 = vmul.f32 %v7850_v56, %v11365_v6 }
0x1b4e   :  { %v14315_v0 = vsub.f32 %v7838_v13, %v7856_v52 }
0x1b50   :  { %v7864_v60 = vmul.f32 %v14315_v0, %v14315_v0 }
0x1b52   :  { %v7872_v46 = vsel %vm124_vm1, %v7864_v60, 0.0 }
0x1b53   :  { %v7853_v17 = vpop.xlane.xlu1 %7852  ;;  %7873 = vadd.xlane.f32.xlu1 %v7872_v46 }
0x1b54   :  { %v7857_v32 = vmul.f32 %v7853_v17, %v11365_v6 }
0x1b56   :  { %v14321_v43 = vsub.f32 %v7839_v16, %v7857_v32 }
0x1b58   :  { %v7865_v22 = vmul.f32 %v14321_v43, %v14321_v43 }
0x1b5a   :  { %v7875_v57 = vsel %vm124_vm1, %v7865_v22, 0.0 }
0x1b5b   :  { %7876 = vadd.xlane.f32.xlu2 %v7875_v57 }
0x1bb6   :  { %v7868_v10 = vpop.xlane.xlu2 %7867 }
0x1bb7   :  { %v7878_v51 = vmul.f32 %v7868_v10, %v11365_v6 }
0x1bb9   :  { %v7882_v37 = vadd.f32 1e-05, %v7878_v51 }
0x1bbb   :  { %10754 = vrsqrt.f32 %v7882_v37  ;;  %vm7892_vm15 = vweird.f32 %v7882_v37 }
0x1bbe   :  { %v7871_v3 = vpop.xlane.xlu0 %7870 }
0x1bbf   :  { %v7879_v55 = vmul.f32 %v7871_v3, %v11365_v6 }
0x1bc1   :  { %v10755_v2 = vpop.eup %10754  ;;  %v7883_v50 = vadd.f32 1e-05, %v7879_v55 }
0x1bc2   :  { %v7887_v62 = vmul.f32 %v10755_v2, %v7882_v37  ;;  %vm7893_vm14 = vweird.f32 %v10755_v2 }
0x1bc3   :  { %10756 = vrsqrt.f32 %v7883_v50  ;;  %vm7894_vm4 = vmor %vm7892_vm15, %vm7893_vm14  ;;  %vm7902_vm2 = vweird.f32 %v7883_v50 }
0x1bc4   :  { %v7888_v48 = vmul.f32 %v10755_v2, %v7887_v62 }
0x1bc6   :  { %v7889_v45 = vmul.f32 0.5, %v7888_v48  ;;  %v7874_v9 = vpop.xlane.xlu1 %7873 }
0x1bc7   :  { %v7880_v15 = vmul.f32 %v7874_v9, %v11365_v6 }
0x1bc8   :  { %v7890_v24 = vsub.f32 1.5, %v7889_v45 }
0x1bc9   :  { %v10757_v61 = vpop.eup %10756  ;;  %v7884_v18 = vadd.f32 1e-05, %v7880_v15 }
0x1bca   :  { %v7891_v23 = vmul.f32 %v10755_v2, %v7890_v24  ;;  %v7897_v40 = vmul.f32 %v10757_v61, %v7883_v50  ;;  %vm7903_vm0 = vweird.f32 %v10757_v61 }
0x1bcb   :  { %10758 = vrsqrt.f32 %v7884_v18  ;;  %vm7904_vm3 = vmor %vm7902_vm2, %vm7903_vm0  ;;  %vm7912_vm6 = vweird.f32 %v7884_v18 }
0x1bcc   :  { %v7895_v49 = vsel %vm7894_vm4, %v10755_v2, %v7891_v23  ;;  %v7898_v25 = vmul.f32 %v10757_v61, %v7897_v40 }
0x1bcd   :  { %v7926_v36 = vmul.f32 %v7895_v49, %v7858_v14 }
0x1bce   :  { %v7899_v29 = vmul.f32 0.5, %v7898_v25  ;;  %v7877_v1 = vpop.xlane.xlu2 %7876 }
0x1bcf   :  { %v7931_v35 = vmul.f32 %v10453_v63, %v7926_v36  ;;  %v7881_v59 = vmul.f32 %v7877_v1, %v11365_v6 }
0x1bd0   :  { %v7900_v8 = vsub.f32 1.5, %v7899_v29 }
0x1bd1   :  { %v10759_v31 = vpop.eup %10758  ;;  %v7936_v58 = vadd.f32 %v10454_v34, %v7931_v35  ;;  %v7885_v13 = vadd.f32 1e-05, %v7881_v59 }
0x1bd2   :  { %v7901_v5 = vmul.f32 %v10757_v61, %v7900_v8  ;;  %v7907_v38 = vmul.f32 %v10759_v31, %v7884_v18  ;;  %vm7913_vm5 = vweird.f32 %v10759_v31 }
0x1bd3   :  { %10760 = vrsqrt.f32 %v7885_v13  ;;  %9926 = vmatmul.msk.f32.vlgmr.msrb.gmra.mxu1 %vm124_vm1, %v7936_v58  ;;  %vm7914_vm7 = vmor %vm7912_vm6, %vm7913_vm5  ;;  %vm7922_vm9 = vweird.f32 %v7885_v13 }
0x1bd4   :  { %v7905_v21 = vsel %vm7904_vm3, %v10757_v61, %v7901_v5  ;;  %v7908_v47 = vmul.f32 %v10759_v31, %v7907_v38 }
0x1bd5   :  { %v7927_v28 = vmul.f32 %v7905_v21, %v14309_v11 }
0x1bd6   :  { %v7909_v41 = vmul.f32 0.5, %v7908_v47 }
0x1bd7   :  { %v7932_v26 = vmul.f32 %v10453_v63, %v7927_v28 }
0x1bd8   :  { %v7910_v16 = vsub.f32 1.5, %v7909_v41 }
0x1bd9   :  { %v10761_v6 = vpop.eup %10760  ;;  %v7937_v27 = vadd.f32 %v10454_v34, %v7932_v26 }
0x1bda   :  { %v7911_v30 = vmul.f32 %v10759_v31, %v7910_v16  ;;  %v7917_v20 = vmul.f32 %v10761_v6, %v7885_v13  ;;  %vm7923_vm8 = vweird.f32 %v10761_v6 }
0x1bdb   :  { %9927 = vmatmul.msk.f32.gmra.mxu1 %vm124_vm1, %v7937_v27  ;;  %vm7924_vm10 = vmor %vm7922_vm9, %vm7923_vm8 }
0x1bdc   :  { %v7915_v14 = vsel %vm7914_vm7, %v10759_v31, %v7911_v30  ;;  %v7918_v7 = vmul.f32 %v10761_v6, %v7917_v20 }
0x1bdd   :  { %v7928_v53 = vmul.f32 %v7915_v14, %v14315_v0  ;;  %v10455_v0 = vld [vmem:[%s14376_s14] ss:$0 sm:$0xff]  ;;  %s10812_s14 = smov 128  }
0x1bde   :  { %v7919_v39 = vmul.f32 0.5, %v7918_v7 }
0x1bdf   :  { %v7933_v12 = vmul.f32 %v10453_v63, %v7928_v53 }
0x1be0   :  { %v7920_v42 = vsub.f32 1.5, %v7919_v39 }
0x1be1   :  { %v7938_v11 = vadd.f32 %v10454_v34, %v7933_v12 }
0x1be2   :  { %v7921_v19 = vmul.f32 %v10761_v6, %v7920_v42 }
0x1be3   :  { %9928 = vmatmul.msk.f32.gmra.mxu1 %vm124_vm1, %v7938_v11 }
0x1be4   :  { %v7925_v56 = vsel %vm7924_vm10, %v10761_v6, %v7921_v19 }
0x1be5   :  { %v7929_v52 = vmul.f32 %v7925_v56, %v14321_v43 }
0x1be7   :  { %v7934_v60 = vmul.f32 %v10453_v63, %v7929_v52 }
0x1be9   :  { %v7939_v46 = vadd.f32 %v10454_v34, %v7934_v60 }
0x1beb   :  { %9929 = vmatmul.msk.f32.gmra.mxu1 %vm124_vm1, %v7939_v46 }
0x1c50   :  { %v7977_v17 = vpop.f32.mrf.mxu1 }
0x1c51   :  { %v7978_v32 = vadd.f32 %v10455_v0, %v7977_v17 }
0x1c53   :  { %7989 = vst [vmem:[#allocation2] sm:$0xff] %v7978_v32 }
0x1c58   :  { %v7980_v22 = vpop.f32.mrf.mxu1 }
0x1c59   :  { %v7981_v57 = vadd.f32 %v10455_v0, %v7980_v22 }
0x1c5b   :  { %7990 = vst [vmem:[#allocation2 + $0x8] sm:$0xff] %v7981_v57 }
0x1c60   :  { %v7983_v54 = vpop.f32.mrf.mxu1 }
0x1c61   :  { %v7984_v4 = vadd.f32 %v10455_v0, %v7983_v54 }
0x1c63   :  { %7991 = vst [vmem:[#allocation2 + $0x10] sm:$0xff] %v7984_v4 }
0x1c68   :  { %v7986_v43 = vpop.f32.mrf.mxu1 }
0x1c69   :  { %v7987_v33 = vadd.f32 %v10455_v0, %v7986_v43 }
0x1c6b   :  { %7992 = vst [vmem:[#allocation2 + $0x18] sm:$0xff] %v7987_v33 }
0x1c6c   :  { %8005 = dma.vmem_to_hbm [thread:$0]  %s7998_s19, 512, %s8000_s22, [#allocation3], %s10812_s14, %s10812_s14, %s14385_s20  }
0x1c6d   :  { %10798 = dma.done.wait [#allocation3], 512  }
0x1c6e   :  { %10799 = vsyncadd [#allocation3], 4294966784 }
0x1c6f   :  { %8010 = vsyncpa [#allocation3], 1 }

</bundles_post_ra>
